<compile_context>
chip_gen: v7x
topology: tpu7x:2x2x1
jax: 0.10.0
libtpu: 0.0.40
codegen_flags: <defaults>
</compile_context>

<pallas_src>
import functools

import jax
import jax.numpy as jnp
from jax.experimental import pallas as pl
from jax.experimental.pallas import tpu as pltpu


# ----------------------------------------------------------------------------
# Pallas kernel: entire spGAT forward in one call
# ----------------------------------------------------------------------------
def spgat_fused_kernel(x_ref, adj_ref, w1_ref, f2t_ref, w2_ref, out_ref, *,
                       alpha, nheads, nhid, nclass):
    n = x_ref.shape[0]

    x = x_ref[...]                               # (N, F)   bf16
    # Edge mask straight off the int8 tile — no (N,N) f32 materialization.
    mask = adj_ref[...] != 0                     # (N, N)   bool

    neg_big = jnp.float32(-1e30)
    tiny = jnp.float32(1e-30)
    neg_alpha = jnp.float32(-alpha)
    ones_bf = jnp.ones((n, 1), jnp.bfloat16)
    ones_f32 = jnp.ones((n, 1), jnp.float32)

    def attention(score, h_bf, apply_elu):
        """One spGraphAttentionLayer given score_ij = a1·h_i + a2·h_j, h = x@W."""
        # e_ij = exp(-leakyrelu(score)) on edges only (matches pyGAT sp layer).
        # Negate folded into the select; per-row max subtraction cancels exactly
        # in the numerator/denominator ratio, so no inf/NaN for extreme scores.
        neg = jnp.where(score > 0, -score, neg_alpha * score)   # = -leakyrelu(score)
        row_max = jnp.max(jnp.where(mask, neg, neg_big), axis=1, keepdims=True)
        stable = jnp.minimum(neg - row_max, 0.0)                # <= 0 on edges exactly
        e = jnp.where(mask, jnp.exp(stable), 0.0).astype(jnp.bfloat16)   # (N, N)

        # Fused numerator + denominator: e @ [h | 1].  The ones column rides on
        # otherwise-idle MXU output lanes, and num/denom use the identical bf16 e.
        d = h_bf.shape[1]
        numsum = jnp.dot(e, jnp.concatenate([h_bf, ones_bf], axis=1),
                         preferred_element_type=jnp.float32)             # (N, D+1)
        num = numsum[:, :d]
        rowsum = numsum[:, d:d + 1]
        inv = pl.reciprocal(jnp.maximum(rowsum, tiny), approx=True)      # EUP
        h_prime = num * inv
        if apply_elu:                                                    # concat=True heads
            h_prime = jnp.where(h_prime > 0, h_prime,
                                jnp.exp(jnp.minimum(h_prime, 0.0)) - 1.0)
        return h_prime

    # ---- layer 1: all heads share one wide matmul (a1 folded into w1) -------
    hd = nheads * nhid
    h1_aug = jnp.dot(x, w1_ref[...],
                     preferred_element_type=jnp.float32)   # (N, H*D + H), f32
    h_all_bf = h1_aug[:, :hd].astype(jnp.bfloat16)         # (N, H*D)
    f1_all = h1_aug[:, hd:hd + nheads]                     # (N, H)
    f2t = f2t_ref[...]                                     # (H, N) pre-transposed

    heads = []
    # TODO(synk): at larger N/H move the head loop onto a grid axis (or a
    # lax.fori_loop with pl.ds column offsets) so only one head's (N,N) temps
    # are live, and tile (row_tile, col_tile) flash-style — required on v7x.
    for h_idx in range(nheads):
        h_bf = h_all_bf[:, h_idx * nhid:(h_idx + 1) * nhid]             # (N, D)
        # score_ij = f1[i] + f2[j]: lane-broadcast column + sublane slice of the
        # pre-transposed f2 block — a single VPU broadcast add, no K=2 matmul.
        score = f1_all[:, h_idx:h_idx + 1] + f2t[h_idx:h_idx + 1, :]    # (N, N)
        heads.append(attention(score, h_bf, apply_elu=True))
    xh = jnp.concatenate(heads, axis=1)                    # (N, H*D) lane-dense, f32

    # ---- layer 2: output attention (concat=False -> no elu inside) ----------
    h2_aug = jnp.dot(xh.astype(jnp.bfloat16), w2_ref[...],
                     preferred_element_type=jnp.float32)                # (N, C+2)
    h2_bf = h2_aug[:, :nclass].astype(jnp.bfloat16)
    f1o = h2_aug[:, nclass:nclass + 1]
    f2o = h2_aug[:, nclass + 1:nclass + 2]
    # f2o is produced in-kernel, so build score_ij = f1o[i] + f2o[j] as
    # [f1o | 1] @ [1 | f2o]^T: one tiny K=2 matmul for the whole layer, which
    # avoids an in-kernel lane<->sublane transpose of an (N, 1) column.
    score_o = jax.lax.dot_general(
        jnp.concatenate([f1o, ones_f32], axis=1),
        jnp.concatenate([ones_f32, f2o], axis=1),
        (((1,), (1,)), ((), ())), preferred_element_type=jnp.float32)   # (N, N)
    logits = attention(score_o, h2_bf, apply_elu=False)                 # (N, C)

    # ---- model epilogue: F.elu + F.log_softmax(dim=1), fused -----------------
    y = jnp.where(logits > 0, logits, jnp.exp(jnp.minimum(logits, 0.0)) - 1.0)
    m = jnp.max(y, axis=1, keepdims=True)
    z = y - m
    lse = jnp.log(jnp.sum(jnp.exp(z), axis=1, keepdims=True))
    out_ref[...] = (z - lse).astype(out_ref.dtype)


# ----------------------------------------------------------------------------
# Wrappers (glue in plain JAX)
# ----------------------------------------------------------------------------
def init_spgat_params(key, nfeat, nhid, nclass, nheads):
    """Deterministic xavier_normal(gain=1.414)-style init, matching pyGAT shapes."""
    def xavier(k, shape):
        fan_in, fan_out = shape[0], shape[1]
        std = 1.414 * jnp.sqrt(2.0 / (fan_in + fan_out))
        return (std * jax.random.normal(k, shape)).astype(jnp.float32)

    keys = jax.random.split(key, 2 * nheads + 2)
    attn = []
    for h in range(nheads):
        w = xavier(keys[2 * h], (nfeat, nhid))          # W: (in_features, out_features)
        a = xavier(keys[2 * h + 1], (1, 2 * nhid))      # a: (1, 2*out_features)
        attn.append((w, a))
    w_out = xavier(keys[-2], (nhid * nheads, nclass))
    a_out = xavier(keys[-1], (1, 2 * nclass))
    return {"attentions": attn, "out": (w_out, a_out)}


def spgat_forward(x, adj, params, *, alpha):
    # TODO(synk): F.dropout is training-mode only; at inference it is identity.
    n, nfeat = x.shape
    attn = params["attentions"]
    nheads = len(attn)
    nhid = attn[0][0].shape[1]
    w_out, a_out = params["out"]
    nclass = w_out.shape[1]
    hd = nheads * nhid

    # Fold a1 into the layer-1 projection (wrapper-side tiny GEMVs, free):
    #   w1_big = [W_0 ... W_{H-1} | W_h a1_h columns]
    w_all = jnp.concatenate([w for (w, _) in attn], axis=1)                 # (F, H*D)
    wf1 = jnp.concatenate([w @ a[:, :nhid].T for (w, a) in attn], axis=1)   # (F, H)
    w1_big = jnp.concatenate([w_all, wf1], axis=1).astype(jnp.bfloat16)     # (F, H*D+H)

    # f2 for layer 1 depends only on inputs, so its (N,H)->(H,N) transpose is
    # done here once (tiny XLA op) instead of a per-head relayout in the kernel.
    wf2 = jnp.concatenate([w @ a[:, nhid:].T for (w, a) in attn], axis=1)   # (F, H)
    f2t = (x @ wf2).T.astype(jnp.float32)                                   # (H, N)

    #   layer 2: w2_big = [W_out | W_out a1_out | W_out a2_out]
    w2_big = jnp.concatenate(
        [w_out, w_out @ a_out[:, :nclass].T, w_out @ a_out[:, nclass:].T],
        axis=1).astype(jnp.bfloat16)                                        # (H*D, C+2)

    x_bf = x.astype(jnp.bfloat16)
    adj_i8 = (adj != 0).astype(jnp.int8)       # mask-only semantics, 4x less traffic

    kernel = functools.partial(spgat_fused_kernel, alpha=alpha,
                               nheads=nheads, nhid=nhid, nclass=nclass)

    # Advisory cost hint for XLA scheduling around the custom call.
    flops = (2 * n * nfeat * (hd + nheads)                              # x @ w1_big
             + nheads * (6 * n * n + 2 * n * n * (nhid + 1))            # heads
             + 2 * n * hd * (nclass + 2)                                # xh @ w2_big
             + 2 * n * n * 2 + 6 * n * n + 2 * n * n * (nclass + 1))    # out layer
    transcendentals = ((nheads + 1) * n * n + nheads * n * nhid
                       + 3 * n * nclass + (nheads + 1) * n)
    io_bytes = (x_bf.size * 2 + adj_i8.size + w1_big.size * 2
                + f2t.size * 4 + w2_big.size * 2 + n * nclass * 4)

    # Keep the resident (N,N) temps inside the scoped-VMEM budget (v5e default
    # is only 16 MiB); cap well under v7x's 64 MiB physical VMEM.
    est_vmem = 2 * io_bytes + 8 * n * n * 4
    vmem_limit = int(min(48 << 20, max(32 << 20, 2 * est_vmem)))

    return pl.pallas_call(
        kernel,
        out_shape=jax.ShapeDtypeStruct((n, nclass), jnp.float32),
        grid=(1,),
        in_specs=[
            pl.BlockSpec((n, nfeat), lambda i: (0, 0)),
            pl.BlockSpec((n, n), lambda i: (0, 0)),
            pl.BlockSpec((nfeat, hd + nheads), lambda i: (0, 0)),
            pl.BlockSpec((nheads, n), lambda i: (0, 0)),
            pl.BlockSpec((hd, nclass + 2), lambda i: (0, 0)),
        ],
        out_specs=pl.BlockSpec((n, nclass), lambda i: (0, 0)),
        compiler_params=pltpu.CompilerParams(
            dimension_semantics=("arbitrary",),
            vmem_limit_bytes=vmem_limit),
        cost_estimate=pl.CostEstimate(flops=int(flops),
                                      transcendentals=int(transcendentals),
                                      bytes_accessed=int(io_bytes)),
    )(x_bf, adj_i8, w1_big, f2t, w2_big)


# ----------------------------------------------------------------------------
# Main
# ----------------------------------------------------------------------------
if __name__ == "__main__":
    # Small shapes, chosen so the fused head output (nheads * nhid = 128) is
    # lane-dense and N is a multiple of the sublane tile.
    N, nfeat, nhid, nclass, nheads = 128, 64, 16, 8, 8
    alpha = 0.2

    key = jax.random.PRNGKey(0)
    kx, kadj, kp = jax.random.split(key, 3)

    x = jax.random.normal(kx, (N, nfeat), dtype=jnp.float32)
    # Random sparse adjacency with self-loops (so every row has >=1 neighbor).
    adj = (jax.random.uniform(kadj, (N, N)) < 0.05).astype(jnp.float32)
    adj = jnp.maximum(adj, jnp.eye(N, dtype=jnp.float32))

    params = init_spgat_params(kp, nfeat, nhid, nclass, nheads)

    out = spgat_forward(x, adj, params, alpha=alpha)
    out = jax.block_until_ready(out)

    assert out.shape == (N, nclass)
    assert bool(jnp.all(jnp.isfinite(out)))
    print("KERNEL_OK")
</pallas_src>

<mosaic_0001>
module attributes {stable_mosaic.version = 11 : i64} {
  func.func @spgat_fused_kernel(%arg0: i32, %arg1: memref<128x64xbf16, #tpu.memory_space<vmem>>, %arg2: memref<128x128xi8, #tpu.memory_space<vmem>>, %arg3: memref<64x136xbf16, #tpu.memory_space<vmem>>, %arg4: memref<8x128xf32, #tpu.memory_space<vmem>>, %arg5: memref<128x10xbf16, #tpu.memory_space<vmem>>, %arg6: memref<128x8xf32, #tpu.memory_space<vmem>>) attributes {dimension_semantics = [#tpu.dimension_semantics<arbitrary>], iteration_bounds = array<i64: 1>, scalar_prefetch = 0 : i64, scratch_operands = 0 : i64, tpu.core_type = #tpu.core_type<tc>, window_params = [{pipeline_mode = #tpu.pipeline_mode<synchronous>, transform_indices = @transform_0, window_bounds = array<i64: 128, 64>}, {pipeline_mode = #tpu.pipeline_mode<synchronous>, transform_indices = @transform_1, window_bounds = array<i64: 128, 128>}, {pipeline_mode = #tpu.pipeline_mode<synchronous>, transform_indices = @transform_2, window_bounds = array<i64: 64, 136>}, {pipeline_mode = #tpu.pipeline_mode<synchronous>, transform_indices = @transform_3, window_bounds = array<i64: 8, 128>}, {pipeline_mode = #tpu.pipeline_mode<synchronous>, transform_indices = @transform_4, window_bounds = array<i64: 128, 10>}, {pipeline_mode = #tpu.pipeline_mode<synchronous>, transform_indices = @transform_5, window_bounds = array<i64: 128, 8>}]} {
    %c0 = arith.constant 0 : index
    %c0_0 = arith.constant 0 : index
    %0 = vector.load %arg1[%c0, %c0_0] : memref<128x64xbf16, #tpu.memory_space<vmem>>, vector<128x64xbf16>
    %c0_1 = arith.constant 0 : index
    %c0_2 = arith.constant 0 : index
    %1 = vector.load %arg2[%c0_1, %c0_2] : memref<128x128xi8, #tpu.memory_space<vmem>>, vector<128x128xi8>
    %c0_i8 = arith.constant 0 : i8
    %2 = vector.broadcast %c0_i8 : i8 to vector<128x128xi8>
    %3 = arith.cmpi ne, %1, %2 : vector<128x128xi8>
    %cst = arith.constant 1.000000e+00 : bf16
    %4 = vector.broadcast %cst : bf16 to vector<128x1xbf16>
    %cst_3 = arith.constant 1.000000e+00 : f32
    %5 = vector.broadcast %cst_3 : f32 to vector<128x1xf32>
    %c0_4 = arith.constant 0 : index
    %c0_5 = arith.constant 0 : index
    %6 = vector.load %arg3[%c0_4, %c0_5] : memref<64x136xbf16, #tpu.memory_space<vmem>>, vector<64x136xbf16>
    %cst_6 = arith.constant dense<0.000000e+00> : vector<128x136xf32>
    %7 = tpu.matmul %0, %6, %cst_6 {dimension_numbers = #tpu.dot_dimension_numbers<[1], [0], [0], [1], [0, 0, 1, 1], [], []>} : vector<128x64xbf16>, vector<64x136xbf16>, vector<128x136xf32> -> vector<128x136xf32>
    %8 = vector.extract_strided_slice %7 {offsets = [0, 0], sizes = [128, 128], strides = [1, 1]} : vector<128x136xf32> to vector<128x128xf32>
    %9 = arith.truncf %8 : vector<128x128xf32> to vector<128x128xbf16>
    %10 = vector.extract_strided_slice %7 {offsets = [0, 128], sizes = [128, 8], strides = [1, 1]} : vector<128x136xf32> to vector<128x8xf32>
    %c0_7 = arith.constant 0 : index
    %c0_8 = arith.constant 0 : index
    %11 = vector.load %arg4[%c0_7, %c0_8] : memref<8x128xf32, #tpu.memory_space<vmem>>, vector<8x128xf32>
    %12 = vector.extract_strided_slice %9 {offsets = [0, 0], sizes = [128, 16], strides = [1, 1]} : vector<128x128xbf16> to vector<128x16xbf16>
    %13 = vector.extract_strided_slice %10 {offsets = [0, 0], sizes = [128, 1], strides = [1, 1]} : vector<128x8xf32> to vector<128x1xf32>
    %14 = vector.extract_strided_slice %11 {offsets = [0, 0], sizes = [1, 128], strides = [1, 1]} : vector<8x128xf32> to vector<1x128xf32>
    %15 = vector.broadcast %13 : vector<128x1xf32> to vector<128x128xf32>
    %16 = vector.broadcast %14 : vector<1x128xf32> to vector<128x128xf32>
    %17 = arith.addf %15, %16 : vector<128x128xf32>
    %cst_9 = arith.constant 0.000000e+00 : f32
    %18 = vector.broadcast %cst_9 : f32 to vector<128x128xf32>
    %19 = arith.cmpf ogt, %17, %18 : vector<128x128xf32>
    %cst_10 = arith.constant 0.000000e+00 : f32
    %20 = vector.broadcast %cst_10 : f32 to vector<128x128xf32>
    %21 = arith.subf %20, %17 : vector<128x128xf32>
    %cst_11 = arith.constant -2.000000e-01 : f32
    %22 = vector.broadcast %cst_11 : f32 to vector<128x128xf32>
    %23 = arith.mulf %22, %17 : vector<128x128xf32>
    %24 = arith.select %19, %21, %23 : vector<128x128xi1>, vector<128x128xf32>
    %cst_12 = arith.constant -1.000000e+30 : f32
    %25 = vector.broadcast %cst_12 : f32 to vector<128x128xf32>
    %26 = arith.select %3, %24, %25 : vector<128x128xi1>, vector<128x128xf32>
    %cst_13 = arith.constant dense<0xFF800000> : vector<128xf32>
    %27 = vector.multi_reduction <maximumf>, %26, %cst_13 [1] : vector<128x128xf32> to vector<128xf32>
    %28 = vector.shape_cast %27 : vector<128xf32> to vector<128x1xf32>
    %29 = vector.broadcast %28 : vector<128x1xf32> to vector<128x128xf32>
    %30 = arith.subf %24, %29 : vector<128x128xf32>
    %cst_14 = arith.constant 0.000000e+00 : f32
    %31 = vector.broadcast %cst_14 : f32 to vector<128x128xf32>
    %32 = arith.minimumf %30, %31 : vector<128x128xf32>
    %33 = math.exp %32 : vector<128x128xf32>
    %cst_15 = arith.constant 0.000000e+00 : f32
    %34 = vector.broadcast %cst_15 : f32 to vector<128x128xf32>
    %35 = arith.select %3, %33, %34 : vector<128x128xi1>, vector<128x128xf32>
    %36 = arith.truncf %35 : vector<128x128xf32> to vector<128x128xbf16>
    %37 = tpu.concatenate %12, %4 in 1 : vector<128x16xbf16>, vector<128x1xbf16> -> vector<128x17xbf16>
    %cst_16 = arith.constant dense<0.000000e+00> : vector<128x17xf32>
    %38 = tpu.matmul %36, %37, %cst_16 {dimension_numbers = #tpu.dot_dimension_numbers<[1], [0], [0], [1], [0, 0, 1, 1], [], []>} : vector<128x128xbf16>, vector<128x17xbf16>, vector<128x17xf32> -> vector<128x17xf32>
    %39 = vector.extract_strided_slice %38 {offsets = [0, 0], sizes = [128, 16], strides = [1, 1]} : vector<128x17xf32> to vector<128x16xf32>
    %40 = vector.extract_strided_slice %38 {offsets = [0, 16], sizes = [128, 1], strides = [1, 1]} : vector<128x17xf32> to vector<128x1xf32>
    %cst_17 = arith.constant 1.000000e-30 : f32
    %41 = vector.broadcast %cst_17 : f32 to vector<128x1xf32>
    %42 = arith.maximumf %40, %41 : vector<128x1xf32>
    %43 = tpu.reciprocal %42 {approx = true} : vector<128x1xf32> -> vector<128x1xf32>
    %44 = vector.broadcast %43 : vector<128x1xf32> to vector<128x16xf32>
    %45 = arith.mulf %39, %44 : vector<128x16xf32>
    %cst_18 = arith.constant 0.000000e+00 : f32
    %46 = vector.broadcast %cst_18 : f32 to vector<128x16xf32>
    %47 = arith.cmpf ogt, %45, %46 : vector<128x16xf32>
    %cst_19 = arith.constant 0.000000e+00 : f32
    %48 = vector.broadcast %cst_19 : f32 to vector<128x16xf32>
    %49 = arith.minimumf %45, %48 : vector<128x16xf32>
    %50 = math.exp %49 : vector<128x16xf32>
    %cst_20 = arith.constant 1.000000e+00 : f32
    %51 = vector.broadcast %cst_20 : f32 to vector<128x16xf32>
    %52 = arith.subf %50, %51 : vector<128x16xf32>
    %53 = arith.select %47, %45, %52 : vector<128x16xi1>, vector<128x16xf32>
    %54 = vector.extract_strided_slice %9 {offsets = [0, 16], sizes = [128, 16], strides = [1, 1]} : vector<128x128xbf16> to vector<128x16xbf16>
    %55 = vector.extract_strided_slice %10 {offsets = [0, 1], sizes = [128, 1], strides = [1, 1]} : vector<128x8xf32> to vector<128x1xf32>
    %56 = vector.extract_strided_slice %11 {offsets = [1, 0], sizes = [1, 128], strides = [1, 1]} : vector<8x128xf32> to vector<1x128xf32>
    %57 = vector.broadcast %55 : vector<128x1xf32> to vector<128x128xf32>
    %58 = vector.broadcast %56 : vector<1x128xf32> to vector<128x128xf32>
    %59 = arith.addf %57, %58 : vector<128x128xf32>
    %cst_21 = arith.constant 0.000000e+00 : f32
    %60 = vector.broadcast %cst_21 : f32 to vector<128x128xf32>
    %61 = arith.cmpf ogt, %59, %60 : vector<128x128xf32>
    %cst_22 = arith.constant 0.000000e+00 : f32
    %62 = vector.broadcast %cst_22 : f32 to vector<128x128xf32>
    %63 = arith.subf %62, %59 : vector<128x128xf32>
    %cst_23 = arith.constant -2.000000e-01 : f32
    %64 = vector.broadcast %cst_23 : f32 to vector<128x128xf32>
    %65 = arith.mulf %64, %59 : vector<128x128xf32>
    %66 = arith.select %61, %63, %65 : vector<128x128xi1>, vector<128x128xf32>
    %cst_24 = arith.constant -1.000000e+30 : f32
    %67 = vector.broadcast %cst_24 : f32 to vector<128x128xf32>
    %68 = arith.select %3, %66, %67 : vector<128x128xi1>, vector<128x128xf32>
    %cst_25 = arith.constant dense<0xFF800000> : vector<128xf32>
    %69 = vector.multi_reduction <maximumf>, %68, %cst_25 [1] : vector<128x128xf32> to vector<128xf32>
    %70 = vector.shape_cast %69 : vector<128xf32> to vector<128x1xf32>
    %71 = vector.broadcast %70 : vector<128x1xf32> to vector<128x128xf32>
    %72 = arith.subf %66, %71 : vector<128x128xf32>
    %cst_26 = arith.constant 0.000000e+00 : f32
    %73 = vector.broadcast %cst_26 : f32 to vector<128x128xf32>
    %74 = arith.minimumf %72, %73 : vector<128x128xf32>
    %75 = math.exp %74 : vector<128x128xf32>
    %cst_27 = arith.constant 0.000000e+00 : f32
    %76 = vector.broadcast %cst_27 : f32 to vector<128x128xf32>
    %77 = arith.select %3, %75, %76 : vector<128x128xi1>, vector<128x128xf32>
    %78 = arith.truncf %77 : vector<128x128xf32> to vector<128x128xbf16>
    %79 = tpu.concatenate %54, %4 in 1 : vector<128x16xbf16>, vector<128x1xbf16> -> vector<128x17xbf16>
    %cst_28 = arith.constant dense<0.000000e+00> : vector<128x17xf32>
    %80 = tpu.matmul %78, %79, %cst_28 {dimension_numbers = #tpu.dot_dimension_numbers<[1], [0], [0], [1], [0, 0, 1, 1], [], []>} : vector<128x128xbf16>, vector<128x17xbf16>, vector<128x17xf32> -> vector<128x17xf32>
    %81 = vector.extract_strided_slice %80 {offsets = [0, 0], sizes = [128, 16], strides = [1, 1]} : vector<128x17xf32> to vector<128x16xf32>
    %82 = vector.extract_strided_slice %80 {offsets = [0, 16], sizes = [128, 1], strides = [1, 1]} : vector<128x17xf32> to vector<128x1xf32>
    %cst_29 = arith.constant 1.000000e-30 : f32
    %83 = vector.broadcast %cst_29 : f32 to vector<128x1xf32>
    %84 = arith.maximumf %82, %83 : vector<128x1xf32>
    %85 = tpu.reciprocal %84 {approx = true} : vector<128x1xf32> -> vector<128x1xf32>
    %86 = vector.broadcast %85 : vector<128x1xf32> to vector<128x16xf32>
    %87 = arith.mulf %81, %86 : vector<128x16xf32>
    %cst_30 = arith.constant 0.000000e+00 : f32
    %88 = vector.broadcast %cst_30 : f32 to vector<128x16xf32>
    %89 = arith.cmpf ogt, %87, %88 : vector<128x16xf32>
    %cst_31 = arith.constant 0.000000e+00 : f32
    %90 = vector.broadcast %cst_31 : f32 to vector<128x16xf32>
    %91 = arith.minimumf %87, %90 : vector<128x16xf32>
    %92 = math.exp %91 : vector<128x16xf32>
    %cst_32 = arith.constant 1.000000e+00 : f32
    %93 = vector.broadcast %cst_32 : f32 to vector<128x16xf32>
    %94 = arith.subf %92, %93 : vector<128x16xf32>
    %95 = arith.select %89, %87, %94 : vector<128x16xi1>, vector<128x16xf32>
    %96 = vector.extract_strided_slice %9 {offsets = [0, 32], sizes = [128, 16], strides = [1, 1]} : vector<128x128xbf16> to vector<128x16xbf16>
    %97 = vector.extract_strided_slice %10 {offsets = [0, 2], sizes = [128, 1], strides = [1, 1]} : vector<128x8xf32> to vector<128x1xf32>
    %98 = vector.extract_strided_slice %11 {offsets = [2, 0], sizes = [1, 128], strides = [1, 1]} : vector<8x128xf32> to vector<1x128xf32>
    %99 = vector.broadcast %97 : vector<128x1xf32> to vector<128x128xf32>
    %100 = vector.broadcast %98 : vector<1x128xf32> to vector<128x128xf32>
    %101 = arith.addf %99, %100 : vector<128x128xf32>
    %cst_33 = arith.constant 0.000000e+00 : f32
    %102 = vector.broadcast %cst_33 : f32 to vector<128x128xf32>
    %103 = arith.cmpf ogt, %101, %102 : vector<128x128xf32>
    %cst_34 = arith.constant 0.000000e+00 : f32
    %104 = vector.broadcast %cst_34 : f32 to vector<128x128xf32>
    %105 = arith.subf %104, %101 : vector<128x128xf32>
    %cst_35 = arith.constant -2.000000e-01 : f32
    %106 = vector.broadcast %cst_35 : f32 to vector<128x128xf32>
    %107 = arith.mulf %106, %101 : vector<128x128xf32>
    %108 = arith.select %103, %105, %107 : vector<128x128xi1>, vector<128x128xf32>
    %cst_36 = arith.constant -1.000000e+30 : f32
    %109 = vector.broadcast %cst_36 : f32 to vector<128x128xf32>
    %110 = arith.select %3, %108, %109 : vector<128x128xi1>, vector<128x128xf32>
    %cst_37 = arith.constant dense<0xFF800000> : vector<128xf32>
    %111 = vector.multi_reduction <maximumf>, %110, %cst_37 [1] : vector<128x128xf32> to vector<128xf32>
    %112 = vector.shape_cast %111 : vector<128xf32> to vector<128x1xf32>
    %113 = vector.broadcast %112 : vector<128x1xf32> to vector<128x128xf32>
    %114 = arith.subf %108, %113 : vector<128x128xf32>
    %cst_38 = arith.constant 0.000000e+00 : f32
    %115 = vector.broadcast %cst_38 : f32 to vector<128x128xf32>
    %116 = arith.minimumf %114, %115 : vector<128x128xf32>
    %117 = math.exp %116 : vector<128x128xf32>
    %cst_39 = arith.constant 0.000000e+00 : f32
    %118 = vector.broadcast %cst_39 : f32 to vector<128x128xf32>
    %119 = arith.select %3, %117, %118 : vector<128x128xi1>, vector<128x128xf32>
    %120 = arith.truncf %119 : vector<128x128xf32> to vector<128x128xbf16>
    %121 = tpu.concatenate %96, %4 in 1 : vector<128x16xbf16>, vector<128x1xbf16> -> vector<128x17xbf16>
    %cst_40 = arith.constant dense<0.000000e+00> : vector<128x17xf32>
    %122 = tpu.matmul %120, %121, %cst_40 {dimension_numbers = #tpu.dot_dimension_numbers<[1], [0], [0], [1], [0, 0, 1, 1], [], []>} : vector<128x128xbf16>, vector<128x17xbf16>, vector<128x17xf32> -> vector<128x17xf32>
    %123 = vector.extract_strided_slice %122 {offsets = [0, 0], sizes = [128, 16], strides = [1, 1]} : vector<128x17xf32> to vector<128x16xf32>
    %124 = vector.extract_strided_slice %122 {offsets = [0, 16], sizes = [128, 1], strides = [1, 1]} : vector<128x17xf32> to vector<128x1xf32>
    %cst_41 = arith.constant 1.000000e-30 : f32
    %125 = vector.broadcast %cst_41 : f32 to vector<128x1xf32>
    %126 = arith.maximumf %124, %125 : vector<128x1xf32>
    %127 = tpu.reciprocal %126 {approx = true} : vector<128x1xf32> -> vector<128x1xf32>
    %128 = vector.broadcast %127 : vector<128x1xf32> to vector<128x16xf32>
    %129 = arith.mulf %123, %128 : vector<128x16xf32>
    %cst_42 = arith.constant 0.000000e+00 : f32
    %130 = vector.broadcast %cst_42 : f32 to vector<128x16xf32>
    %131 = arith.cmpf ogt, %129, %130 : vector<128x16xf32>
    %cst_43 = arith.constant 0.000000e+00 : f32
    %132 = vector.broadcast %cst_43 : f32 to vector<128x16xf32>
    %133 = arith.minimumf %129, %132 : vector<128x16xf32>
    %134 = math.exp %133 : vector<128x16xf32>
    %cst_44 = arith.constant 1.000000e+00 : f32
    %135 = vector.broadcast %cst_44 : f32 to vector<128x16xf32>
    %136 = arith.subf %134, %135 : vector<128x16xf32>
    %137 = arith.select %131, %129, %136 : vector<128x16xi1>, vector<128x16xf32>
    %138 = vector.extract_strided_slice %9 {offsets = [0, 48], sizes = [128, 16], strides = [1, 1]} : vector<128x128xbf16> to vector<128x16xbf16>
    %139 = vector.extract_strided_slice %10 {offsets = [0, 3], sizes = [128, 1], strides = [1, 1]} : vector<128x8xf32> to vector<128x1xf32>
    %140 = vector.extract_strided_slice %11 {offsets = [3, 0], sizes = [1, 128], strides = [1, 1]} : vector<8x128xf32> to vector<1x128xf32>
    %141 = vector.broadcast %139 : vector<128x1xf32> to vector<128x128xf32>
    %142 = vector.broadcast %140 : vector<1x128xf32> to vector<128x128xf32>
    %143 = arith.addf %141, %142 : vector<128x128xf32>
    %cst_45 = arith.constant 0.000000e+00 : f32
    %144 = vector.broadcast %cst_45 : f32 to vector<128x128xf32>
    %145 = arith.cmpf ogt, %143, %144 : vector<128x128xf32>
    %cst_46 = arith.constant 0.000000e+00 : f32
    %146 = vector.broadcast %cst_46 : f32 to vector<128x128xf32>
    %147 = arith.subf %146, %143 : vector<128x128xf32>
    %cst_47 = arith.constant -2.000000e-01 : f32
    %148 = vector.broadcast %cst_47 : f32 to vector<128x128xf32>
    %149 = arith.mulf %148, %143 : vector<128x128xf32>
    %150 = arith.select %145, %147, %149 : vector<128x128xi1>, vector<128x128xf32>
    %cst_48 = arith.constant -1.000000e+30 : f32
    %151 = vector.broadcast %cst_48 : f32 to vector<128x128xf32>
    %152 = arith.select %3, %150, %151 : vector<128x128xi1>, vector<128x128xf32>
    %cst_49 = arith.constant dense<0xFF800000> : vector<128xf32>
    %153 = vector.multi_reduction <maximumf>, %152, %cst_49 [1] : vector<128x128xf32> to vector<128xf32>
    %154 = vector.shape_cast %153 : vector<128xf32> to vector<128x1xf32>
    %155 = vector.broadcast %154 : vector<128x1xf32> to vector<128x128xf32>
    %156 = arith.subf %150, %155 : vector<128x128xf32>
    %cst_50 = arith.constant 0.000000e+00 : f32
    %157 = vector.broadcast %cst_50 : f32 to vector<128x128xf32>
    %158 = arith.minimumf %156, %157 : vector<128x128xf32>
    %159 = math.exp %158 : vector<128x128xf32>
    %cst_51 = arith.constant 0.000000e+00 : f32
    %160 = vector.broadcast %cst_51 : f32 to vector<128x128xf32>
    %161 = arith.select %3, %159, %160 : vector<128x128xi1>, vector<128x128xf32>
    %162 = arith.truncf %161 : vector<128x128xf32> to vector<128x128xbf16>
    %163 = tpu.concatenate %138, %4 in 1 : vector<128x16xbf16>, vector<128x1xbf16> -> vector<128x17xbf16>
    %cst_52 = arith.constant dense<0.000000e+00> : vector<128x17xf32>
    %164 = tpu.matmul %162, %163, %cst_52 {dimension_numbers = #tpu.dot_dimension_numbers<[1], [0], [0], [1], [0, 0, 1, 1], [], []>} : vector<128x128xbf16>, vector<128x17xbf16>, vector<128x17xf32> -> vector<128x17xf32>
    %165 = vector.extract_strided_slice %164 {offsets = [0, 0], sizes = [128, 16], strides = [1, 1]} : vector<128x17xf32> to vector<128x16xf32>
    %166 = vector.extract_strided_slice %164 {offsets = [0, 16], sizes = [128, 1], strides = [1, 1]} : vector<128x17xf32> to vector<128x1xf32>
    %cst_53 = arith.constant 1.000000e-30 : f32
    %167 = vector.broadcast %cst_53 : f32 to vector<128x1xf32>
    %168 = arith.maximumf %166, %167 : vector<128x1xf32>
    %169 = tpu.reciprocal %168 {approx = true} : vector<128x1xf32> -> vector<128x1xf32>
    %170 = vector.broadcast %169 : vector<128x1xf32> to vector<128x16xf32>
    %171 = arith.mulf %165, %170 : vector<128x16xf32>
    %cst_54 = arith.constant 0.000000e+00 : f32
    %172 = vector.broadcast %cst_54 : f32 to vector<128x16xf32>
    %173 = arith.cmpf ogt, %171, %172 : vector<128x16xf32>
    %cst_55 = arith.constant 0.000000e+00 : f32
    %174 = vector.broadcast %cst_55 : f32 to vector<128x16xf32>
    %175 = arith.minimumf %171, %174 : vector<128x16xf32>
    %176 = math.exp %175 : vector<128x16xf32>
    %cst_56 = arith.constant 1.000000e+00 : f32
    %177 = vector.broadcast %cst_56 : f32 to vector<128x16xf32>
    %178 = arith.subf %176, %177 : vector<128x16xf32>
    %179 = arith.select %173, %171, %178 : vector<128x16xi1>, vector<128x16xf32>
    %180 = vector.extract_strided_slice %9 {offsets = [0, 64], sizes = [128, 16], strides = [1, 1]} : vector<128x128xbf16> to vector<128x16xbf16>
    %181 = vector.extract_strided_slice %10 {offsets = [0, 4], sizes = [128, 1], strides = [1, 1]} : vector<128x8xf32> to vector<128x1xf32>
    %182 = vector.extract_strided_slice %11 {offsets = [4, 0], sizes = [1, 128], strides = [1, 1]} : vector<8x128xf32> to vector<1x128xf32>
    %183 = vector.broadcast %181 : vector<128x1xf32> to vector<128x128xf32>
    %184 = vector.broadcast %182 : vector<1x128xf32> to vector<128x128xf32>
    %185 = arith.addf %183, %184 : vector<128x128xf32>
    %cst_57 = arith.constant 0.000000e+00 : f32
    %186 = vector.broadcast %cst_57 : f32 to vector<128x128xf32>
    %187 = arith.cmpf ogt, %185, %186 : vector<128x128xf32>
    %cst_58 = arith.constant 0.000000e+00 : f32
    %188 = vector.broadcast %cst_58 : f32 to vector<128x128xf32>
    %189 = arith.subf %188, %185 : vector<128x128xf32>
    %cst_59 = arith.constant -2.000000e-01 : f32
    %190 = vector.broadcast %cst_59 : f32 to vector<128x128xf32>
    %191 = arith.mulf %190, %185 : vector<128x128xf32>
    %192 = arith.select %187, %189, %191 : vector<128x128xi1>, vector<128x128xf32>
    %cst_60 = arith.constant -1.000000e+30 : f32
    %193 = vector.broadcast %cst_60 : f32 to vector<128x128xf32>
    %194 = arith.select %3, %192, %193 : vector<128x128xi1>, vector<128x128xf32>
    %cst_61 = arith.constant dense<0xFF800000> : vector<128xf32>
    %195 = vector.multi_reduction <maximumf>, %194, %cst_61 [1] : vector<128x128xf32> to vector<128xf32>
    %196 = vector.shape_cast %195 : vector<128xf32> to vector<128x1xf32>
    %197 = vector.broadcast %196 : vector<128x1xf32> to vector<128x128xf32>
    %198 = arith.subf %192, %197 : vector<128x128xf32>
    %cst_62 = arith.constant 0.000000e+00 : f32
    %199 = vector.broadcast %cst_62 : f32 to vector<128x128xf32>
    %200 = arith.minimumf %198, %199 : vector<128x128xf32>
    %201 = math.exp %200 : vector<128x128xf32>
    %cst_63 = arith.constant 0.000000e+00 : f32
    %202 = vector.broadcast %cst_63 : f32 to vector<128x128xf32>
    %203 = arith.select %3, %201, %202 : vector<128x128xi1>, vector<128x128xf32>
    %204 = arith.truncf %203 : vector<128x128xf32> to vector<128x128xbf16>
    %205 = tpu.concatenate %180, %4 in 1 : vector<128x16xbf16>, vector<128x1xbf16> -> vector<128x17xbf16>
    %cst_64 = arith.constant dense<0.000000e+00> : vector<128x17xf32>
    %206 = tpu.matmul %204, %205, %cst_64 {dimension_numbers = #tpu.dot_dimension_numbers<[1], [0], [0], [1], [0, 0, 1, 1], [], []>} : vector<128x128xbf16>, vector<128x17xbf16>, vector<128x17xf32> -> vector<128x17xf32>
    %207 = vector.extract_strided_slice %206 {offsets = [0, 0], sizes = [128, 16], strides = [1, 1]} : vector<128x17xf32> to vector<128x16xf32>
    %208 = vector.extract_strided_slice %206 {offsets = [0, 16], sizes = [128, 1], strides = [1, 1]} : vector<128x17xf32> to vector<128x1xf32>
    %cst_65 = arith.constant 1.000000e-30 : f32
    %209 = vector.broadcast %cst_65 : f32 to vector<128x1xf32>
    %210 = arith.maximumf %208, %209 : vector<128x1xf32>
    %211 = tpu.reciprocal %210 {approx = true} : vector<128x1xf32> -> vector<128x1xf32>
    %212 = vector.broadcast %211 : vector<128x1xf32> to vector<128x16xf32>
    %213 = arith.mulf %207, %212 : vector<128x16xf32>
    %cst_66 = arith.constant 0.000000e+00 : f32
    %214 = vector.broadcast %cst_66 : f32 to vector<128x16xf32>
    %215 = arith.cmpf ogt, %213, %214 : vector<128x16xf32>
    %cst_67 = arith.constant 0.000000e+00 : f32
    %216 = vector.broadcast %cst_67 : f32 to vector<128x16xf32>
    %217 = arith.minimumf %213, %216 : vector<128x16xf32>
    %218 = math.exp %217 : vector<128x16xf32>
    %cst_68 = arith.constant 1.000000e+00 : f32
    %219 = vector.broadcast %cst_68 : f32 to vector<128x16xf32>
    %220 = arith.subf %218, %219 : vector<128x16xf32>
    %221 = arith.select %215, %213, %220 : vector<128x16xi1>, vector<128x16xf32>
    %222 = vector.extract_strided_slice %9 {offsets = [0, 80], sizes = [128, 16], strides = [1, 1]} : vector<128x128xbf16> to vector<128x16xbf16>
    %223 = vector.extract_strided_slice %10 {offsets = [0, 5], sizes = [128, 1], strides = [1, 1]} : vector<128x8xf32> to vector<128x1xf32>
    %224 = vector.extract_strided_slice %11 {offsets = [5, 0], sizes = [1, 128], strides = [1, 1]} : vector<8x128xf32> to vector<1x128xf32>
    %225 = vector.broadcast %223 : vector<128x1xf32> to vector<128x128xf32>
    %226 = vector.broadcast %224 : vector<1x128xf32> to vector<128x128xf32>
    %227 = arith.addf %225, %226 : vector<128x128xf32>
    %cst_69 = arith.constant 0.000000e+00 : f32
    %228 = vector.broadcast %cst_69 : f32 to vector<128x128xf32>
    %229 = arith.cmpf ogt, %227, %228 : vector<128x128xf32>
    %cst_70 = arith.constant 0.000000e+00 : f32
    %230 = vector.broadcast %cst_70 : f32 to vector<128x128xf32>
    %231 = arith.subf %230, %227 : vector<128x128xf32>
    %cst_71 = arith.constant -2.000000e-01 : f32
    %232 = vector.broadcast %cst_71 : f32 to vector<128x128xf32>
    %233 = arith.mulf %232, %227 : vector<128x128xf32>
    %234 = arith.select %229, %231, %233 : vector<128x128xi1>, vector<128x128xf32>
    %cst_72 = arith.constant -1.000000e+30 : f32
    %235 = vector.broadcast %cst_72 : f32 to vector<128x128xf32>
    %236 = arith.select %3, %234, %235 : vector<128x128xi1>, vector<128x128xf32>
    %cst_73 = arith.constant dense<0xFF800000> : vector<128xf32>
    %237 = vector.multi_reduction <maximumf>, %236, %cst_73 [1] : vector<128x128xf32> to vector<128xf32>
    %238 = vector.shape_cast %237 : vector<128xf32> to vector<128x1xf32>
    %239 = vector.broadcast %238 : vector<128x1xf32> to vector<128x128xf32>
    %240 = arith.subf %234, %239 : vector<128x128xf32>
    %cst_74 = arith.constant 0.000000e+00 : f32
    %241 = vector.broadcast %cst_74 : f32 to vector<128x128xf32>
    %242 = arith.minimumf %240, %241 : vector<128x128xf32>
    %243 = math.exp %242 : vector<128x128xf32>
    %cst_75 = arith.constant 0.000000e+00 : f32
    %244 = vector.broadcast %cst_75 : f32 to vector<128x128xf32>
    %245 = arith.select %3, %243, %244 : vector<128x128xi1>, vector<128x128xf32>
    %246 = arith.truncf %245 : vector<128x128xf32> to vector<128x128xbf16>
    %247 = tpu.concatenate %222, %4 in 1 : vector<128x16xbf16>, vector<128x1xbf16> -> vector<128x17xbf16>
    %cst_76 = arith.constant dense<0.000000e+00> : vector<128x17xf32>
    %248 = tpu.matmul %246, %247, %cst_76 {dimension_numbers = #tpu.dot_dimension_numbers<[1], [0], [0], [1], [0, 0, 1, 1], [], []>} : vector<128x128xbf16>, vector<128x17xbf16>, vector<128x17xf32> -> vector<128x17xf32>
    %249 = vector.extract_strided_slice %248 {offsets = [0, 0], sizes = [128, 16], strides = [1, 1]} : vector<128x17xf32> to vector<128x16xf32>
    %250 = vector.extract_strided_slice %248 {offsets = [0, 16], sizes = [128, 1], strides = [1, 1]} : vector<128x17xf32> to vector<128x1xf32>
    %cst_77 = arith.constant 1.000000e-30 : f32
    %251 = vector.broadcast %cst_77 : f32 to vector<128x1xf32>
    %252 = arith.maximumf %250, %251 : vector<128x1xf32>
    %253 = tpu.reciprocal %252 {approx = true} : vector<128x1xf32> -> vector<128x1xf32>
    %254 = vector.broadcast %253 : vector<128x1xf32> to vector<128x16xf32>
    %255 = arith.mulf %249, %254 : vector<128x16xf32>
    %cst_78 = arith.constant 0.000000e+00 : f32
    %256 = vector.broadcast %cst_78 : f32 to vector<128x16xf32>
    %257 = arith.cmpf ogt, %255, %256 : vector<128x16xf32>
    %cst_79 = arith.constant 0.000000e+00 : f32
    %258 = vector.broadcast %cst_79 : f32 to vector<128x16xf32>
    %259 = arith.minimumf %255, %258 : vector<128x16xf32>
    %260 = math.exp %259 : vector<128x16xf32>
    %cst_80 = arith.constant 1.000000e+00 : f32
    %261 = vector.broadcast %cst_80 : f32 to vector<128x16xf32>
    %262 = arith.subf %260, %261 : vector<128x16xf32>
    %263 = arith.select %257, %255, %262 : vector<128x16xi1>, vector<128x16xf32>
    %264 = vector.extract_strided_slice %9 {offsets = [0, 96], sizes = [128, 16], strides = [1, 1]} : vector<128x128xbf16> to vector<128x16xbf16>
    %265 = vector.extract_strided_slice %10 {offsets = [0, 6], sizes = [128, 1], strides = [1, 1]} : vector<128x8xf32> to vector<128x1xf32>
    %266 = vector.extract_strided_slice %11 {offsets = [6, 0], sizes = [1, 128], strides = [1, 1]} : vector<8x128xf32> to vector<1x128xf32>
    %267 = vector.broadcast %265 : vector<128x1xf32> to vector<128x128xf32>
    %268 = vector.broadcast %266 : vector<1x128xf32> to vector<128x128xf32>
    %269 = arith.addf %267, %268 : vector<128x128xf32>
    %cst_81 = arith.constant 0.000000e+00 : f32
    %270 = vector.broadcast %cst_81 : f32 to vector<128x128xf32>
    %271 = arith.cmpf ogt, %269, %270 : vector<128x128xf32>
    %cst_82 = arith.constant 0.000000e+00 : f32
    %272 = vector.broadcast %cst_82 : f32 to vector<128x128xf32>
    %273 = arith.subf %272, %269 : vector<128x128xf32>
    %cst_83 = arith.constant -2.000000e-01 : f32
    %274 = vector.broadcast %cst_83 : f32 to vector<128x128xf32>
    %275 = arith.mulf %274, %269 : vector<128x128xf32>
    %276 = arith.select %271, %273, %275 : vector<128x128xi1>, vector<128x128xf32>
    %cst_84 = arith.constant -1.000000e+30 : f32
    %277 = vector.broadcast %cst_84 : f32 to vector<128x128xf32>
    %278 = arith.select %3, %276, %277 : vector<128x128xi1>, vector<128x128xf32>
    %cst_85 = arith.constant dense<0xFF800000> : vector<128xf32>
    %279 = vector.multi_reduction <maximumf>, %278, %cst_85 [1] : vector<128x128xf32> to vector<128xf32>
    %280 = vector.shape_cast %279 : vector<128xf32> to vector<128x1xf32>
    %281 = vector.broadcast %280 : vector<128x1xf32> to vector<128x128xf32>
    %282 = arith.subf %276, %281 : vector<128x128xf32>
    %cst_86 = arith.constant 0.000000e+00 : f32
    %283 = vector.broadcast %cst_86 : f32 to vector<128x128xf32>
    %284 = arith.minimumf %282, %283 : vector<128x128xf32>
    %285 = math.exp %284 : vector<128x128xf32>
    %cst_87 = arith.constant 0.000000e+00 : f32
    %286 = vector.broadcast %cst_87 : f32 to vector<128x128xf32>
    %287 = arith.select %3, %285, %286 : vector<128x128xi1>, vector<128x128xf32>
    %288 = arith.truncf %287 : vector<128x128xf32> to vector<128x128xbf16>
    %289 = tpu.concatenate %264, %4 in 1 : vector<128x16xbf16>, vector<128x1xbf16> -> vector<128x17xbf16>
    %cst_88 = arith.constant dense<0.000000e+00> : vector<128x17xf32>
    %290 = tpu.matmul %288, %289, %cst_88 {dimension_numbers = #tpu.dot_dimension_numbers<[1], [0], [0], [1], [0, 0, 1, 1], [], []>} : vector<128x128xbf16>, vector<128x17xbf16>, vector<128x17xf32> -> vector<128x17xf32>
    %291 = vector.extract_strided_slice %290 {offsets = [0, 0], sizes = [128, 16], strides = [1, 1]} : vector<128x17xf32> to vector<128x16xf32>
    %292 = vector.extract_strided_slice %290 {offsets = [0, 16], sizes = [128, 1], strides = [1, 1]} : vector<128x17xf32> to vector<128x1xf32>
    %cst_89 = arith.constant 1.000000e-30 : f32
    %293 = vector.broadcast %cst_89 : f32 to vector<128x1xf32>
    %294 = arith.maximumf %292, %293 : vector<128x1xf32>
    %295 = tpu.reciprocal %294 {approx = true} : vector<128x1xf32> -> vector<128x1xf32>
    %296 = vector.broadcast %295 : vector<128x1xf32> to vector<128x16xf32>
    %297 = arith.mulf %291, %296 : vector<128x16xf32>
    %cst_90 = arith.constant 0.000000e+00 : f32
    %298 = vector.broadcast %cst_90 : f32 to vector<128x16xf32>
    %299 = arith.cmpf ogt, %297, %298 : vector<128x16xf32>
    %cst_91 = arith.constant 0.000000e+00 : f32
    %300 = vector.broadcast %cst_91 : f32 to vector<128x16xf32>
    %301 = arith.minimumf %297, %300 : vector<128x16xf32>
    %302 = math.exp %301 : vector<128x16xf32>
    %cst_92 = arith.constant 1.000000e+00 : f32
    %303 = vector.broadcast %cst_92 : f32 to vector<128x16xf32>
    %304 = arith.subf %302, %303 : vector<128x16xf32>
    %305 = arith.select %299, %297, %304 : vector<128x16xi1>, vector<128x16xf32>
    %306 = vector.extract_strided_slice %9 {offsets = [0, 112], sizes = [128, 16], strides = [1, 1]} : vector<128x128xbf16> to vector<128x16xbf16>
    %307 = vector.extract_strided_slice %10 {offsets = [0, 7], sizes = [128, 1], strides = [1, 1]} : vector<128x8xf32> to vector<128x1xf32>
    %308 = vector.extract_strided_slice %11 {offsets = [7, 0], sizes = [1, 128], strides = [1, 1]} : vector<8x128xf32> to vector<1x128xf32>
    %309 = vector.broadcast %307 : vector<128x1xf32> to vector<128x128xf32>
    %310 = vector.broadcast %308 : vector<1x128xf32> to vector<128x128xf32>
    %311 = arith.addf %309, %310 : vector<128x128xf32>
    %cst_93 = arith.constant 0.000000e+00 : f32
    %312 = vector.broadcast %cst_93 : f32 to vector<128x128xf32>
    %313 = arith.cmpf ogt, %311, %312 : vector<128x128xf32>
    %cst_94 = arith.constant 0.000000e+00 : f32
    %314 = vector.broadcast %cst_94 : f32 to vector<128x128xf32>
    %315 = arith.subf %314, %311 : vector<128x128xf32>
    %cst_95 = arith.constant -2.000000e-01 : f32
    %316 = vector.broadcast %cst_95 : f32 to vector<128x128xf32>
    %317 = arith.mulf %316, %311 : vector<128x128xf32>
    %318 = arith.select %313, %315, %317 : vector<128x128xi1>, vector<128x128xf32>
    %cst_96 = arith.constant -1.000000e+30 : f32
    %319 = vector.broadcast %cst_96 : f32 to vector<128x128xf32>
    %320 = arith.select %3, %318, %319 : vector<128x128xi1>, vector<128x128xf32>
    %cst_97 = arith.constant dense<0xFF800000> : vector<128xf32>
    %321 = vector.multi_reduction <maximumf>, %320, %cst_97 [1] : vector<128x128xf32> to vector<128xf32>
    %322 = vector.shape_cast %321 : vector<128xf32> to vector<128x1xf32>
    %323 = vector.broadcast %322 : vector<128x1xf32> to vector<128x128xf32>
    %324 = arith.subf %318, %323 : vector<128x128xf32>
    %cst_98 = arith.constant 0.000000e+00 : f32
    %325 = vector.broadcast %cst_98 : f32 to vector<128x128xf32>
    %326 = arith.minimumf %324, %325 : vector<128x128xf32>
    %327 = math.exp %326 : vector<128x128xf32>
    %cst_99 = arith.constant 0.000000e+00 : f32
    %328 = vector.broadcast %cst_99 : f32 to vector<128x128xf32>
    %329 = arith.select %3, %327, %328 : vector<128x128xi1>, vector<128x128xf32>
    %330 = arith.truncf %329 : vector<128x128xf32> to vector<128x128xbf16>
    %331 = tpu.concatenate %306, %4 in 1 : vector<128x16xbf16>, vector<128x1xbf16> -> vector<128x17xbf16>
    %cst_100 = arith.constant dense<0.000000e+00> : vector<128x17xf32>
    %332 = tpu.matmul %330, %331, %cst_100 {dimension_numbers = #tpu.dot_dimension_numbers<[1], [0], [0], [1], [0, 0, 1, 1], [], []>} : vector<128x128xbf16>, vector<128x17xbf16>, vector<128x17xf32> -> vector<128x17xf32>
    %333 = vector.extract_strided_slice %332 {offsets = [0, 0], sizes = [128, 16], strides = [1, 1]} : vector<128x17xf32> to vector<128x16xf32>
    %334 = vector.extract_strided_slice %332 {offsets = [0, 16], sizes = [128, 1], strides = [1, 1]} : vector<128x17xf32> to vector<128x1xf32>
    %cst_101 = arith.constant 1.000000e-30 : f32
    %335 = vector.broadcast %cst_101 : f32 to vector<128x1xf32>
    %336 = arith.maximumf %334, %335 : vector<128x1xf32>
    %337 = tpu.reciprocal %336 {approx = true} : vector<128x1xf32> -> vector<128x1xf32>
    %338 = vector.broadcast %337 : vector<128x1xf32> to vector<128x16xf32>
    %339 = arith.mulf %333, %338 : vector<128x16xf32>
    %cst_102 = arith.constant 0.000000e+00 : f32
    %340 = vector.broadcast %cst_102 : f32 to vector<128x16xf32>
    %341 = arith.cmpf ogt, %339, %340 : vector<128x16xf32>
    %cst_103 = arith.constant 0.000000e+00 : f32
    %342 = vector.broadcast %cst_103 : f32 to vector<128x16xf32>
    %343 = arith.minimumf %339, %342 : vector<128x16xf32>
    %344 = math.exp %343 : vector<128x16xf32>
    %cst_104 = arith.constant 1.000000e+00 : f32
    %345 = vector.broadcast %cst_104 : f32 to vector<128x16xf32>
    %346 = arith.subf %344, %345 : vector<128x16xf32>
    %347 = arith.select %341, %339, %346 : vector<128x16xi1>, vector<128x16xf32>
    %348 = tpu.concatenate %53, %95, %137, %179, %221, %263, %305, %347 in 1 : vector<128x16xf32>, vector<128x16xf32>, vector<128x16xf32>, vector<128x16xf32>, vector<128x16xf32>, vector<128x16xf32>, vector<128x16xf32>, vector<128x16xf32> -> vector<128x128xf32>
    %349 = arith.truncf %348 : vector<128x128xf32> to vector<128x128xbf16>
    %c0_105 = arith.constant 0 : index
    %c0_106 = arith.constant 0 : index
    %350 = vector.load %arg5[%c0_105, %c0_106] : memref<128x10xbf16, #tpu.memory_space<vmem>>, vector<128x10xbf16>
    %cst_107 = arith.constant dense<0.000000e+00> : vector<128x10xf32>
    %351 = tpu.matmul %349, %350, %cst_107 {dimension_numbers = #tpu.dot_dimension_numbers<[1], [0], [0], [1], [0, 0, 1, 1], [], []>} : vector<128x128xbf16>, vector<128x10xbf16>, vector<128x10xf32> -> vector<128x10xf32>
    %352 = vector.extract_strided_slice %351 {offsets = [0, 0], sizes = [128, 8], strides = [1, 1]} : vector<128x10xf32> to vector<128x8xf32>
    %353 = arith.truncf %352 : vector<128x8xf32> to vector<128x8xbf16>
    %354 = vector.extract_strided_slice %351 {offsets = [0, 8], sizes = [128, 1], strides = [1, 1]} : vector<128x10xf32> to vector<128x1xf32>
    %355 = vector.extract_strided_slice %351 {offsets = [0, 9], sizes = [128, 1], strides = [1, 1]} : vector<128x10xf32> to vector<128x1xf32>
    %356 = tpu.concatenate %354, %5 in 1 : vector<128x1xf32>, vector<128x1xf32> -> vector<128x2xf32>
    %357 = tpu.concatenate %5, %355 in 1 : vector<128x1xf32>, vector<128x1xf32> -> vector<128x2xf32>
    %cst_108 = arith.constant dense<0.000000e+00> : vector<128x128xf32>
    %358 = tpu.matmul %356, %357, %cst_108 {dimension_numbers = #tpu.dot_dimension_numbers<[1], [1], [0], [0], [0, 0, 1, 0], [], []>} : vector<128x2xf32>, vector<128x2xf32>, vector<128x128xf32> -> vector<128x128xf32>
    %cst_109 = arith.constant 0.000000e+00 : f32
    %359 = vector.broadcast %cst_109 : f32 to vector<128x128xf32>
    %360 = arith.cmpf ogt, %358, %359 : vector<128x128xf32>
    %cst_110 = arith.constant 0.000000e+00 : f32
    %361 = vector.broadcast %cst_110 : f32 to vector<128x128xf32>
    %362 = arith.subf %361, %358 : vector<128x128xf32>
    %cst_111 = arith.constant -2.000000e-01 : f32
    %363 = vector.broadcast %cst_111 : f32 to vector<128x128xf32>
    %364 = arith.mulf %363, %358 : vector<128x128xf32>
    %365 = arith.select %360, %362, %364 : vector<128x128xi1>, vector<128x128xf32>
    %cst_112 = arith.constant -1.000000e+30 : f32
    %366 = vector.broadcast %cst_112 : f32 to vector<128x128xf32>
    %367 = arith.select %3, %365, %366 : vector<128x128xi1>, vector<128x128xf32>
    %cst_113 = arith.constant dense<0xFF800000> : vector<128xf32>
    %368 = vector.multi_reduction <maximumf>, %367, %cst_113 [1] : vector<128x128xf32> to vector<128xf32>
    %369 = vector.shape_cast %368 : vector<128xf32> to vector<128x1xf32>
    %370 = vector.broadcast %369 : vector<128x1xf32> to vector<128x128xf32>
    %371 = arith.subf %365, %370 : vector<128x128xf32>
    %cst_114 = arith.constant 0.000000e+00 : f32
    %372 = vector.broadcast %cst_114 : f32 to vector<128x128xf32>
    %373 = arith.minimumf %371, %372 : vector<128x128xf32>
    %374 = math.exp %373 : vector<128x128xf32>
    %cst_115 = arith.constant 0.000000e+00 : f32
    %375 = vector.broadcast %cst_115 : f32 to vector<128x128xf32>
    %376 = arith.select %3, %374, %375 : vector<128x128xi1>, vector<128x128xf32>
    %377 = arith.truncf %376 : vector<128x128xf32> to vector<128x128xbf16>
    %378 = tpu.concatenate %353, %4 in 1 : vector<128x8xbf16>, vector<128x1xbf16> -> vector<128x9xbf16>
    %cst_116 = arith.constant dense<0.000000e+00> : vector<128x9xf32>
    %379 = tpu.matmul %377, %378, %cst_116 {dimension_numbers = #tpu.dot_dimension_numbers<[1], [0], [0], [1], [0, 0, 1, 1], [], []>} : vector<128x128xbf16>, vector<128x9xbf16>, vector<128x9xf32> -> vector<128x9xf32>
    %380 = vector.extract_strided_slice %379 {offsets = [0, 0], sizes = [128, 8], strides = [1, 1]} : vector<128x9xf32> to vector<128x8xf32>
    %381 = vector.extract_strided_slice %379 {offsets = [0, 8], sizes = [128, 1], strides = [1, 1]} : vector<128x9xf32> to vector<128x1xf32>
    %cst_117 = arith.constant 1.000000e-30 : f32
    %382 = vector.broadcast %cst_117 : f32 to vector<128x1xf32>
    %383 = arith.maximumf %381, %382 : vector<128x1xf32>
    %384 = tpu.reciprocal %383 {approx = true} : vector<128x1xf32> -> vector<128x1xf32>
    %385 = vector.broadcast %384 : vector<128x1xf32> to vector<128x8xf32>
    %386 = arith.mulf %380, %385 : vector<128x8xf32>
    %cst_118 = arith.constant 0.000000e+00 : f32
    %387 = vector.broadcast %cst_118 : f32 to vector<128x8xf32>
    %388 = arith.cmpf ogt, %386, %387 : vector<128x8xf32>
    %cst_119 = arith.constant 0.000000e+00 : f32
    %389 = vector.broadcast %cst_119 : f32 to vector<128x8xf32>
    %390 = arith.minimumf %386, %389 : vector<128x8xf32>
    %391 = math.exp %390 : vector<128x8xf32>
    %cst_120 = arith.constant 1.000000e+00 : f32
    %392 = vector.broadcast %cst_120 : f32 to vector<128x8xf32>
    %393 = arith.subf %391, %392 : vector<128x8xf32>
    %394 = arith.select %388, %386, %393 : vector<128x8xi1>, vector<128x8xf32>
    %cst_121 = arith.constant dense<0xFF800000> : vector<128xf32>
    %395 = vector.multi_reduction <maximumf>, %394, %cst_121 [1] : vector<128x8xf32> to vector<128xf32>
    %396 = vector.shape_cast %395 : vector<128xf32> to vector<128x1xf32>
    %397 = vector.broadcast %396 : vector<128x1xf32> to vector<128x8xf32>
    %398 = arith.subf %394, %397 : vector<128x8xf32>
    %399 = math.exp %398 : vector<128x8xf32>
    %cst_122 = arith.constant dense<0.000000e+00> : vector<128xf32>
    %400 = vector.multi_reduction <add>, %399, %cst_122 [1] : vector<128x8xf32> to vector<128xf32>
    %401 = vector.shape_cast %400 : vector<128xf32> to vector<128x1xf32>
    %402 = math.log %401 : vector<128x1xf32>
    %403 = vector.broadcast %402 : vector<128x1xf32> to vector<128x8xf32>
    %404 = arith.subf %398, %403 : vector<128x8xf32>
    %c0_123 = arith.constant 0 : index
    %c0_124 = arith.constant 0 : index
    %405 = vector.load %arg6[%c0_123, %c0_124] : memref<128x8xf32, #tpu.memory_space<vmem>>, vector<128x8xf32>
    tpu.vector_store %arg6[%c0_123, %c0_124], %404 {strides = array<i32>} : memref<128x8xf32, #tpu.memory_space<vmem>>, vector<128x8xf32>,
    return
  }
  func.func @transform_0(%arg0: i32) -> (i32, i32) {
    %c0_i32 = arith.constant 0 : i32
    %c0_i32_0 = arith.constant 0 : i32
    %c0_i32_1 = arith.constant 0 : i32
    return %c0_i32, %c0_i32_0 : i32, i32
  }
  func.func @transform_1(%arg0: i32) -> (i32, i32) {
    %c0_i32 = arith.constant 0 : i32
    %c0_i32_0 = arith.constant 0 : i32
    %c0_i32_1 = arith.constant 0 : i32
    return %c0_i32, %c0_i32_0 : i32, i32
  }
  func.func @transform_2(%arg0: i32) -> (i32, i32) {
    %c0_i32 = arith.constant 0 : i32
    %c0_i32_0 = arith.constant 0 : i32
    %c0_i32_1 = arith.constant 0 : i32
    return %c0_i32, %c0_i32_0 : i32, i32
  }
  func.func @transform_3(%arg0: i32) -> (i32, i32) {
    %c0_i32 = arith.constant 0 : i32
    %c0_i32_0 = arith.constant 0 : i32
    %c0_i32_1 = arith.constant 0 : i32
    return %c0_i32, %c0_i32_0 : i32, i32
  }
  func.func @transform_4(%arg0: i32) -> (i32, i32) {
    %c0_i32 = arith.constant 0 : i32
    %c0_i32_0 = arith.constant 0 : i32
    %c0_i32_1 = arith.constant 0 : i32
    return %c0_i32, %c0_i32_0 : i32, i32
  }
  func.func @transform_5(%arg0: i32) -> (i32, i32) {
    %c0_i32 = arith.constant 0 : i32
    %c0_i32_0 = arith.constant 0 : i32
    %c0_i32_1 = arith.constant 0 : i32
    return %c0_i32, %c0_i32_0 : i32, i32
  }
}

</mosaic_0001>

<bundles_post_ra>
// kernel: tpu_custom_call.1
= control target key start
LH: loop header
LB: loop body
LE: loop exit
PB: predicated region body
PF: predicated region fallthrough
CT: control target
= control target key end

     0   :  { %v14469_v1 = vmov 0   ;;  %vm14504_vm0 = vcmask 523264   ;;  %v14461_v17 = vmov 2   ;;  %vm14505_vm1 = vcmask 130048   ;;  %s9804_s10 = smov 96   ;;  %s9805_s11 = smov 80   ;;  %s14454_s2 = inlined_call_operand.vmem [shape: bf16[64,136], index: 2, kind: input, shape index: {}]   ;;  %s14455_s0 = inlined_call_operand.vmem [shape: bf16[128,64], index: 0, kind: input, shape index: {}]   ;;  %s14456_s1 = inlined_call_operand.vmem [shape: s8[128,128], index: 1, kind: input, shape index: {}]   ;;  %s14457_s3 = inlined_call_operand.vmem [shape: f32[8,128], index: 3, kind: input, shape index: {}]   ;;  %s14458_s4 = inlined_call_operand.vmem [shape: bf16[128,10], index: 4, kind: input, shape index: {}]   ;;  %s14459_s5 = inlined_call_operand.vmem [shape: f32[128,8], index: 5, kind: output, shape index: {}]  }
   0x1   :  { %v8838_v0 = vld [vmem:[%s14454_s2 + $0x4] ss:$8 sps:$4 sm:$0xff]   ;;  %193 = vmatprep.mubr.bf16.mxu0 %v14469_v1  ;;  %8466 = vset.pattern.permute.xlu0 %v14469_v1  ;;  %v8840_v2 = vld [vmem:[%s14454_s2] ss:$8 sps:$4 sm:$0xff]   ;;  %v8841_v3 = vld [vmem:[%s14454_s2 + $0x14] ss:$8 sps:$4 sm:$0xff]  }
   0x2   :  { %161 = vmatprep.subr.bf16.mxu0 %v8838_v0  ;;  %v8843_v4 = vld [vmem:[%s14454_s2 + $0x10] ss:$8 sps:$4 sm:$0xff]   ;;  %v8844_v5 = vld [vmem:[%s14454_s2 + $0x24] ss:$8 sps:$4 sm:$0xff]   ;;  %v8846_v6 = vld [vmem:[%s14454_s2 + $0x20] ss:$8 sps:$4 sm:$0xff]   ;;  %8468 = vset.pattern.permute.xlu1 %v14461_v17 }
   0x3   :  { %162 = vmatpush1.bf16.msra.mxu0 %v8840_v2  ;;  %v8847_v7 = vld [vmem:[%s14454_s2 + $0x34] ss:$8 sps:$4 sm:$0xff]   ;;  %v8849_v8 = vld [vmem:[%s14454_s2 + $0x30] ss:$8 sps:$4 sm:$0xff]   ;;  %v8850_v9 = vld [vmem:[%s14455_s0] sm:$0xff]   ;;  %v14465_v24 = vmov 3  }
   0x4   :  { %163 = vmatprep.subr.bf16.mxu0 %v8841_v3  ;;  %v8851_v10 = vld [vmem:[%s14455_s0 + $0x8] sm:$0xff]   ;;  %v8852_v11 = vld [vmem:[%s14455_s0 + $0x10] sm:$0xff]   ;;  %v8853_v12 = vld [vmem:[%s14455_s0 + $0x18] sm:$0xff]   ;;  %v14463_v25 = vmov 1   ;;  %v14467_v29 = vmov 5   ;;  %v14460_v32 = vmov 4  }
   0x5   :  { %v8854_v13 = vld [vmem:[%s14455_s0 + $0x20] sm:$0xff]   ;;  %v8855_v14 = vld [vmem:[%s14455_s0 + $0x28] sm:$0xff]   ;;  %v8856_v15 = vld [vmem:[%s14455_s0 + $0x30] sm:$0xff]   ;;  %s9808_s13 = smov 64   ;;  %s9809_s14 = smov 48  }
   0x6   :  { %v8857_v16 = vld [vmem:[%s14455_s0 + $0x38] sm:$0xff]   ;;  %s9803_s0 = smov 112   ;;  %s9811_s17 = smov 16  }
   0x7   :  { %164 = vmatpush1.bf16.msra.mxu0 %v8843_v4 }
   0x8   :  { %165 = vmatprep.subr.bf16.mxu0 %v8844_v5 }
   0xb   :  { %166 = vmatpush1.bf16.msra.mxu0 %v8846_v6 }
   0xc   :  { %167 = vmatprep.subr.bf16.mxu0 %v8847_v7 }
   0xf   :  { %168 = vmatpush1.bf16.msra.mxu0 %v8849_v8 }
  0x12   :  { %7424 = vmatmul.mubr.msk.bf16.vlgmr.msra.gmra.mrb[0].mxu0 %vm14504_vm0, %v8850_v9 }
  0x13   :  { %203 = vmatprep.mubr.bf16.mxu0 %v14469_v1 }
  0x1a   :  { %7425 = vmatmul.mubr.msk.bf16.gmra.mrb[4].mxu0 %vm14504_vm0, %v8851_v10 }
  0x1b   :  { %213 = vmatprep.mubr.bf16.mxu0 %v14469_v1 }
  0x22   :  { %7426 = vmatmul.mubr.msk.bf16.gmra.mrb[8].mxu0 %vm14504_vm0, %v8852_v11 }
  0x23   :  { %223 = vmatprep.mubr.bf16.mxu0 %v14469_v1 }
  0x2a   :  { %7427 = vmatmul.mubr.msk.bf16.gmra.mrb[12].mxu0 %vm14504_vm0, %v8853_v12 }
  0x2b   :  { %233 = vmatprep.mubr.bf16.mxu0 %v14469_v1 }
  0x32   :  { %7428 = vmatmul.mubr.msk.bf16.gmra.mrb[16].mxu0 %vm14504_vm0, %v8854_v13 }
  0x33   :  { %243 = vmatprep.mubr.bf16.mxu0 %v14469_v1 }
  0x3a   :  { %7429 = vmatmul.mubr.msk.bf16.gmra.mrb[20].mxu0 %vm14504_vm0, %v8855_v14 }
  0x3b   :  { %253 = vmatprep.mubr.bf16.mxu0 %v14469_v1 }
  0x42   :  { %7430 = vmatmul.mubr.msk.bf16.gmra.mrb[24].mxu0 %vm14504_vm0, %v8856_v15  ;;  %v40_v15 = vld [vmem:[%s14456_s1] sm:$0xff] }
  0x43   :  { %263 = vmatprep.mubr.bf16.mxu0 %v14469_v1  ;;  %vm44_vm2 = vnez %v40_v15 }
  0x4a   :  { %7431 = vmatmul.mubr.msk.bf16.gmra.mrb[28].mxu0 %vm14504_vm0, %v8857_v16 }
  0xe5   :  { %v195_v18 = vpop.f32.mrb[0].mxu0 }
  0xe6   :  { %v9911_v19 = vpop.f32.mrb[1].mxu0 }
  0xe7   :  { %14855 = vst [vmem:[#allocation2_spill] sm:$0xff] %v9911_v19  ;;  %1700 = vperm.xlu1 %8468, %v9911_v19   ;;  %285 = vperm.xlu0 %8466, %v9911_v19   ;;  %v199_v20 = vpop.f32.mrb[2].mxu0 }
  0xe8   :  { %v9915_v21 = vpack.c.bf16 %v199_v20, %v195_v18  ;;  %v9917_v22 = vpop.f32.mrb[3].mxu0 }
  0xe9   :  { %14857 = vst [vmem:[#allocation4_spill] sm:$0xff] %v9917_v22 }
  0xea   :  { %14856 = vst [vmem:[#allocation3_spill] sm:$0xff] %v9915_v21  ;;  %v702_v23 = vsel %vm14505_vm1, %v9915_v21, 1065369472 }
  0xeb   :  { %8469 = vset.pattern.permute.xlu1 %v14465_v24  ;;  %8467 = vset.pattern.permute.xlu0 %v14463_v25 }
  0xec   :  { %8024 = vmatprep.subr.bf16.mxu1 %v702_v23  ;;  %2345 = vperm.xlu1 %8469, %v9911_v19  }
  0xed   :  { %1047 = vperm.xlu0 %8467, %v9911_v19   ;;  %8025 = vmatpush3.bf16.msra.mxu1 %v702_v23  ;;  %v205_v26 = vpop.f32.mrb[4].mxu0  ;;  %v447_v23 = vsel %vm44_vm2, 16843009, %v14469_v1 }
  0xee   :  { %v9925_v27 = vpop.f32.mrb[5].mxu0 }
  0xef   :  { %14858 = vst [vmem:[#allocation5_spill] sm:$0xff] %v9925_v27  ;;  %v209_v28 = vpop.f32.mrb[6].mxu0 }
  0xf0   :  { %8471 = vset.pattern.permute.xlu1 %v14467_v29  ;;  %v9928_v30 = vpack.c.bf16 %v209_v28, %v205_v26  ;;  %v9930_v31 = vpop.f32.mrb[7].mxu0  ;;  %v363_v26 = vlaneseq }
  0xf1   :  { %14860 = vst [vmem:[#allocation7_spill] sm:$0xff] %v9930_v31  ;;  %8470 = vset.pattern.permute.xlu0 %v14460_v32  ;;  %3635 = vperm.xlu1 %8471, %v9911_v19  }
  0xf2   :  { %14859 = vst [vmem:[#allocation6_spill] sm:$0xff] %v9928_v30  ;;  %2990 = vperm.xlu0 %8470, %v9911_v19   ;;  %v705_v33 = vsel %vm14505_vm1, %v9928_v30, 1065369472 }
  0xf3   :  { %8026 = vmatprep.subr.bf16.mxu1 %v705_v33 }
  0xf4   :  { %8027 = vmatpush3.bf16.msra.mxu1 %v705_v33  ;;  %v451_v33 = vunpack.c.0.s8 %v447_v23 }
  0xf5   :  { %8473 = vset.pattern.permute.xlu1 %v14463_v25  ;;  %v215_v34 = vpop.f32.mrb[8].mxu0 }
  0xf6   :  { %8472 = vset.pattern.permute.xlu0 %v14469_v1  ;;  %1051 = vperm.xlu1 %8473, %v9917_v22   ;;  %v9940_v35 = vpop.f32.mrb[9].mxu0 }
  0xf7   :  { %14861 = vst [vmem:[#allocation8_spill] sm:$0xff] %v9940_v35  ;;  %290 = vperm.xlu0 %8472, %v9917_v22   ;;  %v219_v36 = vpop.f32.mrb[10].mxu0 }
  0xf8   :  { %v9943_v37 = vpack.c.bf16 %v219_v36, %v215_v34  ;;  %v9945_v38 = vpop.f32.mrb[11].mxu0  ;;  %v10134_v36 = vshrl.u32 %v363_v26, 7 }
  0xf9   :  { %14863 = vst [vmem:[#allocation10_spill] sm:$0xff] %v9945_v38 }
  0xfa   :  { %14862 = vst [vmem:[#allocation9_spill] sm:$0xff] %v9943_v37  ;;  %8475 = vset.pattern.permute.xlu1 %v14465_v24  ;;  %v708_v39 = vsel %vm14505_vm1, %v9943_v37, 1065369472  ;;  %14885 = vst [vmem:[#allocation32_spill] sm:$0xff] %v10134_v36 }
  0xfb   :  { %8474 = vset.pattern.permute.xlu0 %v14461_v17  ;;  %2349 = vperm.xlu1 %8475, %v9917_v22  }
  0xfc   :  { %1704 = vperm.xlu0 %8474, %v9917_v22   ;;  %8028 = vmatprep.subr.bf16.mxu1 %v708_v39 }
  0xfd   :  { %v225_v40 = vpop.f32.mrb[12].mxu0  ;;  %8029 = vmatpush3.bf16.msra.mxu1 %v708_v39  ;;  %v452_v39 = vunpack.c.1.s8 %v447_v23 }
  0xfe   :  { %v9953_v41 = vpop.f32.mrb[13].mxu0 }
  0xff   :  { %14864 = vst [vmem:[#allocation11_spill] sm:$0xff] %v9953_v41  ;;  %8476 = vset.pattern.permute.xlu1 %v14460_v32  ;;  %v229_v42 = vpop.f32.mrb[14].mxu0 }
 0x100   :  { %8477 = vset.pattern.permute.xlu0 %v14467_v29  ;;  %2994 = vperm.xlu1 %8476, %v9917_v22   ;;  %v9958_v43 = vpack.c.bf16 %v229_v42, %v225_v40  ;;  %v9960_v44 = vpop.f32.mrb[15].mxu0  ;;  %v467_v42 = vpack.c.b16 %v451_v33, %v451_v33 }
 0x101   :  { %14866 = vst [vmem:[#allocation13_spill] sm:$0xff] %v9960_v44  ;;  %3639 = vperm.xlu0 %8477, %v9917_v22  }
 0x102   :  { %14865 = vst [vmem:[#allocation12_spill] sm:$0xff] %v9958_v43  ;;  %v711_v45 = vsel %vm14505_vm1, %v9958_v43, 1065369472 }
 0x103   :  { %8030 = vmatprep.subr.bf16.mxu1 %v711_v45 }
 0x104   :  { %1338 = vrot.lane.b32.xlu1 %v9915_v21, %s9803_s0  ;;  %8031 = vmatpush3.bf16.msra.mxu1 %v711_v45  ;;  %v365_v45 = vsub.s32 0, %v10134_v36 }
 0x105   :  { %8485 = vset.pattern.permute.xlu0 %v14463_v25  ;;  %8478 = vset.pattern.permute.xlu1 %v14469_v1  ;;  %v235_v46 = vpop.f32.mrb[16].mxu0 }
 0x106   :  { %1059 = vperm.xlu0 %8485, %v9930_v31   ;;  %v9970_v47 = vpop.f32.mrb[17].mxu0 }
 0x107   :  { %14867 = vst [vmem:[#allocation14_spill] sm:$0xff] %v9970_v47  ;;  %v239_v48 = vpop.f32.mrb[18].mxu0 }
 0x108   :  { %295 = vperm.xlu1 %8478, %v9925_v27   ;;  %v9973_v49 = vpack.c.bf16 %v239_v48, %v235_v46  ;;  %v9975_v50 = vpop.f32.mrb[19].mxu0  ;;  %v469_v46 = vpack.c.b16 %v452_v39, %v452_v39  ;;  %v453_v48 = vunpack.c.2.s8 %v447_v23 }
 0x109   :  { %14869 = vst [vmem:[#allocation16_spill] sm:$0xff] %v9975_v50 }
 0x10a   :  { %14868 = vst [vmem:[#allocation15_spill] sm:$0xff] %v9973_v49  ;;  %8489 = vset.pattern.permute.xlu0 %v14469_v1  ;;  %v714_v51 = vsel %vm14505_vm1, %v9973_v49, 1065369472 }
 0x10b   :  { %305 = vperm.xlu0 %8489, %v9940_v35   ;;  %8032 = vmatprep.subr.bf16.mxu1 %v714_v51 }
 0x10c   :  { %8479 = vset.pattern.permute.xlu1 %v14463_v25  ;;  %8033 = vmatpush3.bf16.msra.mxu1 %v714_v51  ;;  %v10142_v51 = vld [vmem:[%s14457_s3] sm:$0xff] }
 0x10d   :  { %1055 = vperm.xlu1 %8479, %v9925_v27   ;;  %v245_v52 = vpop.f32.mrb[20].mxu0 }
 0x10e   :  { %v9983_v53 = vpop.f32.mrb[21].mxu0 }
 0x10f   :  { %14870 = vst [vmem:[#allocation17_spill] sm:$0xff] %v9983_v53  ;;  %8493 = vset.pattern.permute.xlu0 %v14467_v29  ;;  %v249_v54 = vpop.f32.mrb[22].mxu0 }
 0x110   :  { %3651 = vperm.xlu0 %8493, %v9940_v35   ;;  %v9987_v55 = vpack.c.bf16 %v249_v54, %v245_v52  ;;  %v9989_v56 = vpop.f32.mrb[23].mxu0  ;;  %v468_v54 = vpack.c.b8 %v467_v42, %v467_v42 }
 0x111   :  { %14872 = vst [vmem:[#allocation19_spill] sm:$0xff] %v9989_v56  ;;  %8480 = vset.pattern.permute.xlu1 %v14461_v17 }
 0x112   :  { %14871 = vst [vmem:[#allocation18_spill] sm:$0xff] %v9987_v55  ;;  %1708 = vperm.xlu1 %8480, %v9925_v27   ;;  %v717_v57 = vsel %vm14505_vm1, %v9987_v55, 1065369472  ;;  %vm499_vm3 = vnez %v468_v54 }
 0x113   :  { %8034 = vmatprep.subr.bf16.mxu1 %v717_v57 }
 0x114   :  { %8495 = vset.pattern.permute.xlu0 %v14463_v25  ;;  %8035 = vmatpush3.bf16.msra.mxu1 %v717_v57 }
 0x115   :  { %1067 = vperm.xlu0 %8495, %v9945_v38   ;;  %v255_v58 = vpop.f32.mrb[24].mxu0 }
 0x116   :  { %8481 = vset.pattern.permute.xlu1 %v14465_v24  ;;  %v9998_v59 = vpop.f32.mrb[25].mxu0 }
 0x117   :  { %14873 = vst [vmem:[#allocation20_spill] sm:$0xff] %v9998_v59  ;;  %2353 = vperm.xlu1 %8481, %v9925_v27   ;;  %v259_v60 = vpop.f32.mrb[26].mxu0 }
 0x118   :  { %v10001_v61 = vpack.c.bf16 %v259_v60, %v255_v58  ;;  %v10003_v62 = vpop.f32.mrb[27].mxu0  ;;  %v10151_v58 = vrot.slane %v10142_v51, %v365_v45  ;;  %v470_v60 = vpack.c.b8 %v469_v46, %v469_v46  ;;  %v454_v46 = vunpack.c.3.s8 %v447_v23 }
 0x119   :  { %14875 = vst [vmem:[#allocation22_spill] sm:$0xff] %v10003_v62  ;;  %8496 = vset.pattern.permute.xlu0 %v14461_v17 }
 0x11a   :  { %14874 = vst [vmem:[#allocation21_spill] sm:$0xff] %v10001_v61  ;;  %1720 = vperm.xlu0 %8496, %v9945_v38   ;;  %v720_v63 = vsel %vm14505_vm1, %v10001_v61, 1065369472  ;;  %vm500_vm4 = vnez %v470_v60 }
 0x11b   :  { %8482 = vset.pattern.permute.xlu1 %v14460_v32  ;;  %8036 = vmatprep.subr.bf16.mxu1 %v720_v63  ;;  %v516_v45 = vsel %vm500_vm4, 16843009, %v14469_v1 }
 0x11c   :  { %2998 = vperm.xlu1 %8482, %v9925_v27   ;;  %8037 = vmatpush3.bf16.msra.mxu1 %v720_v63  ;;  %v471_v63 = vpack.c.b16 %v453_v48, %v453_v48  ;;  %v532_v23 = vunpack.c.0.s8 %v516_v45  ;;  %v41_v45 = vld [vmem:[%s14456_s1 + $0x8] sm:$0xff] }
 0x11d   :  { %v265_v0 = vpop.f32.mrb[28].mxu0  ;;  %vm45_vm11 = vnez %v41_v45 }
 0x11e   :  { %8497 = vset.pattern.permute.xlu0 %v14465_v24  ;;  %v10012_v2 = vpop.f32.mrb[29].mxu0  ;;  %v472_v26 = vpack.c.b8 %v471_v63, %v471_v63  ;;  %v14891_v63 = vmov 0  ;;  %vm10191_vm9 = vcmp.ne.s32.totalorder %v532_v23, 0 }
 0x11f   :  { %14876 = vst [vmem:[#allocation23_spill] sm:$0xff] %v10012_v2  ;;  %2365 = vperm.xlu0 %8497, %v9945_v38   ;;  %v269_v3 = vpop.f32.mrb[30].mxu0 }
 0x120   :  { %8483 = vset.pattern.permute.xlu1 %v14467_v29  ;;  %v10016_v4 = vpack.c.bf16 %v269_v3, %v265_v0  ;;  %v10018_v5 = vpop.f32.mrb[31].mxu0  ;;  %v1112_v0 = vsub.s32 1, %v10134_v36  ;;  %vm501_vm5 = vnez %v472_v26 }
 0x121   :  { %14878 = vst [vmem:[#allocation25_spill] sm:$0xff] %v10018_v5  ;;  %3643 = vperm.xlu1 %8483, %v9925_v27  }
 0x122   :  { %14877 = vst [vmem:[#allocation24_spill] sm:$0xff] %v10016_v4  ;;  %v723_v6 = vsel %vm14505_vm1, %v10016_v4, 1065369472  ;;  %v10163_v33 = vrot.slane %v10142_v51, %v1112_v0  ;;  %v517_v0 = vsel %vm501_vm5, 16843009, %v14469_v1 }
 0x123   :  { %1342 = vrot.lane.b32.xlu0 %v9943_v37, %s9803_s0  ;;  %8038 = vmatprep.subr.bf16.mxu1 %v723_v6 }
 0x124   :  { %8500 = vset.pattern.permute.xlu0 %v14469_v1  ;;  %8039 = vmatpush3.bf16.msra.mxu1 %v723_v6 }
 0x125   :  { %8484 = vset.pattern.permute.xlu1 %v14469_v1 }
 0x126   :  { %300 = vperm.xlu1 %8484, %v9930_v31  }
 0x127   :  { %315 = vperm.xlu0 %8500, %v9953_v41  }
 0x12a   :  { %8486 = vset.pattern.permute.xlu1 %v14461_v17 }
 0x12b   :  { %8506 = vset.pattern.permute.xlu0 %v14463_v25  ;;  %1712 = vperm.xlu1 %8486, %v9930_v31  }
 0x12c   :  { %1075 = vperm.xlu0 %8506, %v9960_v44  }
 0x12f   :  { %8487 = vset.pattern.permute.xlu1 %v14465_v24 }
 0x130   :  { %8507 = vset.pattern.permute.xlu0 %v14461_v17  ;;  %2357 = vperm.xlu1 %8487, %v9930_v31  }
 0x131   :  { %1728 = vperm.xlu0 %8507, %v9960_v44  }
 0x134   :  { %8488 = vset.pattern.permute.xlu1 %v14467_v29 }
 0x135   :  { %8509 = vset.pattern.permute.xlu0 %v14467_v29  ;;  %3647 = vperm.xlu1 %8488, %v9930_v31  }
 0x136   :  { %3663 = vperm.xlu0 %8509, %v9960_v44  }
 0x139   :  { %1340 = vrot.lane.b32.xlu1 %v9928_v30, %s9803_s0  ;;  %v14927_v30 = vmov 0 }
 0x13a   :  { %1344 = vrot.lane.b32.xlu0 %v9958_v43, %s9803_s0  ;;  %8490 = vset.pattern.permute.xlu1 %v14463_v25 }
 0x13b   :  { %8510 = vset.pattern.permute.xlu0 %v14469_v1 }
 0x13d   :  { %1063 = vperm.xlu1 %8490, %v9940_v35  }
 0x13e   :  { %325 = vperm.xlu0 %8510, %v9970_v47  }
 0x141   :  { %8491 = vset.pattern.permute.xlu1 %v14461_v17 }
 0x142   :  { %8512 = vset.pattern.permute.xlu0 %v14461_v17  ;;  %1716 = vperm.xlu1 %8491, %v9940_v35  }
 0x143   :  { %1732 = vperm.xlu0 %8512, %v9970_v47  }
 0x146   :  { %8492 = vset.pattern.permute.xlu1 %v14465_v24 }
 0x147   :  { %8516 = vset.pattern.permute.xlu0 %v14463_v25  ;;  %2361 = vperm.xlu1 %8492, %v9940_v35  }
 0x148   :  { %1083 = vperm.xlu0 %8516, %v9975_v50  }
 0x14b   :  { %8494 = vset.pattern.permute.xlu1 %v14469_v1 }
 0x14c   :  { %8518 = vset.pattern.permute.xlu0 %v14465_v24  ;;  %310 = vperm.xlu1 %8494, %v9945_v38  }
 0x14d   :  { %2381 = vperm.xlu0 %8518, %v9975_v50  }
 0x150   :  { %8498 = vset.pattern.permute.xlu1 %v14460_v32 }
 0x151   :  { %8519 = vset.pattern.permute.xlu0 %v14467_v29  ;;  %3010 = vperm.xlu1 %8498, %v9945_v38  }
 0x152   :  { %3671 = vperm.xlu0 %8519, %v9975_v50  }
 0x155   :  { %8499 = vset.pattern.permute.xlu1 %v14467_v29 }
 0x156   :  { %8520 = vset.pattern.permute.xlu0 %v14469_v1  ;;  %3655 = vperm.xlu1 %8499, %v9945_v38   ;;  %v14908_v38 = vmov 5  }
 0x157   :  { %335 = vperm.xlu0 %8520, %v9983_v53  }
 0x15a   :  { %8501 = vset.pattern.permute.xlu1 %v14463_v25 }
 0x15b   :  { %8526 = vset.pattern.permute.xlu0 %v14463_v25  ;;  %1071 = vperm.xlu1 %8501, %v9953_v41  }
 0x15c   :  { %1091 = vperm.xlu0 %8526, %v9989_v56  }
 0x15f   :  { %8502 = vset.pattern.permute.xlu1 %v14461_v17 }
 0x160   :  { %8527 = vset.pattern.permute.xlu0 %v14461_v17  ;;  %1724 = vperm.xlu1 %8502, %v9953_v41  }
 0x161   :  { %1744 = vperm.xlu0 %8527, %v9989_v56  }
 0x164   :  { %8503 = vset.pattern.permute.xlu1 %v14465_v24 }
 0x165   :  { %8530 = vset.pattern.permute.xlu0 %v14469_v1  ;;  %2369 = vperm.xlu1 %8503, %v9953_v41  }
 0x166   :  { %345 = vperm.xlu0 %8530, %v9998_v59   ;;  %v10081_v7 = vpop.permute.xlu1 %1700  ;;  %v286_v11 = vpop.permute.xlu0 %285 }
 0x167   :  { %v367_v15 = vadd.f32 %v10151_v58, %v286_v11 }
 0x169   :  { %8504 = vset.pattern.permute.xlu1 %v14467_v29  ;;  %v399_v11 = vsub.f32 0.0, %v367_v15  ;;  %vm383_vm6 = vcmp.gt.f32.partialorder %v367_v15, 0.0 }
 0x16a   :  { %8532 = vset.pattern.permute.xlu0 %v14461_v17  ;;  %3659 = vperm.xlu1 %8504, %v9953_v41  }
 0x16b   :  { %1748 = vperm.xlu0 %8532, %v9998_v59   ;;  %v10087_v8 = vpop.permute.xlu1 %2345 }
 0x16c   :  { %14879 = vst [vmem:[#allocation26_spill] sm:$0xff] %v10087_v8  ;;  %v10108_v13 = vpop.permute.xlu0 %1047 }
 0x16e   :  { %8505 = vset.pattern.permute.xlu1 %v14469_v1 }
 0x16f   :  { %8535 = vset.pattern.permute.xlu0 %v14463_v25  ;;  %320 = vperm.xlu1 %8505, %v9960_v44  }
 0x170   :  { %1099 = vperm.xlu0 %8535, %v10003_v62   ;;  %v10093_v9 = vpop.permute.xlu1 %3635 }
 0x171   :  { %14880 = vst [vmem:[#allocation27_spill] sm:$0xff] %v10093_v9  ;;  %v10121_v18 = vpop.permute.xlu0 %2990 }
 0x172   :  { %14883 = vst [vmem:[#allocation30_spill] sm:$0xff] %v10121_v18 }
 0x173   :  { %8508 = vset.pattern.permute.xlu1 %v14465_v24 }
 0x174   :  { %8537 = vset.pattern.permute.xlu0 %v14465_v24  ;;  %2373 = vperm.xlu1 %8508, %v9960_v44  }
 0x175   :  { %2397 = vperm.xlu0 %8537, %v10003_v62   ;;  %v10099_v10 = vpop.permute.xlu1 %1051 }
 0x176   :  { %v10132_v34 = vpop.permute.xlu0 %290  ;;  %v1115_v48 = vadd.f32 %v10163_v33, %v10099_v10  ;;  %v473_v10 = vpack.c.b16 %v454_v46, %v454_v46 }
 0x178   :  { %8511 = vset.pattern.permute.xlu1 %v14463_v25  ;;  %vm1131_vm8 = vcmp.gt.f32.partialorder %v1115_v48, 0.0 }
 0x179   :  { %8538 = vset.pattern.permute.xlu0 %v14469_v1  ;;  %1079 = vperm.xlu1 %8511, %v9970_v47  }
 0x17a   :  { %355 = vperm.xlu0 %8538, %v10012_v2   ;;  %v10105_v12 = vpop.permute.xlu1 %2349 }
 0x17b   :  { %14881 = vst [vmem:[#allocation28_spill] sm:$0xff] %v10105_v12  ;;  %v10144_v52 = vpop.permute.xlu0 %1704 }
 0x17c   :  { %14886 = vst [vmem:[#allocation33_spill] sm:$0xff] %v10144_v52 }
 0x17d   :  { %8513 = vset.pattern.permute.xlu1 %v14465_v24 }
 0x17e   :  { %8543 = vset.pattern.permute.xlu0 %v14463_v25  ;;  %2377 = vperm.xlu1 %8513, %v9970_v47  }
 0x17f   :  { %1107 = vperm.xlu0 %8543, %v10018_v5   ;;  %v10113_v14 = vpop.permute.xlu1 %2994 }
 0x180   :  { %14882 = vst [vmem:[#allocation29_spill] sm:$0xff] %v10113_v14  ;;  %v10154_v3 = vpop.permute.xlu0 %3639 }
 0x181   :  { %14888 = vst [vmem:[#allocation35_spill] sm:$0xff] %v10154_v3  ;;  %v14905_v3 = vmov 3  }
 0x182   :  { %8514 = vset.pattern.permute.xlu1 %v14467_v29 }
 0x183   :  { %8544 = vset.pattern.permute.xlu0 %v14461_v17  ;;  %v1339_v16 = vpop.permute.xlu1 %1338  ;;  %3667 = vperm.xlu1 %8514, %v9970_v47  }
 0x184   :  { %1760 = vperm.xlu0 %8544, %v10018_v5   ;;  %v10125_v20 = vsel %vm14505_vm1, %v1339_v16, 1065369472  ;;  %v515_v16 = vsel %vm499_vm3, 16843009, %v14469_v1 }
 0x185   :  { %14884 = vst [vmem:[#allocation31_spill] sm:$0xff] %v10125_v20  ;;  %8056 = vmatprep.subr.bf16.mxu1 %v10125_v20  ;;  %v10165_v39 = vpop.permute.xlu0 %1059  ;;  %v531_v42 = vunpack.c.0.s8 %v515_v16 }
 0x187   :  { %v296_v28 = vpop.permute.xlu1 %295  ;;  %8515 = vset.pattern.permute.xlu1 %v14469_v1  ;;  %vm10176_vm7 = vcmp.ne.s32.totalorder %v531_v42, 0  ;;  %v14895_v42 = vmov 0 }
 0x188   :  { %330 = vperm.xlu1 %8515, %v9975_v50   ;;  %8547 = vset.pattern.permute.xlu0 %v14460_v32  ;;  %v415_v32 = vmul.f32 -0.2, %v367_v15  ;;  %v14892_v63 = vsel %vm10176_vm7, 4294967295, %v14891_v63  ;;  %v369_v16 = vadd.f32 %v10151_v58, %v296_v28  ;;  %v14896_v42 = vsel %vm10191_vm9, 4294967295, %v14895_v42 }
 0x189   :  { %14893 = vst [vmem:[#allocation38_spill] sm:$0xff] %v14892_v63  ;;  %14897 = vst [vmem:[#allocation40_spill] sm:$0xff] %v14896_v42  ;;  %v533_v28 = vunpack.c.0.s8 %v517_v0 }
 0x18a   :  { %v10174_v60 = vpop.permute.xlu0 %305  ;;  %vm385_vm10 = vcmp.gt.f32.partialorder %v369_v16, 0.0 }
 0x18b   :  { %vm10208_vm12 = vcmp.ne.s32.totalorder %v533_v28, 0 }
 0x18c   :  { %v1056_v40 = vpop.permute.xlu1 %1055  ;;  %8517 = vset.pattern.permute.xlu1 %v14461_v17 }
 0x18d   :  { %1736 = vperm.xlu1 %8517, %v9975_v50   ;;  %v1116_v46 = vadd.f32 %v10163_v33, %v1056_v40  ;;  %v14901_v40 = vmov 0 }
 0x18e   :  { %v14902_v40 = vsel %vm10208_vm12, 4294967295, %v14901_v40 }
 0x18f   :  { %v10201_v1 = vpop.permute.xlu0 %3651  ;;  %14903 = vst [vmem:[#allocation43_spill] sm:$0xff] %v14902_v40  ;;  %vm1132_vm14 = vcmp.gt.f32.partialorder %v1116_v46, 0.0 }
 0x190   :  { %14899 = vst [vmem:[#allocation42_spill] sm:$0xff] %v10201_v1 }
 0x191   :  { %v10146_v57 = vpop.permute.xlu1 %1708  ;;  %8521 = vset.pattern.permute.xlu1 %v14463_v25  ;;  %v1147_v25 = vsub.f32 0.0, %v1115_v48 }
 0x192   :  { %14887 = vst [vmem:[#allocation34_spill] sm:$0xff] %v10146_v57  ;;  %1087 = vperm.xlu1 %8521, %v9983_v53  }
 0x194   :  { %v1068_v45 = vpop.permute.xlu0 %1067 }
 0x196   :  { %v10156_v6 = vpop.permute.xlu1 %2353  ;;  %8522 = vset.pattern.permute.xlu1 %v14461_v17  ;;  %v10182_v17 = vsel %vm383_vm6, %v399_v11, %v415_v32  ;;  %v474_v32 = vpack.c.b8 %v473_v10, %v473_v10  ;;  %v401_v11 = vsub.f32 0.0, %v369_v16  ;;  %v1148_v10 = vsub.f32 0.0, %v1116_v46 }
 0x197   :  { %14889 = vst [vmem:[#allocation36_spill] sm:$0xff] %v10156_v6  ;;  %1740 = vperm.xlu1 %8522, %v9983_v53   ;;  %v563_v15 = vsel %vm10176_vm7, %v10182_v17, -1e+30 }
 0x198   :  { %vm502_vm13 = vnez %v474_v32 }
 0x19b   :  { %v10170_v54 = vpop.permute.xlu1 %2998  ;;  %8523 = vset.pattern.permute.xlu1 %v14465_v24  ;;  %v1163_v24 = vmul.f32 -0.2, %v1115_v48 }
 0x19c   :  { %14890 = vst [vmem:[#allocation37_spill] sm:$0xff] %v10170_v54  ;;  %2385 = vperm.xlu1 %8523, %v9983_v53   ;;  %v14914_v54 = vmov 1  }
 0x19d   :  { %v10199_v48 = vsel %vm1131_vm8, %v1147_v25, %v1163_v24 }
 0x19e   :  { %14898 = vst [vmem:[#allocation41_spill] sm:$0xff] %v10199_v48  ;;  %v1195_v0 = vsel %vm10191_vm9, %v10199_v48, -1e+30 }
 0x1a0   :  { %v10184_v26 = vpop.permute.xlu1 %3643  ;;  %8524 = vset.pattern.permute.xlu1 %v14467_v29  ;;  %v417_v29 = vmul.f32 -0.2, %v369_v16  ;;  %v1164_v16 = vmul.f32 -0.2, %v1116_v46 }
 0x1a1   :  { %14894 = vst [vmem:[#allocation39_spill] sm:$0xff] %v10184_v26  ;;  %3675 = vperm.xlu1 %8524, %v9983_v53   ;;  %v14900_v26 = vmov 0  }
 0x1a2   :  { %v10213_v25 = vsel %vm385_vm10, %v401_v11, %v417_v29  ;;  %v518_v32 = vsel %vm502_vm13, 16843009, %v14900_v26  ;;  %v10226_v29 = vsel %vm1132_vm14, %v1148_v10, %v1164_v16  ;;  %v10237_v10 = vpop.permute.xlu0 %1720  ;;  %v14910_v16 = vmov 0 }
 0x1a3   :  { %579 = vmax.xlane.f32.xlu0 %v563_v15  ;;  %v10216_v15 = vsel %vm45_vm11, 16843009, %v14900_v26  ;;  %v565_v28 = vsel %vm10208_vm12, %v10213_v25, -1e+30  ;;  %14906 = vst [vmem:[#allocation45_spill] sm:$0xff] %v10226_v29  ;;  %14909 = vst [vmem:[#allocation47_spill] sm:$0xff] %v10237_v10 }
 0x1a4   :  { %v1196_v9 = vsel %vm10208_vm12, %v10226_v29, -1e+30  ;;  %v14919_v29 = vmov 0 }
 0x1a5   :  { %v301_v23 = vpop.permute.xlu1 %300  ;;  %8525 = vset.pattern.permute.xlu1 %v14900_v26 }
 0x1a6   :  { %340 = vperm.xlu1 %8525, %v9989_v56   ;;  %v370_v24 = vadd.f32 %v10151_v58, %v301_v23  ;;  %v455_v23 = vunpack.c.0.s8 %v10216_v15 }
 0x1a7   :  { %1212 = vmax.xlane.f32.xlu0 %v1195_v0  ;;  %v534_v0 = vunpack.c.0.s8 %v518_v32 }
 0x1a8   :  { %v402_v46 = vsub.f32 0.0, %v370_v24  ;;  %v418_v11 = vmul.f32 -0.2, %v370_v24  ;;  %vm386_vm15 = vcmp.gt.f32.partialorder %v370_v24, 0.0  ;;  %v475_v27 = vpack.c.b16 %v455_v23, %v455_v23 }
 0x1a9   :  { %vm10240_vm2 = vcmp.ne.s32.totalorder %v534_v0, 0  ;;  %v456_v0 = vunpack.c.1.s8 %v10216_v15 }
 0x1aa   :  { %v10218_v1 = vpop.permute.xlu1 %1712  ;;  %8528 = vset.pattern.permute.xlu1 %v14905_v3  ;;  %v14911_v16 = vsel %vm10240_vm2, 4294967295, %v14910_v16 }
 0x1ab   :  { %14904 = vst [vmem:[#allocation44_spill] sm:$0xff] %v10218_v1  ;;  %583 = vmax.xlane.f32.xlu0 %v565_v28  ;;  %2389 = vperm.xlu1 %8528, %v9989_v56   ;;  %v10235_v28 = vsel %vm386_vm15, %v402_v46, %v418_v11  ;;  %14912 = vst [vmem:[#allocation48_spill] sm:$0xff] %v14911_v16  ;;  %v10251_v46 = vpop.permute.xlu0 %2365  ;;  %v477_v14 = vpack.c.b16 %v456_v0, %v456_v0 }
 0x1ac   :  { %v566_v24 = vsel %vm10240_vm2, %v10235_v28, -1e+30  ;;  %14915 = vst [vmem:[#allocation50_spill] sm:$0xff] %v10251_v46 }
 0x1ad   :  { %v478_v0 = vpack.c.b8 %v477_v14, %v477_v14 }
 0x1af   :  { %1214 = vmax.xlane.f32.xlu0 %v1196_v9  ;;  %v10232_v18 = vpop.permute.xlu1 %2357  ;;  %8529 = vset.pattern.permute.xlu1 %v14908_v38  ;;  %v476_v9 = vpack.c.b8 %v475_v27, %v475_v27  ;;  %v10259_v27 = vpop.permute.xlu0 %1342  ;;  %vm504_vm6 = vnez %v478_v0 }
 0x1b0   :  { %14907 = vst [vmem:[#allocation46_spill] sm:$0xff] %v10232_v18  ;;  %3679 = vperm.xlu1 %8529, %v9989_v56   ;;  %14917 = vst [vmem:[#allocation52_spill] sm:$0xff] %v10259_v27 }
 0x1b1   :  { %vm503_vm3 = vnez %v476_v9 }
 0x1b2   :  { %v519_v23 = vsel %vm503_vm3, 16843009, %v14900_v26 }
 0x1b3   :  { %585 = vmax.xlane.f32.xlu0 %v566_v24  ;;  %v535_v22 = vunpack.c.0.s8 %v519_v23  ;;  %v10264_v37 = vpop.permute.xlu0 %315 }
 0x1b4   :  { %v10247_v32 = vpop.permute.xlu1 %3647  ;;  %8531 = vset.pattern.permute.xlu1 %v14914_v54 }
 0x1b5   :  { %14913 = vst [vmem:[#allocation49_spill] sm:$0xff] %v10247_v32  ;;  %1095 = vperm.xlu1 %8531, %v9998_v59   ;;  %vm10268_vm5 = vcmp.ne.s32.totalorder %v535_v22, 0  ;;  %v1119_v22 = vadd.f32 %v10163_v33, %v1068_v45 }
 0x1b6   :  { %v14920_v29 = vsel %vm10268_vm5, 4294967295, %v14919_v29 }
 0x1b7   :  { %14921 = vst [vmem:[#allocation54_spill] sm:$0xff] %v14920_v29  ;;  %vm1135_vm10 = vcmp.gt.f32.partialorder %v1119_v22, 0.0 }
 0x1b8   :  { %v10253_v11 = vpop.permute.xlu1 %1340 }
 0x1b9   :  { %14916 = vst [vmem:[#allocation51_spill] sm:$0xff] %v10253_v11  ;;  %8533 = vset.pattern.permute.xlu1 %v14905_v3 }
 0x1ba   :  { %2393 = vperm.xlu1 %8533, %v9998_v59  }
 0x1bc   :  { %v1064_v24 = vpop.permute.xlu1 %1063 }
 0x1bd   :  { %v1118_v32 = vadd.f32 %v10163_v33, %v1064_v24  ;;  %v14923_v24 = vmov 2  }
 0x1be   :  { %8534 = vset.pattern.permute.xlu1 %v14900_v26 }
 0x1bf   :  { %350 = vperm.xlu1 %8534, %v10003_v62   ;;  %vm1134_vm4 = vcmp.gt.f32.partialorder %v1118_v32, 0.0  ;;  %v1150_v9 = vsub.f32 0.0, %v1118_v32  ;;  %v1166_v19 = vmul.f32 -0.2, %v1118_v32  ;;  %v1076_v32 = vpop.permute.xlu0 %1075 }
 0x1c0   :  { %v1121_v21 = vadd.f32 %v10163_v33, %v1076_v32 }
 0x1c1   :  { %v10266_v43 = vpop.permute.xlu1 %1716  ;;  %v10272_v46 = vsel %vm1134_vm4, %v1150_v9, %v1166_v19  ;;  %v520_v19 = vsel %vm504_vm6, 16843009, %v14900_v26 }
 0x1c2   :  { %14918 = vst [vmem:[#allocation53_spill] sm:$0xff] %v10266_v43  ;;  %14922 = vst [vmem:[#allocation55_spill] sm:$0xff] %v10272_v46  ;;  %v1198_v23 = vsel %vm10268_vm5, %v10272_v46, -1e+30  ;;  %v1151_v43 = vsub.f32 0.0, %v1119_v22  ;;  %v1153_v52 = vsub.f32 0.0, %v1121_v21 }
 0x1c3   :  { %8536 = vset.pattern.permute.xlu1 %v14923_v24  ;;  %1218 = vmax.xlane.f32.xlu0 %v1198_v23  ;;  %v10285_v46 = vpop.permute.xlu0 %1728  ;;  %v536_v23 = vunpack.c.0.s8 %v520_v19  ;;  %v1169_v6 = vmul.f32 -0.2, %v1121_v21  ;;  %vm1137_vm3 = vcmp.gt.f32.partialorder %v1121_v21, 0.0 }
 0x1c4   :  { %1752 = vperm.xlu1 %8536, %v10003_v62   ;;  %14925 = vst [vmem:[#allocation57_spill] sm:$0xff] %v10285_v46 }
 0x1c5   :  { %vm10294_vm11 = vcmp.ne.s32.totalorder %v536_v23, 0 }
 0x1c6   :  { %v10279_v10 = vpop.permute.xlu1 %2361  ;;  %v14928_v30 = vsel %vm10294_vm11, 4294967295, %v14927_v30 }
 0x1c7   :  { %14924 = vst [vmem:[#allocation56_spill] sm:$0xff] %v10279_v10  ;;  %v1167_v10 = vmul.f32 -0.2, %v1119_v22  ;;  %14929 = vst [vmem:[#allocation59_spill] sm:$0xff] %v14928_v30  ;;  %v10301_v19 = vpop.permute.xlu0 %3663 }
 0x1c8   :  { %8539 = vset.pattern.permute.xlu1 %v14914_v54  ;;  %14930 = vst [vmem:[#allocation60_spill] sm:$0xff] %v10301_v19 }
 0x1c9   :  { %1103 = vperm.xlu1 %8539, %v10012_v2  }
 0x1cb   :  { %v311_v9 = vpop.permute.xlu1 %310  ;;  %v10313_v23 = vpop.permute.xlu0 %1344 }
 0x1cc   :  { %v372_v14 = vadd.f32 %v10151_v58, %v311_v9  ;;  %v10304_v9 = vsel %vm1135_vm10, %v1151_v43, %v1167_v10  ;;  %14933 = vst [vmem:[#allocation63_spill] sm:$0xff] %v10313_v23  ;;  %v458_v43 = vunpack.c.3.s8 %v10216_v15  ;;  %v368_v23 = vadd.f32 %v10151_v58, %v10132_v34 }
 0x1cd   :  { %8540 = vset.pattern.permute.xlu1 %v14923_v24  ;;  %14931 = vst [vmem:[#allocation61_spill] sm:$0xff] %v10304_v9 }
 0x1ce   :  { %1756 = vperm.xlu1 %8540, %v10012_v2   ;;  %vm388_vm8 = vcmp.gt.f32.partialorder %v372_v14, 0.0  ;;  %v404_v0 = vsub.f32 0.0, %v372_v14  ;;  %v420_v54 = vmul.f32 -0.2, %v372_v14  ;;  %v1199_v14 = vsel %vm10294_vm11, %v10304_v9, -1e+30 }
 0x1cf   :  { %vm384_vm10 = vcmp.gt.f32.partialorder %v368_v23, 0.0 }
 0x1d0   :  { %v10290_v45 = vpop.permute.xlu1 %3010  ;;  %v10292_v48 = vsel %vm388_vm8, %v404_v0, %v420_v54  ;;  %v10318_v54 = vpop.permute.xlu0 %325 }
 0x1d1   :  { %14926 = vst [vmem:[#allocation58_spill] sm:$0xff] %v10290_v45  ;;  %v568_v24 = vsel %vm10294_vm11, %v10292_v48, -1e+30 }
 0x1d2   :  { %8541 = vset.pattern.permute.xlu1 %v14905_v3  ;;  %589 = vmax.xlane.f32.xlu0 %v568_v24  ;;  %v481_v24 = vpack.c.b16 %v458_v43, %v458_v43 }
 0x1d3   :  { %2401 = vperm.xlu1 %8541, %v10012_v2  }
 0x1d4   :  { %v10326_v19 = vpop.permute.xlu0 %1732  ;;  %v482_v45 = vpack.c.b8 %v481_v24, %v481_v24 }
 0x1d5   :  { %v10307_v22 = vpop.permute.xlu1 %3655  ;;  %14936 = vst [vmem:[#allocation65_spill] sm:$0xff] %v10326_v19 }
 0x1d6   :  { %14932 = vst [vmem:[#allocation62_spill] sm:$0xff] %v10307_v22  ;;  %1220 = vmax.xlane.f32.xlu0 %v1199_v14  ;;  %v14935_v14 = vmov 4   ;;  %vm506_vm13 = vnez %v482_v45 }
 0x1d7   :  { %8542 = vset.pattern.permute.xlu1 %v14900_v26  ;;  %v522_v43 = vsel %vm506_vm13, 16843009, %v14900_v26 }
 0x1d8   :  { %360 = vperm.xlu1 %8542, %v10018_v5   ;;  %v10330_v9 = vpop.permute.xlu0 %1083  ;;  %v538_v24 = vunpack.c.0.s8 %v522_v43  ;;  %v1114_v43 = vadd.f32 %v10163_v33, %v10108_v13 }
 0x1da   :  { %v10316_v0 = vpop.permute.xlu1 %1071  ;;  %vm10350_vm4 = vcmp.ne.s32.totalorder %v538_v24, 0  ;;  %v1146_v24 = vsub.f32 0.0, %v1114_v43  ;;  %vm1130_vm6 = vcmp.gt.f32.partialorder %v1114_v43, 0.0 }
 0x1dc   :  { %8545 = vset.pattern.permute.xlu1 %v14905_v3  ;;  %v42_v3 = vld [vmem:[%s14456_s1 + $0x10] sm:$0xff] }
 0x1dd   :  { %2405 = vperm.xlu1 %8545, %v10018_v5   ;;  %vm46_vm14 = vnez %v42_v3 }
 0x1de   :  { %v10344_v45 = vsel %vm46_vm14, 16843009, %v14900_v26 }
 0x1df   :  { %v10323_v10 = vpop.permute.xlu1 %1724 }
 0x1e0   :  { %14934 = vst [vmem:[#allocation64_spill] sm:$0xff] %v10323_v10  ;;  %v457_v10 = vunpack.c.2.s8 %v10216_v15 }
 0x1e1   :  { %8546 = vset.pattern.permute.xlu1 %v14935_v14  ;;  %v10339_v14 = vpop.permute.xlu0 %2381 }
 0x1e2   :  { %14939 = vst [vmem:[#allocation68_spill] sm:$0xff] %v10339_v14  ;;  %v14941_v14 = vmov 0  ;;  %v479_v15 = vpack.c.b16 %v457_v10, %v457_v10 }
 0x1e3   :  { %v14942_v14 = vsel %vm10350_vm4, 4294967295, %v14941_v14 }
 0x1e4   :  { %v10328_v22 = vpop.permute.xlu1 %2369  ;;  %14943 = vst [vmem:[#allocation70_spill] sm:$0xff] %v14942_v14  ;;  %v461_v14 = vunpack.c.2.s8 %v10344_v45 }
 0x1e5   :  { %14937 = vst [vmem:[#allocation66_spill] sm:$0xff] %v10328_v22  ;;  %v10357_v12 = vpop.permute.xlu0 %3671 }
 0x1e6   :  { %14944 = vst [vmem:[#allocation71_spill] sm:$0xff] %v10357_v12 }
 0x1e9   :  { %v10332_v46 = vpop.permute.xlu1 %3659  ;;  %v10368_v8 = vpop.permute.xlu0 %335 }
 0x1ea   :  { %14938 = vst [vmem:[#allocation67_spill] sm:$0xff] %v10332_v46 }
 0x1ed   :  { %v10380_v27 = vpop.permute.xlu0 %1091 }
 0x1ee   :  { %v321_v19 = vpop.permute.xlu1 %320 }
 0x1ef   :  { %v374_v22 = vadd.f32 %v10151_v58, %v321_v19  ;;  %v460_v19 = vunpack.c.1.s8 %v10344_v45 }
 0x1f1   :  { %vm390_vm15 = vcmp.gt.f32.partialorder %v374_v22, 0.0  ;;  %v406_v46 = vsub.f32 0.0, %v374_v22  ;;  %v422_v18 = vmul.f32 -0.2, %v374_v22  ;;  %v10362_v22 = vsel %vm1137_vm3, %v1153_v52, %v1169_v6 }
 0x1f2   :  { %14945 = vst [vmem:[#allocation72_spill] sm:$0xff] %v10362_v22  ;;  %v1201_v13 = vsel %vm10350_vm4, %v10362_v22, -1e+30  ;;  %v459_v52 = vunpack.c.0.s8 %v10344_v45  ;;  %v400_v6 = vsub.f32 0.0, %v368_v23 }
 0x1f3   :  { %v10346_v32 = vpop.permute.xlu1 %2373  ;;  %v10348_v3 = vsel %vm390_vm15, %v406_v46, %v422_v18  ;;  %v485_v18 = vpack.c.b16 %v460_v19, %v460_v19  ;;  %v480_v46 = vpack.c.b8 %v479_v15, %v479_v15  ;;  %v416_v19 = vmul.f32 -0.2, %v368_v23 }
 0x1f4   :  { %14940 = vst [vmem:[#allocation69_spill] sm:$0xff] %v10346_v32  ;;  %v570_v21 = vsel %vm10350_vm4, %v10348_v3, -1e+30  ;;  %v1162_v32 = vmul.f32 -0.2, %v1114_v43  ;;  %v1117_v15 = vadd.f32 %v10163_v33, %v10165_v39 }
 0x1f5   :  { %593 = vmax.xlane.f32.xlu0 %v570_v21  ;;  %v486_v21 = vpack.c.b8 %v485_v18, %v485_v18  ;;  %vm505_vm8 = vnez %v480_v46  ;;  %v483_v46 = vpack.c.b16 %v459_v52, %v459_v52  ;;  %v10391_v23 = vsel %vm384_vm10, %v400_v6, %v416_v19  ;;  %v10402_v6 = vpop.permute.xlu0 %1744 }
 0x1f6   :  { %v10376_v34 = vsel %vm1130_vm6, %v1146_v24, %v1162_v32  ;;  %v521_v18 = vsel %vm505_vm8, 16843009, %v14900_v26  ;;  %v1149_v39 = vsub.f32 0.0, %v1117_v15  ;;  %v1165_v32 = vmul.f32 -0.2, %v1117_v15  ;;  %14949 = vst [vmem:[#allocation76_spill] sm:$0xff] %v10402_v6 }
 0x1f7   :  { %14946 = vst [vmem:[#allocation73_spill] sm:$0xff] %v10376_v34  ;;  %v1194_v43 = vsel %vm10176_vm7, %v10376_v34, -1e+30  ;;  %vm508_vm13 = vnez %v486_v21  ;;  %v371_v24 = vadd.f32 %v10151_v58, %v10174_v60  ;;  %vm1133_vm14 = vcmp.gt.f32.partialorder %v1117_v15, 0.0 }
 0x1f8   :  { %v10366_v10 = vpop.permute.xlu1 %1079  ;;  %v537_v22 = vunpack.c.0.s8 %v521_v18  ;;  %v564_v21 = vsel %vm10191_vm9, %v10391_v23, -1e+30  ;;  %v524_v52 = vsel %vm508_vm13, 16843009, %v14900_v26  ;;  %v484_v34 = vpack.c.b8 %v483_v46, %v483_v46 }
 0x1f9   :  { %1224 = vmax.xlane.f32.xlu0 %v1201_v13  ;;  %v43_v13 = vld [vmem:[%s14456_s1 + $0x18] sm:$0xff]  ;;  %v403_v30 = vsub.f32 0.0, %v371_v24  ;;  %v419_v1 = vmul.f32 -0.2, %v371_v24  ;;  %v373_v60 = vadd.f32 %v10151_v58, %v10264_v37  ;;  %v10404_v19 = vsel %vm1133_vm14, %v1149_v39, %v1165_v32 }
 0x1fa   :  { %vm47_vm15 = vnez %v43_v13  ;;  %14950 = vst [vmem:[#allocation77_spill] sm:$0xff] %v10404_v19  ;;  %v1123_v15 = vadd.f32 %v10163_v33, %v10330_v9  ;;  %vm387_vm3 = vcmp.gt.f32.partialorder %v371_v24, 0.0  ;;  %vm10411_vm6 = vcmp.ne.s32.totalorder %v537_v22, 0 }
 0x1fb   :  { %v14951_v18 = vmov 0  ;;  %v1197_v37 = vsel %vm10240_vm2, %v10404_v19, -1e+30  ;;  %v540_v13 = vunpack.c.0.s8 %v524_v52  ;;  %vm10418_vm8 = vnez %v484_v34  ;;  %v346_v52 = vpop.permute.xlu0 %345 }
 0x1fc   :  { %v14952_v18 = vsel %vm10411_vm6, 4294967295, %v14951_v18  ;;  %v487_v9 = vpack.c.b16 %v461_v14, %v461_v14  ;;  %v405_v32 = vsub.f32 0.0, %v373_v60  ;;  %v1120_v6 = vadd.f32 %v10163_v33, %v10316_v0 }
 0x1fd   :  { %v10378_v12 = vpop.permute.xlu1 %2377  ;;  %14953 = vst [vmem:[#allocation78_spill] sm:$0xff] %v14952_v18  ;;  %vm389_vm10 = vcmp.gt.f32.partialorder %v373_v60, 0.0  ;;  %v1155_v19 = vsub.f32 0.0, %v1123_v15  ;;  %v1171_v4 = vmul.f32 -0.2, %v1123_v15  ;;  %vm10428_vm14 = vcmp.ne.s32.totalorder %v540_v13, 0 }
 0x1fe   :  { %14947 = vst [vmem:[#allocation74_spill] sm:$0xff] %v10378_v12  ;;  %v14956_v14 = vmov 0  ;;  %v375_v0 = vadd.f32 %v10151_v58, %v10318_v54  ;;  %v1152_v20 = vsub.f32 0.0, %v1120_v6  ;;  %v1168_v57 = vmul.f32 -0.2, %v1120_v6 }
 0x1ff   :  { %v14957_v14 = vsel %vm10428_vm14, 4294967295, %v14956_v14  ;;  %v10452_v29 = vpop.permute.xlu0 %1748 }
 0x200   :  { %14958 = vst [vmem:[#allocation79_spill] sm:$0xff] %v14957_v14  ;;  %14961 = vst [vmem:[#allocation82_spill] sm:$0xff] %v10452_v29 }
 0x201   :  { %1210 = vmax.xlane.f32.xlu1 %v1194_v43  ;;  %v10409_v43 = vsel %vm47_vm15, 16843009, %v14900_v26  ;;  %vm1139_vm15 = vcmp.gt.f32.partialorder %v1123_v15, 0.0 }
 0x202   :  { %v10393_v12 = vpop.permute.xlu1 %3667  ;;  %v463_v22 = vunpack.c.0.s8 %v10409_v43  ;;  %v10450_v54 = vsel %vm1139_vm15, %v1155_v19, %v1171_v4  ;;  %v14963_v19 = vmov 0 }
 0x203   :  { %14948 = vst [vmem:[#allocation75_spill] sm:$0xff] %v10393_v12  ;;  %v421_v12 = vmul.f32 -0.2, %v373_v60  ;;  %14960 = vst [vmem:[#allocation81_spill] sm:$0xff] %v10450_v54  ;;  %v1122_v60 = vadd.f32 %v10163_v33, %v10366_v10  ;;  %v1203_v4 = vsel %vm10428_vm14, %v10450_v54, -1e+30 }
 0x204   :  { %v491_v13 = vpack.c.b16 %v463_v22, %v463_v22 }
 0x205   :  { %581 = vmax.xlane.f32.xlu1 %v564_v21  ;;  %v10423_v21 = vsel %vm387_vm3, %v403_v30, %v419_v1  ;;  %v523_v1 = vsel %vm10418_vm8, 16843009, %v14900_v26  ;;  %v488_v30 = vpack.c.b8 %v487_v9, %v487_v9  ;;  %v10448_v39 = vsel %vm389_vm10, %v405_v32, %v421_v12 }
 0x206   :  { %vm1136_vm3 = vcmp.gt.f32.partialorder %v1120_v6, 0.0  ;;  %v539_v9 = vunpack.c.0.s8 %v523_v1  ;;  %v492_v22 = vpack.c.b8 %v491_v13, %v491_v13  ;;  %vm391_vm10 = vcmp.gt.f32.partialorder %v375_v0, 0.0  ;;  %v10478_v13 = vpop.permute.xlu0 %1099 }
 0x207   :  { %v331_v46 = vpop.permute.xlu1 %330  ;;  %vm509_vm8 = vnez %v488_v30  ;;  %v10462_v6 = vsel %vm1136_vm3, %v1152_v20, %v1168_v57  ;;  %v465_v32 = vunpack.c.2.s8 %v10409_v43  ;;  %v462_v30 = vunpack.c.3.s8 %v10344_v45 }
 0x208   :  { %v376_v24 = vadd.f32 %v10151_v58, %v331_v46  ;;  %14962 = vst [vmem:[#allocation83_spill] sm:$0xff] %v10462_v6  ;;  %v1200_v10 = vsel %vm10411_vm6, %v10462_v6, -1e+30  ;;  %v525_v1 = vsel %vm509_vm8, 16843009, %v14900_v26  ;;  %vm511_vm15 = vnez %v492_v22 }
 0x209   :  { %1216 = vmax.xlane.f32.xlu1 %v1197_v37  ;;  %v567_v37 = vsel %vm10268_vm5, %v10423_v21, -1e+30  ;;  %v1170_v20 = vmul.f32 -0.2, %v1122_v60  ;;  %v377_v57 = vadd.f32 %v10151_v58, %v10368_v8  ;;  %vm1138_vm3 = vcmp.gt.f32.partialorder %v1122_v60, 0.0 }
 0x20a   :  { %vm392_vm13 = vcmp.gt.f32.partialorder %v376_v24, 0.0  ;;  %v408_v34 = vsub.f32 0.0, %v376_v24  ;;  %v424_v11 = vmul.f32 -0.2, %v376_v24  ;;  %v541_v22 = vunpack.c.0.s8 %v525_v1 }
 0x20b   :  { %v527_v45 = vsel %vm511_vm15, 16843009, %v14900_v26  ;;  %v409_v29 = vsub.f32 0.0, %v377_v57  ;;  %v425_v54 = vmul.f32 -0.2, %v377_v57  ;;  %v379_v8 = vadd.f32 %v10151_v58, %v346_v52 }
 0x20c   :  { %v10437_v46 = vpop.permute.xlu1 %1736  ;;  %v10442_v24 = vsel %vm392_vm13, %v408_v34, %v424_v11  ;;  %v569_v11 = vsel %vm10411_vm6, %v10448_v39, -1e+30  ;;  %v423_v34 = vmul.f32 -0.2, %v375_v0  ;;  %vm10464_vm13 = vcmp.ne.s32.totalorder %v539_v9, 0 }
 0x20d   :  { %14959 = vst [vmem:[#allocation80_spill] sm:$0xff] %v10437_v46  ;;  %587 = vmax.xlane.f32.xlu1 %v567_v37  ;;  %v572_v15 = vsel %vm10428_vm14, %v10442_v24, -1e+30  ;;  %v407_v46 = vsub.f32 0.0, %v375_v0  ;;  %v14964_v19 = vsel %vm10464_vm13, 4294967295, %v14963_v19  ;;  %v1154_v37 = vsub.f32 0.0, %v1122_v60 }
 0x20e   :  { %597 = vmax.xlane.f32.xlu0 %v572_v15  ;;  %14965 = vst [vmem:[#allocation84_spill] sm:$0xff] %v14964_v19  ;;  %v495_v9 = vpack.c.b16 %v465_v32, %v465_v32  ;;  %vm393_vm8 = vcmp.gt.f32.partialorder %v377_v57, 0.0  ;;  %v10491_v32 = vpop.permute.xlu0 %2397  ;;  %v14970_v1 = vmov 0  ;;  %v411_v52 = vsub.f32 0.0, %v379_v8 }
 0x20f   :  { %v10476_v0 = vsel %vm391_vm10, %v407_v46, %v423_v34  ;;  %v10487_v46 = vsel %vm1138_vm3, %v1154_v37, %v1170_v20  ;;  %14969 = vst [vmem:[#allocation88_spill] sm:$0xff] %v10491_v32  ;;  %vm10496_vm10 = vcmp.ne.s32.totalorder %v541_v22, 0  ;;  %v10501_v20 = vsel %vm393_vm8, %v409_v29, %v425_v54 }
 0x210   :  { %14967 = vst [vmem:[#allocation86_spill] sm:$0xff] %v10487_v46  ;;  %v496_v60 = vpack.c.b8 %v495_v9, %v495_v9  ;;  %v14971_v1 = vsel %vm10496_vm10, 4294967295, %v14970_v1  ;;  %vm395_vm15 = vcmp.gt.f32.partialorder %v379_v8, 0.0  ;;  %v573_v22 = vsel %vm10496_vm10, %v10501_v20, -1e+30 }
 0x211   :  { %v1088_v12 = vpop.permute.xlu1 %1087  ;;  %591 = vmax.xlane.f32.xlu1 %v569_v11  ;;  %v571_v11 = vsel %vm10464_vm13, %v10476_v0, -1e+30  ;;  %14972 = vst [vmem:[#allocation89_spill] sm:$0xff] %v14971_v1  ;;  %v14974_v32 = vmov 0  ;;  %v14977_v6 = vmov 0 }
 0x212   :  { %1228 = vmax.xlane.f32.xlu0 %v1203_v4  ;;  %v489_v4 = vpack.c.b16 %v462_v30, %v462_v30  ;;  %v543_v30 = vunpack.c.0.s8 %v527_v45  ;;  %v1124_v37 = vadd.f32 %v10163_v33, %v1088_v12  ;;  %vm513_vm3 = vnez %v496_v60  ;;  %v356_v57 = vpop.permute.xlu0 %355 }
 0x213   :  { %v381_v12 = vadd.f32 %v10151_v58, %v356_v57  ;;  %v529_v54 = vsel %vm513_vm3, 16843009, %v14900_v26 }
 0x214   :  { %vm10508_vm0 = vcmp.ne.s32.totalorder %v543_v30, 0  ;;  %v1156_v45 = vsub.f32 0.0, %v1124_v37  ;;  %vm1140_vm8 = vcmp.gt.f32.partialorder %v1124_v37, 0.0 }
 0x215   :  { %1222 = vmax.xlane.f32.xlu1 %v1200_v10  ;;  %v1202_v10 = vsel %vm10464_vm13, %v10487_v46, -1e+30  ;;  %v14975_v32 = vsel %vm10508_vm0, 4294967295, %v14974_v32  ;;  %v429_v30 = vmul.f32 -0.2, %v381_v12 }
 0x216   :  { %v10480_v15 = vpop.permute.xlu1 %1740  ;;  %14976 = vst [vmem:[#allocation91_spill] sm:$0xff] %v14975_v32 }
 0x217   :  { %14966 = vst [vmem:[#allocation85_spill] sm:$0xff] %v10480_v15  ;;  %v490_v15 = vpack.c.b8 %v489_v4, %v489_v4  ;;  %v1172_v4 = vmul.f32 -0.2, %v1124_v37 }
 0x219   :  { %595 = vmax.xlane.f32.xlu1 %v571_v11  ;;  %v427_v11 = vmul.f32 -0.2, %v379_v8  ;;  %vm510_vm1 = vnez %v490_v15  ;;  %v10520_v15 = vsel %vm1140_vm8, %v1156_v45, %v1172_v4 }
 0x21a   :  { %v526_v8 = vsel %vm510_vm1, 16843009, %v14900_v26 }
 0x21b   :  { %v10489_v34 = vpop.permute.xlu1 %2385  ;;  %v10513_v29 = vsel %vm395_vm15, %v411_v52, %v427_v11  ;;  %v542_v52 = vunpack.c.0.s8 %v526_v8  ;;  %vm397_vm15 = vcmp.gt.f32.partialorder %v381_v12, 0.0  ;;  %v1204_v11 = vsel %vm10496_vm10, %v10520_v15, -1e+30 }
 0x21c   :  { %14968 = vst [vmem:[#allocation87_spill] sm:$0xff] %v10489_v34  ;;  %v575_v60 = vsel %vm10508_vm0, %v10513_v29, -1e+30  ;;  %v545_v34 = vunpack.c.0.s8 %v529_v54  ;;  %v464_v54 = vunpack.c.1.s8 %v10409_v43 }
 0x21d   :  { %1226 = vmax.xlane.f32.xlu1 %v1202_v10  ;;  %v413_v10 = vsub.f32 0.0, %v381_v12  ;;  %vm10536_vm8 = vcmp.ne.s32.totalorder %v542_v52, 0 }
 0x21e   :  { %vm10528_vm3 = vcmp.ne.s32.totalorder %v545_v34, 0 }
 0x21f   :  { %v10526_v46 = vsel %vm397_vm15, %v413_v10, %v429_v30  ;;  %v14978_v6 = vsel %vm10528_vm3, 4294967295, %v14977_v6 }
 0x220   :  { %v10503_v9 = vpop.permute.xlu1 %3675  ;;  %14979 = vst [vmem:[#allocation92_spill] sm:$0xff] %v14978_v6  ;;  %v577_v34 = vsel %vm10528_vm3, %v10526_v46, -1e+30 }
 0x221   :  { %14973 = vst [vmem:[#allocation90_spill] sm:$0xff] %v10503_v9  ;;  %599 = vmax.xlane.f32.xlu1 %v573_v22 }
 0x225   :  { %v341_v9 = vpop.permute.xlu1 %340  ;;  %603 = vmax.xlane.f32.xlu1 %v575_v60  ;;  %v493_v60 = vpack.c.b16 %v464_v54, %v464_v54 }
 0x226   :  { %v378_v57 = vadd.f32 %v10151_v58, %v341_v9  ;;  %v14981_v9 = vmov 0 }
 0x227   :  { %v14982_v9 = vsel %vm10536_vm8, 4294967295, %v14981_v9  ;;  %v494_v30 = vpack.c.b8 %v493_v60, %v493_v60 }
 0x228   :  { %vm394_vm1 = vcmp.gt.f32.partialorder %v378_v57, 0.0  ;;  %v410_v37 = vsub.f32 0.0, %v378_v57  ;;  %v426_v22 = vmul.f32 -0.2, %v378_v57  ;;  %14983 = vst [vmem:[#allocation94_spill] sm:$0xff] %v14982_v9 }
 0x229   :  { %1230 = vmax.xlane.f32.xlu1 %v1204_v11  ;;  %vm512_vm15 = vnez %v494_v30  ;;  %v1125_v11 = vadd.f32 %v10163_v33, %v10380_v27  ;;  %v14987_v27 = vmov 0 }
 0x22a   :  { %v10532_v45 = vpop.permute.xlu1 %2389  ;;  %v10534_v4 = vsel %vm394_vm1, %v410_v37, %v426_v22  ;;  %v528_v52 = vsel %vm512_vm15, 16843009, %v14900_v26 }
 0x22b   :  { %14980 = vst [vmem:[#allocation93_spill] sm:$0xff] %v10532_v45  ;;  %v574_v12 = vsel %vm10536_vm8, %v10534_v4, -1e+30  ;;  %v1157_v60 = vsub.f32 0.0, %v1125_v11  ;;  %vm1141_vm10 = vcmp.gt.f32.partialorder %v1125_v11, 0.0 }
 0x22c   :  { %601 = vmax.xlane.f32.xlu0 %v574_v12  ;;  %v544_v12 = vunpack.c.0.s8 %v528_v52 }
 0x22d   :  { %607 = vmax.xlane.f32.xlu1 %v577_v34 }
 0x22e   :  { %vm10563_vm15 = vcmp.ne.s32.totalorder %v544_v12, 0 }
 0x22f   :  { %v10547_v8 = vpop.permute.xlu1 %3679  ;;  %v14988_v27 = vsel %vm10563_vm15, 4294967295, %v14987_v27 }
 0x230   :  { %14984 = vst [vmem:[#allocation95_spill] sm:$0xff] %v10547_v8  ;;  %v1173_v8 = vmul.f32 -0.2, %v1125_v11  ;;  %14989 = vst [vmem:[#allocation98_spill] sm:$0xff] %v14988_v27 }
 0x234   :  { %v10549_v10 = vpop.permute.xlu1 %1095 }
 0x239   :  { %v10551_v57 = vpop.permute.xlu1 %2393 }
 0x23a   :  { %14985 = vst [vmem:[#allocation96_spill] sm:$0xff] %v10551_v57 }
 0x23e   :  { %v351_v37 = vpop.permute.xlu1 %350  ;;  %3018 = vperm.xlu1 %8546, %v9960_v44  }
 0x23f   :  { %v380_v22 = vadd.f32 %v10151_v58, %v351_v37  ;;  %v10571_v37 = vsel %vm1141_vm10, %v1157_v60, %v1173_v8 }
 0x240   :  { %v1205_v11 = vsel %vm10536_vm8, %v10571_v37, -1e+30 }
 0x241   :  { %vm396_vm1 = vcmp.gt.f32.partialorder %v380_v22, 0.0  ;;  %v412_v34 = vsub.f32 0.0, %v380_v22  ;;  %v428_v54 = vmul.f32 -0.2, %v380_v22  ;;  %v466_v22 = vunpack.c.3.s8 %v10409_v43 }
 0x242   :  { %3022 = vperm.xlu1 %8546, %v9970_v47  }
 0x243   :  { %v10559_v57 = vpop.permute.xlu1 %1752  ;;  %v10561_v30 = vsel %vm396_vm1, %v412_v34, %v428_v54  ;;  %v497_v12 = vpack.c.b16 %v466_v22, %v466_v22 }
 0x244   :  { %14986 = vst [vmem:[#allocation97_spill] sm:$0xff] %v10559_v57  ;;  %v576_v52 = vsel %vm10563_vm15, %v10561_v30, -1e+30 }
 0x245   :  { %605 = vmax.xlane.f32.xlu0 %v576_v52  ;;  %v498_v54 = vpack.c.b8 %v497_v12, %v497_v12 }
 0x246   :  { %3026 = vperm.xlu1 %8546, %v9975_v50   ;;  %v14992_v50 = vmov 0 }
 0x247   :  { %vm514_vm10 = vnez %v498_v54 }
 0x248   :  { %v1104_v47 = vpop.permute.xlu1 %1103  ;;  %v530_v43 = vsel %vm514_vm10, 16843009, %v14900_v26 }
 0x249   :  { %1232 = vmax.xlane.f32.xlu0 %v1205_v11  ;;  %v546_v11 = vunpack.c.0.s8 %v530_v43 }
 0x24a   :  { %3030 = vperm.xlu1 %8546, %v9983_v53  }
 0x24b   :  { %vm10592_vm8 = vcmp.ne.s32.totalorder %v546_v11, 0  ;;  %v1126_v11 = vadd.f32 %v10163_v33, %v10549_v10 }
 0x24c   :  { %v14993_v50 = vsel %vm10592_vm8, 4294967295, %v14992_v50 }
 0x24d   :  { %v10578_v34 = vpop.permute.xlu1 %1756  ;;  %14994 = vst [vmem:[#allocation101_spill] sm:$0xff] %v14993_v50  ;;  %vm1142_vm10 = vcmp.gt.f32.partialorder %v1126_v11, 0.0 }
 0x24e   :  { %14990 = vst [vmem:[#allocation99_spill] sm:$0xff] %v10578_v34  ;;  %3042 = vperm.xlu1 %8546, %v10003_v62  }
 0x252   :  { %v10581_v52 = vpop.permute.xlu1 %2401  ;;  %1346 = vrot.lane.b32.xlu1 %v9973_v49, %s9803_s0  ;;  %v15025_v49 = vld [vmem:[#allocation36_spill] sm:$0xff] }
 0x253   :  { %14991 = vst [vmem:[#allocation100_spill] sm:$0xff] %v10581_v52 }
 0x256   :  { %3046 = vperm.xlu1 %8546, %v10012_v2  }
 0x257   :  { %v361_v8 = vpop.permute.xlu1 %360 }
 0x258   :  { %v382_v60 = vadd.f32 %v10151_v58, %v361_v8  ;;  %v10599_v58 = vpop.permute.xlu0 %1107 }
 0x25a   :  { %8548 = vset.pattern.permute.xlu1 %v14908_v38  ;;  %vm398_vm1 = vcmp.gt.f32.partialorder %v382_v60, 0.0  ;;  %v414_v22 = vsub.f32 0.0, %v382_v60  ;;  %v430_v53 = vmul.f32 -0.2, %v382_v60 }
 0x25b   :  { %3683 = vperm.xlu1 %8548, %v9998_v59  }
 0x25c   :  { %v10590_v12 = vsel %vm398_vm1, %v414_v22, %v430_v53  ;;  %v10603_v38 = vpop.permute.xlu0 %1760 }
 0x25d   :  { %v578_v26 = vsel %vm10592_vm8, %v10590_v12, -1e+30  ;;  %14995 = vst [vmem:[#allocation102_spill] sm:$0xff] %v10603_v38 }
 0x25e   :  { %609 = vmax.xlane.f32.xlu0 %v578_v26  ;;  %v1158_v26 = vsub.f32 0.0, %v1126_v11 }
 0x25f   :  { %3687 = vperm.xlu1 %8548, %v10003_v62   ;;  %v1128_v62 = vadd.f32 %v10163_v33, %v1104_v47 }
 0x260   :  { %v580_v53 = vpop.xlane.xlu0 %579 }
 0x261   :  { %vm1144_vm1 = vcmp.gt.f32.partialorder %v1128_v62, 0.0 }
 0x263   :  { %3691 = vperm.xlu1 %8548, %v10012_v2   ;;  %v1174_v2 = vmul.f32 -0.2, %v1126_v11 }
 0x264   :  { %v10608_v54 = vpop.xlane.xlu0 %1212 }
 0x265   :  { %v10626_v52 = vsel %vm1142_vm10, %v1158_v26, %v1174_v2 }
 0x266   :  { %v1206_v47 = vsel %vm10508_vm0, %v10626_v52, -1e+30 }
 0x267   :  { %3695 = vperm.xlu1 %8548, %v10018_v5  }
 0x268   :  { %v584_v43 = vpop.xlane.xlu0 %583 }
 0x26b   :  { %1348 = vrot.lane.b32.xlu1 %v9987_v55, %s9803_s0 }
 0x26c   :  { %v10612_v8 = vpop.xlane.xlu0 %1214 }
 0x270   :  { %v586_v60 = vpop.xlane.xlu0 %585 }
 0x271   :  { %v614_v10 = vsub.f32 %v10235_v28, %v586_v60 }
 0x274   :  { %3002 = vperm.xlu0 %8547, %v9930_v31   ;;  %v10619_v22 = vpop.xlane.xlu0 %1218  ;;  %v1176_v31 = vmul.f32 -0.2, %v1128_v62 }
 0x278   :  { %3006 = vperm.xlu0 %8547, %v9940_v35   ;;  %v590_v44 = vpop.xlane.xlu0 %589  ;;  %v10623_v35 = vpop.permute.xlu1 %2405 }
 0x279   :  { %14996 = vst [vmem:[#allocation103_spill] sm:$0xff] %v10623_v35 }
 0x27c   :  { %3014 = vperm.xlu0 %8547, %v9953_v41   ;;  %v1160_v41 = vsub.f32 0.0, %v1128_v62 }
 0x280   :  { %3034 = vperm.xlu0 %8547, %v9989_v56   ;;  %v611_v56 = vsub.f32 %v10182_v17, %v580_v53  ;;  %v10637_v17 = vsel %vm1144_vm1, %v1160_v41, %v1176_v31  ;;  %v630_v53 = vmin.f32 %v614_v10, 0.0  ;;  %vm10668_vm1 = vmpackc.low %vm10191_vm9, %vm10176_vm7 }
 0x281   :  { %v1208_v62 = vsel %vm10528_vm3, %v10637_v17, -1e+30  ;;  %vm10680_vm3 = vmpackc.low %vm10240_vm2, %vm10208_vm12 }
 0x282   :  { %v627_v11 = vmin.f32 %v611_v56, 0.0  ;;  %v649_v60 = vmul.f32 1.442695, %v630_v53  ;;  %v616_v56 = vsub.f32 %v10292_v48, %v590_v44 }
 0x284   :  { %3038 = vperm.xlu0 %8547, %v9998_v59   ;;  %v613_v59 = vsub.f32 %v10213_v25, %v584_v43  ;;  %v643_v25 = vmul.f32 1.442695, %v627_v11  ;;  %v632_v41 = vmin.f32 %v616_v56, 0.0  ;;  %v1765_v11 = vsub.s32 2, %v10134_v36 }
 0x286   :  { %v629_v2 = vmin.f32 %v613_v59, 0.0  ;;  %8866 = vpow2.f32 %v643_v25  ;;  %v653_v53 = vmul.f32 1.442695, %v632_v41 }
 0x287   :  { %8868 = vpow2.f32 %v649_v60 }
 0x288   :  { %3050 = vperm.xlu0 %8547, %v10018_v5   ;;  %v10635_v5 = vpop.xlane.xlu0 %1220  ;;  %v647_v45 = vmul.f32 1.442695, %v629_v2 }
 0x28c   :  { %v594_v28 = vpop.xlane.xlu0 %593 }
 0x28d   :  { %v618_v59 = vsub.f32 %v10348_v3, %v594_v28 }
 0x28e   :  { %v10630_v57 = vpop.xlane.xlu1 %1210 }
 0x28f   :  { %1234 = vmax.xlane.f32.xlu1 %v1206_v47  ;;  %v634_v2 = vmin.f32 %v618_v59, 0.0 }
 0x290   :  { %v10647_v10 = vpop.xlane.xlu0 %1224  ;;  %v8867_v56 = vpop.eup %8866 }
 0x291   :  { %v8869_v41 = vpop.eup %8868 }
 0x292   :  { %v582_v26 = vpop.xlane.xlu1 %581 }
 0x293   :  { %v612_v43 = vsub.f32 %v10391_v23, %v582_v26  ;;  %1238 = vmax.xlane.f32.xlu1 %v1208_v62  ;;  %v1127_v23 = vadd.f32 %v10163_v33, %v10478_v13  ;;  %v10654_v62 = vrot.slane %v10142_v51, %v1765_v11 }
 0x295   :  { %v628_v35 = vmin.f32 %v612_v43, 0.0  ;;  %v1159_v3 = vsub.f32 0.0, %v1127_v23  ;;  %v1175_v28 = vmul.f32 -0.2, %v1127_v23  ;;  %v1129_v43 = vadd.f32 %v10163_v33, %v10599_v58 }
 0x296   :  { %v10644_v47 = vpop.xlane.xlu1 %1216  ;;  %vm1143_vm10 = vcmp.gt.f32.partialorder %v1127_v23, 0.0  ;;  %v1767_v51 = vadd.f32 %v10654_v62, %v10081_v7 }
 0x297   :  { %v645_v31 = vmul.f32 1.442695, %v628_v35  ;;  %v1177_v33 = vmul.f32 -0.2, %v1129_v43  ;;  %vm1145_vm0 = vcmp.gt.f32.partialorder %v1129_v43, 0.0 }
 0x299   :  { %8870 = vpow2.f32 %v645_v31 }
 0x29a   :  { %8872 = vpow2.f32 %v647_v45  ;;  %v588_v44 = vpop.xlane.xlu1 %587  ;;  %v657_v45 = vmul.f32 1.442695, %v634_v2 }
 0x29b   :  { %v615_v48 = vsub.f32 %v10423_v21, %v588_v44  ;;  %v598_v35 = vpop.xlane.xlu0 %597  ;;  %8874 = vpow2.f32 %v653_v53  ;;  %v1161_v44 = vsub.f32 0.0, %v1129_v43  ;;  %v15000_v53 = vmov 0 }
 0x29c   :  { %v620_v21 = vsub.f32 %v10442_v24, %v598_v35  ;;  %v14997_v24 = vmov 0  ;;  %v15001_v53 = vsel %vm10680_vm3, 4294967295, %v15000_v53  ;;  %v1815_v35 = vmul.f32 -0.2, %v1767_v51 }
 0x29d   :  { %v631_v26 = vmin.f32 %v615_v48, 0.0  ;;  %v14998_v24 = vsel %vm10668_vm1, 4294967295, %v14997_v24  ;;  %15002 = vst [vmem:[#allocation105_spill] sm:$0xff] %v15001_v53  ;;  %v10695_v43 = vsel %vm1145_vm0, %v1161_v44, %v1177_v33  ;;  %vm10720_vm0 = vmpackc.low %vm10294_vm11, %vm10268_vm5 }
 0x29e   :  { %v592_v25 = vpop.xlane.xlu1 %591  ;;  %14999 = vst [vmem:[#allocation104_spill] sm:$0xff] %v14998_v24  ;;  %v636_v48 = vmin.f32 %v620_v21, 0.0 }
 0x29f   :  { %v651_v60 = vmul.f32 1.442695, %v631_v26  ;;  %v617_v13 = vsub.f32 %v10448_v39, %v592_v25  ;;  %v10672_v39 = vsel %vm1143_vm10, %v1159_v3, %v1175_v28  ;;  %v1799_v26 = vsub.f32 0.0, %v1767_v51 }
 0x2a0   :  { %v2410_v3 = vsub.s32 3, %v10134_v36  ;;  %v1207_v28 = vsel %vm10563_vm15, %v10672_v39, -1e+30  ;;  %vm1783_vm10 = vcmp.gt.f32.partialorder %v1767_v51, 0.0  ;;  %v661_v21 = vmul.f32 1.442695, %v636_v48 }
 0x2a1   :  { %8876 = vpow2.f32 %v651_v60  ;;  %v633_v31 = vmin.f32 %v617_v13, 0.0  ;;  %v15003_v60 = vld [vmem:[#allocation34_spill] sm:$0xff]  ;;  %v1209_v51 = vsel %vm10592_vm8, %v10695_v43, -1e+30  ;;  %v10712_v33 = vsel %vm1783_vm10, %v1799_v26, %v1815_v35  ;;  %v15014_v26 = vld [vmem:[#allocation52_spill] sm:$0xff] }
 0x2a2   :  { %v10662_v59 = vpop.xlane.xlu1 %1222  ;;  %8878 = vpow2.f32 %v657_v45  ;;  %v1769_v13 = vadd.f32 %v10654_v62, %v15003_v60 }
 0x2a3   :  { %v8871_v11 = vpop.eup %8870  ;;  %v655_v58 = vmul.f32 1.442695, %v633_v31  ;;  %v15005_v31 = vld [vmem:[#allocation24_spill] sm:$0xff] }
 0x2a4   :  { %v8873_v23 = vpop.eup %8872  ;;  %1350 = vrot.lane.b32.xlu1 %v10001_v61, %s9803_s0  ;;  %v7433_v7 = vpack.c.bf16 %v8871_v11, %v8867_v56  ;;  %v15004_v56 = vld [vmem:[#allocation31_spill] sm:$0xff]  ;;  %vm1785_vm10 = vcmp.gt.f32.partialorder %v1769_v13, 0.0 }
 0x2a5   :  { %8880 = vpow2.f32 %v655_v58  ;;  %v7436_v2 = vpack.c.bf16 %v8869_v41, %v8873_v23  ;;  %v15006_v41 = vld [vmem:[#allocation51_spill] sm:$0xff]  ;;  %v8875_v23 = vpop.eup %8874 }
 0x2a6   :  { %8040 = vmatprep.mubr.msk.bf16.mxu1 %vm10668_vm1, %v7433_v7  ;;  %v596_v25 = vpop.xlane.xlu1 %595  ;;  %vm15007_vm1 = vcmask 130048   ;;  %8882 = vpow2.f32 %v661_v21 }
 0x2a7   :  { %v619_v45 = vsub.f32 %v10476_v0, %v596_v25  ;;  %1236 = vmax.xlane.f32.xlu0 %v1207_v28  ;;  %8041 = vmatmul.mubr.msk.bf16.vlgmr.msra.gmra.mrb[0].mxu1 %vm10680_vm3, %v7436_v2  ;;  %v1358_v11 = vsel %vm15007_vm1, %v15006_v41, 1065369472  ;;  %v9794_v0 = vld [vmem:[%s14457_s3] sm:$0xff]  ;;  %v1801_v2 = vsub.f32 0.0, %v1769_v13  ;;  %v1817_v25 = vmul.f32 -0.2, %v1769_v13 }
 0x2a8   :  { %8057 = vmatpush3.bf16.msra.mxu1 %v15004_v56  ;;  %1352 = vrot.lane.b32.xlu1 %v15005_v31, %s9803_s0  ;;  %v10705_v7 = vrot.slane %v9794_v0, %v2410_v3  ;;  %v15008_v28 = vld [vmem:[#allocation44_spill] sm:$0xff]  ;;  %v15011_v41 = vmov 0  ;;  %v1361_v35 = vsel %vm15007_vm1, %v15014_v26, 1065369472  ;;  %v15015_v31 = vld [vmem:[#allocation26_spill] sm:$0xff]  ;;  %vm10737_vm1 = vmpackc.low %vm10350_vm4, %vm10411_vm6 }
 0x2a9   :  { %v635_v58 = vmin.f32 %v619_v45, 0.0  ;;  %8058 = vmatprep.subr.bf16.mxu1 %v1358_v11  ;;  %v1770_v60 = vadd.f32 %v10654_v62, %v15008_v28  ;;  %v15012_v41 = vsel %vm10720_vm0, 4294967295, %v15011_v41 }
 0x2aa   :  { %v10707_v44 = vpop.xlane.xlu1 %1226  ;;  %15013 = vst [vmem:[#allocation34_spill] sm:$0xff] %v15012_v41  ;;  %v2412_v21 = vadd.f32 %v10705_v7, %v15015_v31  ;;  %v15023_v31 = vld [vmem:[#allocation28_spill] sm:$0xff] }
 0x2ab   :  { %v8877_v48 = vpop.eup %8876  ;;  %v659_v45 = vmul.f32 1.442695, %v635_v58  ;;  %1240 = vmax.xlane.f32.xlu0 %v1209_v51  ;;  %v1847_v51 = vsel %vm10176_vm7, %v10712_v33, -1e+30  ;;  %v1818_v61 = vmul.f32 -0.2, %v1770_v60 }
 0x2ac   :  { %8059 = vmatpush3.bf16.msra.mxu1 %v1358_v11  ;;  %v7439_v0 = vpack.c.bf16 %v8875_v23, %v8877_v48  ;;  %v8879_v28 = vpop.eup %8878  ;;  %v1802_v11 = vsub.f32 0.0, %v1770_v60  ;;  %v15017_v23 = vmov 0  ;;  %v10741_v48 = vsel %vm1785_vm10, %v1801_v2, %v1817_v25 }
 0x2ad   :  { %8884 = vpow2.f32 %v659_v45  ;;  %8060 = vmatprep.subr.bf16.mxu1 %v1361_v35  ;;  %v15018_v23 = vsel %vm10737_vm1, 4294967295, %v15017_v23  ;;  %15020 = vst [vmem:[#allocation51_spill] sm:$0xff] %v10741_v48  ;;  %v15021_v45 = vld [vmem:[#allocation63_spill] sm:$0xff]  ;;  %vm1786_vm3 = vcmp.gt.f32.partialorder %v1770_v60, 0.0  ;;  %v1849_v2 = vsel %vm10208_vm12, %v10741_v48, -1e+30  ;;  %v10757_v60 = vpop.xlane.xlu0 %1228 }
 0x2ae   :  { %8044 = vmatprep.mubr.msk.bf16.mxu1 %vm10720_vm0, %v7439_v0  ;;  %v600_v58 = vpop.xlane.xlu1 %599  ;;  %15019 = vst [vmem:[#allocation31_spill] sm:$0xff] %v15018_v23  ;;  %vm15022_vm0 = vcmask 130048   ;;  %v2444_v25 = vsub.f32 0.0, %v2412_v21 }
 0x2af   :  { %v8881_v36 = vpop.eup %8880  ;;  %1863 = vmax.xlane.f32.xlu0 %v1847_v51  ;;  %v1364_v26 = vsel %vm15022_vm0, %v15021_v45, 1065369472  ;;  %v2413_v51 = vadd.f32 %v10705_v7, %v15023_v31  ;;  %v621_v34 = vsub.f32 %v10501_v20, %v600_v58  ;;  %vm2428_vm0 = vcmp.gt.f32.partialorder %v2412_v21, 0.0 }
 0x2b0   :  { %8061 = vmatpush3.bf16.msra.mxu1 %v1361_v35  ;;  %v7442_v0 = vpack.c.bf16 %v8879_v28, %v8881_v36  ;;  %v2460_v35 = vmul.f32 -0.2, %v2412_v21  ;;  %v10755_v36 = vsel %vm1786_vm3, %v1802_v11, %v1818_v61  ;;  %v8883_v28 = vpop.eup %8882  ;;  %v2414_v20 = vadd.f32 %v10705_v7, %v15025_v49  ;;  %vm10770_vm3 = vmpackc.low %vm10428_vm14, %vm10464_vm13 }
 0x2b1   :  { %8062 = vmatprep.subr.bf16.mxu1 %v1364_v26  ;;  %15024 = vst [vmem:[#allocation44_spill] sm:$0xff] %v10755_v36  ;;  %v2445_v45 = vsub.f32 0.0, %v2413_v51  ;;  %v1850_v48 = vsel %vm10240_vm2, %v10755_v36, -1e+30  ;;  %v637_v58 = vmin.f32 %v621_v34, 0.0  ;;  %v15026_v61 = vmov 0 }
 0x2b2   :  { %8045 = vmatmul.mubr.msk.bf16.gmra.mrb[4].mxu1 %vm10737_vm1, %v7442_v0  ;;  %v10749_v38 = vpop.xlane.xlu1 %603  ;;  %v2461_v0 = vmul.f32 -0.2, %v2413_v51  ;;  %v15027_v61 = vsel %vm10770_vm3, 4294967295, %v15026_v61  ;;  %v10774_v21 = vsel %vm2428_vm0, %v2444_v25, %v2460_v35  ;;  %vm2429_vm10 = vcmp.gt.f32.partialorder %v2413_v51, 0.0  ;;  %v15029_v25 = vld [vmem:[#allocation46_spill] sm:$0xff] }
 0x2b3   :  { %1867 = vmax.xlane.f32.xlu0 %v1849_v2  ;;  %15028 = vst [vmem:[#allocation52_spill] sm:$0xff] %v15027_v61  ;;  %v2492_v34 = vsel %vm10176_vm7, %v10774_v21, -1e+30  ;;  %v2446_v36 = vsub.f32 0.0, %v2414_v20  ;;  %v2462_v19 = vmul.f32 -0.2, %v2414_v20  ;;  %v2415_v51 = vadd.f32 %v10705_v7, %v15029_v25 }
 0x2b4   :  { %8063 = vmatpush3.bf16.msra.mxu1 %v1364_v26  ;;  %vm2430_vm0 = vcmp.gt.f32.partialorder %v2414_v20, 0.0 }
 0x2b5   :  { %v2463_v63 = vmul.f32 -0.2, %v2415_v51 }
 0x2b6   :  { %v10759_v31 = vpop.xlane.xlu1 %1230 }
 0x2b7   :  { %v8885_v55 = vpop.eup %8884  ;;  %1869 = vmax.xlane.f32.xlu0 %v1850_v48  ;;  %v10784_v48 = vsel %vm2429_vm10, %v2445_v45, %v2461_v0  ;;  %v10793_v45 = vsel %vm2430_vm0, %v2446_v36, %v2462_v19  ;;  %v15032_v0 = vld [vmem:[#allocation33_spill] sm:$0xff]  ;;  %vm2431_vm10 = vcmp.gt.f32.partialorder %v2415_v51, 0.0  ;;  %vm15037_vm0 = vnez %v14971_v1 }
 0x2b8   :  { %v7445_v11 = vpack.c.bf16 %v8883_v28, %v8885_v55  ;;  %v663_v55 = vmul.f32 1.442695, %v637_v58  ;;  %15031 = vst [vmem:[#allocation63_spill] sm:$0xff] %v10793_v45  ;;  %v1768_v25 = vadd.f32 %v10654_v62, %v15032_v0  ;;  %v2494_v20 = vsel %vm10208_vm12, %v10793_v45, -1e+30 }
 0x2b9   :  { %v602_v26 = vpop.xlane.xlu0 %601 }
 0x2ba   :  { %v622_v2 = vsub.f32 %v10534_v4, %v602_v26  ;;  %8048 = vmatprep.mubr.msk.bf16.mxu1 %vm10770_vm3, %v7445_v11  ;;  %v10779_v49 = vpop.xlane.xlu1 %607  ;;  %v2493_v11 = vsel %vm10191_vm9, %v10784_v48, -1e+30  ;;  %v2447_v26 = vsub.f32 0.0, %v2415_v51  ;;  %8886 = vpow2.f32 %v663_v55 }
 0x2bb   :  { %2508 = vmax.xlane.f32.xlu0 %v2492_v34  ;;  %v1800_v34 = vsub.f32 0.0, %v1768_v25  ;;  %vm1784_vm7 = vcmp.gt.f32.partialorder %v1768_v25, 0.0 }
 0x2bc   :  { %v638_v35 = vmin.f32 %v622_v2, 0.0  ;;  %v10802_v2 = vsel %vm2431_vm10, %v2447_v26, %v2463_v63  ;;  %vm15038_vm10 = vnez %v14982_v9  ;;  %v15039_v63 = vmov 0 }
 0x2bd   :  { %15034 = vst [vmem:[#allocation36_spill] sm:$0xff] %v10802_v2  ;;  %v2495_v19 = vsel %vm10240_vm2, %v10802_v2, -1e+30  ;;  %vm10817_vm12 = vmpackc.low %vm15038_vm10, %vm15037_vm0  ;;  %vm15063_vm10 = vnez %v14978_v6 }
 0x2be   :  { %v665_v4 = vmul.f32 1.442695, %v638_v35  ;;  %v10788_v28 = vpop.permute.xlu1 %3018  ;;  %v1816_v35 = vmul.f32 -0.2, %v1768_v25  ;;  %v15040_v63 = vsel %vm10817_vm12, 4294967295, %v15039_v63  ;;  %v623_v25 = vsub.f32 %v10513_v29, %v10749_v38  ;;  %v15046_v38 = vld [vmem:[#allocation3_spill] sm:$0xff] }
 0x2bf   :  { %15030 = vst [vmem:[#allocation26_spill] sm:$0xff] %v10788_v28  ;;  %2510 = vmax.xlane.f32.xlu0 %v2493_v11  ;;  %15041 = vst [vmem:[#allocation106_spill] sm:$0xff] %v15040_v63 }
 0x2c0   :  { %8888 = vpow2.f32 %v665_v4  ;;  %v10809_v36 = vsel %vm1784_vm7, %v1800_v34, %v1816_v35  ;;  %v639_v34 = vmin.f32 %v623_v25, 0.0  ;;  %vm15043_vm7 = vcmask 130048  }
 0x2c1   :  { %v1848_v26 = vsel %vm10191_vm9, %v10809_v36, -1e+30  ;;  %vm15057_vm9 = vcmask 130048  }
 0x2c2   :  { %v10797_v58 = vpop.permute.xlu1 %3022 }
 0x2c3   :  { %15033 = vst [vmem:[#allocation28_spill] sm:$0xff] %v10797_v58  ;;  %2512 = vmax.xlane.f32.xlu0 %v2494_v20 }
 0x2c4   :  { %v8887_v51 = vpop.eup %8886 }
 0x2c6   :  { %v10804_v55 = vpop.permute.xlu1 %3026 }
 0x2c7   :  { %15035 = vst [vmem:[#allocation46_spill] sm:$0xff] %v10804_v55  ;;  %2514 = vmax.xlane.f32.xlu0 %v2495_v19  ;;  %v667_v55 = vmul.f32 1.442695, %v639_v34 }
 0x2c9   :  { %8890 = vpow2.f32 %v667_v55 }
 0x2ca   :  { %v8889_v4 = vpop.eup %8888  ;;  %v10811_v11 = vpop.permute.xlu1 %3030 }
 0x2cb   :  { %15036 = vst [vmem:[#allocation33_spill] sm:$0xff] %v10811_v11  ;;  %v7448_v0 = vpack.c.bf16 %v8889_v4, %v8887_v51 }
 0x2cc   :  { %1865 = vmax.xlane.f32.xlu1 %v1848_v26 }
 0x2cd   :  { %8049 = vmatmul.mubr.msk.bf16.gmra.mrb[8].mxu1 %vm10817_vm12, %v7448_v0  ;;  %v15047_v0 = vld [vmem:[#allocation6_spill] sm:$0xff] }
 0x2ce   :  { %v10828_v20 = vpop.permute.xlu1 %3042 }
 0x2cf   :  { %15042 = vst [vmem:[#allocation107_spill] sm:$0xff] %v10828_v20 }
 0x2d2   :  { %v1347_v35 = vpop.permute.xlu1 %1346  ;;  %v606_v19 = vpop.xlane.xlu0 %605 }
 0x2d3   :  { %v1367_v58 = vsel %vm15043_vm7, %v1347_v35, 1065369472  ;;  %v624_v11 = vsub.f32 %v10561_v30, %v606_v19  ;;  %vm15051_vm7 = vnez %v14975_v32  ;;  %v15052_v35 = vmov 0 }
 0x2d4   :  { %8064 = vmatprep.subr.bf16.mxu1 %v1367_v58  ;;  %vm10852_vm2 = vmpackc.low %vm10563_vm15, %vm15051_vm7  ;;  %v625_v19 = vsub.f32 %v10526_v46, %v10779_v49 }
 0x2d5   :  { %8065 = vmatpush3.bf16.msra.mxu1 %v1367_v58  ;;  %v640_v51 = vmin.f32 %v624_v11, 0.0  ;;  %v8891_v58 = vpop.eup %8890  ;;  %v15050_v11 = vld [vmem:[#allocation73_spill] sm:$0xff]  ;;  %v15053_v35 = vsel %vm10852_vm2, 4294967295, %v15052_v35 }
 0x2d6   :  { %v10832_v4 = vpop.permute.xlu1 %3046  ;;  %v1242_v34 = vsub.f32 %v15050_v11, %v10630_v57  ;;  %15054 = vst [vmem:[#allocation73_spill] sm:$0xff] %v15053_v35  ;;  %v10864_v11 = vpop.xlane.xlu0 %1232 }
 0x2d7   :  { %15044 = vst [vmem:[#allocation108_spill] sm:$0xff] %v10832_v4  ;;  %v669_v26 = vmul.f32 1.442695, %v640_v51 }
 0x2d9   :  { %8892 = vpow2.f32 %v669_v26 }
 0x2da   :  { %v10834_v29 = vpop.permute.xlu1 %3683 }
 0x2db   :  { %15045 = vst [vmem:[#allocation109_spill] sm:$0xff] %v10834_v29  ;;  %v641_v29 = vmin.f32 %v625_v19, 0.0 }
 0x2dd   :  { %1983 = vrot.lane.b32.xlu1 %v15046_v38, %s9804_s10  ;;  %1985 = vrot.lane.b32.xlu0 %v15047_v0, %s9804_s10 }
 0x2de   :  { %v10840_v25 = vpop.permute.xlu1 %3687 }
 0x2df   :  { %15048 = vst [vmem:[#allocation3_spill] sm:$0xff] %v10840_v25  ;;  %v1258_v25 = vmin.f32 %v1242_v34, 0.0 }
 0x2e1   :  { %2628 = vrot.lane.b32.xlu1 %v15046_v38, %s9805_s11  ;;  %v1274_v49 = vmul.f32 1.442695, %v1258_v25 }
 0x2e2   :  { %v10844_v30 = vpop.permute.xlu1 %3691 }
 0x2e3   :  { %15049 = vst [vmem:[#allocation110_spill] sm:$0xff] %v10844_v30  ;;  %v8893_v55 = vpop.eup %8892  ;;  %v15056_v30 = vld [vmem:[#allocation41_spill] sm:$0xff]  ;;  %8894 = vpow2.f32 %v1274_v49 }
 0x2e4   :  { %v7451_v51 = vpack.c.bf16 %v8893_v55, %v8891_v58  ;;  %v1243_v57 = vsub.f32 %v15056_v30, %v10608_v54  ;;  %v671_v55 = vmul.f32 1.442695, %v641_v29  ;;  %v15058_v30 = vld [vmem:[#allocation47_spill] sm:$0xff] }
 0x2e5   :  { %2630 = vrot.lane.b32.xlu1 %v15047_v0, %s9805_s11  ;;  %v1772_v2 = vadd.f32 %v10654_v62, %v15058_v30  ;;  %v15062_v30 = vld [vmem:[#allocation69_spill] sm:$0xff] }
 0x2e6   :  { %v10860_v26 = vpop.permute.xlu1 %3695  ;;  %8052 = vmatprep.mubr.msk.bf16.mxu1 %vm10852_vm2, %v7451_v51  ;;  %v1259_v4 = vmin.f32 %v1243_v57, 0.0  ;;  %8896 = vpow2.f32 %v671_v55  ;;  %v15059_v57 = vld [vmem:[#allocation56_spill] sm:$0xff] }
 0x2e7   :  { %15055 = vst [vmem:[#allocation111_spill] sm:$0xff] %v10860_v26  ;;  %v1804_v34 = vsub.f32 0.0, %v1772_v2  ;;  %v1820_v19 = vmul.f32 -0.2, %v1772_v2 }
 0x2e8   :  { %v1276_v54 = vmul.f32 1.442695, %v1259_v4 }
 0x2ea   :  { %v1349_v20 = vpop.permute.xlu1 %1348 }
 0x2eb   :  { %v610_v45 = vpop.xlane.xlu0 %609  ;;  %v1370_v46 = vsel %vm15057_vm9, %v1349_v20, 1065369472  ;;  %v2416_v20 = vadd.f32 %v10705_v7, %v15059_v57  ;;  %vm1788_vm9 = vcmp.gt.f32.partialorder %v1772_v2, 0.0  ;;  %v2419_v2 = vadd.f32 %v10705_v7, %v15062_v30  ;;  %v15068_v57 = vld [vmem:[#allocation53_spill] sm:$0xff] }
 0x2ec   :  { %v626_v58 = vsub.f32 %v10590_v12, %v610_v45  ;;  %8066 = vmatprep.subr.bf16.mxu1 %v1370_v46  ;;  %v15060_v12 = vld [vmem:[#allocation50_spill] sm:$0xff]  ;;  %v10876_v4 = vsel %vm1788_vm9, %v1804_v34, %v1820_v19  ;;  %vm10887_vm9 = vmpackc.low %vm10592_vm8, %vm15063_vm10 }
 0x2ed   :  { %8067 = vmatpush3.bf16.msra.mxu1 %v1370_v46  ;;  %v2417_v45 = vadd.f32 %v10705_v7, %v15060_v12  ;;  %v2448_v29 = vsub.f32 0.0, %v2416_v20  ;;  %v2464_v25 = vmul.f32 -0.2, %v2416_v20  ;;  %15061 = vst [vmem:[#allocation41_spill] sm:$0xff] %v10876_v4  ;;  %vm2432_vm15 = vcmp.gt.f32.partialorder %v2416_v20, 0.0  ;;  %v8895_v46 = vpop.eup %8894 }
 0x2ee   :  { %v642_v26 = vmin.f32 %v626_v58, 0.0  ;;  %v1771_v20 = vadd.f32 %v10654_v62, %v15068_v57  ;;  %v2451_v30 = vsub.f32 0.0, %v2419_v2  ;;  %v2467_v28 = vmul.f32 -0.2, %v2419_v2 }
 0x2ef   :  { %v2449_v55 = vsub.f32 0.0, %v2417_v45  ;;  %v10891_v34 = vsel %vm2432_vm15, %v2448_v29, %v2464_v25  ;;  %vm2433_vm13 = vcmp.gt.f32.partialorder %v2417_v45, 0.0  ;;  %vm15069_vm15 = vnez %v14998_v24 }
 0x2f0   :  { %v673_v51 = vmul.f32 1.442695, %v642_v26  ;;  %v8897_v49 = vpop.eup %8896  ;;  %v1852_v26 = vsel %vm10294_vm11, %v10876_v4, -1e+30  ;;  %15067 = vst [vmem:[#allocation56_spill] sm:$0xff] %v10891_v34  ;;  %v1803_v25 = vsub.f32 0.0, %v1771_v20 }
 0x2f1   :  { %v1819_v57 = vmul.f32 -0.2, %v1771_v20  ;;  %vm2435_vm8 = vcmp.gt.f32.partialorder %v2419_v2, 0.0  ;;  %vm1787_vm10 = vcmp.gt.f32.partialorder %v1771_v20, 0.0 }
 0x2f2   :  { %8898 = vpow2.f32 %v673_v51  ;;  %v15064_v51 = vmov 0 }
 0x2f3   :  { %8900 = vpow2.f32 %v1276_v54  ;;  %v2465_v54 = vmul.f32 -0.2, %v2417_v45  ;;  %v15065_v51 = vsel %vm10887_vm9, 4294967295, %v15064_v51 }
 0x2f4   :  { %15066 = vst [vmem:[#allocation47_spill] sm:$0xff] %v15065_v51 }
 0x2f5   :  { %v10902_v29 = vsel %vm2433_vm13, %v2449_v55, %v2465_v54  ;;  %v10913_v54 = vsel %vm1787_vm10, %v1803_v25, %v1819_v57  ;;  %vm15087_vm10 = vcmask 130048  }
 0x2f6   :  { %15073 = vst [vmem:[#allocation69_spill] sm:$0xff] %v10913_v54  ;;  %v1851_v20 = vsel %vm10268_vm5, %v10913_v54, -1e+30  ;;  %v15080_v54 = vld [vmem:[#allocation83_spill] sm:$0xff] }
 0x2fc   :  { %v8899_v58 = vpop.eup %8898  ;;  %1873 = vmax.xlane.f32.xlu0 %v1852_v26  ;;  %v2496_v26 = vsel %vm10268_vm5, %v10891_v34, -1e+30 }
 0x2fd   :  { %v8901_v19 = vpop.eup %8900  ;;  %v7454_v12 = vpack.c.bf16 %v8899_v58, %v8897_v49  ;;  %v15070_v49 = vld [vmem:[#allocation64_spill] sm:$0xff]  ;;  %v10909_v58 = vsel %vm2435_vm8, %v2451_v30, %v2467_v28 }
 0x2fe   :  { %v7473_v4 = vpack.c.bf16 %v8901_v19, %v8895_v46  ;;  %v1773_v45 = vadd.f32 %v10654_v62, %v15070_v49  ;;  %v2497_v46 = vsel %vm10294_vm11, %v10902_v29, -1e+30  ;;  %15071 = vst [vmem:[#allocation50_spill] sm:$0xff] %v10909_v58  ;;  %v15072_v19 = vld [vmem:[#allocation57_spill] sm:$0xff]  ;;  %v2499_v2 = vsel %vm10350_vm4, %v10909_v58, -1e+30 }
 0x2ff   :  { %8053 = vmatmul.mubr.msk.bf16.gmra.mrb[12].mxu1 %vm10887_vm9, %v7454_v12  ;;  %v1774_v12 = vadd.f32 %v10654_v62, %v15072_v19  ;;  %v1248_v58 = vsub.f32 %v15080_v54, %v10662_v59 }
 0x300   :  { %2516 = vmax.xlane.f32.xlu0 %v2496_v26  ;;  %8072 = vmatprep.mubr.msk.bf16.mxu1 %vm15069_vm15, %v7473_v4  ;;  %v1805_v4 = vsub.f32 0.0, %v1773_v45  ;;  %v1821_v55 = vmul.f32 -0.2, %v1773_v45  ;;  %vm1789_vm13 = vcmp.gt.f32.partialorder %v1773_v45, 0.0  ;;  %v10931_v45 = vpop.permute.xlu0 %3002 }
 0x301   :  { %v1806_v26 = vsub.f32 0.0, %v1774_v12  ;;  %v1822_v28 = vmul.f32 -0.2, %v1774_v12  ;;  %vm1790_vm8 = vcmp.gt.f32.partialorder %v1774_v12, 0.0  ;;  %v1264_v59 = vmin.f32 %v1248_v58, 0.0 }
 0x302   :  { %v10921_v30 = vsel %vm1789_vm13, %v1805_v4, %v1821_v55  ;;  %v15077_v4 = vld [vmem:[#allocation61_spill] sm:$0xff]  ;;  %v1252_v58 = vsub.f32 %v10520_v15, %v10759_v31  ;;  %vm15088_vm13 = vmmov %vm15087_vm10 }
 0x303   :  { %15074 = vst [vmem:[#allocation53_spill] sm:$0xff] %v10921_v30  ;;  %v1853_v25 = vsel %vm10411_vm6, %v10921_v30, -1e+30  ;;  %v10926_v57 = vsel %vm1790_vm8, %v1806_v26, %v1822_v28  ;;  %v1247_v12 = vsub.f32 %v15077_v4, %v10635_v5  ;;  %v15078_v55 = vld [vmem:[#allocation45_spill] sm:$0xff]  ;;  %vm15090_vm8 = vnez %v15001_v53 }
 0x304   :  { %2518 = vmax.xlane.f32.xlu0 %v2497_v46  ;;  %15075 = vst [vmem:[#allocation64_spill] sm:$0xff] %v10926_v57  ;;  %v1854_v49 = vsel %vm10350_vm4, %v10926_v57, -1e+30  ;;  %v15076_v46 = vld [vmem:[#allocation77_spill] sm:$0xff]  ;;  %v10941_v30 = vpop.permute.xlu0 %3006 }
 0x305   :  { %v1245_v19 = vsub.f32 %v15076_v46, %v10644_v47  ;;  %v15081_v46 = vld [vmem:[#allocation86_spill] sm:$0xff] }
 0x306   :  { %v1250_v5 = vsub.f32 %v15081_v46, %v10707_v44 }
 0x307   :  { %v1261_v28 = vmin.f32 %v1245_v19, 0.0  ;;  %v15083_v19 = vld [vmem:[#allocation81_spill] sm:$0xff] }
 0x308   :  { %2522 = vmax.xlane.f32.xlu0 %v2499_v2  ;;  %v1244_v2 = vsub.f32 %v15078_v55, %v10612_v8  ;;  %v15082_v8 = vld [vmem:[#allocation72_spill] sm:$0xff]  ;;  %v1266_v54 = vmin.f32 %v1250_v5, 0.0 }
 0x309   :  { %1871 = vmax.xlane.f32.xlu1 %v1851_v20  ;;  %v15079_v20 = vld [vmem:[#allocation55_spill] sm:$0xff]  ;;  %v1280_v3 = vmul.f32 1.442695, %v1261_v28  ;;  %v1249_v55 = vsub.f32 %v15082_v8, %v10647_v10  ;;  %v15085_v10 = vld [vmem:[#allocation9_spill] sm:$0xff]  ;;  %v1286_v28 = vmul.f32 1.442695, %v1264_v59 }
 0x30a   :  { %v1246_v26 = vsub.f32 %v15079_v20, %v10619_v22  ;;  %v1260_v57 = vmin.f32 %v1244_v2, 0.0  ;;  %v10951_v20 = vpop.permute.xlu0 %3014  ;;  %v15084_v2 = vld [vmem:[#allocation12_spill] sm:$0xff] }
 0x30b   :  { %8902 = vpow2.f32 %v1280_v3  ;;  %v1265_v44 = vmin.f32 %v1249_v55, 0.0 }
 0x30c   :  { %v1278_v34 = vmul.f32 1.442695, %v1260_v57 }
 0x30d   :  { %1875 = vmax.xlane.f32.xlu1 %v1853_v25  ;;  %v1263_v25 = vmin.f32 %v1247_v12, 0.0  ;;  %v1251_v12 = vsub.f32 %v15083_v19, %v10757_v60  ;;  %v1253_v60 = vsub.f32 %v10571_v37, %v10864_v11  ;;  %v1288_v3 = vmul.f32 1.442695, %v1265_v44 }
 0x30e   :  { %v1268_v37 = vmin.f32 %v1252_v58, 0.0 }
 0x30f   :  { %v1284_v47 = vmul.f32 1.442695, %v1263_v25  ;;  %v1267_v57 = vmin.f32 %v1251_v12, 0.0  ;;  %v1290_v25 = vmul.f32 1.442695, %v1266_v54  ;;  %v1269_v5 = vmin.f32 %v1253_v60, 0.0 }
 0x310   :  { %v1294_v54 = vmul.f32 1.442695, %v1268_v37  ;;  %v15094_v37 = vld [vmem:[#allocation85_spill] sm:$0xff] }
 0x311   :  { %1877 = vmax.xlane.f32.xlu1 %v1854_v49  ;;  %v1262_v49 = vmin.f32 %v1246_v26, 0.0  ;;  %8904 = vpow2.f32 %v1284_v47  ;;  %v1292_v47 = vmul.f32 1.442695, %v1267_v57  ;;  %v1296_v31 = vmul.f32 1.442695, %v1269_v5 }
 0x312   :  { %8906 = vpow2.f32 %v1278_v34 }
 0x313   :  { %v1282_v22 = vmul.f32 1.442695, %v1262_v49  ;;  %v10959_v49 = vpop.permute.xlu0 %3034 }
 0x314   :  { %15086 = vst [vmem:[#allocation57_spill] sm:$0xff] %v10959_v49 }
 0x315   :  { %8908 = vpow2.f32 %v1282_v22  ;;  %v8903_v55 = vpop.eup %8902 }
 0x316   :  { %8910 = vpow2.f32 %v1286_v28  ;;  %v15092_v28 = vld [vmem:[#allocation80_spill] sm:$0xff] }
 0x317   :  { %8912 = vpow2.f32 %v1290_v25  ;;  %v10965_v19 = vpop.permute.xlu0 %3038  ;;  %v1776_v60 = vadd.f32 %v10654_v62, %v15092_v28 }
 0x318   :  { %8914 = vpow2.f32 %v1288_v3  ;;  %15089 = vst [vmem:[#allocation77_spill] sm:$0xff] %v10965_v19 }
 0x319   :  { %8916 = vpow2.f32 %v1292_v47  ;;  %v1824_v5 = vmul.f32 -0.2, %v1776_v60 }
 0x31a   :  { %8918 = vpow2.f32 %v1296_v31 }
 0x31b   :  { %v8905_v22 = vpop.eup %8904  ;;  %v10974_v25 = vpop.permute.xlu0 %3050  ;;  %8920 = vpow2.f32 %v1294_v54 }
 0x31c   :  { %v1235_v4 = vpop.xlane.xlu1 %1234  ;;  %v8907_v15 = vpop.eup %8906  ;;  %15093 = vst [vmem:[#allocation61_spill] sm:$0xff] %v10974_v25 }
 0x31d   :  { %v7476_v59 = vpack.c.bf16 %v8903_v55, %v8907_v15  ;;  %v1254_v57 = vsub.f32 %v10626_v52, %v1235_v4  ;;  %v1808_v4 = vsub.f32 0.0, %v1776_v60 }
 0x31e   :  { %2634 = vrot.lane.b32.xlu0 %v15084_v2, %s9805_s11 }
 0x31f   :  { %v8909_v12 = vpop.eup %8908  ;;  %v1270_v58 = vmin.f32 %v1254_v57, 0.0 }
 0x320   :  { %v1239_v26 = vpop.xlane.xlu1 %1238  ;;  %v7479_v44 = vpack.c.bf16 %v8905_v22, %v8909_v12 }
 0x321   :  { %v1298_v31 = vmul.f32 1.442695, %v1270_v58 }
 0x322   :  { %1987 = vrot.lane.b32.xlu1 %v15085_v10, %s9804_s10 }
 0x323   :  { %8922 = vpow2.f32 %v1298_v31 }
 0x324   :  { %v1351_v46 = vpop.permute.xlu1 %1350 }
 0x325   :  { %v1373_v34 = vsel %vm15087_vm10, %v1351_v46, 1065369472  ;;  %vm15091_vm10 = vnez %v15012_v41  ;;  %v8911_v46 = vpop.eup %8910 }
 0x326   :  { %8068 = vmatprep.subr.bf16.mxu1 %v1373_v34  ;;  %v8913_v3 = vpop.eup %8912 }
 0x327   :  { %8069 = vmatpush3.bf16.msra.mxu1 %v1373_v34  ;;  %v1256_v34 = vsub.f32 %v10637_v17, %v1239_v26  ;;  %v8915_v47 = vpop.eup %8914 }
 0x328   :  { %v1353_v8 = vpop.permute.xlu1 %1352  ;;  %v8917_v52 = vpop.eup %8916  ;;  %v7482_v55 = vpack.c.bf16 %v8915_v47, %v8911_v46  ;;  %v15096_v46 = vld [vmem:[#allocation66_spill] sm:$0xff] }
 0x329   :  { %v1376_v11 = vsel %vm15088_vm13, %v1353_v8, 1065369472  ;;  %v7485_v15 = vpack.c.bf16 %v8917_v52, %v8913_v3  ;;  %vm1792_vm13 = vcmp.gt.f32.partialorder %v1776_v60, 0.0  ;;  %v1272_v12 = vmin.f32 %v1256_v34, 0.0  ;;  %v8919_v54 = vpop.eup %8918 }
 0x32a   :  { %8070 = vmatprep.subr.bf16.mxu1 %v1376_v11  ;;  %v10984_v26 = vsel %vm1792_vm13, %v1808_v4, %v1824_v5  ;;  %v2418_v60 = vadd.f32 %v10705_v7, %v15096_v46  ;;  %v8921_v58 = vpop.eup %8920 }
 0x32b   :  { %8071 = vmatpush3.bf16.msra.mxu1 %v1376_v11  ;;  %v1777_v11 = vadd.f32 %v10654_v62, %v15094_v37  ;;  %15095 = vst [vmem:[#allocation45_spill] sm:$0xff] %v10984_v26  ;;  %v1302_v3 = vmul.f32 1.442695, %v1272_v12  ;;  %v1856_v52 = vsel %vm10428_vm14, %v10984_v26, -1e+30  ;;  %v7488_v4 = vpack.c.bf16 %v8919_v54, %v8921_v58 }
 0x32c   :  { %vm2434_vm13 = vcmp.gt.f32.partialorder %v2418_v60, 0.0 }
 0x32d   :  { %v1825_v57 = vmul.f32 -0.2, %v1777_v11  ;;  %vm1793_vm11 = vcmp.gt.f32.partialorder %v1777_v11, 0.0 }
 0x32e   :  { %8073 = vmatmul.mubr.msk.bf16.vlgmr.msra.gmra.mrb[16].mxu1 %vm15090_vm8, %v7476_v59 }
 0x32f   :  { %8076 = vmatprep.mubr.msk.bf16.mxu1 %vm15091_vm10, %v7479_v44  ;;  %v1809_v44 = vsub.f32 0.0, %v1777_v11 }
 0x334   :  { %v1237_v8 = vpop.xlane.xlu0 %1236 }
 0x335   :  { %v1255_v22 = vsub.f32 %v10672_v39, %v1237_v8  ;;  %v10992_v8 = vsel %vm1793_vm11, %v1809_v44, %v1825_v57  ;;  %vm15101_vm11 = vcmask 130048  }
 0x336   :  { %8077 = vmatmul.mubr.msk.bf16.gmra.mrb[20].mxu1 %vm10737_vm1, %v7482_v55  ;;  %15097 = vst [vmem:[#allocation55_spill] sm:$0xff] %v10992_v8  ;;  %v2466_v55 = vmul.f32 -0.2, %v2418_v60  ;;  %v1857_v11 = vsel %vm15037_vm0, %v10992_v8, -1e+30 }
 0x337   :  { %v1271_v59 = vmin.f32 %v1255_v22, 0.0  ;;  %8080 = vmatprep.mubr.msk.bf16.mxu1 %vm10770_vm3, %v7485_v15  ;;  %v8923_v15 = vpop.eup %8922  ;;  %vm15123_vm3 = vnez %v14982_v9 }
 0x338   :  { %v1241_v17 = vpop.xlane.xlu0 %1240 }
 0x339   :  { %v1300_v28 = vmul.f32 1.442695, %v1271_v59  ;;  %v1257_v39 = vsub.f32 %v10695_v43, %v1241_v17  ;;  %v2450_v43 = vsub.f32 0.0, %v2418_v60 }
 0x33b   :  { %8924 = vpow2.f32 %v1300_v28  ;;  %v1273_v34 = vmin.f32 %v1257_v39, 0.0  ;;  %v11001_v22 = vsel %vm2434_vm13, %v2450_v43, %v2466_v55  ;;  %vm15102_vm13 = vmmov %vm15101_vm11 }
 0x33c   :  { %v1864_v47 = vpop.xlane.xlu0 %1863  ;;  %8926 = vpow2.f32 %v1302_v3  ;;  %v2498_v59 = vsel %vm10411_vm6, %v11001_v22, -1e+30 }
 0x33d   :  { %v1304_v5 = vmul.f32 1.442695, %v1273_v34  ;;  %1881 = vmax.xlane.f32.xlu0 %v1856_v52 }
 0x33e   :  { %8081 = vmatmul.mubr.msk.bf16.gmra.mrb[24].mxu1 %vm10817_vm12, %v7488_v4  ;;  %vm15122_vm12 = vnez %v14978_v6 }
 0x33f   :  { %8928 = vpow2.f32 %v1304_v5  ;;  %v1895_v5 = vsub.f32 %v10712_v33, %v1864_v47 }
 0x340   :  { %v10996_v37 = vpop.xlane.xlu0 %1867 }
 0x341   :  { %15098 = vst [vmem:[#allocation83_spill] sm:$0xff] %v10996_v37  ;;  %1883 = vmax.xlane.f32.xlu0 %v1857_v11  ;;  %v1911_v43 = vmin.f32 %v1895_v5, 0.0 }
 0x344   :  { %v11003_v31 = vpop.xlane.xlu0 %1869 }
 0x345   :  { %v8925_v12 = vpop.eup %8924 }
 0x346   :  { %2520 = vmax.xlane.f32.xlu1 %v2498_v59  ;;  %v7491_v17 = vpack.c.bf16 %v8925_v12, %v8923_v15  ;;  %v8927_v54 = vpop.eup %8926  ;;  %v1927_v15 = vmul.f32 1.442695, %v1911_v43  ;;  %v15100_v12 = vld [vmem:[#allocation18_spill] sm:$0xff]  ;;  %v15105_v43 = vld [vmem:[#allocation65_spill] sm:$0xff] }
 0x348   :  { %v2509_v44 = vpop.xlane.xlu0 %2508  ;;  %8084 = vmatprep.mubr.msk.bf16.mxu1 %vm10852_vm2, %v7491_v17 }
 0x349   :  { %v8929_v57 = vpop.eup %8928  ;;  %v2540_v28 = vsub.f32 %v10774_v21, %v2509_v44  ;;  %v15099_v21 = vld [vmem:[#allocation15_spill] sm:$0xff] }
 0x34a   :  { %v7494_v39 = vpack.c.bf16 %v8929_v57, %v8927_v54 }
 0x34b   :  { %v2556_v46 = vmin.f32 %v2540_v28, 0.0 }
 0x34c   :  { %v2511_v60 = vpop.xlane.xlu0 %2510  ;;  %8085 = vmatmul.mubr.msk.bf16.gmra.mrb[28].mxu1 %vm10887_vm9, %v7494_v39  ;;  %vm15103_vm9 = vmmov %vm15101_vm11 }
 0x34d   :  { %v2541_v3 = vsub.f32 %v10784_v48, %v2511_v60  ;;  %v2572_v58 = vmul.f32 1.442695, %v2556_v46 }
 0x34f   :  { %v2557_v34 = vmin.f32 %v2541_v3, 0.0  ;;  %8930 = vpow2.f32 %v2572_v58  ;;  %v14587_v3 = vmov 7  }
 0x350   :  { %v11014_v4 = vpop.xlane.xlu0 %2512  ;;  %8549 = vset.pattern.permute.xlu1 %v14587_v3 }
 0x351   :  { %v2574_v52 = vmul.f32 1.442695, %v2557_v34 }
 0x353   :  { %8932 = vpow2.f32 %v2574_v52 }
 0x354   :  { %v11017_v55 = vpop.xlane.xlu0 %2514  ;;  %8934 = vpow2.f32 %v1927_v15 }
 0x357   :  { %2632 = vrot.lane.b32.xlu1 %v15085_v10, %s9805_s11  ;;  %1991 = vrot.lane.b32.xlu0 %v15099_v21, %s9804_s10 }
 0x358   :  { %v1986_v17 = vpop.permute.xlu0 %1985 }
 0x359   :  { %v1866_v11 = vpop.xlane.xlu1 %1865  ;;  %v8931_v33 = vpop.eup %8930 }
 0x35a   :  { %v1896_v48 = vsub.f32 %v10809_v36, %v1866_v11  ;;  %v2003_v36 = vsel %vm15102_vm13, %v1986_v17, 1065369472  ;;  %v1775_v11 = vadd.f32 %v10654_v62, %v15105_v43 }
 0x35b   :  { %1989 = vrot.lane.b32.xlu1 %v15084_v2, %s9804_s10  ;;  %1993 = vrot.lane.b32.xlu0 %v15100_v12, %s9804_s10 }
 0x35c   :  { %v1912_v47 = vmin.f32 %v1896_v48, 0.0  ;;  %v15106_v48 = vld [vmem:[#allocation82_spill] sm:$0xff] }
 0x35d   :  { %v8933_v59 = vpop.eup %8932  ;;  %v1984_v54 = vpop.permute.xlu1 %1983  ;;  %v1779_v15 = vadd.f32 %v10654_v62, %v15106_v48 }
 0x35e   :  { %v1929_v44 = vmul.f32 1.442695, %v1912_v47  ;;  %v2000_v57 = vsel %vm15101_vm11, %v1984_v54, 1065369472  ;;  %v7553_v28 = vpack.c.bf16 %v8933_v59, %v8931_v33  ;;  %vm15104_vm11 = vmmov %vm15103_vm9  ;;  %v8935_v34 = vpop.eup %8934  ;;  %v1807_v33 = vsub.f32 0.0, %v1775_v11  ;;  %v15107_v54 = vld [vmem:[#allocation99_spill] sm:$0xff] }
 0x35f   :  { %2638 = vrot.lane.b32.xlu0 %v15100_v12, %s9805_s11  ;;  %8088 = vmatprep.subr.bf16.mxu0 %v2000_v57  ;;  %v1823_v47 = vmul.f32 -0.2, %v1775_v11  ;;  %v1811_v59 = vsub.f32 0.0, %v1779_v15  ;;  %v1827_v17 = vmul.f32 -0.2, %v1779_v15  ;;  %vm1795_vm13 = vcmp.gt.f32.partialorder %v1779_v15, 0.0 }
 0x360   :  { %8936 = vpow2.f32 %v1929_v44  ;;  %8089 = vmatpush3.bf16.msra.mxu0 %v2000_v57  ;;  %8136 = vmatprep.mubr.msk.bf16.mxu1 %vm15069_vm15, %v7553_v28  ;;  %v1781_v44 = vadd.f32 %v10654_v62, %v15107_v54  ;;  %v15108_v57 = vld [vmem:[#allocation76_spill] sm:$0xff] }
 0x361   :  { %8090 = vmatprep.subr.bf16.mxu0 %v2003_v36  ;;  %v2629_v39 = vpop.permute.xlu1 %2628  ;;  %v1778_v28 = vadd.f32 %v10654_v62, %v15108_v57  ;;  %v15119_v57 = vld [vmem:[#allocation68_spill] sm:$0xff] }
 0x362   :  { %v2645_v46 = vsel %vm15103_vm9, %v2629_v39, 1065369472  ;;  %vm1791_vm9 = vcmp.gt.f32.partialorder %v1775_v11, 0.0  ;;  %v15110_v39 = vld [vmem:[#allocation102_spill] sm:$0xff] }
 0x363   :  { %8120 = vmatprep.subr.bf16.mxu1 %v2645_v46  ;;  %v1810_v48 = vsub.f32 0.0, %v1778_v28  ;;  %v1826_v11 = vmul.f32 -0.2, %v1778_v28 }
 0x364   :  { %8091 = vmatpush3.bf16.msra.mxu0 %v2003_v36  ;;  %8121 = vmatpush3.bf16.msra.mxu1 %v2645_v46  ;;  %v11047_v36 = vsel %vm1791_vm9, %v1807_v33, %v1823_v47  ;;  %v1782_v46 = vadd.f32 %v10654_v62, %v15110_v39  ;;  %vm1794_vm9 = vcmp.gt.f32.partialorder %v1778_v28, 0.0  ;;  %v2421_v39 = vadd.f32 %v10705_v7, %v15119_v57 }
 0x365   :  { %v2631_v60 = vpop.permute.xlu1 %2630  ;;  %15109 = vst [vmem:[#allocation86_spill] sm:$0xff] %v11047_v36 }
 0x366   :  { %v2648_v58 = vsel %vm15104_vm11, %v2631_v60, 1065369472  ;;  %v1813_v60 = vsub.f32 0.0, %v1781_v44  ;;  %vm1797_vm11 = vcmp.gt.f32.partialorder %v1781_v44, 0.0  ;;  %v1830_v3 = vmul.f32 -0.2, %v1782_v46 }
 0x367   :  { %8122 = vmatprep.subr.bf16.mxu1 %v2648_v58 }
 0x368   :  { %8123 = vmatpush3.bf16.msra.mxu1 %v2648_v58  ;;  %v1829_v58 = vmul.f32 -0.2, %v1781_v44 }
 0x36a   :  { %v8937_v52 = vpop.eup %8936  ;;  %v11071_v44 = vsel %vm1797_vm11, %v1813_v60, %v1829_v58  ;;  %v2453_v60 = vsub.f32 0.0, %v2421_v39  ;;  %v2469_v58 = vmul.f32 -0.2, %v2421_v39  ;;  %vm2437_vm11 = vcmp.gt.f32.partialorder %v2421_v39, 0.0 }
 0x36b   :  { %v7513_v5 = vpack.c.bf16 %v8937_v52, %v8935_v34  ;;  %v11053_v52 = vsel %vm1795_vm13, %v1811_v59, %v1827_v17  ;;  %v15117_v59 = vld [vmem:[#allocation84_spill] sm:$0xff]  ;;  %15120 = vst [vmem:[#allocation66_spill] sm:$0xff] %v11071_v44 }
 0x36c   :  { %15112 = vst [vmem:[#allocation81_spill] sm:$0xff] %v11053_v52  ;;  %v1859_v47 = vsel %vm15051_vm7, %v11053_v52, -1e+30  ;;  %vm15118_vm13 = vnez %v15117_v59  ;;  %v15165_v52 = vld [vmem:[#allocation5_spill] sm:$0xff] }
 0x36d   :  { %8104 = vmatprep.mubr.msk.bf16.mxu0 %vm15069_vm15, %v7513_v5  ;;  %v15113_v5 = vld [vmem:[#allocation74_spill] sm:$0xff]  ;;  %v1855_v17 = vsel %vm15118_vm13, %v11047_v36, -1e+30  ;;  %vm1798_vm15 = vcmp.gt.f32.partialorder %v1782_v46, 0.0 }
 0x36e   :  { %v2420_v43 = vadd.f32 %v10705_v7, %v15113_v5  ;;  %v1814_v5 = vsub.f32 0.0, %v1782_v46 }
 0x370   :  { %v2468_v28 = vmul.f32 -0.2, %v2420_v43  ;;  %vm2436_vm2 = vcmp.gt.f32.partialorder %v2420_v43, 0.0 }
 0x37a   :  { %v11051_v34 = vpop.f32.mrb[0].mxu1 }
 0x37b   :  { %15111 = vst [vmem:[#allocation72_spill] sm:$0xff] %v11051_v34  ;;  %v11057_v54 = vpop.f32.mrb[1].mxu1  ;;  %v11073_v34 = vsel %vm1794_vm9, %v1810_v48, %v1826_v11  ;;  %vm15127_vm9 = vnez %v14993_v50 }
 0x37c   :  { %15114 = vst [vmem:[#allocation9_spill] sm:$0xff] %v11057_v54  ;;  %v11059_v15 = vpop.f32.mrb[2].mxu1  ;;  %15121 = vst [vmem:[#allocation65_spill] sm:$0xff] %v11073_v34  ;;  %v1861_v54 = vsel %vm15122_vm12, %v11071_v44, -1e+30 }
 0x37d   :  { %15115 = vst [vmem:[#allocation80_spill] sm:$0xff] %v11059_v15  ;;  %v11061_v33 = vpop.f32.mrb[3].mxu1  ;;  %v2452_v15 = vsub.f32 0.0, %v2420_v43  ;;  %v1858_v57 = vsel %vm15123_vm3, %v11073_v34, -1e+30  ;;  %v15196_v34 = vld [vmem:[#allocation30_spill] sm:$0xff] }
 0x37e   :  { %15116 = vst [vmem:[#allocation85_spill] sm:$0xff] %v11061_v33  ;;  %1887 = vmax.xlane.f32.xlu0 %v1859_v47  ;;  %v11081_v33 = vsel %vm1798_vm15, %v1814_v5, %v1830_v3  ;;  %v15125_v47 = vld [vmem:[#allocation87_spill] sm:$0xff] }
 0x37f   :  { %1879 = vmax.xlane.f32.xlu1 %v1855_v17  ;;  %15124 = vst [vmem:[#allocation82_spill] sm:$0xff] %v11081_v33  ;;  %v2422_v17 = vadd.f32 %v10705_v7, %v15125_v47  ;;  %v11085_v48 = vsel %vm2436_vm2, %v2452_v15, %v2468_v28  ;;  %v1862_v43 = vsel %vm15127_vm9, %v11081_v33, -1e+30  ;;  %v15129_v47 = vld [vmem:[#allocation93_spill] sm:$0xff]  ;;  %v11101_v28 = vsel %vm2437_vm11, %v2453_v60, %v2469_v58 }
 0x380   :  { %v2500_v3 = vsel %vm15118_vm13, %v11085_v48, -1e+30  ;;  %v2423_v15 = vadd.f32 %v10705_v7, %v15129_v47  ;;  %vm15139_vm11 = vcmask 130048  }
 0x381   :  { %v2470_v5 = vmul.f32 -0.2, %v2422_v17  ;;  %vm2438_vm2 = vcmp.gt.f32.partialorder %v2422_v17, 0.0 }
 0x382   :  { %1891 = vmax.xlane.f32.xlu0 %v1861_v54  ;;  %v2454_v54 = vsub.f32 0.0, %v2422_v17  ;;  %vm2439_vm15 = vcmp.gt.f32.partialorder %v2423_v15, 0.0 }
 0x383   :  { %1885 = vmax.xlane.f32.xlu1 %v1858_v57 }
 0x384   :  { %v11108_v25 = vsel %vm2438_vm2, %v2454_v54, %v2470_v5  ;;  %v15133_v54 = vld [vmem:[#allocation21_spill] sm:$0xff] }
 0x385   :  { %v11087_v46 = vpop.f32.mrb[4].mxu1 }
 0x386   :  { %15126 = vst [vmem:[#allocation99_spill] sm:$0xff] %v11087_v46  ;;  %1893 = vmax.xlane.f32.xlu0 %v1862_v43  ;;  %v11092_v11 = vpop.f32.mrb[5].mxu1  ;;  %v2501_v43 = vsel %vm10428_vm14, %v11101_v28, -1e+30  ;;  %v2455_v46 = vsub.f32 0.0, %v2423_v15 }
 0x387   :  { %15128 = vst [vmem:[#allocation76_spill] sm:$0xff] %v11092_v11  ;;  %2524 = vmax.xlane.f32.xlu1 %v2500_v3  ;;  %v11099_v39 = vpop.f32.mrb[6].mxu1  ;;  %v2471_v11 = vmul.f32 -0.2, %v2423_v15  ;;  %v2502_v3 = vsel %vm15037_vm0, %v11108_v25, -1e+30 }
 0x388   :  { %15130 = vst [vmem:[#allocation102_spill] sm:$0xff] %v11099_v39  ;;  %v11103_v57 = vpop.f32.mrb[7].mxu1  ;;  %v15140_v39 = vld [vmem:[#allocation103_spill] sm:$0xff] }
 0x389   :  { %15131 = vst [vmem:[#allocation74_spill] sm:$0xff] %v11103_v57  ;;  %v11113_v60 = vsel %vm2439_vm15, %v2455_v46, %v2471_v11  ;;  %v2427_v57 = vadd.f32 %v10705_v7, %v15140_v39  ;;  %v11139_v19 = vpop.xlane.xlu0 %1873  ;;  %v15143_v39 = vld [vmem:[#allocation96_spill] sm:$0xff] }
 0x38a   :  { %v2503_v58 = vsel %vm15123_vm3, %v11113_v60, -1e+30  ;;  %15141 = vst [vmem:[#allocation103_spill] sm:$0xff] %v11139_v19  ;;  %v2424_v9 = vadd.f32 %v10705_v7, %v15143_v39  ;;  %v15147_v39 = vld [vmem:[#allocation100_spill] sm:$0xff]  ;;  %vm15208_vm3 = vnez %v14911_v16 }
 0x38b   :  { %2526 = vmax.xlane.f32.xlu1 %v2501_v43  ;;  %v2475_v12 = vmul.f32 -0.2, %v2427_v57  ;;  %vm2443_vm2 = vcmp.gt.f32.partialorder %v2427_v57, 0.0  ;;  %v2426_v24 = vadd.f32 %v10705_v7, %v15147_v39 }
 0x38c   :  { %v2456_v1 = vsub.f32 0.0, %v2424_v9  ;;  %v2472_v50 = vmul.f32 -0.2, %v2424_v9 }
 0x38f   :  { %2528 = vmax.xlane.f32.xlu1 %v2502_v3 }
 0x393   :  { %2530 = vmax.xlane.f32.xlu1 %v2503_v58 }
 0x396   :  { %v11118_v17 = vpop.xlane.xlu1 %1871 }
 0x39a   :  { %v11120_v47 = vpop.xlane.xlu1 %1875 }
 0x39b   :  { %15132 = vst [vmem:[#allocation68_spill] sm:$0xff] %v11120_v47 }
 0x39c   :  { %1995 = vrot.lane.b32.xlu0 %v15133_v54, %s9804_s10 }
 0x39e   :  { %v11124_v5 = vpop.xlane.xlu1 %1877 }
 0x39f   :  { %15134 = vst [vmem:[#allocation87_spill] sm:$0xff] %v11124_v5 }
 0x3a0   :  { %v11126_v15 = vpop.f32.mrb[8].mxu1 }
 0x3a1   :  { %15135 = vst [vmem:[#allocation93_spill] sm:$0xff] %v11126_v15  ;;  %v11128_v43 = vpop.f32.mrb[9].mxu1  ;;  %v2459_v15 = vsub.f32 0.0, %v2427_v57 }
 0x3a2   :  { %15136 = vst [vmem:[#allocation112_spill] sm:$0xff] %v11128_v43  ;;  %v11130_v46 = vpop.f32.mrb[10].mxu1  ;;  %v1988_v11 = vpop.permute.xlu1 %1987 }
 0x3a3   :  { %15137 = vst [vmem:[#allocation113_spill] sm:$0xff] %v11130_v46  ;;  %v11132_v3 = vpop.f32.mrb[11].mxu1  ;;  %v2006_v58 = vsel %vm15139_vm11, %v1988_v11, 1065369472  ;;  %v11141_v43 = vpop.xlane.xlu0 %2516  ;;  %v11143_v46 = vsel %vm2443_vm2, %v2459_v15, %v2475_v12  ;;  %v15142_v11 = vld [vmem:[#allocation97_spill] sm:$0xff]  ;;  %v15144_v12 = vld [vmem:[#allocation88_spill] sm:$0xff]  ;;  %vm15146_vm2 = vnez %v14988_v27 }
 0x3a4   :  { %15138 = vst [vmem:[#allocation114_spill] sm:$0xff] %v11132_v3  ;;  %2636 = vrot.lane.b32.xlu1 %v15099_v21, %s9805_s11  ;;  %8092 = vmatprep.subr.bf16.mxu0 %v2006_v58  ;;  %v2507_v3 = vsel %vm15127_vm9, %v11143_v46, -1e+30  ;;  %v2425_v15 = vadd.f32 %v10705_v7, %v15144_v12  ;;  %vm2440_vm11 = vcmp.gt.f32.partialorder %v2424_v9, 0.0  ;;  %v2474_v9 = vmul.f32 -0.2, %v2426_v24 }
 0x3a5   :  { %8093 = vmatpush3.bf16.msra.mxu0 %v2006_v58  ;;  %v1780_v58 = vadd.f32 %v10654_v62, %v15142_v11  ;;  %v11165_v2 = vsel %vm2440_vm11, %v2456_v1, %v2472_v50 }
 0x3a6   :  { %v2473_v11 = vmul.f32 -0.2, %v2425_v15  ;;  %vm2441_vm9 = vcmp.gt.f32.partialorder %v2425_v15, 0.0 }
 0x3a7   :  { %v11150_v21 = vpop.xlane.xlu0 %2518  ;;  %v1812_v59 = vsub.f32 0.0, %v1780_v58  ;;  %v1828_v49 = vmul.f32 -0.2, %v1780_v58  ;;  %vm1796_vm15 = vcmp.gt.f32.partialorder %v1780_v58, 0.0 }
 0x3a9   :  { %v11158_v14 = vsel %vm1796_vm15, %v1812_v59, %v1828_v49  ;;  %v2504_v49 = vsel %vm15051_vm7, %v11165_v2, -1e+30  ;;  %v2458_v59 = vsub.f32 0.0, %v2426_v24  ;;  %vm2442_vm15 = vcmp.gt.f32.partialorder %v2426_v24, 0.0 }
 0x3aa   :  { %15145 = vst [vmem:[#allocation97_spill] sm:$0xff] %v11158_v14  ;;  %v1860_v62 = vsel %vm15146_vm2, %v11158_v14, -1e+30 }
 0x3ab   :  { %v11154_v57 = vpop.xlane.xlu0 %2522  ;;  %v11177_v50 = vsel %vm2442_vm15, %v2458_v59, %v2474_v9 }
 0x3ac   :  { %v2506_v24 = vsel %vm15122_vm12, %v11177_v50, -1e+30 }
 0x3af   :  { %v2635_v58 = vpop.permute.xlu0 %2634 }
 0x3bb   :  { %2538 = vmax.xlane.f32.xlu0 %v2507_v3  ;;  %v2457_v3 = vsub.f32 0.0, %v2425_v15 }
 0x3bd   :  { %v11172_v44 = vsel %vm2441_vm9, %v2457_v3, %v2473_v11  ;;  %vm15155_vm9 = vcmask 130048  }
 0x3be   :  { %v2505_v7 = vsel %vm15146_vm2, %v11172_v44, -1e+30  ;;  %vm15156_vm11 = vmmov %vm15155_vm9 }
 0x3bf   :  { %vm15157_vm15 = vmmov %vm15155_vm9 }
 0x3c0   :  { %vm15158_vm2 = vmmov %vm15155_vm9 }
 0x3c8   :  { %1889 = vmax.xlane.f32.xlu1 %v1860_v62  ;;  %v9807_v62 = vmov 6  }
 0x3c9   :  { %8550 = vset.pattern.permute.xlu0 %v9807_v62 }
 0x3ca   :  { %v11170_v12 = vpop.xlane.xlu0 %1881 }
 0x3cb   :  { %15148 = vst [vmem:[#allocation96_spill] sm:$0xff] %v11170_v12 }
 0x3cc   :  { %2532 = vmax.xlane.f32.xlu1 %v2504_v49  ;;  %v15153_v49 = vld [vmem:[#allocation24_spill] sm:$0xff] }
 0x3ce   :  { %v11181_v1 = vpop.xlane.xlu0 %1883 }
 0x3cf   :  { %15149 = vst [vmem:[#allocation88_spill] sm:$0xff] %v11181_v1 }
 0x3d0   :  { %2534 = vmax.xlane.f32.xlu1 %v2505_v7 }
 0x3d1   :  { %2640 = vrot.lane.b32.xlu0 %v15133_v54, %s9805_s11 }
 0x3d2   :  { %v11183_v15 = vpop.f32.mrb[12].mxu1 }
 0x3d3   :  { %15150 = vst [vmem:[#allocation100_spill] sm:$0xff] %v11183_v15  ;;  %v11185_v39 = vpop.f32.mrb[13].mxu1  ;;  %v11187_v3 = vpop.xlane.xlu1 %2520 }
 0x3d4   :  { %15151 = vst [vmem:[#allocation115_spill] sm:$0xff] %v11185_v39  ;;  %2536 = vmax.xlane.f32.xlu1 %v2506_v24  ;;  %v11192_v11 = vpop.f32.mrb[14].mxu1  ;;  %v1992_v15 = vpop.permute.xlu0 %1991  ;;  %v2654_v39 = vsel %vm15156_vm11, %v2635_v58, 1065369472  ;;  %v11208_v58 = vld [vmem:[%s14457_s3] sm:$0xff] }
 0x3d5   :  { %15152 = vst [vmem:[#allocation116_spill] sm:$0xff] %v11192_v11  ;;  %2642 = vrot.lane.b32.xlu0 %v15153_v49, %s9805_s11  ;;  %v11196_v59 = vpop.f32.mrb[15].mxu1  ;;  %v2012_v24 = vsel %vm15158_vm2, %v1992_v15, 1065369472 }
 0x3d6   :  { %15154 = vst [vmem:[#allocation117_spill] sm:$0xff] %v11196_v59  ;;  %v15159_v59 = vld [vmem:[#allocation32_spill] sm:$0xff] }
 0x3d7   :  { %v2633_v9 = vpop.permute.xlu1 %2632  ;;  %v3055_v6 = vsub.s32 4, %v15159_v59 }
 0x3d8   :  { %v2651_v7 = vsel %vm15155_vm9, %v2633_v9, 1065369472  ;;  %v1994_v11 = vpop.permute.xlu0 %1993  ;;  %vm15160_vm9 = vmmov %vm15158_vm2 }
 0x3d9   :  { %8124 = vmatprep.subr.bf16.mxu1 %v2651_v7  ;;  %v2015_v9 = vsel %vm15160_vm9, %v1994_v11, 1065369472  ;;  %v15164_v11 = vld [vmem:[#allocation37_spill] sm:$0xff]  ;;  %vm15171_vm9 = vnez %v14902_v40 }
 0x3da   :  { %8125 = vmatpush3.bf16.msra.mxu1 %v2651_v7  ;;  %v15161_v7 = vld [vmem:[#allocation2_spill] sm:$0xff] }
 0x3db   :  { %8126 = vmatprep.subr.bf16.mxu1 %v2654_v39  ;;  %v1990_v54 = vpop.permute.xlu1 %1989 }
 0x3dc   :  { %v2009_v27 = vsel %vm15157_vm15, %v1990_v54, 1065369472  ;;  %v15162_v54 = vld [vmem:[#allocation29_spill] sm:$0xff]  ;;  %vm15168_vm15 = vnez %v14896_v42 }
 0x3dd   :  { %8094 = vmatprep.subr.bf16.mxu0 %v2009_v27 }
 0x3de   :  { %8095 = vmatpush3.bf16.msra.mxu0 %v2009_v27  ;;  %8127 = vmatpush3.bf16.msra.mxu1 %v2654_v39  ;;  %v11211_v27 = vrot.slane %v11208_v58, %v3055_v6  ;;  %v15163_v39 = vld [vmem:[#allocation4_spill] sm:$0xff]  ;;  %v15167_v6 = vld [vmem:[#allocation7_spill] sm:$0xff] }
 0x3df   :  { %8096 = vmatprep.subr.bf16.mxu0 %v2012_v24 }
 0x3e0   :  { %v3058_v15 = vadd.f32 %v11211_v27, %v15162_v54  ;;  %v3059_v33 = vadd.f32 %v11211_v27, %v15164_v11  ;;  %v15172_v11 = vld [vmem:[#allocation10_spill] sm:$0xff]  ;;  %v3063_v19 = vadd.f32 %v11211_v27, %v10951_v20 }
 0x3e2   :  { %8097 = vmatpush3.bf16.msra.mxu0 %v2012_v24  ;;  %v3090_v24 = vsub.f32 0.0, %v3058_v15  ;;  %v3106_v32 = vmul.f32 -0.2, %v3058_v15  ;;  %vm3074_vm2 = vcmp.gt.f32.partialorder %v3058_v15, 0.0  ;;  %v3091_v8 = vsub.f32 0.0, %v3059_v33 }
 0x3e3   :  { %8098 = vmatprep.subr.bf16.mxu0 %v2015_v9  ;;  %v3107_v1 = vmul.f32 -0.2, %v3059_v33  ;;  %vm3075_vm11 = vcmp.gt.f32.partialorder %v3059_v33, 0.0  ;;  %v3095_v20 = vsub.f32 0.0, %v3063_v19 }
 0x3e4   :  { %v11219_v14 = vsel %vm3074_vm2, %v3090_v24, %v3106_v32  ;;  %v15173_v32 = vld [vmem:[#allocation13_spill] sm:$0xff]  ;;  %v15174_v24 = vld [vmem:[#allocation16_spill] sm:$0xff]  ;;  %vm15193_vm2 = vcmask 130048  }
 0x3e5   :  { %4925 = vperm.xlu1 %8549, %v15161_v7   ;;  %15166 = vst [vmem:[#allocation2_spill] sm:$0xff] %v11219_v14  ;;  %v11225_v54 = vsel %vm3075_vm11, %v3091_v8, %v3107_v1  ;;  %v15179_v1 = vld [vmem:[#allocation17_spill] sm:$0xff]  ;;  %vm15199_vm11 = vmmov %vm15193_vm2 }
 0x3e6   :  { %8099 = vmatpush3.bf16.msra.mxu0 %v2015_v9  ;;  %v3138_v9 = vsel %vm15168_vm15, %v11219_v14, -1e+30  ;;  %15169 = vst [vmem:[#allocation29_spill] sm:$0xff] %v11225_v54  ;;  %v3139_v15 = vsel %vm15171_vm9, %v11225_v54, -1e+30  ;;  %v2639_v14 = vpop.permute.xlu0 %2638  ;;  %vm15201_vm12 = vmmov %vm15199_vm11 }
 0x3e9   :  { %4929 = vperm.xlu1 %8549, %v15163_v39   ;;  %v15170_v39 = vld [vmem:[#allocation8_spill] sm:$0xff] }
 0x3ed   :  { %4933 = vperm.xlu1 %8549, %v15165_v52  }
 0x3f1   :  { %4937 = vperm.xlu1 %8549, %v15167_v6  }
 0x3f4   :  { %3155 = vmax.xlane.f32.xlu0 %v3138_v9 }
 0x3f5   :  { %4941 = vperm.xlu1 %8549, %v15170_v39  }
 0x3f8   :  { %3157 = vmax.xlane.f32.xlu0 %v3139_v15 }
 0x3f9   :  { %4945 = vperm.xlu1 %8549, %v15172_v11  }
 0x3fd   :  { %4953 = vperm.xlu1 %8549, %v15173_v32  }
 0x401   :  { %4961 = vperm.xlu1 %8549, %v15174_v24   ;;  %v11234_v33 = vpop.f32.mrb[16].mxu1 }
 0x402   :  { %15175 = vst [vmem:[#allocation37_spill] sm:$0xff] %v11234_v33  ;;  %v11236_v52 = vpop.f32.mrb[17].mxu1 }
 0x403   :  { %15176 = vst [vmem:[#allocation7_spill] sm:$0xff] %v11236_v52  ;;  %v11238_v9 = vpop.f32.mrb[18].mxu1 }
 0x404   :  { %15177 = vst [vmem:[#allocation8_spill] sm:$0xff] %v11238_v9  ;;  %v11240_v8 = vpop.f32.mrb[19].mxu1 }
 0x405   :  { %15178 = vst [vmem:[#allocation16_spill] sm:$0xff] %v11240_v8  ;;  %4965 = vperm.xlu1 %8549, %v15179_v1  }
 0x409   :  { %1997 = vrot.lane.b32.xlu1 %v15153_v49, %s9804_s10  ;;  %v11245_v15 = vpop.f32.mrb[20].mxu1 }
 0x40a   :  { %15180 = vst [vmem:[#allocation118_spill] sm:$0xff] %v11245_v15  ;;  %v11247_v54 = vpop.f32.mrb[21].mxu1  ;;  %8551 = vset.pattern.permute.xlu1 %v9807_v62 }
 0x40b   :  { %15181 = vst [vmem:[#allocation119_spill] sm:$0xff] %v11247_v54  ;;  %v11249_v32 = vpop.xlane.xlu0 %1887  ;;  %v11251_v33 = vpop.f32.mrb[22].mxu1 }
 0x40c   :  { %15182 = vst [vmem:[#allocation120_spill] sm:$0xff] %v11249_v32  ;;  %15183 = vst [vmem:[#allocation121_spill] sm:$0xff] %v11251_v33  ;;  %v11253_v52 = vpop.f32.mrb[23].mxu1  ;;  %v11255_v9 = vpop.xlane.xlu1 %1879 }
 0x40d   :  { %15184 = vst [vmem:[#allocation122_spill] sm:$0xff] %v11253_v52  ;;  %15185 = vst [vmem:[#allocation123_spill] sm:$0xff] %v11255_v9 }
 0x40e   :  { %3273 = vrot.lane.b32.xlu0 %v15046_v38, %s9808_s13 }
 0x40f   :  { %v11259_v8 = vpop.xlane.xlu0 %1891 }
 0x410   :  { %15186 = vst [vmem:[#allocation124_spill] sm:$0xff] %v11259_v8  ;;  %v11261_v49 = vpop.xlane.xlu1 %1885 }
 0x411   :  { %15187 = vst [vmem:[#allocation125_spill] sm:$0xff] %v11261_v49  ;;  %v11263_v15 = vpop.f32.mrb[24].mxu1 }
 0x412   :  { %15188 = vst [vmem:[#allocation126_spill] sm:$0xff] %v11263_v15  ;;  %3275 = vrot.lane.b32.xlu0 %v15047_v0, %s9808_s13  ;;  %v11267_v62 = vpop.f32.mrb[25].mxu1 }
 0x413   :  { %15189 = vst [vmem:[#allocation127_spill] sm:$0xff] %v11267_v62  ;;  %v11269_v33 = vpop.xlane.xlu0 %1893  ;;  %v11271_v52 = vpop.f32.mrb[26].mxu1 }
 0x414   :  { %15190 = vst [vmem:[#allocation128_spill] sm:$0xff] %v11269_v33  ;;  %15191 = vst [vmem:[#allocation129_spill] sm:$0xff] %v11271_v52  ;;  %v11273_v54 = vpop.f32.mrb[27].mxu1  ;;  %v11275_v1 = vpop.xlane.xlu1 %2524  ;;  %v3700_v33 = vsub.s32 5, %v15159_v59  ;;  %v15200_v59 = vld [vmem:[#allocation27_spill] sm:$0xff] }
 0x415   :  { %15192 = vst [vmem:[#allocation130_spill] sm:$0xff] %v11273_v54 }
 0x416   :  { %3920 = vrot.lane.b32.xlu0 %v15047_v0, %s9809_s14  ;;  %v3057_v0 = vadd.f32 %v11211_v27, %v15196_v34 }
 0x417   :  { %v1996_v11 = vpop.permute.xlu0 %1995 }
 0x418   :  { %v11279_v8 = vpop.xlane.xlu1 %2526  ;;  %v2018_v15 = vsel %vm15193_vm2, %v1996_v11, 1065369472  ;;  %v11298_v11 = vrot.slane %v11208_v58, %v3700_v33  ;;  %v3089_v12 = vsub.f32 0.0, %v3057_v0  ;;  %v3105_v47 = vmul.f32 -0.2, %v3057_v0 }
 0x419   :  { %8100 = vmatprep.subr.bf16.mxu0 %v2018_v15  ;;  %vm3073_vm2 = vcmp.gt.f32.partialorder %v3057_v0, 0.0  ;;  %v3061_v33 = vadd.f32 %v11211_v27, %v10941_v30 }
 0x41a   :  { %8101 = vmatpush3.bf16.msra.mxu0 %v2018_v15  ;;  %v3702_v34 = vadd.f32 %v11298_v11, %v15200_v59  ;;  %v11308_v36 = vsel %vm3073_vm2, %v3089_v12, %v3105_v47  ;;  %v15204_v59 = vld [vmem:[#allocation38_spill] sm:$0xff] }
 0x41b   :  { %15202 = vst [vmem:[#allocation27_spill] sm:$0xff] %v11308_v36  ;;  %v3109_v5 = vmul.f32 -0.2, %v3061_v33  ;;  %vm3077_vm2 = vcmp.gt.f32.partialorder %v3061_v33, 0.0 }
 0x41c   :  { %v11282_v62 = vpop.xlane.xlu1 %2528  ;;  %v3750_v9 = vmul.f32 -0.2, %v3702_v34 }
 0x41f   :  { %v11285_v52 = vpop.f32.mrb[28].mxu1 }
 0x420   :  { %15194 = vst [vmem:[#allocation131_spill] sm:$0xff] %v11285_v52  ;;  %v11287_v54 = vpop.f32.mrb[29].mxu1  ;;  %v11289_v32 = vpop.xlane.xlu1 %2530  ;;  %v3060_v52 = vadd.f32 %v11211_v27, %v10931_v45  ;;  %v3734_v45 = vsub.f32 0.0, %v3702_v34 }
 0x421   :  { %15195 = vst [vmem:[#allocation132_spill] sm:$0xff] %v11287_v54  ;;  %v11293_v49 = vpop.f32.mrb[30].mxu1 }
 0x422   :  { %15197 = vst [vmem:[#allocation30_spill] sm:$0xff] %v11293_v49  ;;  %v11295_v26 = vpop.f32.mrb[31].mxu1  ;;  %v2660_v49 = vsel %vm15201_vm12, %v2639_v14, 1065369472  ;;  %v3108_v58 = vmul.f32 -0.2, %v3060_v52 }
 0x423   :  { %15198 = vst [vmem:[#allocation133_spill] sm:$0xff] %v11295_v26  ;;  %v3092_v26 = vsub.f32 0.0, %v3060_v52  ;;  %vm3076_vm7 = vcmp.gt.f32.partialorder %v3060_v52, 0.0  ;;  %vm3718_vm12 = vcmp.gt.f32.partialorder %v3702_v34, 0.0  ;;  %v3093_v14 = vsub.f32 0.0, %v3061_v33 }
 0x424   :  { %v2637_v15 = vpop.permute.xlu1 %2636  ;;  %v11319_v47 = vsel %vm3718_vm12, %v3734_v45, %v3750_v9 }
 0x425   :  { %v2657_v54 = vsel %vm15199_vm11, %v2637_v15, 1065369472  ;;  %v15203_v15 = vld [vmem:[#allocation35_spill] sm:$0xff]  ;;  %vm15205_vm11 = vnez %v15204_v59  ;;  %v11317_v30 = vsel %vm3076_vm7, %v3092_v26, %v3108_v58  ;;  %v11328_v26 = vsel %vm3077_vm2, %v3093_v14, %v3109_v5 }
 0x426   :  { %8128 = vmatprep.subr.bf16.mxu1 %v2657_v54  ;;  %v3703_v0 = vadd.f32 %v11298_v11, %v15203_v15  ;;  %15206 = vst [vmem:[#allocation35_spill] sm:$0xff] %v11317_v30  ;;  %v15207_v15 = vld [vmem:[#allocation39_spill] sm:$0xff]  ;;  %v3140_v34 = vsel %vm15208_vm3, %v11317_v30, -1e+30  ;;  %vm3079_vm7 = vcmp.gt.f32.partialorder %v3063_v19, 0.0 }
 0x427   :  { %8129 = vmatpush3.bf16.msra.mxu1 %v2657_v54  ;;  %v3137_v54 = vsel %vm15205_vm11, %v11308_v36, -1e+30  ;;  %v15209_v36 = vld [vmem:[#allocation26_spill] sm:$0xff]  ;;  %v3782_v9 = vsel %vm15205_vm11, %v11319_v47, -1e+30 }
 0x428   :  { %8130 = vmatprep.subr.bf16.mxu1 %v2660_v49  ;;  %v3735_v52 = vsub.f32 0.0, %v3703_v0  ;;  %v3751_v12 = vmul.f32 -0.2, %v3703_v0  ;;  %vm3719_vm13 = vcmp.gt.f32.partialorder %v3703_v0, 0.0  ;;  %v3064_v37 = vadd.f32 %v11211_v27, %v15209_v36 }
 0x429   :  { %v3141_v45 = vsel %vm10268_vm5, %v11328_v26, -1e+30 }
 0x42a   :  { %v11336_v0 = vsel %vm3719_vm13, %v3735_v52, %v3751_v12  ;;  %v3096_v30 = vsub.f32 0.0, %v3064_v37  ;;  %vm3080_vm12 = vcmp.gt.f32.partialorder %v3064_v37, 0.0 }
 0x42b   :  { %8131 = vmatpush3.bf16.msra.mxu1 %v2660_v49  ;;  %v3704_v49 = vadd.f32 %v11298_v11, %v15207_v15  ;;  %v15210_v15 = vld [vmem:[#allocation49_spill] sm:$0xff]  ;;  %v3783_v14 = vsel %vm15168_vm15, %v11336_v0, -1e+30 }
 0x42c   :  { %v3705_v36 = vadd.f32 %v11298_v11, %v15210_v15 }
 0x42d   :  { %3153 = vmax.xlane.f32.xlu1 %v3137_v54  ;;  %v3111_v54 = vmul.f32 -0.2, %v3063_v19  ;;  %v3736_v58 = vsub.f32 0.0, %v3704_v49  ;;  %v3752_v33 = vmul.f32 -0.2, %v3704_v49  ;;  %vm3720_vm2 = vcmp.gt.f32.partialorder %v3704_v49, 0.0 }
 0x42e   :  { %v3737_v52 = vsub.f32 0.0, %v3705_v36  ;;  %v3753_v12 = vmul.f32 -0.2, %v3705_v36  ;;  %vm3721_vm13 = vcmp.gt.f32.partialorder %v3705_v36, 0.0 }
 0x42f   :  { %v11340_v19 = vsel %vm3079_vm7, %v3095_v20, %v3111_v54  ;;  %v2545_v20 = vsub.f32 %v10902_v29, %v11150_v21  ;;  %vm15217_vm7 = vcmask 130048  }
 0x430   :  { %v3143_v5 = vsel %vm10411_vm6, %v11340_v19, -1e+30 }
 0x431   :  { %3159 = vmax.xlane.f32.xlu1 %v3140_v34  ;;  %v3112_v34 = vmul.f32 -0.2, %v3064_v37  ;;  %v15212_v37 = vld [vmem:[#allocation36_spill] sm:$0xff]  ;;  %v2561_v29 = vmin.f32 %v2545_v20, 0.0 }
 0x432   :  { %v2543_v49 = vsub.f32 %v15212_v37, %v11017_v55  ;;  %v15215_v55 = vld [vmem:[#allocation56_spill] sm:$0xff] }
 0x433   :  { %v11348_v15 = vsel %vm3080_vm12, %v3096_v30, %v3112_v34  ;;  %v15213_v30 = vld [vmem:[#allocation63_spill] sm:$0xff]  ;;  %vm15218_vm12 = vmmov %vm15217_vm7 }
 0x434   :  { %v3144_v54 = vsel %vm10350_vm4, %v11348_v15, -1e+30  ;;  %v2542_v34 = vsub.f32 %v15213_v30, %v11014_v4  ;;  %v2559_v36 = vmin.f32 %v2543_v49, 0.0  ;;  %v2546_v4 = vsub.f32 %v11001_v22, %v11187_v3 }
 0x435   :  { %3161 = vmax.xlane.f32.xlu0 %v3141_v45  ;;  %3798 = vmax.xlane.f32.xlu1 %v3782_v9  ;;  %v11350_v45 = vsel %vm3720_vm2, %v3736_v58, %v3752_v33  ;;  %v11364_v58 = vsel %vm3721_vm13, %v3737_v52, %v3753_v12  ;;  %v2544_v33 = vsub.f32 %v15215_v55, %v11141_v43  ;;  %v15216_v43 = vld [vmem:[#allocation50_spill] sm:$0xff] }
 0x436   :  { %15211 = vst [vmem:[#allocation39_spill] sm:$0xff] %v11350_v45  ;;  %v3784_v9 = vsel %vm15171_vm9, %v11350_v45, -1e+30  ;;  %15214 = vst [vmem:[#allocation26_spill] sm:$0xff] %v11364_v58  ;;  %v3785_v21 = vsel %vm15208_vm3, %v11364_v58, -1e+30  ;;  %v2549_v52 = vsub.f32 %v11101_v28, %v11279_v8  ;;  %v2547_v49 = vsub.f32 %v15216_v43, %v11154_v57 }
 0x437   :  { %v2578_v37 = vmul.f32 1.442695, %v2559_v36  ;;  %v2562_v30 = vmin.f32 %v2546_v4, 0.0  ;;  %v2551_v28 = vsub.f32 %v11113_v60, %v11289_v32  ;;  %vm15220_vm2 = vnez %v15027_v61 }
 0x438   :  { %vm15221_vm13 = vnez %v15040_v63  ;;  %vm15230_vm3 = vnez %v15065_v51  ;;  %v15298_v51 = vld [vmem:[#allocation71_spill] sm:$0xff]  ;;  %v15301_v63 = vld [vmem:[#allocation90_spill] sm:$0xff] }
 0x439   :  { %3165 = vmax.xlane.f32.xlu0 %v3143_v5  ;;  %3800 = vmax.xlane.f32.xlu1 %v3783_v14  ;;  %v2558_v5 = vmin.f32 %v2542_v34, 0.0  ;;  %v2560_v14 = vmin.f32 %v2544_v33, 0.0  ;;  %8938 = vpow2.f32 %v2578_v37  ;;  %v2565_v34 = vmin.f32 %v2549_v52, 0.0 }
 0x43a   :  { %v2563_v33 = vmin.f32 %v2547_v49, 0.0  ;;  %v2584_v3 = vmul.f32 1.442695, %v2562_v30 }
 0x43b   :  { %v2576_v12 = vmul.f32 1.442695, %v2558_v5  ;;  %v2580_v20 = vmul.f32 1.442695, %v2560_v14  ;;  %v2590_v8 = vmul.f32 1.442695, %v2565_v34 }
 0x43c   :  { %v2586_v57 = vmul.f32 1.442695, %v2563_v33 }
 0x43d   :  { %3167 = vmax.xlane.f32.xlu0 %v3144_v54  ;;  %3802 = vmax.xlane.f32.xlu1 %v3784_v9  ;;  %v2582_v54 = vmul.f32 1.442695, %v2561_v29  ;;  %v2548_v9 = vsub.f32 %v11085_v48, %v11275_v1  ;;  %v2550_v29 = vsub.f32 %v11108_v25, %v11282_v62 }
 0x43f   :  { %8940 = vpow2.f32 %v2582_v54  ;;  %v2564_v22 = vmin.f32 %v2548_v9, 0.0  ;;  %v2566_v37 = vmin.f32 %v2550_v29, 0.0  ;;  %v15219_v29 = vld [vmem:[#allocation11_spill] sm:$0xff] }
 0x440   :  { %8942 = vpow2.f32 %v2576_v12 }
 0x441   :  { %3804 = vmax.xlane.f32.xlu1 %v3785_v21  ;;  %8944 = vpow2.f32 %v2580_v20  ;;  %v2588_v1 = vmul.f32 1.442695, %v2564_v22  ;;  %v2567_v21 = vmin.f32 %v2551_v28, 0.0  ;;  %v2592_v52 = vmul.f32 1.442695, %v2566_v37 }
 0x442   :  { %8946 = vpow2.f32 %v2584_v3 }
 0x443   :  { %8948 = vpow2.f32 %v2590_v8  ;;  %v8939_v14 = vpop.eup %8938  ;;  %v2594_v62 = vmul.f32 1.442695, %v2567_v21 }
 0x444   :  { %8950 = vpow2.f32 %v2586_v57 }
 0x445   :  { %8952 = vpow2.f32 %v2588_v1 }
 0x446   :  { %8954 = vpow2.f32 %v2594_v62  ;;  %v15224_v62 = vld [vmem:[#allocation42_spill] sm:$0xff] }
 0x447   :  { %8956 = vpow2.f32 %v2592_v52 }
 0x448   :  { %v2539_v55 = vpop.xlane.xlu0 %2538 }
 0x449   :  { %v8941_v32 = vpop.eup %8940  ;;  %v2555_v34 = vsub.f32 %v11143_v46, %v2539_v55 }
 0x44a   :  { %v8943_v25 = vpop.eup %8942 }
 0x44b   :  { %v8945_v4 = vpop.eup %8944  ;;  %v7556_v54 = vpack.c.bf16 %v8939_v14, %v8943_v25 }
 0x44c   :  { %v2641_v36 = vpop.permute.xlu0 %2640  ;;  %v7559_v43 = vpack.c.bf16 %v8941_v32, %v8945_v4  ;;  %v8947_v49 = vpop.eup %8946  ;;  %v3706_v4 = vadd.f32 %v11298_v11, %v15224_v62 }
 0x44d   :  { %v2663_v48 = vsel %vm15217_vm7, %v2641_v36, 1065369472  ;;  %v2571_v36 = vmin.f32 %v2555_v34, 0.0 }
 0x44e   :  { %8132 = vmatprep.subr.bf16.mxu1 %v2663_v48  ;;  %v3754_v34 = vmul.f32 -0.2, %v3706_v4  ;;  %vm3722_vm15 = vcmp.gt.f32.partialorder %v3706_v4, 0.0 }
 0x44f   :  { %8133 = vmatpush3.bf16.msra.mxu1 %v2663_v48  ;;  %v2602_v21 = vmul.f32 1.442695, %v2571_v36  ;;  %v15228_v36 = vld [vmem:[#allocation44_spill] sm:$0xff] }
 0x450   :  { %v2643_v5 = vpop.permute.xlu0 %2642 }
 0x451   :  { %v2666_v60 = vsel %vm15218_vm12, %v2643_v5, 1065369472  ;;  %vm15226_vm12 = vnez %v15053_v35 }
 0x452   :  { %3918 = vrot.lane.b32.xlu1 %v15046_v38, %s9809_s14  ;;  %8134 = vmatprep.subr.bf16.mxu1 %v2666_v60 }
 0x453   :  { %4280 = vperm.xlu0 %8550, %v15161_v7   ;;  %8135 = vmatpush3.bf16.msra.mxu1 %v2666_v60  ;;  %v8949_v7 = vpop.eup %8948  ;;  %v15222_v60 = vld [vmem:[#allocation58_spill] sm:$0xff] }
 0x454   :  { %v8951_v30 = vpop.eup %8950  ;;  %v3062_v32 = vadd.f32 %v11211_v27, %v15222_v60  ;;  %v15236_v60 = vld [vmem:[#allocation51_spill] sm:$0xff] }
 0x455   :  { %v11388_v12 = vpop.xlane.xlu1 %1889  ;;  %v8953_v33 = vpop.eup %8952  ;;  %v7562_v3 = vpack.c.bf16 %v8951_v30, %v8947_v49  ;;  %v3738_v30 = vsub.f32 0.0, %v3706_v4 }
 0x456   :  { %8137 = vmatmul.mubr.msk.bf16.vlgmr.msra.gmra.mrb[32].mxu1 %vm15090_vm8, %v7556_v54  ;;  %v7565_v8 = vpack.c.bf16 %v8949_v7, %v8953_v33  ;;  %v8955_v46 = vpop.eup %8954  ;;  %v3110_v49 = vmul.f32 -0.2, %v3062_v32  ;;  %vm3078_vm7 = vcmp.gt.f32.partialorder %v3062_v32, 0.0  ;;  %v15225_v7 = vmov 7  }
 0x457   :  { %4292 = vperm.xlu0 %8550, %v15167_v6   ;;  %8140 = vmatprep.mubr.msk.bf16.mxu1 %vm15091_vm10, %v7559_v43  ;;  %v8957_v1 = vpop.eup %8956  ;;  %v3094_v43 = vsub.f32 0.0, %v3062_v32 }
 0x458   :  { %v7568_v5 = vpack.c.bf16 %v8955_v46, %v8957_v1  ;;  %v11441_v1 = vsel %vm3722_vm15, %v3738_v30, %v3754_v34 }
 0x459   :  { %v2533_v20 = vpop.xlane.xlu1 %2532  ;;  %15233 = vst [vmem:[#allocation49_spill] sm:$0xff] %v11441_v1 }
 0x45a   :  { %v2552_v9 = vsub.f32 %v11165_v2, %v2533_v20 }
 0x45b   :  { %4296 = vperm.xlu0 %8550, %v15170_v39  }
 0x45c   :  { %v2568_v22 = vmin.f32 %v2552_v9, 0.0 }
 0x45d   :  { %v2535_v28 = vpop.xlane.xlu1 %2534 }
 0x45e   :  { %v2553_v6 = vsub.f32 %v11172_v44, %v2535_v28  ;;  %8141 = vmatmul.mubr.msk.bf16.gmra.mrb[36].mxu1 %vm10737_vm1, %v7562_v3  ;;  %v2596_v57 = vmul.f32 1.442695, %v2568_v22  ;;  %v15227_v3 = vld [vmem:[#allocation62_spill] sm:$0xff] }
 0x45f   :  { %4304 = vperm.xlu0 %8550, %v15219_v29   ;;  %8144 = vmatprep.mubr.msk.bf16.mxu1 %vm15220_vm2, %v7565_v8  ;;  %v3707_v28 = vadd.f32 %v11298_v11, %v15227_v3  ;;  %v11428_v8 = vsel %vm3078_vm7, %v3094_v43, %v3110_v49  ;;  %v3786_v49 = vsel %vm10268_vm5, %v11441_v1, -1e+30  ;;  %v15305_v1 = vld [vmem:[#allocation15_spill] sm:$0xff] }
 0x460   :  { %v2569_v2 = vmin.f32 %v2553_v6, 0.0  ;;  %8958 = vpow2.f32 %v2596_v57  ;;  %v1898_v57 = vsub.f32 %v15228_v36, %v11003_v31  ;;  %v15235_v31 = vld [vmem:[#allocation83_spill] sm:$0xff]  ;;  %v15241_v36 = vld [vmem:[#allocation64_spill] sm:$0xff] }
 0x461   :  { %v2537_v39 = vpop.xlane.xlu1 %2536  ;;  %v1897_v32 = vsub.f32 %v15236_v60, %v15235_v31  ;;  %vm3723_vm7 = vcmp.gt.f32.partialorder %v3707_v28, 0.0  ;;  %v15245_v60 = vld [vmem:[#allocation60_spill] sm:$0xff] }
 0x462   :  { %v2598_v55 = vmul.f32 1.442695, %v2569_v2  ;;  %v2554_v48 = vsub.f32 %v11177_v50, %v2537_v39  ;;  %v15229_v2 = vld [vmem:[#allocation69_spill] sm:$0xff]  ;;  %v1914_v4 = vmin.f32 %v1898_v57, 0.0 }
 0x463   :  { %4316 = vperm.xlu0 %8550, %v15174_v24   ;;  %v15223_v24 = vld [vmem:[#allocation22_spill] sm:$0xff]  ;;  %v1899_v46 = vsub.f32 %v15229_v2, %v11118_v17  ;;  %v15237_v17 = vld [vmem:[#allocation103_spill] sm:$0xff]  ;;  %v1913_v30 = vmin.f32 %v1897_v32, 0.0  ;;  %v15246_v32 = vld [vmem:[#allocation68_spill] sm:$0xff] }
 0x464   :  { %8960 = vpow2.f32 %v2598_v55  ;;  %v2570_v44 = vmin.f32 %v2554_v48, 0.0  ;;  %v15231_v55 = vld [vmem:[#allocation59_spill] sm:$0xff]  ;;  %v1933_v3 = vmul.f32 1.442695, %v1914_v4  ;;  %v15249_v4 = vld [vmem:[#allocation96_spill] sm:$0xff] }
 0x465   :  { %v11406_v14 = vpop.permute.xlu1 %4925  ;;  %8962 = vpow2.f32 %v2602_v21  ;;  %vm15232_vm9 = vnez %v15231_v55  ;;  %v3739_v21 = vsub.f32 0.0, %v3707_v28  ;;  %v15242_v2 = vld [vmem:[#allocation123_spill] sm:$0xff] }
 0x466   :  { %v2600_v37 = vmul.f32 1.442695, %v2570_v44  ;;  %8145 = vmatmul.mubr.msk.bf16.gmra.mrb[40].mxu1 %vm15221_vm13, %v7568_v5  ;;  %v3142_v48 = vsel %vm15232_vm9, %v11428_v8, -1e+30  ;;  %v3755_v44 = vmul.f32 -0.2, %v3707_v28 }
 0x467   :  { %3277 = vrot.lane.b32.xlu0 %v15085_v10, %s9808_s13  ;;  %v15234_v5 = vld [vmem:[#allocation67_spill] sm:$0xff] }
 0x468   :  { %8964 = vpow2.f32 %v2600_v37  ;;  %v3708_v37 = vadd.f32 %v11298_v11, %v15234_v5  ;;  %v11454_v34 = vsel %vm3723_vm7, %v3739_v21, %v3755_v44  ;;  %v3709_v21 = vadd.f32 %v11298_v11, %v15245_v60 }
 0x469   :  { %v11412_v50 = vpop.permute.xlu1 %4929  ;;  %15239 = vst [vmem:[#allocation36_spill] sm:$0xff] %v11454_v34  ;;  %v3787_v31 = vsel %vm15232_vm9, %v11454_v34, -1e+30  ;;  %v1931_v44 = vmul.f32 1.442695, %v1913_v30  ;;  %8966 = vpow2.f32 %v1933_v3  ;;  %v15252_v3 = vld [vmem:[#allocation125_spill] sm:$0xff] }
 0x46a   :  { %v8959_v25 = vpop.eup %8958  ;;  %vm3724_vm15 = vcmp.gt.f32.partialorder %v3708_v37, 0.0  ;;  %v3741_v60 = vsub.f32 0.0, %v3709_v21  ;;  %vm3725_vm7 = vcmp.gt.f32.partialorder %v3709_v21, 0.0 }
 0x46b   :  { %4332 = vperm.xlu0 %8550, %v15223_v24  }
 0x46d   :  { %v11419_v54 = vpop.permute.xlu1 %4933 }
 0x46e   :  { %v8961_v52 = vpop.eup %8960 }
 0x46f   :  { %v7571_v20 = vpack.c.bf16 %v8961_v52, %v8959_v25  ;;  %8552 = vset.pattern.permute.xlu0 %v15225_v7  ;;  %v8963_v9 = vpop.eup %8962  ;;  %v15238_v25 = vld [vmem:[#allocation41_spill] sm:$0xff]  ;;  %v1915_v52 = vmin.f32 %v1899_v46, 0.0  ;;  %v15243_v46 = vld [vmem:[#allocation86_spill] sm:$0xff] }
 0x470   :  { %v1900_v62 = vsub.f32 %v15238_v25, %v15237_v17 }
 0x471   :  { %8148 = vmatprep.mubr.msk.bf16.mxu1 %vm15226_vm12, %v7571_v20  ;;  %v11424_v33 = vpop.permute.xlu1 %4937  ;;  %v3740_v20 = vsub.f32 0.0, %v3708_v37  ;;  %v1935_v57 = vmul.f32 1.442695, %v1915_v52  ;;  %v15250_v52 = vld [vmem:[#allocation45_spill] sm:$0xff] }
 0x472   :  { %v8965_v22 = vpop.eup %8964 }
 0x473   :  { %v7574_v6 = vpack.c.bf16 %v8963_v9, %v8965_v22  ;;  %v3756_v9 = vmul.f32 -0.2, %v3708_v37  ;;  %v1916_v22 = vmin.f32 %v1900_v62, 0.0  ;;  %v15247_v37 = vld [vmem:[#allocation53_spill] sm:$0xff]  ;;  %8968 = vpow2.f32 %v1935_v57 }
 0x474   :  { %v1901_v17 = vsub.f32 %v15247_v37, %v15246_v32  ;;  %8970 = vpow2.f32 %v1931_v44  ;;  %v15254_v32 = vld [vmem:[#allocation97_spill] sm:$0xff]  ;;  %v15257_v44 = vld [vmem:[#allocation55_spill] sm:$0xff] }
 0x475   :  { %8149 = vmatmul.mubr.msk.bf16.gmra.mrb[44].mxu1 %vm15230_vm3, %v7574_v6  ;;  %v11436_v39 = vpop.permute.xlu1 %4941  ;;  %v15240_v6 = vld [vmem:[#allocation87_spill] sm:$0xff]  ;;  %v11469_v25 = vsel %vm3724_vm15, %v3740_v20, %v3756_v9  ;;  %v1937_v62 = vmul.f32 1.442695, %v1916_v22  ;;  %v1908_v37 = vsub.f32 %v15254_v32, %v11388_v12  ;;  %vm15261_vm15 = vcmask 130048  }
 0x476   :  { %3163 = vmax.xlane.f32.xlu1 %v3142_v48  ;;  %v1902_v28 = vsub.f32 %v15241_v36, %v15240_v6  ;;  %v1903_v48 = vsub.f32 %v15243_v46, %v15242_v2  ;;  %15248 = vst [vmem:[#allocation56_spill] sm:$0xff] %v11469_v25  ;;  %v3788_v30 = vsel %vm10411_vm6, %v11469_v25, -1e+30  ;;  %v1917_v20 = vmin.f32 %v1901_v17, 0.0  ;;  %v15256_v25 = vld [vmem:[#allocation88_spill] sm:$0xff] }
 0x477   :  { %8972 = vpow2.f32 %v1937_v62  ;;  %v1905_v17 = vsub.f32 %v15257_v44, %v15256_v25 }
 0x478   :  { %v1918_v6 = vmin.f32 %v1902_v28, 0.0  ;;  %v1919_v36 = vmin.f32 %v1903_v48, 0.0  ;;  %v15253_v28 = vld [vmem:[#allocation65_spill] sm:$0xff] }
 0x479   :  { %v11449_v43 = vpop.permute.xlu1 %4945  ;;  %v1906_v57 = vsub.f32 %v15253_v28, %v15252_v3 }
 0x47a   :  { %3806 = vmax.xlane.f32.xlu1 %v3786_v49  ;;  %v1904_v49 = vsub.f32 %v15250_v52, %v15249_v4  ;;  %v1941_v22 = vmul.f32 1.442695, %v1918_v6  ;;  %v1943_v48 = vmul.f32 1.442695, %v1919_v36  ;;  %v1924_v36 = vmin.f32 %v1908_v37, 0.0 }
 0x47b   :  { %v1922_v3 = vmin.f32 %v1906_v57, 0.0  ;;  %v15262_v57 = vld [vmem:[#allocation128_spill] sm:$0xff] }
 0x47c   :  { %v1920_v9 = vmin.f32 %v1904_v49, 0.0  ;;  %v15260_v49 = vld [vmem:[#allocation81_spill] sm:$0xff]  ;;  %8974 = vpow2.f32 %v1941_v22 }
 0x47d   :  { %v11460_v5 = vpop.permute.xlu1 %4953  ;;  %8976 = vpow2.f32 %v1943_v48  ;;  %v1949_v22 = vmul.f32 1.442695, %v1922_v3  ;;  %v15263_v48 = vld [vmem:[#allocation82_spill] sm:$0xff] }
 0x47e   :  { %15244 = vst [vmem:[#allocation63_spill] sm:$0xff] %v11460_v5  ;;  %3808 = vmax.xlane.f32.xlu1 %v3787_v31  ;;  %v3757_v31 = vmul.f32 -0.2, %v3709_v21  ;;  %v1945_v62 = vmul.f32 1.442695, %v1920_v9  ;;  %v15259_v21 = vld [vmem:[#allocation120_spill] sm:$0xff]  ;;  %v1910_v37 = vsub.f32 %v15263_v48, %v15262_v57 }
 0x47f   :  { %v1907_v6 = vsub.f32 %v15260_v49, %v15259_v21 }
 0x480   :  { %v1926_v3 = vmin.f32 %v1910_v37, 0.0  ;;  %v15269_v37 = vld [vmem:[#allocation5_spill] sm:$0xff] }
 0x481   :  { %v11473_v2 = vpop.xlane.xlu0 %3155  ;;  %v11475_v46 = vpop.permute.xlu1 %4961 }
 0x482   :  { %15251 = vst [vmem:[#allocation50_spill] sm:$0xff] %v11475_v46  ;;  %3810 = vmax.xlane.f32.xlu1 %v3788_v30  ;;  %v1939_v46 = vmul.f32 1.442695, %v1917_v20  ;;  %v11490_v30 = vsel %vm3725_vm7, %v3741_v60, %v3757_v31  ;;  %v8967_v20 = vpop.eup %8966  ;;  %v1923_v31 = vmin.f32 %v1907_v6, 0.0  ;;  %vm15264_vm7 = vmmov %vm15261_vm15 }
 0x483   :  { %15258 = vst [vmem:[#allocation58_spill] sm:$0xff] %v11490_v30  ;;  %v3789_v32 = vsel %vm10350_vm4, %v11490_v30, -1e+30  ;;  %v8969_v60 = vpop.eup %8968  ;;  %v1953_v30 = vmul.f32 1.442695, %v1924_v36 }
 0x484   :  { %8978 = vpow2.f32 %v1939_v46  ;;  %v8971_v9 = vpop.eup %8970  ;;  %v1951_v6 = vmul.f32 1.442695, %v1923_v31  ;;  %v1957_v31 = vmul.f32 1.442695, %v1926_v3 }
 0x485   :  { %v11484_v4 = vpop.xlane.xlu0 %3157  ;;  %v11486_v52 = vpop.permute.xlu1 %4965  ;;  %8980 = vpow2.f32 %v1945_v62  ;;  %v7516_v49 = vpack.c.bf16 %v8967_v20, %v8971_v9 }
 0x486   :  { %15255 = vst [vmem:[#allocation11_spill] sm:$0xff] %v11486_v52  ;;  %v1921_v52 = vmin.f32 %v1905_v17, 0.0  ;;  %v8973_v21 = vpop.eup %8972  ;;  %8982 = vpow2.f32 %v1949_v22 }
 0x487   :  { %v7519_v62 = vpack.c.bf16 %v8973_v21, %v8969_v60  ;;  %8984 = vpow2.f32 %v1953_v30  ;;  %v8975_v36 = vpop.eup %8974 }
 0x488   :  { %v1947_v17 = vmul.f32 1.442695, %v1921_v52  ;;  %v8977_v20 = vpop.eup %8976 }
 0x489   :  { %v3274_v28 = vpop.permute.xlu0 %3273  ;;  %v1998_v12 = vpop.permute.xlu1 %1997 }
 0x48a   :  { %3812 = vmax.xlane.f32.xlu0 %v3789_v32  ;;  %v2021_v25 = vsel %vm15261_vm15, %v1998_v12, 1065369472  ;;  %v3290_v44 = vsel %vm15264_vm7, %v3274_v28, 1065369472  ;;  %v15265_v32 = vld [vmem:[#allocation124_spill] sm:$0xff]  ;;  %v15266_v12 = vld [vmem:[#allocation66_spill] sm:$0xff]  ;;  %vm15267_vm15 = vmmov %vm15264_vm7  ;;  %8986 = vpow2.f32 %v1947_v17 }
 0x48b   :  { %8102 = vmatprep.subr.bf16.mxu0 %v2021_v25  ;;  %v1909_v5 = vsub.f32 %v15266_v12, %v15265_v32  ;;  %8988 = vpow2.f32 %v1951_v6  ;;  %v15271_v32 = vld [vmem:[#allocation13_spill] sm:$0xff] }
 0x48c   :  { %8103 = vmatpush3.bf16.msra.mxu0 %v2021_v25  ;;  %v15268_v25 = vld [vmem:[#allocation4_spill] sm:$0xff]  ;;  %8990 = vpow2.f32 %v1957_v31 }
 0x48d   :  { %v3276_v46 = vpop.permute.xlu0 %3275  ;;  %8152 = vmatprep.subr.bf16.mxu0 %v3290_v44  ;;  %v1925_v52 = vmin.f32 %v1909_v5, 0.0 }
 0x48e   :  { %v3293_v28 = vsel %vm15267_vm15, %v3276_v46, 1065369472  ;;  %v8979_v60 = vpop.eup %8978 }
 0x48f   :  { %8105 = vmatmul.mubr.msk.bf16.vlgmr.msra.gmra.mrb[32].mxu0 %vm15090_vm8, %v7516_v49  ;;  %v8981_v9 = vpop.eup %8980  ;;  %v7522_v22 = vpack.c.bf16 %v8975_v36, %v8979_v60  ;;  %v1955_v57 = vmul.f32 1.442695, %v1925_v52  ;;  %v15274_v36 = vld [vmem:[#allocation19_spill] sm:$0xff]  ;;  %v15278_v60 = vld [vmem:[#allocation25_spill] sm:$0xff] }
 0x490   :  { %8108 = vmatprep.mubr.msk.bf16.mxu0 %vm15091_vm10, %v7519_v62  ;;  %8153 = vmatpush3.bf16.msra.mxu0 %v3290_v44  ;;  %v7525_v48 = vpack.c.bf16 %v8981_v9, %v8977_v20  ;;  %v8983_v5 = vpop.eup %8982  ;;  %v15270_v44 = vld [vmem:[#allocation10_spill] sm:$0xff]  ;;  %v15276_v52 = vld [vmem:[#allocation23_spill] sm:$0xff]  ;;  %v15279_v9 = vld [vmem:[#allocation12_spill] sm:$0xff] }
 0x491   :  { %8154 = vmatprep.subr.bf16.mxu0 %v3293_v28  ;;  %8992 = vpow2.f32 %v1955_v57  ;;  %v8985_v30 = vpop.eup %8984  ;;  %v15272_v62 = vld [vmem:[#allocation14_spill] sm:$0xff]  ;;  %v15280_v57 = vld [vmem:[#allocation27_spill] sm:$0xff] }
 0x492   :  { %v15277_v20 = vld [vmem:[#allocation2_spill] sm:$0xff] }
 0x493   :  { %4284 = vperm.xlu1 %8551, %v15268_v25   ;;  %v3186_v25 = vsub.f32 %v15277_v20, %v11473_v2 }
 0x494   :  { %8155 = vmatpush3.bf16.msra.mxu0 %v3293_v28  ;;  %v8987_v21 = vpop.eup %8986  ;;  %v15273_v28 = vld [vmem:[#allocation17_spill] sm:$0xff] }
 0x495   :  { %v8989_v49 = vpop.eup %8988  ;;  %v7528_v46 = vpack.c.bf16 %v8983_v5, %v8987_v21  ;;  %v3202_v31 = vmin.f32 %v3186_v25, 0.0  ;;  %v15283_v25 = vld [vmem:[#allocation104_spill] sm:$0xff] }
 0x496   :  { %v7531_v17 = vpack.c.bf16 %v8985_v30, %v8989_v49  ;;  %v8991_v12 = vpop.eup %8990  ;;  %v3921_v30 = vpop.permute.xlu0 %3920  ;;  %vm15284_vm7 = vnez %v15283_v25 }
 0x497   :  { %4288 = vperm.xlu1 %8551, %v15269_v37   ;;  %8109 = vmatmul.mubr.msk.bf16.gmra.mrb[36].mxu0 %vm10737_vm1, %v7522_v22  ;;  %v3219_v37 = vmul.f32 1.442695, %v3202_v31 }
 0x498   :  { %8112 = vmatprep.mubr.msk.bf16.mxu0 %vm15220_vm2, %v7525_v48 }
 0x499   :  { %8994 = vpow2.f32 %v3219_v37 }
 0x49b   :  { %4300 = vperm.xlu1 %8551, %v15270_v44   ;;  %v8993_v6 = vpop.eup %8992 }
 0x49c   :  { %v7534_v3 = vpack.c.bf16 %v8991_v12, %v8993_v6 }
 0x49f   :  { %4308 = vperm.xlu1 %8551, %v15271_v32   ;;  %8113 = vmatmul.mubr.msk.bf16.gmra.mrb[40].mxu0 %vm15221_vm13, %v7528_v46 }
 0x4a0   :  { %4949 = vperm.xlu0 %8552, %v15219_v29   ;;  %8116 = vmatprep.mubr.msk.bf16.mxu0 %vm15226_vm12, %v7531_v17  ;;  %v15275_v29 = vld [vmem:[#allocation20_spill] sm:$0xff] }
 0x4a3   :  { %4312 = vperm.xlu1 %8551, %v15272_v62   ;;  %v8995_v6 = vpop.eup %8994 }
 0x4a4   :  { %4957 = vperm.xlu0 %8552, %v15272_v62  }
 0x4a7   :  { %4320 = vperm.xlu1 %8551, %v15273_v28   ;;  %8117 = vmatmul.mubr.msk.bf16.gmra.mrb[44].mxu0 %vm15230_vm3, %v7534_v3  ;;  %vm15287_vm3 = vcmask 130048  }
 0x4a8   :  { %4969 = vperm.xlu0 %8552, %v15274_v36   ;;  %vm15288_vm13 = vmmov %vm15287_vm3 }
 0x4ab   :  { %4324 = vperm.xlu1 %8551, %v15274_v36   ;;  %v15282_v36 = vld [vmem:[#allocation46_spill] sm:$0xff] }
 0x4ac   :  { %3922 = vrot.lane.b32.xlu0 %v15085_v10, %s9809_s14 }
 0x4af   :  { %4328 = vperm.xlu1 %8551, %v15275_v29  }
 0x4b0   :  { %4973 = vperm.xlu0 %8552, %v15275_v29   ;;  %v3066_v29 = vadd.f32 %v11211_v27, %v15282_v36 }
 0x4b2   :  { %v3114_v31 = vmul.f32 -0.2, %v3066_v29  ;;  %vm3082_vm15 = vcmp.gt.f32.partialorder %v3066_v29, 0.0 }
 0x4b3   :  { %4336 = vperm.xlu1 %8551, %v15276_v52  }
 0x4b4   :  { %4985 = vperm.xlu0 %8552, %v15278_v60  }
 0x4b7   :  { %4340 = vperm.xlu1 %8551, %v15278_v60   ;;  %v3098_v60 = vsub.f32 0.0, %v3066_v29 }
 0x4b8   :  { %3924 = vrot.lane.b32.xlu0 %v15279_v9, %s9809_s14 }
 0x4ba   :  { %v3154_v22 = vpop.xlane.xlu1 %3153 }
 0x4bb   :  { %v3185_v48 = vsub.f32 %v15280_v57, %v3154_v22  ;;  %8553 = vset.pattern.permute.xlu1 %v15225_v7  ;;  %v15286_v22 = vld [vmem:[#allocation33_spill] sm:$0xff] }
 0x4bc   :  { %4977 = vperm.xlu1 %8553, %v15223_v24   ;;  %v3067_v57 = vadd.f32 %v11211_v27, %v15286_v22 }
 0x4bd   :  { %v3201_v5 = vmin.f32 %v3185_v48, 0.0 }
 0x4be   :  { %v11542_v44 = vpop.xlane.xlu1 %3159  ;;  %vm3083_vm12 = vcmp.gt.f32.partialorder %v3067_v57, 0.0 }
 0x4bf   :  { %v3217_v2 = vmul.f32 1.442695, %v3201_v5  ;;  %v3099_v5 = vsub.f32 0.0, %v3067_v57 }
 0x4c0   :  { %4981 = vperm.xlu1 %8553, %v15276_v52  }
 0x4c1   :  { %8996 = vpow2.f32 %v3217_v2  ;;  %v3115_v2 = vmul.f32 -0.2, %v3067_v57 }
 0x4c2   :  { %v11545_v21 = vpop.xlane.xlu0 %3161  ;;  %v3799_v49 = vpop.xlane.xlu1 %3798 }
 0x4c3   :  { %v3830_v46 = vsub.f32 %v11319_v47, %v3799_v49 }
 0x4c4   :  { %3279 = vrot.lane.b32.xlu1 %v15279_v9, %s9808_s13 }
 0x4c5   :  { %v3846_v7 = vmin.f32 %v3830_v46, 0.0  ;;  %v11568_v46 = vsel %vm3082_vm15, %v3098_v60, %v3114_v31  ;;  %vm15297_vm15 = vcmask 130048  }
 0x4c6   :  { %v3801_v17 = vpop.xlane.xlu1 %3800  ;;  %v11551_v32 = vpop.xlane.xlu0 %3165 }
 0x4c7   :  { %v3831_v24 = vsub.f32 %v11336_v0, %v3801_v17  ;;  %v3862_v12 = vmul.f32 1.442695, %v3846_v7  ;;  %v3938_v7 = vsel %vm15288_vm13, %v3921_v30, 1065369472 }
 0x4c9   :  { %v3847_v62 = vmin.f32 %v3831_v24, 0.0  ;;  %8998 = vpow2.f32 %v3862_v12  ;;  %v3146_v12 = vsel %vm10428_vm14, %v11568_v46, -1e+30  ;;  %v15314_v24 = vld [vmem:[#allocation61_spill] sm:$0xff] }
 0x4ca   :  { %v11553_v3 = vpop.xlane.xlu1 %3802  ;;  %v11557_v20 = vpop.xlane.xlu0 %3167 }
 0x4cb   :  { %15281 = vst [vmem:[#allocation22_spill] sm:$0xff] %v11553_v3  ;;  %v8997_v28 = vpop.eup %8996  ;;  %v3864_v52 = vmul.f32 1.442695, %v3847_v62 }
 0x4cc   :  { %v7593_v47 = vpack.c.bf16 %v8995_v6, %v8997_v28  ;;  %v11576_v6 = vsel %vm3083_vm12, %v3099_v5, %v3115_v2 }
 0x4cd   :  { %9000 = vpow2.f32 %v3864_v52  ;;  %v3147_v30 = vsel %vm15037_vm0, %v11576_v6, -1e+30 }
 0x4ce   :  { %8168 = vmatprep.mubr.msk.bf16.mxu0 %vm15284_vm7, %v7593_v47  ;;  %v11561_v0 = vpop.xlane.xlu1 %3804  ;;  %v15291_v47 = vld [vmem:[#allocation28_spill] sm:$0xff] }
 0x4cf   :  { %15285 = vst [vmem:[#allocation42_spill] sm:$0xff] %v11561_v0  ;;  %v3065_v60 = vadd.f32 %v11211_v27, %v15291_v47  ;;  %v15342_v0 = vld [vmem:[#allocation110_spill] sm:$0xff] }
 0x4d1   :  { %v3097_v22 = vsub.f32 0.0, %v3065_v60  ;;  %v3113_v57 = vmul.f32 -0.2, %v3065_v60 }
 0x4d2   :  { %v11565_v48 = vpop.permute.xlu0 %4280  ;;  %v3919_v37 = vpop.permute.xlu1 %3918 }
 0x4d3   :  { %v3935_v49 = vsel %vm15287_vm3, %v3919_v37, 1065369472  ;;  %v8999_v62 = vpop.eup %8998  ;;  %v15292_v37 = vld [vmem:[#allocation57_spill] sm:$0xff]  ;;  %vm3081_vm3 = vcmp.gt.f32.partialorder %v3065_v60, 0.0  ;;  %v3711_v60 = vadd.f32 %v11298_v11, %v15298_v51 }
 0x4d4   :  { %8184 = vmatprep.subr.bf16.mxu1 %v3935_v49  ;;  %v3068_v5 = vadd.f32 %v11211_v27, %v15292_v37 }
 0x4d5   :  { %8185 = vmatpush3.bf16.msra.mxu1 %v3935_v49  ;;  %v15294_v49 = vld [vmem:[#allocation75_spill] sm:$0xff]  ;;  %v3759_v35 = vmul.f32 -0.2, %v3711_v60 }
 0x4d6   :  { %v11571_v17 = vpop.permute.xlu0 %4292  ;;  %8186 = vmatprep.subr.bf16.mxu1 %v3938_v7  ;;  %vm3084_vm13 = vcmp.gt.f32.partialorder %v3068_v5, 0.0 }
 0x4d7   :  { %3171 = vmax.xlane.f32.xlu0 %v3146_v12  ;;  %v9001_v28 = vpop.eup %9000  ;;  %v3100_v12 = vsub.f32 0.0, %v3068_v5 }
 0x4d8   :  { %v7633_v36 = vpack.c.bf16 %v9001_v28, %v8999_v62  ;;  %v3116_v62 = vmul.f32 -0.2, %v3068_v5  ;;  %v11595_v28 = vsel %vm3081_vm3, %v3097_v22, %v3113_v57  ;;  %v15299_v22 = vld [vmem:[#allocation94_spill] sm:$0xff]  ;;  %v3743_v5 = vsub.f32 0.0, %v3711_v60 }
 0x4d9   :  { %8187 = vmatpush3.bf16.msra.mxu1 %v3938_v7  ;;  %v3710_v7 = vadd.f32 %v11298_v11, %v15294_v49 }
 0x4da   :  { %v11578_v29 = vpop.permute.xlu0 %4296  ;;  %8200 = vmatprep.mubr.msk.bf16.mxu1 %vm15284_vm7, %v7633_v36  ;;  %v11603_v49 = vsel %vm3084_vm13, %v3100_v12, %v3116_v62  ;;  %vm15300_vm7 = vnez %v15299_v22 }
 0x4db   :  { %3173 = vmax.xlane.f32.xlu0 %v3147_v30  ;;  %v15295_v30 = vld [vmem:[#allocation84_spill] sm:$0xff]  ;;  %v3742_v37 = vsub.f32 0.0, %v3710_v7  ;;  %vm3726_vm3 = vcmp.gt.f32.partialorder %v3710_v7, 0.0  ;;  %v3148_v57 = vsel %vm15300_vm7, %v11603_v49, -1e+30 }
 0x4dc   :  { %vm15296_vm12 = vnez %v15295_v30 }
 0x4dd   :  { %v3145_v47 = vsel %vm15296_vm12, %v11595_v28, -1e+30 }
 0x4de   :  { %v11587_v31 = vpop.permute.xlu0 %4304 }
 0x4e2   :  { %v11591_v2 = vpop.permute.xlu0 %4316 }
 0x4e3   :  { %15293 = vst [vmem:[#allocation62_spill] sm:$0xff] %v11591_v2  ;;  %v3758_v2 = vmul.f32 -0.2, %v3710_v7  ;;  %v15303_v7 = vld [vmem:[#allocation95_spill] sm:$0xff] }
 0x4e4   :  { %v3713_v62 = vadd.f32 %v11298_v11, %v15303_v7  ;;  %v15311_v7 = vld [vmem:[#allocation77_spill] sm:$0xff] }
 0x4e5   :  { %v11610_v61 = vsel %vm3726_vm3, %v3742_v37, %v3758_v2 }
 0x4e6   :  { %v3278_v36 = vpop.permute.xlu0 %3277  ;;  %15302 = vst [vmem:[#allocation44_spill] sm:$0xff] %v11610_v61  ;;  %v3790_v51 = vsel %vm15296_vm12, %v11610_v61, -1e+30  ;;  %v3745_v2 = vsub.f32 0.0, %v3713_v62  ;;  %vm3729_vm3 = vcmp.gt.f32.partialorder %v3713_v62, 0.0  ;;  %v15316_v61 = vld [vmem:[#allocation91_spill] sm:$0xff] }
 0x4e7   :  { %v3296_v25 = vsel %vm15297_vm15, %v3278_v36, 1065369472  ;;  %v3712_v36 = vadd.f32 %v11298_v11, %v15301_v63  ;;  %vm3727_vm15 = vcmp.gt.f32.partialorder %v3711_v60, 0.0  ;;  %v3761_v60 = vmul.f32 -0.2, %v3713_v62 }
 0x4e8   :  { %3169 = vmax.xlane.f32.xlu1 %v3145_v47  ;;  %8156 = vmatprep.subr.bf16.mxu0 %v3296_v25  ;;  %v11617_v47 = vsel %vm3727_vm15, %v3743_v5, %v3759_v35  ;;  %v3069_v62 = vadd.f32 %v11211_v27, %v15311_v7  ;;  %vm15334_vm12 = vcmask 130048  }
 0x4e9   :  { %8157 = vmatpush3.bf16.msra.mxu0 %v3296_v25  ;;  %v3744_v12 = vsub.f32 0.0, %v3712_v36  ;;  %v3760_v25 = vmul.f32 -0.2, %v3712_v36  ;;  %15304 = vst [vmem:[#allocation69_spill] sm:$0xff] %v11617_v47  ;;  %vm3728_vm13 = vcmp.gt.f32.partialorder %v3712_v36, 0.0  ;;  %v11631_v5 = vsel %vm3729_vm3, %v3745_v2, %v3761_v60  ;;  %v15313_v2 = vld [vmem:[#allocation108_spill] sm:$0xff] }
 0x4ea   :  { %v3791_v63 = vsel %vm10428_vm14, %v11617_v47, -1e+30  ;;  %15308 = vst [vmem:[#allocation83_spill] sm:$0xff] %v11631_v5  ;;  %v3793_v36 = vsel %vm15300_vm7, %v11631_v5, -1e+30  ;;  %v3071_v60 = vadd.f32 %v11211_v27, %v15313_v2  ;;  %vm3085_vm15 = vcmp.gt.f32.partialorder %v3069_v62, 0.0  ;;  %v11658_v7 = vpop.permute.xlu0 %4332 }
 0x4eb   :  { %v11624_v37 = vsel %vm3728_vm13, %v3744_v12, %v3760_v25  ;;  %v3117_v22 = vmul.f32 -0.2, %v3069_v62  ;;  %15315 = vst [vmem:[#allocation87_spill] sm:$0xff] %v11658_v7  ;;  %vm15317_vm3 = vnez %v15316_v61 }
 0x4ec   :  { %3175 = vmax.xlane.f32.xlu1 %v3148_v57  ;;  %15306 = vst [vmem:[#allocation67_spill] sm:$0xff] %v11624_v37  ;;  %v15307_v57 = vld [vmem:[#allocation18_spill] sm:$0xff]  ;;  %v3792_v35 = vsel %vm15037_vm0, %v11624_v37, -1e+30  ;;  %v3103_v30 = vsub.f32 0.0, %v3071_v60  ;;  %v3072_v37 = vadd.f32 %v11211_v27, %v15314_v24  ;;  %vm3087_vm13 = vcmp.gt.f32.partialorder %v3071_v60, 0.0 }
 0x4ed   :  { %v3119_v52 = vmul.f32 -0.2, %v3071_v60 }
 0x4ee   :  { %vm3088_vm7 = vcmp.gt.f32.partialorder %v3072_v37, 0.0 }
 0x4ef   :  { %v11665_v47 = vsel %vm3087_vm13, %v3103_v30, %v3119_v52 }
 0x4f0   :  { %3814 = vmax.xlane.f32.xlu1 %v3790_v51 }
 0x4f1   :  { %3281 = vrot.lane.b32.xlu0 %v15305_v1, %s9808_s13 }
 0x4f4   :  { %3816 = vmax.xlane.f32.xlu1 %v3791_v63 }
 0x4f5   :  { %3283 = vrot.lane.b32.xlu0 %v15307_v57, %s9808_s13 }
 0x4f8   :  { %3818 = vmax.xlane.f32.xlu1 %v3792_v35  ;;  %v3101_v35 = vsub.f32 0.0, %v3069_v62  ;;  %v3120_v62 = vmul.f32 -0.2, %v3072_v37 }
 0x4f9   :  { %3928 = vrot.lane.b32.xlu0 %v15307_v57, %s9809_s14 }
 0x4fa   :  { %v11656_v5 = vsel %vm3085_vm15, %v3101_v35, %v3117_v22  ;;  %v15319_v22 = vld [vmem:[#allocation92_spill] sm:$0xff] }
 0x4fb   :  { %v3149_v2 = vsel %vm15317_vm3, %v11656_v5, -1e+30  ;;  %vm15320_vm15 = vnez %v15319_v22 }
 0x4fc   :  { %3820 = vmax.xlane.f32.xlu1 %v3793_v36  ;;  %v3151_v60 = vsel %vm15320_vm15, %v11665_v47, -1e+30 }
 0x503   :  { %v11638_v51 = vpop.xlane.xlu1 %3163 }
 0x507   :  { %v11640_v12 = vpop.xlane.xlu1 %3806 }
 0x508   :  { %15309 = vst [vmem:[#allocation51_spill] sm:$0xff] %v11640_v12 }
 0x50b   :  { %v11642_v25 = vpop.xlane.xlu1 %3808 }
 0x50c   :  { %15310 = vst [vmem:[#allocation103_spill] sm:$0xff] %v11642_v25 }
 0x50d   :  { %3926 = vrot.lane.b32.xlu1 %v15305_v1, %s9809_s14 }
 0x50f   :  { %v11648_v63 = vpop.xlane.xlu1 %3810 }
 0x510   :  { %15312 = vst [vmem:[#allocation41_spill] sm:$0xff] %v11648_v63  ;;  %v3104_v63 = vsub.f32 0.0, %v3072_v37 }
 0x512   :  { %v11674_v35 = vsel %vm3088_vm7, %v3104_v63, %v3120_v62 }
 0x513   :  { %v11652_v36 = vpop.permute.xlu1 %4284 }
 0x517   :  { %v11660_v57 = vpop.permute.xlu1 %4288  ;;  %v11667_v1 = vpop.xlane.xlu0 %3812 }
 0x518   :  { %3177 = vmax.xlane.f32.xlu0 %v3149_v2  ;;  %15318 = vst [vmem:[#allocation64_spill] sm:$0xff] %v11667_v1  ;;  %v15322_v2 = vld [vmem:[#allocation101_spill] sm:$0xff]  ;;  %v15326_v1 = vld [vmem:[#allocation107_spill] sm:$0xff] }
 0x519   :  { %vm15323_vm13 = vnez %v15322_v2  ;;  %v3070_v23 = vadd.f32 %v11211_v27, %v15326_v1  ;;  %v9796_v2 = vld [vmem:[%s14457_s3] sm:$0xff]  ;;  %s9810_s3 = smov 32  }
 0x51a   :  { %v3152_v52 = vsel %vm15323_vm13, %v11674_v35, -1e+30 }
 0x51b   :  { %v11669_v24 = vpop.permute.xlu1 %4300  ;;  %v3102_v62 = vsub.f32 0.0, %v3070_v23  ;;  %vm3086_vm7 = vcmp.gt.f32.partialorder %v3070_v23, 0.0 }
 0x51c   :  { %3181 = vmax.xlane.f32.xlu0 %v3151_v60  ;;  %v3118_v60 = vmul.f32 -0.2, %v3070_v23 }
 0x51f   :  { %v11676_v7 = vpop.permute.xlu0 %4949  ;;  %v11678_v12 = vpop.permute.xlu1 %4308 }
 0x520   :  { %15321 = vst [vmem:[#allocation123_spill] sm:$0xff] %v11676_v7  ;;  %3183 = vmax.xlane.f32.xlu0 %v3152_v52  ;;  %v15329_v7 = vld [vmem:[#allocation109_spill] sm:$0xff] }
 0x521   :  { %v3714_v3 = vadd.f32 %v11298_v11, %v15329_v7  ;;  %v11708_v7 = vsel %vm3086_vm7, %v3102_v62, %v3118_v60  ;;  %vm15352_vm7 = vcmask 130048  }
 0x522   :  { %15337 = vst [vmem:[#allocation88_spill] sm:$0xff] %v11708_v7 }
 0x523   :  { %v11683_v30 = vpop.permute.xlu0 %4957  ;;  %v11685_v37 = vpop.permute.xlu1 %4312  ;;  %v3746_v1 = vsub.f32 0.0, %v3714_v3  ;;  %vm3730_vm0 = vcmp.gt.f32.partialorder %v3714_v3, 0.0 }
 0x524   :  { %15324 = vst [vmem:[#allocation86_spill] sm:$0xff] %v11683_v30  ;;  %15325 = vst [vmem:[#allocation60_spill] sm:$0xff] %v11685_v37 }
 0x527   :  { %v11689_v45 = vpop.permute.xlu0 %4969  ;;  %v11691_v63 = vpop.permute.xlu1 %4320 }
 0x528   :  { %15327 = vst [vmem:[#allocation68_spill] sm:$0xff] %v11689_v45  ;;  %15328 = vst [vmem:[#allocation53_spill] sm:$0xff] %v11691_v63  ;;  %v3762_v45 = vmul.f32 -0.2, %v3714_v3  ;;  %v15335_v63 = vld [vmem:[#allocation3_spill] sm:$0xff] }
 0x529   :  { %v11695_v13 = vpop.f32.mrb[32].mxu1  ;;  %v3715_v25 = vadd.f32 %v11298_v11, %v15335_v63  ;;  %v3716_v63 = vadd.f32 %v11298_v11, %v15342_v0 }
 0x52a   :  { %15330 = vst [vmem:[#allocation96_spill] sm:$0xff] %v11695_v13  ;;  %v11697_v52 = vpop.f32.mrb[33].mxu1  ;;  %v11721_v62 = vsel %vm3730_vm0, %v3746_v1, %v3762_v45 }
 0x52b   :  { %15331 = vst [vmem:[#allocation45_spill] sm:$0xff] %v11697_v52  ;;  %v3923_v30 = vpop.permute.xlu0 %3922  ;;  %v11699_v34 = vpop.f32.mrb[34].mxu1  ;;  %v15340_v52 = vld [vmem:[#allocation98_spill] sm:$0xff]  ;;  %v3794_v0 = vsel %vm15317_vm3, %v11721_v62, -1e+30  ;;  %vm3732_vm0 = vcmp.gt.f32.partialorder %v3716_v63, 0.0 }
 0x52c   :  { %15332 = vst [vmem:[#allocation125_spill] sm:$0xff] %v11699_v34  ;;  %v11701_v37 = vpop.permute.xlu1 %4324  ;;  %v3941_v27 = vsel %vm15334_vm12, %v3923_v30, 1065369472  ;;  %v11706_v58 = vpop.f32.mrb[35].mxu1  ;;  %vm15341_vm14 = vnez %v15340_v52  ;;  %v3747_v34 = vsub.f32 0.0, %v3715_v25  ;;  %vm3731_vm12 = vcmp.gt.f32.partialorder %v3715_v25, 0.0 }
 0x52d   :  { %15333 = vst [vmem:[#allocation65_spill] sm:$0xff] %v11701_v37  ;;  %15336 = vst [vmem:[#allocation97_spill] sm:$0xff] %v11706_v58  ;;  %8188 = vmatprep.subr.bf16.mxu1 %v3941_v27  ;;  %v3150_v30 = vsel %vm15341_vm14, %v11708_v7, -1e+30  ;;  %v3763_v37 = vmul.f32 -0.2, %v3715_v25 }
 0x52e   :  { %8189 = vmatpush3.bf16.msra.mxu1 %v3941_v27  ;;  %v3764_v7 = vmul.f32 -0.2, %v3716_v63  ;;  %v15350_v25 = vld [vmem:[#allocation21_spill] sm:$0xff] }
 0x52f   :  { %v11710_v23 = vpop.permute.xlu0 %4973  ;;  %v11738_v1 = vsel %vm3731_vm12, %v3747_v34, %v3763_v37  ;;  %v15354_v34 = vld [vmem:[#allocation24_spill] sm:$0xff] }
 0x530   :  { %15338 = vst [vmem:[#allocation55_spill] sm:$0xff] %v11710_v23  ;;  %v11712_v13 = vpop.permute.xlu1 %4328 }
 0x531   :  { %15339 = vst [vmem:[#allocation120_spill] sm:$0xff] %v11712_v13  ;;  %3179 = vmax.xlane.f32.xlu1 %v3150_v30  ;;  %v11719_v58 = vpop.f32.mrb[36].mxu1  ;;  %v3748_v30 = vsub.f32 0.0, %v3716_v63 }
 0x532   :  { %15343 = vst [vmem:[#allocation81_spill] sm:$0xff] %v11719_v58  ;;  %v11723_v60 = vpop.f32.mrb[37].mxu1  ;;  %v15349_v58 = vld [vmem:[#allocation111_spill] sm:$0xff] }
 0x533   :  { %15344 = vst [vmem:[#allocation128_spill] sm:$0xff] %v11723_v60  ;;  %v11725_v3 = vpop.permute.xlu0 %4985  ;;  %v11727_v27 = vpop.f32.mrb[38].mxu1  ;;  %v3717_v45 = vadd.f32 %v11298_v11, %v15349_v58  ;;  %v11750_v58 = vsel %vm3732_vm0, %v3748_v30, %v3764_v7  ;;  %vm15360_vm0 = vmmov %vm15352_vm7  ;;  %v15477_v18 = vld [vmem:[#allocation125_spill] sm:$0xff] }
 0x534   :  { %15345 = vst [vmem:[#allocation82_spill] sm:$0xff] %v11725_v3  ;;  %15346 = vst [vmem:[#allocation124_spill] sm:$0xff] %v11727_v27  ;;  %v11729_v23 = vpop.permute.xlu1 %4336  ;;  %v11731_v13 = vpop.f32.mrb[39].mxu1 }
 0x535   :  { %15347 = vst [vmem:[#allocation66_spill] sm:$0xff] %v11729_v23  ;;  %15348 = vst [vmem:[#allocation4_spill] sm:$0xff] %v11731_v13  ;;  %3822 = vmax.xlane.f32.xlu1 %v3794_v0  ;;  %v3795_v13 = vsel %vm15341_vm14, %v11738_v1, -1e+30  ;;  %v3749_v61 = vsub.f32 0.0, %v3717_v45  ;;  %vm3733_vm12 = vcmp.gt.f32.partialorder %v3717_v45, 0.0 }
 0x536   :  { %3285 = vrot.lane.b32.xlu0 %v15350_v25, %s9808_s13  ;;  %v3765_v23 = vmul.f32 -0.2, %v3717_v45 }
 0x537   :  { %v3925_v27 = vpop.permute.xlu0 %3924 }
 0x538   :  { %v11742_v60 = vpop.permute.xlu1 %4340  ;;  %v3944_v3 = vsel %vm15352_vm7, %v3925_v27, 1065369472  ;;  %v11765_v7 = vsel %vm3733_vm12, %v3749_v61, %v3765_v23 }
 0x539   :  { %15351 = vst [vmem:[#allocation5_spill] sm:$0xff] %v11742_v60  ;;  %3824 = vmax.xlane.f32.xlu1 %v3795_v13  ;;  %v11748_v11 = vpop.f32.mrb[40].mxu1  ;;  %8190 = vmatprep.subr.bf16.mxu1 %v3944_v3  ;;  %v3796_v13 = vsel %vm15320_vm15, %v11750_v58, -1e+30 }
 0x53a   :  { %15353 = vst [vmem:[#allocation10_spill] sm:$0xff] %v11748_v11  ;;  %3287 = vrot.lane.b32.xlu0 %v15354_v34, %s9808_s13  ;;  %v11754_v37 = vpop.f32.mrb[41].mxu1  ;;  %8191 = vmatpush3.bf16.msra.mxu1 %v3944_v3  ;;  %v3797_v3 = vsel %vm15323_vm13, %v11765_v7, -1e+30  ;;  %vm15367_vm13 = vnez %v14902_v40  ;;  %v3190_v40 = vsub.f32 %v11428_v8, %v11638_v51  ;;  %v3192_v8 = vsub.f32 %v11348_v15, %v11557_v20 }
 0x53b   :  { %15355 = vst [vmem:[#allocation13_spill] sm:$0xff] %v11754_v37  ;;  %v11756_v63 = vpop.f32.mrb[42].mxu1 }
 0x53c   :  { %15356 = vst [vmem:[#allocation14_spill] sm:$0xff] %v11756_v63  ;;  %v11758_v0 = vpop.permute.xlu1 %4977  ;;  %v11760_v27 = vpop.f32.mrb[43].mxu1 }
 0x53d   :  { %15357 = vst [vmem:[#allocation17_spill] sm:$0xff] %v11758_v0  ;;  %15358 = vst [vmem:[#allocation19_spill] sm:$0xff] %v11760_v27  ;;  %3826 = vmax.xlane.f32.xlu1 %v3796_v13  ;;  %v15362_v13 = vld [vmem:[#allocation32_spill] sm:$0xff] }
 0x53e   :  { %3932 = vrot.lane.b32.xlu0 %v15354_v34, %s9809_s14  ;;  %v4345_v61 = vsub.s32 6, %v15362_v13 }
 0x540   :  { %v11769_v30 = vpop.permute.xlu1 %4981 }
 0x541   :  { %15359 = vst [vmem:[#allocation20_spill] sm:$0xff] %v11769_v30  ;;  %3828 = vmax.xlane.f32.xlu1 %v3797_v3  ;;  %v11787_v3 = vrot.slane %v9796_v2, %v4345_v61 }
 0x544   :  { %v3280_v45 = vpop.permute.xlu1 %3279 }
 0x545   :  { %v3299_v63 = vsel %vm15360_vm0, %v3280_v45, 1065369472  ;;  %v4347_v45 = vadd.f32 %v11787_v3, %v11565_v48 }
 0x546   :  { %8158 = vmatprep.subr.bf16.mxu0 %v3299_v63 }
 0x547   :  { %8159 = vmatpush3.bf16.msra.mxu0 %v3299_v63  ;;  %v4379_v63 = vsub.f32 0.0, %v4347_v45  ;;  %vm4363_vm7 = vcmp.gt.f32.partialorder %v4347_v45, 0.0 }
 0x548   :  { %v11775_v27 = vpop.f32.mrb[44].mxu1 }
 0x549   :  { %15361 = vst [vmem:[#allocation23_spill] sm:$0xff] %v11775_v27  ;;  %v11778_v23 = vpop.f32.mrb[45].mxu1  ;;  %v4395_v27 = vmul.f32 -0.2, %v4347_v45 }
 0x54a   :  { %15363 = vst [vmem:[#allocation2_spill] sm:$0xff] %v11778_v23  ;;  %v11780_v11 = vpop.f32.mrb[46].mxu1  ;;  %v4349_v23 = vadd.f32 %v11787_v3, %v11660_v57 }
 0x54b   :  { %15364 = vst [vmem:[#allocation25_spill] sm:$0xff] %v11780_v11  ;;  %v11782_v37 = vpop.f32.mrb[47].mxu1  ;;  %v11797_v0 = vsel %vm4363_vm7, %v4379_v63, %v4395_v27  ;;  %vm15372_vm7 = vnez %v14911_v16  ;;  %v3206_v16 = vmin.f32 %v3190_v40, 0.0  ;;  %v9812_v40 = vmov 16  }
 0x54c   :  { %15365 = vst [vmem:[#allocation12_spill] sm:$0xff] %v11782_v37  ;;  %v4350_v37 = vadd.f32 %v11787_v3, %v11571_v17  ;;  %v4381_v11 = vsub.f32 0.0, %v4349_v23  ;;  %v4397_v52 = vmul.f32 -0.2, %v4349_v23  ;;  %vm4365_vm12 = vcmp.gt.f32.partialorder %v4349_v23, 0.0  ;;  %8554 = vset.pattern.permute.xlu0 %v9812_v40  ;;  %8555 = vset.pattern.permute.xlu1 %v9812_v40 }
 0x54d   :  { %v4427_v48 = vsel %vm15205_vm11, %v11797_v0, -1e+30 }
 0x54e   :  { %v4382_v61 = vsub.f32 0.0, %v4350_v37  ;;  %v4398_v60 = vmul.f32 -0.2, %v4350_v37  ;;  %v11802_v22 = vsel %vm4365_vm12, %v4381_v11, %v4397_v52  ;;  %vm4366_vm0 = vcmp.gt.f32.partialorder %v4350_v37, 0.0 }
 0x54f   :  { %15366 = vst [vmem:[#allocation27_spill] sm:$0xff] %v11802_v22  ;;  %v4429_v57 = vsel %vm15367_vm13, %v11802_v22, -1e+30  ;;  %v4990_v37 = vsub.s32 7, %v15362_v13  ;;  %vm15378_vm12 = vcmask 130048  }
 0x550   :  { %v11807_v17 = vsel %vm4366_vm0, %v4382_v61, %v4398_v60  ;;  %v4348_v61 = vadd.f32 %v11787_v3, %v11652_v36  ;;  %vm15379_vm14 = vmmov %vm15378_vm12 }
 0x551   :  { %15368 = vst [vmem:[#allocation46_spill] sm:$0xff] %v11807_v17  ;;  %v4430_v52 = vsel %vm15372_vm7, %v11807_v17, -1e+30  ;;  %v11825_v60 = vrot.slane %v9796_v2, %v4990_v37 }
 0x552   :  { %3930 = vrot.lane.b32.xlu1 %v15350_v25, %s9809_s14  ;;  %v4380_v13 = vsub.f32 0.0, %v4348_v61  ;;  %vm4364_vm0 = vcmp.gt.f32.partialorder %v4348_v61, 0.0 }
 0x55d   :  { %4443 = vmax.xlane.f32.xlu0 %v4427_v48 }
 0x561   :  { %4447 = vmax.xlane.f32.xlu0 %v4429_v57 }
 0x562   :  { %v11809_v27 = vpop.f32.mrb[32].mxu0 }
 0x563   :  { %15369 = vst [vmem:[#allocation33_spill] sm:$0xff] %v11809_v27  ;;  %v11811_v23 = vpop.f32.mrb[33].mxu0 }
 0x564   :  { %15370 = vst [vmem:[#allocation28_spill] sm:$0xff] %v11811_v23  ;;  %v11813_v45 = vpop.xlane.xlu0 %3171  ;;  %v11815_v63 = vpop.f32.mrb[34].mxu0 }
 0x565   :  { %15371 = vst [vmem:[#allocation57_spill] sm:$0xff] %v11815_v63  ;;  %v11820_v11 = vpop.f32.mrb[35].mxu0  ;;  %4449 = vmax.xlane.f32.xlu0 %v4430_v52  ;;  %v4992_v52 = vadd.f32 %v11825_v60, %v11406_v14  ;;  %v3194_v15 = vsub.f32 %v11568_v46, %v11813_v45 }
 0x566   :  { %15373 = vst [vmem:[#allocation75_spill] sm:$0xff] %v11820_v11  ;;  %v4396_v11 = vmul.f32 -0.2, %v4348_v61 }
 0x567   :  { %vm5008_vm15 = vcmp.gt.f32.partialorder %v4992_v52, 0.0 }
 0x568   :  { %v11823_v48 = vpop.xlane.xlu0 %3173 }
 0x56a   :  { %v11829_v57 = vpop.f32.mrb[36].mxu0 }
 0x56b   :  { %15374 = vst [vmem:[#allocation71_spill] sm:$0xff] %v11829_v57  ;;  %v11831_v27 = vpop.f32.mrb[37].mxu0  ;;  %v5024_v57 = vsub.f32 0.0, %v4992_v52 }
 0x56c   :  { %15375 = vst [vmem:[#allocation90_spill] sm:$0xff] %v11831_v27  ;;  %v3282_v63 = vpop.permute.xlu0 %3281  ;;  %v11833_v23 = vpop.f32.mrb[38].mxu0  ;;  %v5040_v27 = vmul.f32 -0.2, %v4992_v52 }
 0x56d   :  { %15376 = vst [vmem:[#allocation95_spill] sm:$0xff] %v11833_v23  ;;  %v11835_v22 = vpop.f32.mrb[39].mxu0  ;;  %v3302_v2 = vsel %vm15378_vm12, %v3282_v63, 1065369472  ;;  %v4993_v23 = vadd.f32 %v11825_v60, %v11412_v50 }
 0x56e   :  { %15377 = vst [vmem:[#allocation77_spill] sm:$0xff] %v11835_v22  ;;  %8160 = vmatprep.subr.bf16.mxu0 %v3302_v2  ;;  %v11845_v22 = vsel %vm4364_vm0, %v4380_v13, %v4396_v11  ;;  %v4994_v11 = vadd.f32 %v11825_v60, %v11419_v54  ;;  %v11860_v13 = vsel %vm5008_vm15, %v5024_v57, %v5040_v27 }
 0x56f   :  { %8161 = vmatpush3.bf16.msra.mxu0 %v3302_v2  ;;  %15381 = vst [vmem:[#allocation61_spill] sm:$0xff] %v11845_v22  ;;  %v5025_v50 = vsub.f32 0.0, %v4993_v23  ;;  %v5041_v30 = vmul.f32 -0.2, %v4993_v23  ;;  %vm5009_vm12 = vcmp.gt.f32.partialorder %v4993_v23, 0.0 }
 0x570   :  { %v3284_v36 = vpop.permute.xlu0 %3283  ;;  %vm5010_vm15 = vcmp.gt.f32.partialorder %v4994_v11, 0.0 }
 0x571   :  { %v3305_v37 = vsel %vm15379_vm14, %v3284_v36, 1065369472  ;;  %vm15385_vm14 = vnez %v14896_v42 }
 0x572   :  { %v11843_v17 = vpop.f32.mrb[40].mxu0  ;;  %8162 = vmatprep.subr.bf16.mxu0 %v3305_v37  ;;  %v4428_v36 = vsel %vm15385_vm14, %v11845_v22, -1e+30  ;;  %v11871_v22 = vsel %vm5009_vm12, %v5025_v50, %v5041_v30  ;;  %vm15391_vm12 = vcmask 130048  }
 0x573   :  { %15380 = vst [vmem:[#allocation108_spill] sm:$0xff] %v11843_v17  ;;  %v11847_v14 = vpop.f32.mrb[41].mxu0  ;;  %8163 = vmatpush3.bf16.msra.mxu0 %v3305_v37  ;;  %v5072_v37 = vsel %vm15205_vm11, %v11860_v13, -1e+30  ;;  %v4995_v17 = vadd.f32 %v11825_v60, %v11424_v33  ;;  %v5073_v33 = vsel %vm15385_vm14, %v11871_v22, -1e+30 }
 0x574   :  { %15382 = vst [vmem:[#allocation107_spill] sm:$0xff] %v11847_v14  ;;  %v11849_v63 = vpop.f32.mrb[42].mxu0 }
 0x575   :  { %15383 = vst [vmem:[#allocation109_spill] sm:$0xff] %v11849_v63  ;;  %v11851_v61 = vpop.f32.mrb[43].mxu0  ;;  %v11853_v2 = vpop.xlane.xlu1 %3169  ;;  %v5026_v63 = vsub.f32 0.0, %v4994_v11  ;;  %v5043_v30 = vmul.f32 -0.2, %v4995_v17  ;;  %vm5011_vm0 = vcmp.gt.f32.partialorder %v4995_v17, 0.0 }
 0x576   :  { %15384 = vst [vmem:[#allocation3_spill] sm:$0xff] %v11851_v61  ;;  %4445 = vmax.xlane.f32.xlu1 %v4428_v36  ;;  %v5042_v61 = vmul.f32 -0.2, %v4994_v11  ;;  %v5027_v36 = vsub.f32 0.0, %v4995_v17 }
 0x578   :  { %v11886_v50 = vsel %vm5010_vm15, %v5026_v63, %v5042_v61  ;;  %vm15392_vm15 = vmmov %vm15391_vm12 }
 0x579   :  { %v11862_v52 = vpop.xlane.xlu1 %3175  ;;  %v5074_v59 = vsel %vm15367_vm13, %v11886_v50, -1e+30 }
 0x57a   :  { %v11869_v14 = vpop.f32.mrb[44].mxu0  ;;  %5088 = vmax.xlane.f32.xlu1 %v5072_v37  ;;  %v15390_v37 = vld [vmem:[#allocation6_spill] sm:$0xff]  ;;  %v3196_v46 = vsub.f32 %v11603_v49, %v11862_v52  ;;  %v4996_v52 = vadd.f32 %v11825_v60, %v11436_v39 }
 0x57b   :  { %15386 = vst [vmem:[#allocation110_spill] sm:$0xff] %v11869_v14  ;;  %v11873_v54 = vpop.f32.mrb[45].mxu0  ;;  %4563 = vrot.lane.b32.xlu0 %v15046_v38, %s9810_s3 }
 0x57c   :  { %15387 = vst [vmem:[#allocation111_spill] sm:$0xff] %v11873_v54  ;;  %v11877_v27 = vpop.f32.mrb[46].mxu0  ;;  %v3212_v49 = vmin.f32 %v3196_v46, 0.0 }
 0x57d   :  { %15388 = vst [vmem:[#allocation21_spill] sm:$0xff] %v11877_v27  ;;  %v11879_v23 = vpop.f32.mrb[47].mxu0  ;;  %v11881_v57 = vpop.xlane.xlu1 %3814 }
 0x57e   :  { %15389 = vst [vmem:[#allocation24_spill] sm:$0xff] %v11879_v23  ;;  %5090 = vmax.xlane.f32.xlu1 %v5073_v33  ;;  %v11895_v23 = vsel %vm5011_vm0, %v5027_v36, %v5043_v30  ;;  %v3239_v39 = vmul.f32 1.442695, %v3212_v49 }
 0x57f   :  { %4565 = vrot.lane.b32.xlu0 %v15390_v37, %s9810_s3  ;;  %v5075_v63 = vsel %vm15372_vm7, %v11895_v23, -1e+30 }
 0x581   :  { %v11890_v11 = vpop.xlane.xlu1 %3816 }
 0x582   :  { %5092 = vmax.xlane.f32.xlu1 %v5074_v59  ;;  %v3929_v59 = vpop.permute.xlu0 %3928 }
 0x583   :  { %5210 = vrot.lane.b32.xlu0 %v15390_v37, %s9811_s17  ;;  %v3950_v30 = vsel %vm15392_vm15, %v3929_v59, 1065369472  ;;  %v4352_v59 = vadd.f32 %v11787_v3, %v11669_v24  ;;  %v3227_v24 = vmul.f32 1.442695, %v3206_v16  ;;  %v3208_v16 = vmin.f32 %v3192_v8, 0.0 }
 0x585   :  { %v11899_v33 = vpop.xlane.xlu1 %3818  ;;  %vm4368_vm0 = vcmp.gt.f32.partialorder %v4352_v59, 0.0 }
 0x586   :  { %5094 = vmax.xlane.f32.xlu1 %v5075_v63  ;;  %v15394_v63 = vld [vmem:[#allocation29_spill] sm:$0xff] }
 0x587   :  { %4567 = vrot.lane.b32.xlu0 %v15085_v10, %s9810_s3 }
 0x589   :  { %v11906_v17 = vpop.xlane.xlu1 %3820 }
 0x58b   :  { %5212 = vrot.lane.b32.xlu0 %v15085_v10, %s9811_s17  ;;  %v15393_v10 = vld [vmem:[#allocation35_spill] sm:$0xff] }
 0x58c   :  { %v3188_v37 = vsub.f32 %v15393_v10, %v11542_v44  ;;  %v4384_v44 = vsub.f32 0.0, %v4352_v59  ;;  %v4400_v10 = vmul.f32 -0.2, %v4352_v59 }
 0x58d   :  { %v3927_v61 = vpop.permute.xlu1 %3926 }
 0x58e   :  { %v3947_v36 = vsel %vm15391_vm12, %v3927_v61, 1065369472  ;;  %v3187_v61 = vsub.f32 %v15394_v63, %v11484_v4  ;;  %v11940_v59 = vsel %vm4368_vm0, %v4384_v44, %v4400_v10  ;;  %vm15395_vm0 = vmmov %vm15392_vm15 }
 0x58f   :  { %5214 = vrot.lane.b32.xlu0 %v15279_v9, %s9811_s17  ;;  %8192 = vmatprep.subr.bf16.mxu1 %v3947_v36 }
 0x590   :  { %8193 = vmatpush3.bf16.msra.mxu1 %v3947_v36  ;;  %v3189_v36 = vsub.f32 %v11328_v26, %v11545_v21  ;;  %v3193_v26 = vsub.f32 %v11595_v28, %v11853_v2  ;;  %v4432_v2 = vsel %vm15232_vm9, %v11940_v59, -1e+30 }
 0x591   :  { %8194 = vmatprep.subr.bf16.mxu1 %v3950_v30 }
 0x592   :  { %v3205_v4 = vmin.f32 %v3189_v36, 0.0  ;;  %v3209_v20 = vmin.f32 %v3193_v26, 0.0 }
 0x594   :  { %8195 = vmatpush3.bf16.msra.mxu1 %v3950_v30  ;;  %v3204_v30 = vmin.f32 %v3188_v37, 0.0  ;;  %v3225_v36 = vmul.f32 1.442695, %v3205_v4  ;;  %v3233_v45 = vmul.f32 1.442695, %v3209_v20  ;;  %v4351_v4 = vadd.f32 %v11787_v3, %v11578_v29 }
 0x595   :  { %v5028_v20 = vsub.f32 0.0, %v4996_v52 }
 0x596   :  { %v3223_v63 = vmul.f32 1.442695, %v3204_v30  ;;  %v3210_v30 = vmin.f32 %v3194_v15, 0.0  ;;  %v4383_v40 = vsub.f32 0.0, %v4351_v4 }
 0x597   :  { %5208 = vrot.lane.b32.xlu1 %v15046_v38, %s9811_s17  ;;  %v3203_v38 = vmin.f32 %v3187_v61, 0.0 }
 0x598   :  { %9002 = vpow2.f32 %v3223_v63  ;;  %v3195_v63 = vsub.f32 %v11576_v6, %v11823_v48  ;;  %v4399_v48 = vmul.f32 -0.2, %v4351_v4 }
 0x599   :  { %v3221_v51 = vmul.f32 1.442695, %v3203_v38  ;;  %9004 = vpow2.f32 %v3227_v24  ;;  %v3231_v38 = vmul.f32 1.442695, %v3208_v16 }
 0x59a   :  { %v3211_v29 = vmin.f32 %v3195_v63, 0.0  ;;  %v15396_v63 = vld [vmem:[#allocation88_spill] sm:$0xff] }
 0x59b   :  { %4569 = vrot.lane.b32.xlu1 %v15279_v9, %s9810_s3  ;;  %v4353_v9 = vadd.f32 %v11787_v3, %v11587_v31  ;;  %v3191_v31 = vsub.f32 %v11340_v19, %v11551_v32  ;;  %9006 = vpow2.f32 %v3221_v51  ;;  %v3235_v51 = vmul.f32 1.442695, %v3210_v30 }
 0x59c   :  { %9008 = vpow2.f32 %v3225_v36  ;;  %v3237_v30 = vmul.f32 1.442695, %v3211_v29  ;;  %v15397_v29 = vld [vmem:[#allocation42_spill] sm:$0xff] }
 0x59d   :  { %v4385_v37 = vsub.f32 0.0, %v4353_v9  ;;  %v4401_v61 = vmul.f32 -0.2, %v4353_v9  ;;  %vm4369_vm12 = vcmp.gt.f32.partialorder %v4353_v9, 0.0  ;;  %v3207_v19 = vmin.f32 %v3191_v31, 0.0 }
 0x59e   :  { %9010 = vpow2.f32 %v3231_v38 }
 0x59f   :  { %v11947_v32 = vsel %vm4369_vm12, %v4385_v37, %v4401_v61  ;;  %v3229_v10 = vmul.f32 1.442695, %v3207_v19  ;;  %9012 = vpow2.f32 %v3233_v45  ;;  %v4354_v37 = vadd.f32 %v11787_v3, %v11678_v12 }
 0x5a0   :  { %v4433_v44 = vsel %vm10411_vm6, %v11947_v32, -1e+30  ;;  %vm4367_vm12 = vcmp.gt.f32.partialorder %v4351_v4, 0.0  ;;  %v5044_v19 = vmul.f32 -0.2, %v4996_v52 }
 0x5a1   :  { %9014 = vpow2.f32 %v3229_v10  ;;  %v4386_v46 = vsub.f32 0.0, %v4354_v37  ;;  %v4402_v45 = vmul.f32 -0.2, %v4354_v37 }
 0x5a2   :  { %v9003_v26 = vpop.eup %9002  ;;  %9016 = vpow2.f32 %v3235_v51 }
 0x5a3   :  { %v9005_v6 = vpop.eup %9004  ;;  %9018 = vpow2.f32 %v3239_v39 }
 0x5a4   :  { %9020 = vpow2.f32 %v3237_v30 }
 0x5a5   :  { %v11928_v42 = vpop.xlane.xlu0 %3177  ;;  %v9007_v36 = vpop.eup %9006 }
 0x5a6   :  { %v3197_v61 = vsub.f32 %v11656_v5, %v11928_v42  ;;  %v9009_v16 = vpop.eup %9008  ;;  %v11971_v42 = vsel %vm4367_vm12, %v4383_v40, %v4399_v48  ;;  %v4997_v5 = vadd.f32 %v11825_v60, %v11449_v43 }
 0x5a7   :  { %v7599_v12 = vpack.c.bf16 %v9005_v6, %v9009_v16 }
 0x5a8   :  { %v5029_v49 = vsub.f32 0.0, %v4997_v5  ;;  %v5045_v40 = vmul.f32 -0.2, %v4997_v5  ;;  %vm5013_vm12 = vcmp.gt.f32.partialorder %v4997_v5, 0.0 }
 0x5a9   :  { %v11936_v21 = vpop.xlane.xlu0 %3181 }
 0x5aa   :  { %v3199_v38 = vsub.f32 %v11665_v47, %v11936_v21  ;;  %v9011_v47 = vpop.eup %9010 }
 0x5ab   :  { %v9013_v10 = vpop.eup %9012 }
 0x5ac   :  { %v3215_v21 = vmin.f32 %v3199_v38, 0.0  ;;  %v9015_v51 = vpop.eup %9014 }
 0x5ad   :  { %v3184_v28 = vpop.xlane.xlu0 %3183 }
 0x5ae   :  { %4453 = vmax.xlane.f32.xlu0 %v4432_v2  ;;  %v3200_v15 = vsub.f32 %v11674_v35, %v3184_v28  ;;  %v7596_v2 = vpack.c.bf16 %v9003_v26, %v9007_v36  ;;  %v15400_v36 = vld [vmem:[#allocation36_spill] sm:$0xff] }
 0x5b0   :  { %v3216_v35 = vmin.f32 %v3200_v15, 0.0  ;;  %v3245_v15 = vmul.f32 1.442695, %v3215_v21  ;;  %v15407_v21 = vld [vmem:[#allocation49_spill] sm:$0xff] }
 0x5b1   :  { %v3286_v9 = vpop.permute.xlu0 %3285 }
 0x5b2   :  { %4455 = vmax.xlane.f32.xlu0 %v4433_v44  ;;  %v3308_v8 = vsel %vm15392_vm15, %v3286_v9, 1065369472  ;;  %v3213_v9 = vmin.f32 %v3197_v61, 0.0  ;;  %vm4370_vm15 = vcmp.gt.f32.partialorder %v4354_v37, 0.0  ;;  %v4431_v44 = vsel %vm10268_vm5, %v11971_v42, -1e+30 }
 0x5b3   :  { %8164 = vmatprep.subr.bf16.mxu0 %v3308_v8  ;;  %v11981_v43 = vsel %vm4370_vm15, %v4386_v46, %v4402_v45  ;;  %v7602_v37 = vpack.c.bf16 %v9011_v47, %v9015_v51  ;;  %v15399_v61 = vld [vmem:[#allocation103_spill] sm:$0xff] }
 0x5b4   :  { %8165 = vmatpush3.bf16.msra.mxu0 %v3308_v8  ;;  %v3241_v4 = vmul.f32 1.442695, %v3213_v9  ;;  %v3835_v39 = vsub.f32 %v15400_v36, %v15399_v61  ;;  %v4434_v30 = vsel %vm10350_vm4, %v11981_v43, -1e+30  ;;  %v15404_v46 = vld [vmem:[#allocation123_spill] sm:$0xff] }
 0x5b5   :  { %v3288_v24 = vpop.permute.xlu0 %3287  ;;  %v4998_v45 = vadd.f32 %v11825_v60, %v15404_v46  ;;  %v15406_v47 = vld [vmem:[#allocation51_spill] sm:$0xff] }
 0x5b6   :  { %v3311_v31 = vsel %vm15395_vm0, %v3288_v24, 1065369472  ;;  %vm5012_vm0 = vcmp.gt.f32.partialorder %v4996_v52, 0.0  ;;  %v3247_v24 = vmul.f32 1.442695, %v3216_v35  ;;  %v9017_v52 = vpop.eup %9016  ;;  %9022 = vpow2.f32 %v3241_v4  ;;  %v15410_v61 = vld [vmem:[#allocation15_spill] sm:$0xff] }
 0x5b7   :  { %8166 = vmatprep.subr.bf16.mxu0 %v3311_v31  ;;  %v11983_v26 = vsel %vm5012_vm0, %v5028_v20, %v5044_v19  ;;  %v7605_v38 = vpack.c.bf16 %v9017_v52, %v9013_v10  ;;  %v15402_v20 = vld [vmem:[#allocation22_spill] sm:$0xff]  ;;  %v15403_v19 = vld [vmem:[#allocation39_spill] sm:$0xff]  ;;  %v3851_v4 = vmin.f32 %v3835_v39, 0.0  ;;  %vm5014_vm15 = vcmp.gt.f32.partialorder %v4998_v45, 0.0  ;;  %v15411_v39 = vld [vmem:[#allocation64_spill] sm:$0xff] }
 0x5b8   :  { %8167 = vmatpush3.bf16.msra.mxu0 %v3311_v31  ;;  %v15398_v31 = vld [vmem:[#allocation26_spill] sm:$0xff]  ;;  %9024 = vpow2.f32 %v3247_v24  ;;  %v5030_v24 = vsub.f32 0.0, %v4998_v45 }
 0x5b9   :  { %v3833_v6 = vsub.f32 %v15398_v31, %v15397_v29  ;;  %v5076_v29 = vsel %vm10268_vm5, %v11983_v26, -1e+30 }
 0x5bb   :  { %8169 = vmatmul.mubr.msk.bf16.vlgmr.msra.gmra.mrb[48].mxu0 %vm15090_vm8, %v7596_v2  ;;  %v3849_v10 = vmin.f32 %v3833_v6, 0.0  ;;  %v2768_v2 = vmax.f32 %v15477_v18, 1e-30 }
 0x5bc   :  { %8172 = vmatprep.mubr.msk.bf16.mxu0 %vm15091_vm10, %v7599_v12  ;;  %v3832_v12 = vsub.f32 %v15403_v19, %v15402_v20  ;;  %v3872_v19 = vmul.f32 1.442695, %v3851_v4 }
 0x5bd   :  { %v3868_v36 = vmul.f32 1.442695, %v3849_v10  ;;  %v15416_v10 = vld [vmem:[#allocation106_spill] sm:$0xff] }
 0x5be   :  { %v3180_v28 = vpop.xlane.xlu1 %3179  ;;  %v3848_v31 = vmin.f32 %v3832_v12, 0.0  ;;  %v15413_v12 = vld [vmem:[#allocation69_spill] sm:$0xff]  ;;  %vm15417_vm0 = vnez %v15416_v10 }
 0x5bf   :  { %v3198_v8 = vsub.f32 %v15396_v63, %v3180_v28  ;;  %4451 = vmax.xlane.f32.xlu1 %v4431_v44  ;;  %v3834_v28 = vsub.f32 %v15407_v21, %v15406_v47  ;;  %v9019_v63 = vpop.eup %9018  ;;  %v3839_v46 = vsub.f32 %v15413_v12, %v11890_v11  ;;  %v15414_v21 = vld [vmem:[#allocation41_spill] sm:$0xff]  ;;  %v15418_v11 = vld [vmem:[#allocation44_spill] sm:$0xff] }
 0x5c0   :  { %v9021_v5 = vpop.eup %9020  ;;  %v3866_v47 = vmul.f32 1.442695, %v3848_v31  ;;  %v3838_v4 = vsub.f32 %v15418_v11, %v11881_v57  ;;  %v15423_v11 = vld [vmem:[#allocation67_spill] sm:$0xff] }
 0x5c1   :  { %v3214_v48 = vmin.f32 %v3198_v8, 0.0  ;;  %v15409_v8 = vld [vmem:[#allocation63_spill] sm:$0xff]  ;;  %v3850_v6 = vmin.f32 %v3834_v28, 0.0 }
 0x5c2   :  { %v11989_v16 = vpop.xlane.xlu1 %3822  ;;  %v4999_v51 = vadd.f32 %v11825_v60, %v15409_v8 }
 0x5c3   :  { %v3243_v9 = vmul.f32 1.442695, %v3214_v48  ;;  %4457 = vmax.xlane.f32.xlu1 %v4434_v30  ;;  %8173 = vmatmul.mubr.msk.bf16.gmra.mrb[52].mxu0 %vm10737_vm1, %v7602_v37  ;;  %v5046_v48 = vmul.f32 -0.2, %v4998_v45  ;;  %v12011_v37 = vsel %vm5013_vm12, %v5029_v49, %v5045_v40  ;;  %v15415_v45 = vld [vmem:[#allocation56_spill] sm:$0xff] }
 0x5c4   :  { %8176 = vmatprep.mubr.msk.bf16.mxu0 %vm15220_vm2, %v7605_v38  ;;  %v7608_v38 = vpack.c.bf16 %v9019_v63, %v9021_v5  ;;  %v5031_v20 = vsub.f32 0.0, %v4999_v51  ;;  %v5077_v49 = vsel %vm15232_vm9, %v12011_v37, -1e+30  ;;  %v5047_v40 = vmul.f32 -0.2, %v4999_v51  ;;  %v9023_v5 = vpop.eup %9022 }
 0x5c5   :  { %9026 = vpow2.f32 %v3243_v9  ;;  %v3836_v28 = vsub.f32 %v15415_v45, %v15414_v21  ;;  %v12028_v63 = vsel %vm5014_vm15, %v5030_v24, %v5046_v48  ;;  %v3870_v8 = vmul.f32 1.442695, %v3850_v6  ;;  %v3933_v45 = vpop.permute.xlu0 %3932 }
 0x5c6   :  { %9028 = vpow2.f32 %v3245_v15  ;;  %v12006_v52 = vpop.xlane.xlu1 %3824  ;;  %v15412_v15 = vld [vmem:[#allocation58_spill] sm:$0xff]  ;;  %vm5015_vm12 = vcmp.gt.f32.partialorder %v4999_v51, 0.0  ;;  %v5078_v24 = vsel %vm10411_vm6, %v12028_v63, -1e+30  ;;  %v3854_v51 = vmin.f32 %v3838_v4, 0.0 }
 0x5c7   :  { %5096 = vmax.xlane.f32.xlu1 %v5076_v29  ;;  %v3837_v30 = vsub.f32 %v15412_v15, %v15411_v39  ;;  %v15419_v29 = vld [vmem:[#allocation18_spill] sm:$0xff]  ;;  %9030 = vpow2.f32 %v3868_v36  ;;  %v9025_v39 = vpop.eup %9024  ;;  %v3855_v15 = vmin.f32 %v3839_v46, 0.0  ;;  %v3852_v6 = vmin.f32 %v3836_v28, 0.0  ;;  %v15421_v28 = vld [vmem:[#allocation73_spill] sm:$0xff] }
 0x5c8   :  { %4571 = vrot.lane.b32.xlu0 %v15410_v61, %s9810_s3  ;;  %9032 = vpow2.f32 %v3872_v19  ;;  %v12037_v57 = vsel %vm5015_vm12, %v5031_v20, %v5047_v40  ;;  %v15420_v19 = vld [vmem:[#allocation83_spill] sm:$0xff]  ;;  %vm15422_vm15 = vnez %v15421_v28  ;;  %v3840_v4 = vsub.f32 %v15423_v11, %v11899_v33 }
 0x5c9   :  { %v3853_v31 = vmin.f32 %v3837_v30, 0.0  ;;  %9034 = vpow2.f32 %v3866_v47  ;;  %v3841_v46 = vsub.f32 %v15420_v19, %v11906_v17  ;;  %v3880_v21 = vmul.f32 1.442695, %v3855_v15  ;;  %v15424_v17 = vld [vmem:[#allocation47_spill] sm:$0xff] }
 0x5ca   :  { %v12019_v9 = vpop.xlane.xlu1 %3826  ;;  %9036 = vpow2.f32 %v3870_v8  ;;  %v3843_v47 = vsub.f32 %v11738_v1, %v12006_v52  ;;  %v5079_v40 = vsel %vm10350_vm4, %v12037_v57, -1e+30  ;;  %v3874_v8 = vmul.f32 1.442695, %v3852_v6 }
 0x5cb   :  { %5098 = vmax.xlane.f32.xlu1 %v5077_v49  ;;  %8177 = vmatmul.mubr.msk.bf16.gmra.mrb[56].mxu0 %vm15417_vm0, %v7608_v38  ;;  %v3876_v30 = vmul.f32 1.442695, %v3853_v31  ;;  %vm15425_vm12 = vnez %v15424_v17  ;;  %vm15426_vm6 = vcmask 130048   ;;  %v3842_v1 = vsub.f32 %v11721_v62, %v11989_v16 }
 0x5cc   :  { %4573 = vrot.lane.b32.xlu0 %v15419_v29, %s9810_s3  ;;  %v3857_v52 = vmin.f32 %v3841_v46, 0.0  ;;  %vm15427_vm4 = vmmov %vm15426_vm6  ;;  %v3859_v33 = vmin.f32 %v3843_v47, 0.0  ;;  %v3856_v15 = vmin.f32 %v3840_v4, 0.0  ;;  %v3844_v19 = vsub.f32 %v11750_v58, %v12019_v9 }
 0x5cd   :  { %9038 = vpow2.f32 %v3876_v30  ;;  %v3956_v31 = vsel %vm15427_vm4, %v3933_v45, 1065369472 }
 0x5ce   :  { %v3829_v12 = vpop.xlane.xlu1 %3828  ;;  %9040 = vpow2.f32 %v3880_v21  ;;  %v3884_v16 = vmul.f32 1.442695, %v3857_v52  ;;  %v3882_v30 = vmul.f32 1.442695, %v3856_v15 }
 0x5cf   :  { %v9027_v48 = vpop.eup %9026  ;;  %5100 = vmax.xlane.f32.xlu1 %v5078_v24  ;;  %9042 = vpow2.f32 %v3874_v8  ;;  %v3845_v6 = vsub.f32 %v11765_v7, %v3829_v12  ;;  %v3860_v12 = vmin.f32 %v3844_v19, 0.0 }
 0x5d0   :  { %v9029_v38 = vpop.eup %9028  ;;  %5218 = vrot.lane.b32.xlu0 %v15419_v29, %s9811_s17  ;;  %v7611_v36 = vpack.c.bf16 %v9027_v48, %v9023_v5  ;;  %v3878_v5 = vmul.f32 1.442695, %v3854_v51  ;;  %v3858_v48 = vmin.f32 %v3842_v1, 0.0 }
 0x5d1   :  { %v7614_v49 = vpack.c.bf16 %v9025_v39, %v9029_v38  ;;  %v9031_v39 = vpop.eup %9030 }
 0x5d2   :  { %8180 = vmatprep.mubr.msk.bf16.mxu0 %vm15422_vm15, %v7611_v36  ;;  %v3931_v20 = vpop.permute.xlu1 %3930  ;;  %v9033_v24 = vpop.eup %9032  ;;  %9044 = vpow2.f32 %v3878_v5  ;;  %v3888_v36 = vmul.f32 1.442695, %v3859_v33 }
 0x5d3   :  { %5102 = vmax.xlane.f32.xlu1 %v5079_v40  ;;  %8181 = vmatmul.mubr.msk.bf16.gmra.mrb[60].mxu0 %vm15425_vm12, %v7614_v49  ;;  %v3953_v29 = vsel %vm15426_vm6, %v3931_v20, 1065369472  ;;  %v9035_v62 = vpop.eup %9034  ;;  %v3886_v49 = vmul.f32 1.442695, %v3858_v48  ;;  %9046 = vpow2.f32 %v3884_v16  ;;  %v3890_v20 = vmul.f32 1.442695, %v3860_v12 }
 0x5d4   :  { %4575 = vrot.lane.b32.xlu0 %v15350_v25, %s9810_s3  ;;  %8196 = vmatprep.subr.bf16.mxu1 %v3953_v29  ;;  %v9037_v38 = vpop.eup %9036  ;;  %v7636_v51 = vpack.c.bf16 %v9031_v39, %v9035_v62  ;;  %9048 = vpow2.f32 %v3888_v36  ;;  %v15429_v16 = vld [vmem:[#allocation53_spill] sm:$0xff]  ;;  %v15430_v36 = vld [vmem:[#allocation86_spill] sm:$0xff] }
 0x5d5   :  { %8197 = vmatpush3.bf16.msra.mxu1 %v3953_v29  ;;  %v7639_v46 = vpack.c.bf16 %v9033_v24, %v9037_v38  ;;  %9050 = vpow2.f32 %v3882_v30  ;;  %v5000_v30 = vadd.f32 %v11825_v60, %v15430_v36 }
 0x5d6   :  { %8198 = vmatprep.subr.bf16.mxu1 %v3956_v31  ;;  %9052 = vpow2.f32 %v3886_v49 }
 0x5d7   :  { %v9039_v7 = vpop.eup %9038 }
 0x5d8   :  { %5220 = vrot.lane.b32.xlu0 %v15350_v25, %s9811_s17  ;;  %v3861_v25 = vmin.f32 %v3845_v6, 0.0  ;;  %v9041_v21 = vpop.eup %9040  ;;  %v4357_v6 = vadd.f32 %v11787_v3, %v15429_v16 }
 0x5d9   :  { %8199 = vmatpush3.bf16.msra.mxu1 %v3956_v31  ;;  %v9043_v58 = vpop.eup %9042 }
 0x5da   :  { %v3892_v9 = vmul.f32 1.442695, %v3861_v25  ;;  %v7642_v47 = vpack.c.bf16 %v9039_v7, %v9043_v58  ;;  %v4389_v19 = vsub.f32 0.0, %v4357_v6  ;;  %vm4373_vm5 = vcmp.gt.f32.partialorder %v4357_v6, 0.0  ;;  %v15431_v25 = vld [vmem:[#allocation11_spill] sm:$0xff] }
 0x5db   :  { %v5002_v7 = vadd.f32 %v11825_v60, %v15431_v25  ;;  %v15443_v25 = vld [vmem:[#allocation66_spill] sm:$0xff] }
 0x5dc   :  { %5222 = vrot.lane.b32.xlu0 %v15354_v34, %s9811_s17  ;;  %8201 = vmatmul.mubr.msk.bf16.vlgmr.msra.gmra.mrb[48].mxu1 %vm15090_vm8, %v7636_v51  ;;  %v9045_v45 = vpop.eup %9044  ;;  %9054 = vpow2.f32 %v3892_v9  ;;  %v5032_v9 = vsub.f32 0.0, %v5000_v30 }
 0x5dd   :  { %8204 = vmatprep.mubr.msk.bf16.mxu1 %vm15091_vm10, %v7639_v46  ;;  %v7645_v40 = vpack.c.bf16 %v9041_v21, %v9045_v45  ;;  %v9047_v8 = vpop.eup %9046  ;;  %9056 = vpow2.f32 %v3890_v20  ;;  %v4405_v46 = vmul.f32 -0.2, %v4357_v6  ;;  %v15432_v21 = vld [vmem:[#allocation79_spill] sm:$0xff]  ;;  %v5048_v45 = vmul.f32 -0.2, %v5000_v30  ;;  %v15440_v6 = vld [vmem:[#allocation65_spill] sm:$0xff] }
 0x5de   :  { %v9049_v11 = vpop.eup %9048  ;;  %vm15433_vm9 = vnez %v15432_v21  ;;  %vm5018_vm7 = vcmp.gt.f32.partialorder %v5002_v7, 0.0  ;;  %v15476_v21 = vld [vmem:[#allocation76_spill] sm:$0xff] }
 0x5df   :  { %v9051_v4 = vpop.eup %9050  ;;  %v12104_v20 = vsel %vm4373_vm5, %v4389_v19, %v4405_v46 }
 0x5e0   :  { %v9053_v29 = vpop.eup %9052  ;;  %v7648_v1 = vpack.c.bf16 %v9047_v8, %v9051_v4  ;;  %v5050_v8 = vmul.f32 -0.2, %v5002_v7 }
 0x5e1   :  { %v7651_v52 = vpack.c.bf16 %v9049_v11, %v9053_v29  ;;  %v15435_v11 = vld [vmem:[#allocation60_spill] sm:$0xff] }
 0x5e2   :  { %v4355_v4 = vadd.f32 %v11787_v3, %v15435_v11 }
 0x5e4   :  { %5216 = vrot.lane.b32.xlu1 %v15410_v61, %s9811_s17  ;;  %8205 = vmatmul.mubr.msk.bf16.gmra.mrb[52].mxu1 %vm10737_vm1, %v7642_v47  ;;  %v15428_v61 = vld [vmem:[#allocation62_spill] sm:$0xff] }
 0x5e5   :  { %8208 = vmatprep.mubr.msk.bf16.mxu1 %vm15220_vm2, %v7645_v40  ;;  %v4356_v31 = vadd.f32 %v11787_v3, %v15428_v61  ;;  %v5034_v40 = vsub.f32 0.0, %v5002_v7  ;;  %v4361_v7 = vadd.f32 %v11787_v3, %v15443_v25 }
 0x5e6   :  { %v9055_v39 = vpop.eup %9054 }
 0x5e7   :  { %v9057_v15 = vpop.eup %9056  ;;  %v4388_v24 = vsub.f32 0.0, %v4356_v31  ;;  %vm4372_vm4 = vcmp.gt.f32.partialorder %v4356_v31, 0.0 }
 0x5e8   :  { %4577 = vrot.lane.b32.xlu1 %v15354_v34, %s9810_s3  ;;  %v4404_v34 = vmul.f32 -0.2, %v4356_v31  ;;  %v7654_v62 = vpack.c.bf16 %v9055_v39, %v9057_v15  ;;  %v15438_v31 = vld [vmem:[#allocation120_spill] sm:$0xff] }
 0x5e9   :  { %v4359_v39 = vadd.f32 %v11787_v3, %v15438_v31  ;;  %v15446_v31 = vld [vmem:[#allocation55_spill] sm:$0xff] }
 0x5ea   :  { %v4444_v5 = vpop.xlane.xlu0 %4443  ;;  %v12093_v51 = vsel %vm4372_vm4, %v4388_v24, %v4404_v34  ;;  %vm15434_vm4 = vmmov %vm15426_vm6  ;;  %v15439_v24 = vld [vmem:[#allocation50_spill] sm:$0xff] }
 0x5eb   :  { %v4436_v58 = vsel %vm15433_vm9, %v12093_v51, -1e+30  ;;  %v4475_v29 = vsub.f32 %v11797_v0, %v4444_v5  ;;  %v5001_v34 = vadd.f32 %v11825_v60, %v15439_v24  ;;  %v12120_v0 = vsel %vm5018_vm7, %v5034_v40, %v5050_v8 }
 0x5ec   :  { %8209 = vmatmul.mubr.msk.bf16.gmra.mrb[56].mxu1 %vm15417_vm0, %v7648_v1  ;;  %v4403_v5 = vmul.f32 -0.2, %v4355_v4  ;;  %v4391_v46 = vsub.f32 0.0, %v4359_v39  ;;  %vm4375_vm7 = vcmp.gt.f32.partialorder %v4359_v39, 0.0  ;;  %v5004_v24 = vadd.f32 %v11825_v60, %v15446_v31 }
 0x5ed   :  { %8212 = vmatprep.mubr.msk.bf16.mxu1 %vm15422_vm15, %v7651_v52  ;;  %v15436_v52 = vld [vmem:[#allocation89_spill] sm:$0xff]  ;;  %v4491_v16 = vmin.f32 %v4475_v29, 0.0  ;;  %vm5017_vm11 = vcmp.gt.f32.partialorder %v5001_v34, 0.0 }
 0x5ee   :  { %v12085_v33 = vpop.xlane.xlu0 %4447  ;;  %vm15437_vm13 = vnez %v15436_v52 }
 0x5ef   :  { %v4437_v61 = vsel %vm15437_vm13, %v12104_v20, -1e+30  ;;  %v4507_v40 = vmul.f32 1.442695, %v4491_v16  ;;  %v5082_v29 = vsel %vm15437_vm13, %v12120_v0, -1e+30 }
 0x5f1   :  { %9058 = vpow2.f32 %v4507_v40 }
 0x5f2   :  { %v12087_v48 = vpop.xlane.xlu0 %4449 }
 0x5f4   :  { %8213 = vmatmul.mubr.msk.bf16.gmra.mrb[60].mxu1 %vm15425_vm12, %v7654_v62  ;;  %v4387_v62 = vsub.f32 0.0, %v4355_v4 }
 0x5f6   :  { %v4564_v38 = vpop.permute.xlu0 %4563 }
 0x5f7   :  { %v4580_v49 = vsel %vm15426_vm6, %v4564_v38, 1065369472  ;;  %vm5016_vm6 = vcmp.gt.f32.partialorder %v5000_v30, 0.0  ;;  %v4358_v38 = vadd.f32 %v11787_v3, %v15440_v6  ;;  %v15441_v30 = vld [vmem:[#allocation84_spill] sm:$0xff]  ;;  %v4393_v6 = vsub.f32 0.0, %v4361_v7 }
 0x5f8   :  { %8216 = vmatprep.subr.bf16.mxu0 %v4580_v49  ;;  %v12116_v15 = vsel %vm5016_vm6, %v5032_v9, %v5048_v45  ;;  %vm15442_vm5 = vnez %v15441_v30  ;;  %vm15444_vm6 = vcmask 130048   ;;  %v15445_v9 = vld [vmem:[#allocation61_spill] sm:$0xff] }
 0x5f9   :  { %8217 = vmatpush3.bf16.msra.mxu0 %v4580_v49  ;;  %v5080_v19 = vsel %vm15442_vm5, %v12116_v15, -1e+30  ;;  %v4407_v49 = vmul.f32 -0.2, %v4359_v39  ;;  %v4390_v8 = vsub.f32 0.0, %v4358_v38  ;;  %vm4374_vm13 = vcmp.gt.f32.partialorder %v4358_v38, 0.0 }
 0x5fa   :  { %v4566_v12 = vpop.permute.xlu0 %4565  ;;  %v4406_v16 = vmul.f32 -0.2, %v4358_v38  ;;  %v15449_v38 = vld [vmem:[#allocation68_spill] sm:$0xff] }
 0x5fb   :  { %4461 = vmax.xlane.f32.xlu0 %v4436_v58  ;;  %v4583_v47 = vsel %vm15434_vm4, %v4566_v12, 1065369472  ;;  %vm4371_vm4 = vcmp.gt.f32.partialorder %v4355_v4, 0.0  ;;  %v12139_v39 = vsel %vm4375_vm7, %v4391_v46, %v4407_v49  ;;  %v5036_v49 = vsub.f32 0.0, %v5004_v24 }
 0x5fc   :  { %8218 = vmatprep.subr.bf16.mxu0 %v4583_v47  ;;  %v12155_v31 = vsel %vm4374_vm13, %v4390_v8, %v4406_v16  ;;  %v15453_v8 = vld [vmem:[#allocation94_spill] sm:$0xff] }
 0x5fd   :  { %8219 = vmatpush3.bf16.msra.mxu0 %v4583_v47  ;;  %v5033_v47 = vsub.f32 0.0, %v5001_v34  ;;  %vm15454_vm13 = vnez %v15453_v8 }
 0x5fe   :  { %v12109_v1 = vpop.permute.xlu0 %5210 }
 0x5ff   :  { %4463 = vmax.xlane.f32.xlu0 %v4437_v61  ;;  %v12135_v61 = vsel %vm4371_vm4, %v4387_v62, %v4403_v5  ;;  %v4439_v5 = vsel %vm15317_vm3, %v12139_v39, -1e+30  ;;  %vm5020_vm4 = vcmp.gt.f32.partialorder %v5004_v24, 0.0  ;;  %v15464_v62 = vld [vmem:[#allocation85_spill] sm:$0xff] }
 0x600   :  { %v4435_v46 = vsel %vm15442_vm5, %v12135_v61, -1e+30  ;;  %v823_v8 = vmax.f32 %v15464_v62, 1e-30  ;;  %v15491_v62 = vld [vmem:[#allocation37_spill] sm:$0xff] }
 0x602   :  { %v4568_v36 = vpop.permute.xlu0 %4567 }
 0x603   :  { %5104 = vmax.xlane.f32.xlu0 %v5080_v19  ;;  %v4446_v12 = vpop.xlane.xlu1 %4445  ;;  %v4586_v58 = vsel %vm15444_vm6, %v4568_v36, 1065369472  ;;  %v4409_v36 = vmul.f32 -0.2, %v4361_v7  ;;  %vm4377_vm6 = vcmp.gt.f32.partialorder %v4361_v7, 0.0 }
 0x604   :  { %v4476_v45 = vsub.f32 %v15445_v9, %v4446_v12  ;;  %8220 = vmatprep.subr.bf16.mxu0 %v4586_v58  ;;  %v5052_v9 = vmul.f32 -0.2, %v5004_v24  ;;  %v4438_v24 = vsel %vm15454_vm13, %v12155_v31, -1e+30 }
 0x605   :  { %8221 = vmatpush3.bf16.msra.mxu0 %v4586_v58  ;;  %v5049_v58 = vmul.f32 -0.2, %v5001_v34  ;;  %v12150_v40 = vsel %vm4377_vm6, %v4393_v6, %v4409_v36 }
 0x606   :  { %v4492_v11 = vmin.f32 %v4476_v45, 0.0  ;;  %v15448_v45 = vld [vmem:[#allocation20_spill] sm:$0xff]  ;;  %v12170_v16 = vsel %vm5020_vm4, %v5036_v49, %v5052_v9 }
 0x607   :  { %5108 = vmax.xlane.f32.xlu0 %v5082_v29  ;;  %v5089_v19 = vpop.xlane.xlu1 %5088  ;;  %v12163_v6 = vsel %vm5017_vm11, %v5033_v47, %v5049_v58  ;;  %v5084_v34 = vsel %vm15317_vm3, %v12170_v16, -1e+30  ;;  %v9059_v47 = vpop.eup %9058 }
 0x608   :  { %v4509_v25 = vmul.f32 1.442695, %v4492_v11  ;;  %v5120_v12 = vsub.f32 %v11860_v13, %v5089_v19  ;;  %v5006_v13 = vadd.f32 %v11825_v60, %v15448_v45  ;;  %v5003_v11 = vadd.f32 %v11825_v60, %v15449_v38  ;;  %v15451_v45 = vld [vmem:[#allocation92_spill] sm:$0xff] }
 0x609   :  { %vm15452_vm7 = vnez %v15451_v45  ;;  %v5081_v49 = vsel %vm15433_vm9, %v12163_v6, -1e+30 }
 0x60a   :  { %9060 = vpow2.f32 %v4509_v25  ;;  %v5136_v4 = vmin.f32 %v5120_v12, 0.0  ;;  %v15450_v25 = vld [vmem:[#allocation87_spill] sm:$0xff]  ;;  %v5038_v36 = vsub.f32 0.0, %v5006_v13  ;;  %v5054_v38 = vmul.f32 -0.2, %v5006_v13 }
 0x60b   :  { %4467 = vmax.xlane.f32.xlu0 %v4439_v5  ;;  %v5091_v7 = vpop.xlane.xlu1 %5090  ;;  %v4360_v12 = vadd.f32 %v11787_v3, %v15450_v25  ;;  %v4441_v5 = vsel %vm15452_vm7, %v12150_v40, -1e+30  ;;  %vm5022_vm6 = vcmp.gt.f32.partialorder %v5006_v13, 0.0  ;;  %vm5019_vm5 = vcmp.gt.f32.partialorder %v5003_v11, 0.0  ;;  %v15455_v13 = vld [vmem:[#allocation5_spill] sm:$0xff] }
 0x60c   :  { %v5121_v29 = vsub.f32 %v11871_v22, %v5091_v7  ;;  %4459 = vmax.xlane.f32.xlu1 %v4435_v46  ;;  %v5152_v19 = vmul.f32 1.442695, %v5136_v4  ;;  %v5035_v4 = vsub.f32 0.0, %v5003_v11  ;;  %v5051_v46 = vmul.f32 -0.2, %v5003_v11 }
 0x60d   :  { %v4392_v58 = vsub.f32 0.0, %v4360_v12  ;;  %v4362_v11 = vadd.f32 %v11787_v3, %v15455_v13  ;;  %vm4376_vm11 = vcmp.gt.f32.partialorder %v4360_v12, 0.0 }
 0x60e   :  { %v5137_v52 = vmin.f32 %v5121_v29, 0.0  ;;  %9062 = vpow2.f32 %v5152_v19  ;;  %v4408_v29 = vmul.f32 -0.2, %v4360_v12  ;;  %v12184_v19 = vsel %vm5019_vm5, %v5035_v4, %v5051_v46  ;;  %v15458_v46 = vld [vmem:[#allocation17_spill] sm:$0xff] }
 0x60f   :  { %4471 = vmax.xlane.f32.xlu0 %v4441_v5  ;;  %v12165_v22 = vpop.xlane.xlu1 %5092  ;;  %v4394_v3 = vsub.f32 0.0, %v4362_v11  ;;  %v4410_v4 = vmul.f32 -0.2, %v4362_v11  ;;  %v5005_v12 = vadd.f32 %v11825_v60, %v15458_v46  ;;  %vm15459_vm5 = vcmask 130048  }
 0x610   :  { %v5154_v7 = vmul.f32 1.442695, %v5137_v52  ;;  %4465 = vmax.xlane.f32.xlu1 %v4438_v24  ;;  %v12180_v52 = vsel %vm5022_vm6, %v5038_v36, %v5054_v38  ;;  %v5083_v36 = vsel %vm15454_vm13, %v12184_v19, -1e+30  ;;  %v12194_v38 = vsel %vm4376_vm11, %v4392_v58, %v4408_v29  ;;  %vm15465_vm3 = vmmov %vm15459_vm5 }
 0x611   :  { %v5086_v24 = vsel %vm15452_vm7, %v12180_v52, -1e+30  ;;  %vm4378_vm6 = vcmp.gt.f32.partialorder %v4362_v11, 0.0  ;;  %vm15460_vm7 = vmmov %vm15459_vm5  ;;  %v5037_v45 = vsub.f32 0.0, %v5005_v12 }
 0x612   :  { %9064 = vpow2.f32 %v5154_v7  ;;  %v15456_v7 = vld [vmem:[#allocation104_spill] sm:$0xff] }
 0x613   :  { %5112 = vmax.xlane.f32.xlu0 %v5084_v34  ;;  %v12175_v25 = vpop.xlane.xlu1 %5094  ;;  %vm15457_vm4 = vnez %v15456_v7  ;;  %9066 = vrcp.f32 %v823_v8  ;;  %v15470_v8 = vld [vmem:[#allocation9_spill] sm:$0xff]  ;;  %v15472_v7 = vld [vmem:[#allocation72_spill] sm:$0xff] }
 0x614   :  { %v9061_v9 = vpop.eup %9060  ;;  %5106 = vmax.xlane.f32.xlu1 %v5081_v49  ;;  %v5213_v49 = vpop.permute.xlu0 %5212 }
 0x615   :  { %v7673_v5 = vpack.c.bf16 %v9061_v9, %v9059_v47  ;;  %v5228_v9 = vsel %vm15460_vm7, %v12109_v1, 1065369472  ;;  %vm5021_vm7 = vcmp.gt.f32.partialorder %v5005_v12, 0.0 }
 0x617   :  { %5116 = vmax.xlane.f32.xlu0 %v5086_v24  ;;  %8232 = vmatprep.mubr.msk.bf16.mxu0 %vm15457_vm4, %v7673_v5  ;;  %v5209_v34 = vpop.permute.xlu1 %5208  ;;  %v15461_v5 = vld [vmem:[#allocation82_spill] sm:$0xff] }
 0x618   :  { %5110 = vmax.xlane.f32.xlu1 %v5083_v36  ;;  %v5225_v47 = vsel %vm15459_vm5, %v5209_v34, 1065369472  ;;  %v9063_v13 = vpop.eup %9062  ;;  %v5007_v58 = vadd.f32 %v11825_v60, %v15461_v5  ;;  %v15462_v24 = vld [vmem:[#allocation98_spill] sm:$0xff]  ;;  %v5053_v34 = vmul.f32 -0.2, %v5005_v12  ;;  %v5215_v5 = vpop.permute.xlu0 %5214  ;;  %v15468_v12 = vld [vmem:[#allocation93_spill] sm:$0xff] }
 0x619   :  { %8248 = vmatprep.subr.bf16.mxu1 %v5225_v47  ;;  %vm15463_vm11 = vnez %v15462_v24  ;;  %v5231_v60 = vsel %vm15465_vm3, %v5213_v49, 1065369472  ;;  %v5234_v49 = vsel %vm15465_vm3, %v5215_v5, 1065369472  ;;  %v824_v24 = vmax.f32 %v15472_v7, 1e-30 }
 0x61a   :  { %8249 = vmatpush3.bf16.msra.mxu1 %v5225_v47  ;;  %v4440_v46 = vsel %vm15463_vm11, %v12194_v38, -1e+30  ;;  %v12207_v47 = vsel %vm4378_vm6, %v4394_v3, %v4410_v4  ;;  %v5039_v3 = vsub.f32 0.0, %v5007_v58  ;;  %v5055_v4 = vmul.f32 -0.2, %v5007_v58 }
 0x61b   :  { %8250 = vmatprep.subr.bf16.mxu1 %v5228_v9  ;;  %v4570_v29 = vpop.permute.xlu1 %4569  ;;  %vm5023_vm6 = vcmp.gt.f32.partialorder %v5007_v58, 0.0  ;;  %v822_v58 = vmax.f32 %v15470_v8, 1e-30  ;;  %v15490_v8 = vld [vmem:[#allocation116_spill] sm:$0xff] }
 0x61c   :  { %v9065_v36 = vpop.eup %9064  ;;  %4469 = vmax.xlane.f32.xlu1 %v4440_v46  ;;  %v4589_v11 = vsel %vm15459_vm5, %v4570_v29, 1065369472  ;;  %v15466_v46 = vld [vmem:[#allocation101_spill] sm:$0xff]  ;;  %vm15481_vm5 = vmmov %vm15465_vm3 }
 0x61d   :  { %8222 = vmatprep.subr.bf16.mxu0 %v4589_v11  ;;  %v7713_v1 = vpack.c.bf16 %v9065_v36, %v9063_v13  ;;  %vm15467_vm13 = vnez %v15466_v46  ;;  %v12216_v13 = vsel %vm5021_vm7, %v5037_v45, %v5053_v34  ;;  %v15471_v34 = vld [vmem:[#allocation100_spill] sm:$0xff]  ;;  %v9067_v5 = vpop.eup %9066  ;;  %vm15483_vm7 = vmmov %vm15465_vm3 }
 0x61e   :  { %8223 = vmatpush3.bf16.msra.mxu0 %v4589_v11  ;;  %8251 = vmatpush3.bf16.msra.mxu1 %v5228_v9  ;;  %v4442_v29 = vsel %vm15467_vm13, %v12207_v47, -1e+30  ;;  %v832_v9 = vmax.f32 %v15468_v12, 1e-30  ;;  %v5085_v36 = vsel %vm15463_vm11, %v12216_v13, -1e+30  ;;  %v12223_v11 = vsel %vm5023_vm6, %v5039_v3, %v5055_v4  ;;  %vm15486_vm6 = vmmov %vm15465_vm3 }
 0x61f   :  { %8252 = vmatprep.subr.bf16.mxu1 %v5231_v60  ;;  %8264 = vmatprep.mubr.msk.bf16.mxu1 %vm15457_vm4, %v7713_v1  ;;  %v15469_v1 = vld [vmem:[#allocation115_spill] sm:$0xff]  ;;  %v5087_v45 = vsel %vm15467_vm13, %v12223_v11, -1e+30  ;;  %v837_v12 = vmax.f32 %v15490_v8, 1e-30 }
 0x620   :  { %4473 = vmax.xlane.f32.xlu1 %v4442_v29  ;;  %9068 = vrcp.f32 %v832_v9  ;;  %v834_v29 = vmax.f32 %v15469_v1, 1e-30  ;;  %v15473_v3 = vld [vmem:[#allocation7_spill] sm:$0xff] }
 0x621   :  { %v1475_v4 = vmax.f32 %v15473_v3, 1e-30 }
 0x622   :  { %8253 = vmatpush3.bf16.msra.mxu1 %v5231_v60  ;;  %v836_v60 = vmax.f32 %v15471_v34, 1e-30  ;;  %9070 = vrcp.f32 %v834_v29  ;;  %v826_v29 = vmax.f32 %v15476_v21, 1e-30 }
 0x623   :  { %8254 = vmatprep.subr.bf16.mxu1 %v5234_v49  ;;  %9072 = vrcp.f32 %v822_v58 }
 0x624   :  { %5114 = vmax.xlane.f32.xlu1 %v5085_v36  ;;  %9074 = vrcp.f32 %v836_v60 }
 0x625   :  { %9076 = vrcp.f32 %v824_v24  ;;  %v15478_v24 = vld [vmem:[#allocation74_spill] sm:$0xff] }
 0x626   :  { %8255 = vmatpush3.bf16.msra.mxu1 %v5234_v49  ;;  %v15474_v49 = vld [vmem:[#allocation80_spill] sm:$0xff]  ;;  %9078 = vrcp.f32 %v1475_v4 }
 0x627   :  { %v825_v36 = vmax.f32 %v15474_v49, 1e-30 }
 0x628   :  { %5118 = vmax.xlane.f32.xlu1 %v5087_v45  ;;  %v15475_v45 = vld [vmem:[#allocation97_spill] sm:$0xff] }
 0x629   :  { %v2766_v46 = vmax.f32 %v15475_v45, 1e-30  ;;  %9080 = vrcp.f32 %v825_v36  ;;  %v15479_v36 = vld [vmem:[#allocation99_spill] sm:$0xff] }
 0x62a   :  { %v9069_v9 = vpop.eup %9068  ;;  %v828_v55 = vmax.f32 %v15479_v36, 1e-30 }
 0x62b   :  { %9082 = vrcp.f32 %v2766_v46 }
 0x62c   :  { %v9071_v30 = vpop.eup %9070  ;;  %9084 = vrcp.f32 %v826_v29  ;;  %v15480_v29 = vld [vmem:[#allocation102_spill] sm:$0xff] }
 0x62d   :  { %861 = vperm.xlu0 %8554, %v9067_v5   ;;  %v9073_v58 = vpop.eup %9072  ;;  %v827_v5 = vmax.f32 %v15478_v24, 1e-30  ;;  %9086 = vrcp.f32 %v2768_v2 }
 0x62e   :  { %v9075_v60 = vpop.eup %9074 }
 0x62f   :  { %9088 = vrcp.f32 %v827_v5 }
 0x630   :  { %9090 = vrcp.f32 %v828_v55  ;;  %v15484_v55 = vld [vmem:[#allocation114_spill] sm:$0xff] }
 0x631   :  { %906 = vperm.xlu0 %8554, %v9069_v9   ;;  %v9077_v9 = vpop.eup %9076 }
 0x632   :  { %v9079_v56 = vpop.eup %9078 }
 0x635   :  { %916 = vperm.xlu0 %8554, %v9071_v30   ;;  %v9081_v30 = vpop.eup %9080 }
 0x636   :  { %v9083_v46 = vpop.eup %9082 }
 0x639   :  { %856 = vperm.xlu1 %8555, %v9073_v58   ;;  %926 = vperm.xlu0 %8554, %v9075_v60   ;;  %v829_v58 = vmax.f32 %v15480_v29, 1e-30  ;;  %v9085_v60 = vpop.eup %9084 }
 0x63a   :  { %v9087_v1 = vpop.eup %9086 }
 0x63b   :  { %v12238_v4 = vpop.xlane.xlu0 %4453  ;;  %9092 = vrcp.f32 %v829_v58  ;;  %v9089_v36 = vpop.eup %9088 }
 0x63d   :  { %866 = vperm.xlu1 %8555, %v9077_v9   ;;  %1509 = vperm.xlu0 %8554, %v9079_v56   ;;  %v15482_v56 = vld [vmem:[#allocation112_spill] sm:$0xff] }
 0x63e   :  { %v830_v9 = vmax.f32 %v15482_v56, 1e-30 }
 0x63f   :  { %v12241_v34 = vpop.xlane.xlu0 %4455 }
 0x640   :  { %9094 = vrcp.f32 %v830_v9 }
 0x641   :  { %871 = vperm.xlu1 %8555, %v9081_v30   ;;  %2804 = vperm.xlu0 %8554, %v9083_v46   ;;  %v831_v46 = vmax.f32 %v15484_v55, 1e-30 }
 0x643   :  { %v4572_v2 = vpop.permute.xlu0 %4571  ;;  %9096 = vrcp.f32 %v831_v46  ;;  %v15489_v46 = vld [vmem:[#allocation27_spill] sm:$0xff] }
 0x644   :  { %v4592_v24 = vsel %vm15481_vm5, %v4572_v2, 1065369472  ;;  %v9091_v2 = vpop.eup %9090  ;;  %vm15495_vm5 = vmmov %vm15465_vm3 }
 0x645   :  { %876 = vperm.xlu1 %8555, %v9085_v60   ;;  %2814 = vperm.xlu0 %8554, %v9087_v1   ;;  %v15485_v1 = vld [vmem:[#allocation113_spill] sm:$0xff] }
 0x646   :  { %8224 = vmatprep.subr.bf16.mxu0 %v4592_v24  ;;  %v833_v58 = vmax.f32 %v15485_v1, 1e-30  ;;  %v4477_v1 = vsub.f32 %v15489_v46, %v12085_v33  ;;  %v15492_v33 = vld [vmem:[#allocation16_spill] sm:$0xff] }
 0x647   :  { %8225 = vmatpush3.bf16.msra.mxu0 %v4592_v24  ;;  %v4574_v5 = vpop.permute.xlu0 %4573  ;;  %v9093_v24 = vpop.eup %9092 }
 0x648   :  { %v4595_v30 = vsel %vm15483_vm7, %v4574_v5, 1065369472  ;;  %9098 = vrcp.f32 %v833_v58  ;;  %v15488_v5 = vld [vmem:[#allocation46_spill] sm:$0xff]  ;;  %vm15496_vm7 = vmmov %vm15465_vm3 }
 0x649   :  { %881 = vperm.xlu1 %8555, %v9089_v36   ;;  %8226 = vmatprep.subr.bf16.mxu0 %v4595_v30  ;;  %v15487_v36 = vld [vmem:[#allocation117_spill] sm:$0xff] }
 0x64a   :  { %v835_v9 = vmax.f32 %v15487_v36, 1e-30  ;;  %v9095_v55 = vpop.eup %9094 }
 0x64b   :  { %8227 = vmatpush3.bf16.msra.mxu0 %v4595_v30  ;;  %v12248_v29 = vpop.permute.xlu0 %5218  ;;  %v4478_v30 = vsub.f32 %v15488_v5, %v12087_v48  ;;  %v1477_v48 = vmax.f32 %v15491_v62, 1e-30  ;;  %v4493_v5 = vmin.f32 %v4477_v1, 0.0 }
 0x64c   :  { %v4452_v60 = vpop.xlane.xlu1 %4451  ;;  %9100 = vrcp.f32 %v835_v9 }
 0x64d   :  { %886 = vperm.xlu1 %8555, %v9091_v2   ;;  %v4479_v2 = vsub.f32 %v11971_v42, %v4452_v60  ;;  %v4494_v58 = vmin.f32 %v4478_v30, 0.0  ;;  %v5122_v42 = vsub.f32 %v11886_v50, %v12165_v22  ;;  %9102 = vrcp.f32 %v837_v12 }
 0x64e   :  { %v5123_v60 = vsub.f32 %v11895_v23, %v12175_v25  ;;  %9104 = vrcp.f32 %v1477_v48  ;;  %v4511_v1 = vmul.f32 1.442695, %v4493_v5  ;;  %v4481_v50 = vsub.f32 %v11947_v32, %v12241_v34  ;;  %v15493_v25 = vld [vmem:[#allocation8_spill] sm:$0xff] }
 0x64f   :  { %v4576_v56 = vpop.permute.xlu0 %4575  ;;  %v4513_v46 = vmul.f32 1.442695, %v4494_v58  ;;  %v5138_v27 = vmin.f32 %v5122_v42, 0.0  ;;  %v15494_v58 = vld [vmem:[#allocation28_spill] sm:$0xff] }
 0x650   :  { %v4458_v21 = vpop.xlane.xlu1 %4457  ;;  %v4598_v49 = vsel %vm15486_vm6, %v4576_v56, 1065369472  ;;  %v4480_v56 = vsub.f32 %v11940_v59, %v12238_v4  ;;  %v5139_v22 = vmin.f32 %v5123_v60, 0.0  ;;  %v4497_v48 = vmin.f32 %v4481_v50, 0.0  ;;  %vm15498_vm6 = vmmov %vm15465_vm3 }
 0x651   :  { %891 = vperm.xlu1 %8555, %v9093_v24   ;;  %8228 = vmatprep.subr.bf16.mxu0 %v4598_v49  ;;  %v9097_v24 = vpop.eup %9096  ;;  %v4482_v59 = vsub.f32 %v11981_v43, %v4458_v21 }
 0x652   :  { %8229 = vmatpush3.bf16.msra.mxu0 %v4598_v49  ;;  %v4495_v49 = vmin.f32 %v4479_v2, 0.0  ;;  %v4496_v9 = vmin.f32 %v4480_v56, 0.0  ;;  %v9099_v4 = vpop.eup %9098  ;;  %v1478_v56 = vmax.f32 %v15493_v25, 1e-30  ;;  %v5158_v32 = vmul.f32 1.442695, %v5139_v22 }
 0x653   :  { %v4498_v43 = vmin.f32 %v4482_v59, 0.0  ;;  %v4519_v60 = vmul.f32 1.442695, %v4497_v48 }
 0x654   :  { %v5097_v7 = vpop.xlane.xlu1 %5096  ;;  %v4515_v30 = vmul.f32 1.442695, %v4495_v49  ;;  %v4517_v12 = vmul.f32 1.442695, %v4496_v9  ;;  %v5156_v49 = vmul.f32 1.442695, %v5138_v27 }
 0x655   :  { %896 = vperm.xlu1 %8555, %v9095_v55   ;;  %v1476_v55 = vmax.f32 %v15492_v33, 1e-30  ;;  %v5124_v23 = vsub.f32 %v11983_v26, %v5097_v7  ;;  %v4521_v5 = vmul.f32 1.442695, %v4498_v43 }
 0x656   :  { %v9101_v21 = vpop.eup %9100 }
 0x657   :  { %9106 = vrcp.f32 %v1476_v55  ;;  %v5140_v34 = vmin.f32 %v5124_v23, 0.0  ;;  %v9103_v7 = vpop.eup %9102 }
 0x658   :  { %v5099_v36 = vpop.xlane.xlu1 %5098  ;;  %9108 = vpow2.f32 %v4513_v46  ;;  %v5221_v46 = vpop.permute.xlu0 %5220 }
 0x659   :  { %901 = vperm.xlu1 %8555, %v9097_v24   ;;  %v5125_v2 = vsub.f32 %v12011_v37, %v5099_v36  ;;  %v2120_v37 = vmax.f32 %v15494_v58, 1e-30  ;;  %9110 = vpow2.f32 %v4515_v30  ;;  %v5160_v59 = vmul.f32 1.442695, %v5140_v34  ;;  %v15499_v34 = vld [vmem:[#allocation33_spill] sm:$0xff] }
 0x65a   :  { %9112 = vpow2.f32 %v4511_v1 }
 0x65b   :  { %v5141_v36 = vmin.f32 %v5125_v2, 0.0  ;;  %9114 = vpow2.f32 %v4517_v12  ;;  %v15497_v12 = vld [vmem:[#allocation75_spill] sm:$0xff] }
 0x65c   :  { %v5101_v8 = vpop.xlane.xlu1 %5100  ;;  %9116 = vrcp.f32 %v1478_v56  ;;  %v2121_v23 = vmax.f32 %v15497_v12, 1e-30 }
 0x65d   :  { %911 = vperm.xlu1 %8555, %v9099_v4   ;;  %9118 = vrcp.f32 %v2120_v37  ;;  %v5162_v42 = vmul.f32 1.442695, %v5141_v36  ;;  %v5126_v9 = vsub.f32 %v12028_v63, %v5101_v8  ;;  %v9105_v4 = vpop.eup %9104  ;;  %v5223_v36 = vpop.permute.xlu0 %5222 }
 0x65e   :  { %9120 = vpow2.f32 %v5156_v49 }
 0x65f   :  { %9122 = vpow2.f32 %v5158_v32  ;;  %v5142_v63 = vmin.f32 %v5126_v9, 0.0  ;;  %v15500_v9 = vld [vmem:[#allocation57_spill] sm:$0xff] }
 0x660   :  { %v5103_v24 = vpop.xlane.xlu1 %5102  ;;  %9124 = vpow2.f32 %v4521_v5  ;;  %v2122_v5 = vmax.f32 %v15499_v34, 1e-30 }
 0x661   :  { %921 = vperm.xlu1 %8555, %v9101_v21   ;;  %v5127_v26 = vsub.f32 %v12037_v57, %v5103_v24  ;;  %v5240_v57 = vsel %vm15495_vm5, %v12248_v29, 1065369472  ;;  %v9107_v2 = vpop.eup %9106  ;;  %9126 = vpow2.f32 %v5162_v42  ;;  %v5243_v29 = vsel %vm15498_vm6, %v5221_v46, 1065369472 }
 0x662   :  { %v9109_v50 = vpop.eup %9108  ;;  %9128 = vpow2.f32 %v4519_v60  ;;  %v5164_v49 = vmul.f32 1.442695, %v5142_v63 }
 0x663   :  { %v5143_v30 = vmin.f32 %v5127_v26, 0.0  ;;  %v9111_v22 = vpop.eup %9110  ;;  %9130 = vpow2.f32 %v5160_v59 }
 0x664   :  { %v5217_v55 = vpop.permute.xlu1 %5216  ;;  %v9113_v56 = vpop.eup %9112  ;;  %9132 = vrcp.f32 %v2121_v23 }
 0x665   :  { %931 = vperm.xlu1 %8555, %v9103_v7   ;;  %v5237_v27 = vsel %vm15465_vm3, %v5217_v55, 1065369472  ;;  %v5166_v43 = vmul.f32 1.442695, %v5143_v30  ;;  %v9115_v21 = vpop.eup %9114  ;;  %v7676_v37 = vpack.c.bf16 %v9109_v50, %v9113_v56  ;;  %v5246_v7 = vsel %vm15465_vm3, %v5223_v36, 1065369472 }
 0x666   :  { %8256 = vmatprep.subr.bf16.mxu1 %v5237_v27  ;;  %v9117_v24 = vpop.eup %9116  ;;  %v7679_v48 = vpack.c.bf16 %v9115_v21, %v9111_v22 }
 0x667   :  { %8257 = vmatpush3.bf16.msra.mxu1 %v5237_v27  ;;  %v9119_v32 = vpop.eup %9118  ;;  %9134 = vpow2.f32 %v5166_v43  ;;  %v2123_v27 = vmax.f32 %v15500_v9, 1e-30 }
 0x668   :  { %8258 = vmatprep.subr.bf16.mxu1 %v5240_v57  ;;  %v4578_v1 = vpop.permute.xlu1 %4577  ;;  %v9121_v26 = vpop.eup %9120  ;;  %9136 = vpow2.f32 %v5164_v49 }
 0x669   :  { %1514 = vperm.xlu1 %8555, %v9107_v2   ;;  %v4601_v8 = vsel %vm15496_vm7, %v4578_v1, 1065369472  ;;  %v9123_v42 = vpop.eup %9122  ;;  %9138 = vrcp.f32 %v2122_v5  ;;  %v15501_v2 = vld [vmem:[#allocation45_spill] sm:$0xff] }
 0x66a   :  { %8230 = vmatprep.subr.bf16.mxu0 %v4601_v8  ;;  %v9125_v55 = vpop.eup %9124  ;;  %v2765_v1 = vmax.f32 %v15501_v2, 1e-30  ;;  %9140 = vrcp.f32 %v2123_v27 }
 0x66b   :  { %8231 = vmatpush3.bf16.msra.mxu0 %v4601_v8  ;;  %8259 = vmatpush3.bf16.msra.mxu1 %v5240_v57  ;;  %v9127_v60 = vpop.eup %9126  ;;  %v15502_v8 = vld [vmem:[#allocation96_spill] sm:$0xff] }
 0x66c   :  { %8260 = vmatprep.subr.bf16.mxu1 %v5243_v29  ;;  %v9129_v46 = vpop.eup %9128  ;;  %v2767_v22 = vmax.f32 %v15502_v8, 1e-30  ;;  %9142 = vrcp.f32 %v2765_v1 }
 0x66d   :  { %1519 = vperm.xlu1 %8555, %v9105_v4   ;;  %v9131_v59 = vpop.eup %9130  ;;  %v7716_v4 = vpack.c.bf16 %v9123_v42, %v9121_v26  ;;  %v7682_v30 = vpack.c.bf16 %v9125_v55, %v9129_v46 }
 0x66e   :  { %8233 = vmatmul.mubr.msk.bf16.vlgmr.msra.gmra.mrb[64].mxu0 %vm15090_vm8, %v7676_v37  ;;  %v7719_v57 = vpack.c.bf16 %v9127_v60, %v9131_v59  ;;  %v9133_v50 = vpop.eup %9132  ;;  %9144 = vrcp.f32 %v2767_v22 }
 0x66f   :  { %8236 = vmatprep.mubr.msk.bf16.mxu0 %vm15091_vm10, %v7679_v48  ;;  %8261 = vmatpush3.bf16.msra.mxu1 %v5243_v29 }
 0x670   :  { %8262 = vmatprep.subr.bf16.mxu1 %v5246_v7 }
 0x671   :  { %1524 = vperm.xlu1 %8555, %v9117_v24   ;;  %v9135_v63 = vpop.eup %9134 }
 0x672   :  { %v9137_v23 = vpop.eup %9136 }
 0x673   :  { %8263 = vmatpush3.bf16.msra.mxu1 %v5246_v7  ;;  %v9139_v56 = vpop.eup %9138  ;;  %v7722_v43 = vpack.c.bf16 %v9135_v63, %v9137_v23 }
 0x674   :  { %v9141_v29 = vpop.eup %9140 }
 0x675   :  { %2154 = vperm.xlu1 %8555, %v9119_v32  }
 0x676   :  { %8237 = vmatmul.mubr.msk.bf16.gmra.mrb[68].mxu0 %vm10737_vm1, %v7682_v30  ;;  %8265 = vmatmul.mubr.msk.bf16.vlgmr.msra.gmra.mrb[64].mxu1 %vm15090_vm8, %v7716_v4  ;;  %v9143_v21 = vpop.eup %9142 }
 0x677   :  { %8268 = vmatprep.mubr.msk.bf16.mxu1 %vm15091_vm10, %v7719_v57 }
 0x678   :  { %v9145_v37 = vpop.eup %9144 }
 0x679   :  { %2159 = vperm.xlu1 %8555, %v9133_v50  }
 0x67d   :  { %2164 = vperm.xlu1 %8555, %v9139_v56  }
 0x67e   :  { %8269 = vmatmul.mubr.msk.bf16.gmra.mrb[68].mxu1 %vm10737_vm1, %v7722_v43  ;;  %vm15798_vm1 = vcmask 654336  }
 0x681   :  { %2169 = vperm.xlu1 %8555, %v9141_v29  }
 0x685   :  { %2799 = vperm.xlu1 %8555, %v9143_v21  }
 0x688   :  { %v4462_v36 = vpop.xlane.xlu0 %4461 }
 0x689   :  { %2809 = vperm.xlu1 %8555, %v9145_v37   ;;  %v4484_v60 = vsub.f32 %v12093_v51, %v4462_v36 }
 0x68b   :  { %v4500_v4 = vmin.f32 %v4484_v60, 0.0 }
 0x68c   :  { %v4464_v24 = vpop.xlane.xlu0 %4463 }
 0x68d   :  { %v4485_v30 = vsub.f32 %v12104_v20, %v4464_v24  ;;  %v4525_v23 = vmul.f32 1.442695, %v4500_v4 }
 0x68e   :  { %v12299_v49 = vpop.f32.mrb[48].mxu0 }
 0x68f   :  { %v12301_v48 = vpop.f32.mrb[49].mxu0  ;;  %v3412_v42 = vmax.f32 %v12299_v49, 1e-30  ;;  %v4501_v56 = vmin.f32 %v4485_v30, 0.0 }
 0x690   :  { %v3410_v32 = vmax.f32 %v12301_v48, 1e-30  ;;  %v5105_v5 = vpop.xlane.xlu0 %5104  ;;  %v12304_v26 = vpop.f32.mrb[50].mxu0 }
 0x691   :  { %v12306_v7 = vpop.f32.mrb[51].mxu0  ;;  %v3413_v46 = vmax.f32 %v12304_v26, 1e-30  ;;  %v5128_v21 = vsub.f32 %v12116_v15, %v5105_v5 }
 0x692   :  { %9146 = vrcp.f32 %v3410_v32  ;;  %v3411_v55 = vmax.f32 %v12306_v7, 1e-30 }
 0x693   :  { %v5144_v5 = vmin.f32 %v5128_v21, 0.0 }
 0x694   :  { %v5109_v27 = vpop.xlane.xlu0 %5108  ;;  %9148 = vrcp.f32 %v3411_v55 }
 0x695   :  { %9150 = vrcp.f32 %v3412_v42  ;;  %v4527_v42 = vmul.f32 1.442695, %v4501_v56  ;;  %v5130_v55 = vsub.f32 %v12120_v0, %v5109_v27  ;;  %v5168_v56 = vmul.f32 1.442695, %v5144_v5 }
 0x696   :  { %v12312_v59 = vpop.f32.mrb[52].mxu0  ;;  %9152 = vrcp.f32 %v3413_v46 }
 0x697   :  { %15503 = vst [vmem:[#allocation32_spill] sm:$0xff] %v12312_v59  ;;  %v12315_v57 = vpop.f32.mrb[53].mxu0  ;;  %9154 = vpow2.f32 %v4525_v23  ;;  %v5146_v0 = vmin.f32 %v5130_v55, 0.0 }
 0x698   :  { %15504 = vst [vmem:[#allocation6_spill] sm:$0xff] %v12315_v57  ;;  %v12317_v1 = vpop.f32.mrb[54].mxu0  ;;  %v4468_v22 = vpop.xlane.xlu0 %4467 }
 0x699   :  { %15505 = vst [vmem:[#allocation35_spill] sm:$0xff] %v12317_v1  ;;  %v12319_v50 = vpop.f32.mrb[55].mxu0  ;;  %v4460_v63 = vpop.xlane.xlu1 %4459 }
 0x69a   :  { %15506 = vst [vmem:[#allocation29_spill] sm:$0xff] %v12319_v50  ;;  %v4483_v51 = vsub.f32 %v12135_v61, %v4460_v63 }
 0x69c   :  { %v9147_v43 = vpop.eup %9146  ;;  %v4499_v29 = vmin.f32 %v4483_v51, 0.0  ;;  %v4472_v46 = vpop.xlane.xlu0 %4471 }
 0x69d   :  { %3444 = vperm.xlu1 %8555, %v9147_v43   ;;  %v4466_v37 = vpop.xlane.xlu1 %4465  ;;  %v4487_v43 = vsub.f32 %v12139_v39, %v4468_v22 }
 0x69e   :  { %v4523_v20 = vmul.f32 1.442695, %v4499_v29  ;;  %v4486_v36 = vsub.f32 %v12155_v31, %v4466_v37  ;;  %v12324_v24 = vpop.f32.mrb[56].mxu0  ;;  %v9149_v32 = vpop.eup %9148 }
 0x69f   :  { %v12327_v60 = vpop.f32.mrb[57].mxu0  ;;  %v9151_v61 = vpop.eup %9150  ;;  %3449 = vperm.xlu0 %8554, %v9149_v32   ;;  %v5172_v32 = vmul.f32 1.442695, %v5146_v0  ;;  %v4503_v5 = vmin.f32 %v4487_v43, 0.0 }
 0x6a0   :  { %9156 = vpow2.f32 %v4523_v20  ;;  %v4502_v4 = vmin.f32 %v4486_v36, 0.0  ;;  %v12329_v15 = vpop.f32.mrb[58].mxu0  ;;  %v9153_v23 = vpop.eup %9152 }
 0x6a1   :  { %v12331_v30 = vpop.f32.mrb[59].mxu0  ;;  %3454 = vperm.xlu1 %8555, %v9151_v61   ;;  %v5107_v31 = vpop.xlane.xlu1 %5106  ;;  %9158 = vpow2.f32 %v4527_v42  ;;  %v4489_v61 = vsub.f32 %v12150_v40, %v4472_v46 }
 0x6a2   :  { %v4529_v63 = vmul.f32 1.442695, %v4502_v4  ;;  %v5129_v51 = vsub.f32 %v12163_v6, %v5107_v31  ;;  %v5113_v37 = vpop.xlane.xlu0 %5112  ;;  %v9155_v4 = vpop.eup %9154 }
 0x6a3   :  { %3459 = vperm.xlu0 %8554, %v9153_v23  }
 0x6a4   :  { %9160 = vpow2.f32 %v4529_v63  ;;  %v5145_v27 = vmin.f32 %v5129_v51, 0.0  ;;  %v4505_v51 = vmin.f32 %v4489_v61, 0.0 }
 0x6a5   :  { %v5111_v29 = vpop.xlane.xlu1 %5110 }
 0x6a6   :  { %v5170_v20 = vmul.f32 1.442695, %v5145_v27  ;;  %v5131_v21 = vsub.f32 %v12184_v19, %v5111_v29  ;;  %v12336_v36 = vpop.f32.mrb[60].mxu0  ;;  %v5117_v40 = vpop.xlane.xlu0 %5116  ;;  %v4531_v27 = vmul.f32 1.442695, %v4503_v5  ;;  %v5132_v29 = vsub.f32 %v12170_v16, %v5113_v37 }
 0x6a7   :  { %15507 = vst [vmem:[#allocation88_spill] sm:$0xff] %v12336_v36  ;;  %v12339_v6 = vpop.f32.mrb[61].mxu0 }
 0x6a8   :  { %15508 = vst [vmem:[#allocation42_spill] sm:$0xff] %v12339_v6  ;;  %9162 = vpow2.f32 %v5170_v20  ;;  %v5147_v42 = vmin.f32 %v5131_v21, 0.0  ;;  %v12341_v55 = vpop.f32.mrb[62].mxu0  ;;  %v5148_v37 = vmin.f32 %v5132_v29, 0.0 }
 0x6a9   :  { %15509 = vst [vmem:[#allocation26_spill] sm:$0xff] %v12341_v55  ;;  %9164 = vpow2.f32 %v5168_v56  ;;  %v12343_v39 = vpop.f32.mrb[63].mxu0  ;;  %v4470_v22 = vpop.xlane.xlu1 %4469 }
 0x6aa   :  { %15510 = vst [vmem:[#allocation103_spill] sm:$0xff] %v12343_v39  ;;  %v9157_v31 = vpop.eup %9156  ;;  %v5174_v63 = vmul.f32 1.442695, %v5147_v42  ;;  %v4488_v19 = vsub.f32 %v12194_v38, %v4470_v22  ;;  %9166 = vpow2.f32 %v5172_v32  ;;  %v4535_v42 = vmul.f32 1.442695, %v4505_v51 }
 0x6ab   :  { %v7685_v23 = vpack.c.bf16 %v9155_v4, %v9157_v31  ;;  %v9159_v0 = vpop.eup %9158  ;;  %v5134_v38 = vsub.f32 %v12180_v52, %v5117_v40  ;;  %v5176_v29 = vmul.f32 1.442695, %v5148_v37 }
 0x6ac   :  { %9168 = vpow2.f32 %v5174_v63  ;;  %v4504_v46 = vmin.f32 %v4488_v19, 0.0 }
 0x6ad   :  { %8240 = vmatprep.mubr.msk.bf16.mxu0 %vm15220_vm2, %v7685_v23  ;;  %v4474_v56 = vpop.xlane.xlu1 %4473  ;;  %v5150_v23 = vmin.f32 %v5134_v38, 0.0 }
 0x6ae   :  { %v9161_v43 = vpop.eup %9160  ;;  %v4533_v20 = vmul.f32 1.442695, %v4504_v46  ;;  %v4490_v21 = vsub.f32 %v12207_v47, %v4474_v56 }
 0x6af   :  { %v12351_v32 = vpop.f32.mrb[48].mxu1  ;;  %v7688_v61 = vpack.c.bf16 %v9161_v43, %v9159_v0 }
 0x6b0   :  { %9170 = vpow2.f32 %v4533_v20  ;;  %v4506_v4 = vmin.f32 %v4490_v21, 0.0  ;;  %v12353_v22 = vpop.f32.mrb[49].mxu1  ;;  %v4057_v40 = vmax.f32 %v12351_v32, 1e-30 }
 0x6b1   :  { %9172 = vpow2.f32 %v4531_v27  ;;  %v4055_v5 = vmax.f32 %v12353_v22, 1e-30  ;;  %v12356_v31 = vpop.f32.mrb[50].mxu1  ;;  %8241 = vmatmul.mubr.msk.bf16.gmra.mrb[72].mxu0 %vm15417_vm0, %v7688_v61  ;;  %v5115_v16 = vpop.xlane.xlu1 %5114 }
 0x6b2   :  { %v9163_v47 = vpop.eup %9162  ;;  %v4537_v63 = vmul.f32 1.442695, %v4506_v4  ;;  %v5133_v52 = vsub.f32 %v12216_v13, %v5115_v16  ;;  %v12361_v19 = vpop.f32.mrb[51].mxu1  ;;  %9174 = vpow2.f32 %v4535_v42  ;;  %v5180_v42 = vmul.f32 1.442695, %v5150_v23 }
 0x6b3   :  { %v9165_v51 = vpop.eup %9164  ;;  %v4056_v56 = vmax.f32 %v12361_v19, 1e-30 }
 0x6b4   :  { %9176 = vpow2.f32 %v4537_v63  ;;  %v5149_v46 = vmin.f32 %v5133_v52, 0.0  ;;  %v7725_v0 = vpack.c.bf16 %v9163_v47, %v9165_v51  ;;  %v9167_v27 = vpop.eup %9166 }
 0x6b5   :  { %9178 = vrcp.f32 %v4055_v5  ;;  %v5119_v43 = vpop.xlane.xlu1 %5118  ;;  %v4058_v5 = vmax.f32 %v12356_v31, 1e-30 }
 0x6b6   :  { %v9169_v20 = vpop.eup %9168  ;;  %v5178_v21 = vmul.f32 1.442695, %v5149_v46  ;;  %8272 = vmatprep.mubr.msk.bf16.mxu1 %vm15220_vm2, %v7725_v0  ;;  %v5135_v13 = vsub.f32 %v12223_v11, %v5119_v43  ;;  %9180 = vrcp.f32 %v4057_v40 }
 0x6b7   :  { %v12368_v38 = vpop.f32.mrb[52].mxu1  ;;  %v7728_v61 = vpack.c.bf16 %v9169_v20, %v9167_v27 }
 0x6b8   :  { %15511 = vst [vmem:[#allocation36_spill] sm:$0xff] %v12368_v38  ;;  %9182 = vpow2.f32 %v5178_v21  ;;  %v5151_v4 = vmin.f32 %v5135_v13, 0.0  ;;  %v12370_v16 = vpop.f32.mrb[53].mxu1 }
 0x6b9   :  { %15512 = vst [vmem:[#allocation22_spill] sm:$0xff] %v12370_v16  ;;  %9184 = vrcp.f32 %v4056_v56  ;;  %v12373_v47 = vpop.f32.mrb[54].mxu1  ;;  %8273 = vmatmul.mubr.msk.bf16.gmra.mrb[72].mxu1 %vm15417_vm0, %v7728_v61  ;;  %v12377_v37 = vpop.permute.xlu1 %856  ;;  %vm15743_vm0 = vcmask 130048  }
 0x6ba   :  { %15513 = vst [vmem:[#allocation39_spill] sm:$0xff] %v12373_v47  ;;  %15514 = vst [vmem:[#allocation123_spill] sm:$0xff] %v12377_v37  ;;  %v9171_v11 = vpop.eup %9170  ;;  %9186 = vpow2.f32 %v5176_v29  ;;  %v5182_v63 = vmul.f32 1.442695, %v5151_v4  ;;  %v12379_v52 = vpop.f32.mrb[55].mxu1 }
 0x6bb   :  { %15515 = vst [vmem:[#allocation51_spill] sm:$0xff] %v12379_v52  ;;  %v9173_v51 = vpop.eup %9172  ;;  %9188 = vpow2.f32 %v5180_v42 }
 0x6bc   :  { %9190 = vpow2.f32 %v5182_v63  ;;  %v7691_v23 = vpack.c.bf16 %v9171_v11, %v9173_v51  ;;  %v9175_v40 = vpop.eup %9174  ;;  %v12397_v63 = vpop.permute.xlu0 %861 }
 0x6bd   :  { %9192 = vrcp.f32 %v4058_v5  ;;  %v12381_v46 = vpop.permute.xlu1 %866  ;;  %15518 = vst [vmem:[#allocation15_spill] sm:$0xff] %v12397_v63 }
 0x6be   :  { %15516 = vst [vmem:[#allocation49_spill] sm:$0xff] %v12381_v46  ;;  %v9177_v0 = vpop.eup %9176  ;;  %8244 = vmatprep.mubr.msk.bf16.mxu0 %vm15422_vm15, %v7691_v23 }
 0x6bf   :  { %v9179_v27 = vpop.eup %9178  ;;  %v12385_v56 = vpop.f32.mrb[56].mxu1  ;;  %v7694_v43 = vpack.c.bf16 %v9177_v0, %v9175_v40 }
 0x6c0   :  { %4089 = vperm.xlu1 %8555, %v9179_v27   ;;  %v12387_v20 = vpop.f32.mrb[57].mxu1  ;;  %v9181_v29 = vpop.eup %9180 }
 0x6c1   :  { %v12389_v21 = vpop.f32.mrb[58].mxu1  ;;  %8245 = vmatmul.mubr.msk.bf16.gmra.mrb[76].mxu0 %vm15425_vm12, %v7694_v43  ;;  %v12393_v13 = vpop.permute.xlu1 %871 }
 0x6c2   :  { %15517 = vst [vmem:[#allocation63_spill] sm:$0xff] %v12393_v13  ;;  %v9183_v42 = vpop.eup %9182  ;;  %v12395_v61 = vpop.f32.mrb[59].mxu1 }
 0x6c3   :  { %v9185_v4 = vpop.eup %9184 }
 0x6c4   :  { %v9187_v5 = vpop.eup %9186  ;;  %4094 = vperm.xlu0 %8554, %v9185_v4   ;;  %4099 = vperm.xlu1 %8555, %v9181_v29  }
 0x6c5   :  { %v9189_v11 = vpop.eup %9188  ;;  %v12399_v51 = vpop.permute.xlu1 %876  ;;  %v7731_v40 = vpack.c.bf16 %v9183_v42, %v9187_v5 }
 0x6c6   :  { %15519 = vst [vmem:[#allocation64_spill] sm:$0xff] %v12399_v51  ;;  %v9191_v23 = vpop.eup %9190  ;;  %v12415_v42 = vpop.permute.xlu0 %906 }
 0x6c7   :  { %v9193_v0 = vpop.eup %9192  ;;  %v12401_v27 = vpop.f32.mrb[60].mxu1  ;;  %8276 = vmatprep.mubr.msk.bf16.mxu1 %vm15422_vm15, %v7731_v40  ;;  %v7734_v10 = vpack.c.bf16 %v9191_v23, %v9189_v11  ;;  %15525 = vst [vmem:[#allocation18_spill] sm:$0xff] %v12415_v42 }
 0x6c8   :  { %15520 = vst [vmem:[#allocation58_spill] sm:$0xff] %v12401_v27  ;;  %4104 = vperm.xlu0 %8554, %v9193_v0   ;;  %v12405_v43 = vpop.f32.mrb[61].mxu1 }
 0x6c9   :  { %15521 = vst [vmem:[#allocation69_spill] sm:$0xff] %v12405_v43  ;;  %v12407_v44 = vpop.f32.mrb[62].mxu1  ;;  %v12409_v29 = vpop.permute.xlu1 %881  ;;  %8277 = vmatmul.mubr.msk.bf16.gmra.mrb[76].mxu1 %vm15425_vm12, %v7734_v10 }
 0x6ca   :  { %15522 = vst [vmem:[#allocation41_spill] sm:$0xff] %v12407_v44  ;;  %15523 = vst [vmem:[#allocation56_spill] sm:$0xff] %v12409_v29  ;;  %v12413_v4 = vpop.f32.mrb[63].mxu1  ;;  %v12419_v0 = vpop.permute.xlu0 %916 }
 0x6cb   :  { %15524 = vst [vmem:[#allocation44_spill] sm:$0xff] %v12413_v4  ;;  %15527 = vst [vmem:[#allocation67_spill] sm:$0xff] %v12419_v0 }
 0x6cd   :  { %v12417_v5 = vpop.permute.xlu1 %886 }
 0x6ce   :  { %15526 = vst [vmem:[#allocation83_spill] sm:$0xff] %v12417_v5  ;;  %v12425_v11 = vpop.permute.xlu0 %926 }
 0x6cf   :  { %15530 = vst [vmem:[#allocation86_spill] sm:$0xff] %v12425_v11 }
 0x6d1   :  { %v12421_v28 = vpop.permute.xlu1 %891 }
 0x6d2   :  { %15528 = vst [vmem:[#allocation62_spill] sm:$0xff] %v12421_v28  ;;  %v1510_v35 = vpop.permute.xlu0 %1509 }
 0x6d3   :  { %v1587_v10 = vmul.f32 %v1510_v35, %v15473_v3 }
 0x6d5   :  { %v12423_v40 = vpop.permute.xlu1 %896  ;;  %v1619_v53 = vmin.f32 %v1587_v10, 0.0  ;;  %vm1603_vm5 = vcmp.gt.f32.partialorder %v1587_v10, 0.0 }
 0x6d6   :  { %15529 = vst [vmem:[#allocation53_spill] sm:$0xff] %v12423_v40 }
 0x6d7   :  { %v1635_v5 = vmul.f32 1.442695, %v1619_v53  ;;  %v2805_v53 = vpop.permute.xlu0 %2804 }
 0x6d9   :  { %v12427_v23 = vpop.permute.xlu1 %901  ;;  %9194 = vpow2.f32 %v1635_v5 }
 0x6da   :  { %15531 = vst [vmem:[#allocation11_spill] sm:$0xff] %v12427_v23 }
 0x6dd   :  { %v12429_v41 = vpop.permute.xlu1 %911 }
 0x6de   :  { %15532 = vst [vmem:[#allocation60_spill] sm:$0xff] %v12429_v41 }
 0x6e1   :  { %v12432_v17 = vpop.permute.xlu1 %921 }
 0x6e2   :  { %15533 = vst [vmem:[#allocation120_spill] sm:$0xff] %v12432_v17 }
 0x6e5   :  { %v12434_v29 = vpop.permute.xlu1 %931 }
 0x6e6   :  { %15534 = vst [vmem:[#allocation50_spill] sm:$0xff] %v12434_v29  ;;  %v9195_v29 = vpop.eup %9194 }
 0x6e9   :  { %v1515_v0 = vpop.permute.xlu1 %1514 }
 0x6ea   :  { %v1588_v28 = vmul.f32 %v1515_v0, %v15492_v33  ;;  %v7496_v0 = vadd.f32 -1.0, %v9195_v29 }
 0x6ec   :  { %v1620_v40 = vmin.f32 %v1588_v28, 0.0  ;;  %vm1604_vm7 = vcmp.gt.f32.partialorder %v1588_v28, 0.0 }
 0x6ed   :  { %v1520_v51 = vpop.permute.xlu1 %1519 }
 0x6ee   :  { %v1637_v11 = vmul.f32 1.442695, %v1620_v40  ;;  %v1589_v23 = vmul.f32 %v15491_v62, %v1520_v51 }
 0x6f0   :  { %9196 = vpow2.f32 %v1637_v11  ;;  %v1621_v13 = vmin.f32 %v1589_v23, 0.0  ;;  %v12444_v11 = vsel %vm1603_vm5, %v1587_v10, %v7496_v0  ;;  %vm1605_vm6 = vcmp.gt.f32.partialorder %v1589_v23, 0.0 }
 0x6f1   :  { %v1525_v41 = vpop.permute.xlu1 %1524  ;;  %15535 = vst [vmem:[#allocation65_spill] sm:$0xff] %v12444_v11 }
 0x6f2   :  { %v1639_v46 = vmul.f32 1.442695, %v1621_v13  ;;  %v1590_v35 = vmul.f32 %v15493_v25, %v1525_v41  ;;  %v12442_v13 = vmul.f32 %v2805_v53, %v15475_v45  ;;  %v2815_v25 = vpop.permute.xlu0 %2814 }
 0x6f4   :  { %9198 = vpow2.f32 %v1639_v46  ;;  %v1622_v3 = vmin.f32 %v1590_v35, 0.0  ;;  %v2910_v45 = vmin.f32 %v12442_v13, 0.0  ;;  %vm1606_vm3 = vcmp.gt.f32.partialorder %v1590_v35, 0.0 }
 0x6f5   :  { %v2155_v17 = vpop.permute.xlu1 %2154 }
 0x6f6   :  { %v1641_v37 = vmul.f32 1.442695, %v1622_v3  ;;  %v2232_v33 = vmul.f32 %v2155_v17, %v15494_v58 }
 0x6f8   :  { %9200 = vpow2.f32 %v1641_v37  ;;  %v2264_v5 = vmin.f32 %v2232_v33, 0.0  ;;  %vm2248_vm5 = vcmp.gt.f32.partialorder %v2232_v33, 0.0 }
 0x6f9   :  { %v2160_v40 = vpop.permute.xlu1 %2159 }
 0x6fa   :  { %v9197_v42 = vpop.eup %9196  ;;  %v2280_v62 = vmul.f32 1.442695, %v2264_v5  ;;  %v2233_v51 = vmul.f32 %v2160_v40, %v15497_v12 }
 0x6fb   :  { %v7497_v41 = vadd.f32 -1.0, %v9197_v42  ;;  %v12453_v42 = vmul.f32 %v15477_v18, %v2815_v25 }
 0x6fc   :  { %9202 = vpow2.f32 %v2280_v62  ;;  %v2265_v46 = vmin.f32 %v2233_v51, 0.0  ;;  %v2927_v62 = vmul.f32 1.442695, %v2910_v45 }
 0x6fd   :  { %v12446_v17 = vsel %vm1604_vm7, %v1588_v28, %v7497_v41  ;;  %v2165_v58 = vpop.permute.xlu1 %2164  ;;  %v2912_v41 = vmin.f32 %v12453_v42, 0.0  ;;  %vm2249_vm7 = vcmp.gt.f32.partialorder %v2233_v51, 0.0 }
 0x6fe   :  { %15536 = vst [vmem:[#allocation66_spill] sm:$0xff] %v12446_v17  ;;  %v9199_v37 = vpop.eup %9198  ;;  %v2282_v3 = vmul.f32 1.442695, %v2265_v46  ;;  %v2234_v12 = vmul.f32 %v15499_v34, %v2165_v58 }
 0x6ff   :  { %v7498_v5 = vadd.f32 -1.0, %v9199_v37  ;;  %v2931_v45 = vmul.f32 1.442695, %v2912_v41 }
 0x700   :  { %9204 = vpow2.f32 %v2282_v3  ;;  %v2266_v53 = vmin.f32 %v2234_v12, 0.0 }
 0x701   :  { %v2170_v10 = vpop.permute.xlu1 %2169  ;;  %v12457_v46 = vsel %vm1605_vm6, %v1589_v23, %v7498_v5  ;;  %vm2250_vm6 = vcmp.gt.f32.partialorder %v2234_v12, 0.0 }
 0x702   :  { %v9201_v0 = vpop.eup %9200  ;;  %v2284_v28 = vmul.f32 1.442695, %v2266_v53  ;;  %v2235_v40 = vmul.f32 %v15500_v9, %v2170_v10  ;;  %15537 = vst [vmem:[#allocation61_spill] sm:$0xff] %v12457_v46 }
 0x703   :  { %v7499_v29 = vadd.f32 -1.0, %v9201_v0 }
 0x704   :  { %9206 = vpow2.f32 %v2284_v28  ;;  %v2267_v34 = vmin.f32 %v2235_v40, 0.0 }
 0x705   :  { %v12459_v18 = vsel %vm1606_vm3, %v1590_v35, %v7499_v29  ;;  %v2800_v25 = vpop.permute.xlu1 %2799  ;;  %9208 = vpow2.f32 %v2927_v62  ;;  %vm2251_vm3 = vcmp.gt.f32.partialorder %v2235_v40, 0.0 }
 0x706   :  { %15538 = vst [vmem:[#allocation55_spill] sm:$0xff] %v12459_v18  ;;  %v9203_v58 = vpop.eup %9202  ;;  %v2286_v3 = vmul.f32 1.442695, %v2267_v34  ;;  %v2877_v9 = vmul.f32 %v2800_v25, %v15501_v2 }
 0x707   :  { %v7536_v10 = vadd.f32 -1.0, %v9203_v58 }
 0x708   :  { %9210 = vpow2.f32 %v2286_v3  ;;  %v2909_v53 = vmin.f32 %v2877_v9, 0.0 }
 0x709   :  { %v2810_v0 = vpop.permute.xlu1 %2809  ;;  %9212 = vpow2.f32 %v2931_v45  ;;  %v12465_v5 = vsel %vm2248_vm5, %v2232_v33, %v7536_v10  ;;  %vm2894_vm5 = vcmp.gt.f32.partialorder %v12442_v13, 0.0 }
 0x70a   :  { %v9205_v28 = vpop.eup %9204  ;;  %v2925_v63 = vmul.f32 1.442695, %v2909_v53  ;;  %v2879_v23 = vmul.f32 %v15502_v8, %v2810_v0  ;;  %15539 = vst [vmem:[#allocation20_spill] sm:$0xff] %v12465_v5  ;;  %v15560_v5 = vld [vmem:[#allocation118_spill] sm:$0xff] }
 0x70b   :  { %v7537_v35 = vadd.f32 -1.0, %v9205_v28 }
 0x70c   :  { %9214 = vpow2.f32 %v2925_v63  ;;  %v2911_v29 = vmin.f32 %v2879_v23, 0.0 }
 0x70d   :  { %v12467_v34 = vsel %vm2249_vm7, %v2233_v51, %v7537_v35  ;;  %vm2893_vm7 = vcmp.gt.f32.partialorder %v2877_v9, 0.0 }
 0x70e   :  { %15540 = vst [vmem:[#allocation68_spill] sm:$0xff] %v12467_v34  ;;  %v9207_v2 = vpop.eup %9206  ;;  %v2929_v41 = vmul.f32 1.442695, %v2911_v29  ;;  %v1481_v34 = vmax.f32 %v15560_v5, 1e-30 }
 0x70f   :  { %v9209_v25 = vpop.eup %9208  ;;  %v7538_v58 = vadd.f32 -1.0, %v9207_v2 }
 0x710   :  { %9216 = vpow2.f32 %v2929_v41  ;;  %v7577_v53 = vadd.f32 -1.0, %v9209_v25 }
 0x711   :  { %v12471_v63 = vsel %vm2250_vm6, %v2234_v12, %v7538_v58  ;;  %vm2896_vm6 = vcmp.gt.f32.partialorder %v12453_v42, 0.0 }
 0x712   :  { %v9211_v3 = vpop.eup %9210  ;;  %15541 = vst [vmem:[#allocation87_spill] sm:$0xff] %v12471_v63  ;;  %v12479_v28 = vsel %vm2894_vm5, %v12442_v13, %v7577_v53 }
 0x713   :  { %v7539_v8 = vadd.f32 -1.0, %v9211_v3  ;;  %v9213_v45 = vpop.eup %9212  ;;  %15543 = vst [vmem:[#allocation17_spill] sm:$0xff] %v12479_v28 }
 0x714   :  { %v7579_v35 = vadd.f32 -1.0, %v9213_v45 }
 0x715   :  { %v12473_v33 = vsel %vm2251_vm3, %v2235_v40, %v7539_v8  ;;  %vm2895_vm3 = vcmp.gt.f32.partialorder %v2879_v23, 0.0 }
 0x716   :  { %15542 = vst [vmem:[#allocation5_spill] sm:$0xff] %v12473_v33  ;;  %v9215_v51 = vpop.eup %9214  ;;  %v12487_v25 = vsel %vm2896_vm6, %v12453_v42, %v7579_v35 }
 0x717   :  { %v7576_v0 = vadd.f32 -1.0, %v9215_v51  ;;  %15545 = vst [vmem:[#allocation7_spill] sm:$0xff] %v12487_v25 }
 0x719   :  { %v12481_v29 = vsel %vm2893_vm7, %v2877_v9, %v7576_v0 }
 0x71a   :  { %15544 = vst [vmem:[#allocation82_spill] sm:$0xff] %v12481_v29  ;;  %v9217_v2 = vpop.eup %9216 }
 0x71b   :  { %v7578_v40 = vadd.f32 -1.0, %v9217_v2 }
 0x71c   :  { %v3445_v41 = vpop.permute.xlu1 %3444 }
 0x71d   :  { %v12489_v58 = vsel %vm2895_vm3, %v2879_v23, %v7578_v40  ;;  %v3522_v13 = vmul.f32 %v3445_v41, %v12301_v48 }
 0x71e   :  { %15546 = vst [vmem:[#allocation97_spill] sm:$0xff] %v12489_v58  ;;  %v3450_v8 = vpop.permute.xlu0 %3449 }
 0x71f   :  { %v3554_v3 = vmin.f32 %v3522_v13, 0.0  ;;  %v3523_v45 = vmul.f32 %v3450_v8, %v12306_v7  ;;  %vm3538_vm5 = vcmp.gt.f32.partialorder %v3522_v13, 0.0 }
 0x720   :  { %v3455_v53 = vpop.permute.xlu1 %3454 }
 0x721   :  { %v3570_v51 = vmul.f32 1.442695, %v3554_v3  ;;  %v3524_v0 = vmul.f32 %v12299_v49, %v3455_v53  ;;  %v3555_v2 = vmin.f32 %v3523_v45, 0.0  ;;  %vm3539_vm7 = vcmp.gt.f32.partialorder %v3523_v45, 0.0 }
 0x722   :  { %v3460_v42 = vpop.permute.xlu0 %3459 }
 0x723   :  { %9218 = vpow2.f32 %v3570_v51  ;;  %v3556_v12 = vmin.f32 %v3524_v0, 0.0  ;;  %v3572_v35 = vmul.f32 1.442695, %v3555_v2  ;;  %v3525_v23 = vmul.f32 %v12304_v26, %v3460_v42 }
 0x724   :  { %vm3540_vm6 = vcmp.gt.f32.partialorder %v3524_v0, 0.0 }
 0x725   :  { %v3574_v40 = vmul.f32 1.442695, %v3556_v12  ;;  %9220 = vpow2.f32 %v3572_v35  ;;  %v3557_v48 = vmin.f32 %v3525_v23, 0.0  ;;  %vm3541_vm3 = vcmp.gt.f32.partialorder %v3525_v23, 0.0 }
 0x727   :  { %9222 = vpow2.f32 %v3574_v40  ;;  %v3576_v41 = vmul.f32 1.442695, %v3557_v48 }
 0x729   :  { %9224 = vpow2.f32 %v3576_v41 }
 0x72d   :  { %v9219_v9 = vpop.eup %9218 }
 0x72e   :  { %v7616_v10 = vadd.f32 -1.0, %v9219_v9 }
 0x72f   :  { %v9221_v7 = vpop.eup %9220 }
 0x730   :  { %v7617_v3 = vadd.f32 -1.0, %v9221_v7  ;;  %v12497_v49 = vsel %vm3538_vm5, %v3522_v13, %v7616_v10 }
 0x731   :  { %v9223_v8 = vpop.eup %9222  ;;  %15547 = vst [vmem:[#allocation125_spill] sm:$0xff] %v12497_v49 }
 0x732   :  { %v12499_v53 = vsel %vm3539_vm7, %v3523_v45, %v7617_v3  ;;  %v7618_v51 = vadd.f32 -1.0, %v9223_v8 }
 0x733   :  { %15548 = vst [vmem:[#allocation46_spill] sm:$0xff] %v12499_v53  ;;  %v9225_v2 = vpop.eup %9224 }
 0x734   :  { %v7619_v12 = vadd.f32 -1.0, %v9225_v2  ;;  %v12503_v42 = vsel %vm3540_vm6, %v3524_v0, %v7618_v51 }
 0x735   :  { %15549 = vst [vmem:[#allocation27_spill] sm:$0xff] %v12503_v42 }
 0x736   :  { %v12505_v9 = vsel %vm3541_vm3, %v3525_v23, %v7619_v12 }
 0x737   :  { %15550 = vst [vmem:[#allocation37_spill] sm:$0xff] %v12505_v9 }
 0x73f   :  { %v4090_v40 = vpop.permute.xlu1 %4089 }
 0x740   :  { %v12510_v10 = vmul.f32 %v4090_v40, %v12353_v22 }
 0x741   :  { %v12512_v13 = vpop.f32.mrb[64].mxu0 }
 0x742   :  { %v4199_v45 = vmin.f32 %v12510_v10, 0.0  ;;  %v12515_v48 = vpop.f32.mrb[65].mxu0  ;;  %v4702_v3 = vmax.f32 %v12512_v13, 1e-30  ;;  %vm4183_vm5 = vcmp.gt.f32.partialorder %v12510_v10, 0.0 }
 0x743   :  { %v4095_v41 = vpop.permute.xlu0 %4094  ;;  %v4100_v7 = vpop.permute.xlu1 %4099  ;;  %v4700_v0 = vmax.f32 %v12515_v48, 1e-30 }
 0x744   :  { %v4215_v8 = vmul.f32 1.442695, %v4199_v45  ;;  %v4168_v23 = vmul.f32 %v4095_v41, %v12361_v19  ;;  %v12521_v51 = vmul.f32 %v12351_v32, %v4100_v7  ;;  %v12523_v22 = vpop.f32.mrb[66].mxu0 }
 0x745   :  { %9226 = vrcp.f32 %v4700_v0  ;;  %v12525_v2 = vpop.f32.mrb[67].mxu0  ;;  %v4703_v32 = vmax.f32 %v12523_v22, 1e-30 }
 0x746   :  { %9228 = vpow2.f32 %v4215_v8  ;;  %v4200_v12 = vmin.f32 %v4168_v23, 0.0  ;;  %v4201_v40 = vmin.f32 %v12521_v51, 0.0  ;;  %v4701_v26 = vmax.f32 %v12525_v2, 1e-30 }
 0x747   :  { %v4105_v35 = vpop.permute.xlu0 %4104  ;;  %9230 = vrcp.f32 %v4702_v3  ;;  %vm4184_vm7 = vcmp.gt.f32.partialorder %v4168_v23, 0.0  ;;  %vm4185_vm6 = vcmp.gt.f32.partialorder %v12521_v51, 0.0 }
 0x748   :  { %v4217_v45 = vmul.f32 1.442695, %v4200_v12  ;;  %v4170_v19 = vmul.f32 %v12356_v31, %v4105_v35  ;;  %v4219_v41 = vmul.f32 1.442695, %v4201_v40  ;;  %9232 = vrcp.f32 %v4701_v26 }
 0x749   :  { %v12531_v7 = vpop.f32.mrb[68].mxu0  ;;  %v12533_v0 = vpop.f32.mrb[64].mxu1 }
 0x74a   :  { %15551 = vst [vmem:[#allocation16_spill] sm:$0xff] %v12531_v7  ;;  %9234 = vpow2.f32 %v4217_v45  ;;  %v4202_v8 = vmin.f32 %v4170_v19, 0.0  ;;  %v12535_v62 = vpop.f32.mrb[69].mxu0  ;;  %v12537_v37 = vpop.f32.mrb[65].mxu1  ;;  %v5347_v45 = vmax.f32 %v12533_v0, 1e-30 }
 0x74b   :  { %15552 = vst [vmem:[#allocation8_spill] sm:$0xff] %v12535_v62  ;;  %9236 = vpow2.f32 %v4219_v41  ;;  %v5345_v3 = vmax.f32 %v12537_v37, 1e-30  ;;  %v12540_v12 = vpop.f32.mrb[70].mxu0  ;;  %v12542_v31 = vpop.f32.mrb[66].mxu1  ;;  %vm4186_vm3 = vcmp.gt.f32.partialorder %v4170_v19, 0.0 }
 0x74c   :  { %v4221_v42 = vmul.f32 1.442695, %v4202_v8  ;;  %15553 = vst [vmem:[#allocation28_spill] sm:$0xff] %v12540_v12  ;;  %9238 = vrcp.f32 %v4703_v32  ;;  %v12544_v26 = vpop.f32.mrb[71].mxu0  ;;  %v12546_v35 = vpop.f32.mrb[67].mxu1  ;;  %v15557_v32 = vld [vmem:[#allocation119_spill] sm:$0xff] }
 0x74d   :  { %15554 = vst [vmem:[#allocation75_spill] sm:$0xff] %v12544_v26  ;;  %v5346_v41 = vmax.f32 %v12546_v35, 1e-30  ;;  %v1479_v25 = vmax.f32 %v15557_v32, 1e-30 }
 0x74e   :  { %9240 = vpow2.f32 %v4221_v42  ;;  %v5348_v63 = vmax.f32 %v12542_v31, 1e-30 }
 0x74f   :  { %v9227_v40 = vpop.eup %9226  ;;  %9242 = vrcp.f32 %v5345_v3 }
 0x750   :  { %v9229_v9 = vpop.eup %9228  ;;  %4734 = vperm.xlu1 %8555, %v9227_v40   ;;  %9244 = vrcp.f32 %v5347_v45 }
 0x751   :  { %v12550_v8 = vpop.f32.mrb[68].mxu1  ;;  %v9231_v49 = vpop.eup %9230  ;;  %v7656_v29 = vadd.f32 -1.0, %v9229_v9  ;;  %9246 = vrcp.f32 %v5346_v41 }
 0x752   :  { %15555 = vst [vmem:[#allocation33_spill] sm:$0xff] %v12550_v8  ;;  %v12552_v53 = vpop.f32.mrb[69].mxu1  ;;  %v9233_v58 = vpop.eup %9232  ;;  %9248 = vrcp.f32 %v1479_v25  ;;  %v15564_v25 = vld [vmem:[#allocation121_spill] sm:$0xff] }
 0x753   :  { %15556 = vst [vmem:[#allocation57_spill] sm:$0xff] %v12552_v53  ;;  %v12555_v28 = vpop.f32.mrb[70].mxu1  ;;  %4739 = vperm.xlu0 %8554, %v9233_v58   ;;  %v12563_v9 = vsel %vm4183_vm5, %v12510_v10, %v7656_v29  ;;  %v15563_v58 = vld [vmem:[#allocation122_spill] sm:$0xff]  ;;  %9250 = vrcp.f32 %v5348_v63  ;;  %v1482_v29 = vmax.f32 %v15564_v25, 1e-30 }
 0x754   :  { %15558 = vst [vmem:[#allocation45_spill] sm:$0xff] %v12555_v28  ;;  %v9235_v42 = vpop.eup %9234  ;;  %v12558_v3 = vpop.f32.mrb[71].mxu1  ;;  %4744 = vperm.xlu1 %8555, %v9231_v49   ;;  %15561 = vst [vmem:[#allocation119_spill] sm:$0xff] %v12563_v9  ;;  %v1480_v11 = vmax.f32 %v15563_v58, 1e-30  ;;  %9252 = vrcp.f32 %v1481_v34  ;;  %v15568_v49 = vld [vmem:[#allocation71_spill] sm:$0xff] }
 0x755   :  { %15559 = vst [vmem:[#allocation96_spill] sm:$0xff] %v12558_v3  ;;  %v9237_v40 = vpop.eup %9236  ;;  %v7657_v33 = vadd.f32 -1.0, %v9235_v42  ;;  %v2126_v9 = vmax.f32 %v15568_v49, 1e-30  ;;  %v15569_v34 = vld [vmem:[#allocation77_spill] sm:$0xff] }
 0x756   :  { %v9239_v46 = vpop.eup %9238  ;;  %v7658_v18 = vadd.f32 -1.0, %v9237_v40  ;;  %9254 = vrcp.f32 %v1480_v11  ;;  %v15571_v11 = vld [vmem:[#allocation95_spill] sm:$0xff] }
 0x757   :  { %v12565_v45 = vsel %vm4184_vm7, %v4168_v23, %v7657_v33  ;;  %4749 = vperm.xlu0 %8554, %v9239_v46   ;;  %v15567_v23 = vld [vmem:[#allocation90_spill] sm:$0xff]  ;;  %9256 = vrcp.f32 %v1482_v29  ;;  %v15572_v29 = vld [vmem:[#allocation81_spill] sm:$0xff] }
 0x758   :  { %15562 = vst [vmem:[#allocation118_spill] sm:$0xff] %v12565_v45  ;;  %v9241_v41 = vpop.eup %9240  ;;  %v12573_v33 = vsel %vm4185_vm6, %v12521_v51, %v7658_v18  ;;  %v2124_v40 = vmax.f32 %v15567_v23, 1e-30  ;;  %v2125_v18 = vmax.f32 %v15569_v34, 1e-30 }
 0x759   :  { %v7659_v42 = vadd.f32 -1.0, %v9241_v41  ;;  %v9243_v17 = vpop.eup %9242  ;;  %15565 = vst [vmem:[#allocation122_spill] sm:$0xff] %v12573_v33  ;;  %v2127_v45 = vmax.f32 %v15571_v11, 1e-30 }
 0x75a   :  { %5379 = vperm.xlu1 %8555, %v9243_v17   ;;  %v9245_v63 = vpop.eup %9244  ;;  %9258 = vrcp.f32 %v2124_v40  ;;  %v15573_v40 = vld [vmem:[#allocation4_spill] sm:$0xff] }
 0x75b   :  { %v12575_v10 = vsel %vm4186_vm3, %v4170_v19, %v7659_v42  ;;  %v9247_v41 = vpop.eup %9246  ;;  %v15570_v42 = vld [vmem:[#allocation128_spill] sm:$0xff]  ;;  %9260 = vrcp.f32 %v2126_v9 }
 0x75c   :  { %15566 = vst [vmem:[#allocation121_spill] sm:$0xff] %v12575_v10  ;;  %5384 = vperm.xlu0 %8554, %v9247_v41   ;;  %v9249_v51 = vpop.eup %9248  ;;  %v2769_v17 = vmax.f32 %v15570_v42, 1e-30  ;;  %9262 = vrcp.f32 %v2125_v18  ;;  %v2771_v10 = vmax.f32 %v15572_v29, 1e-30  ;;  %v15574_v42 = vld [vmem:[#allocation124_spill] sm:$0xff] }
 0x75d   :  { %v9251_v19 = vpop.eup %9250  ;;  %v2772_v9 = vmax.f32 %v15574_v42, 1e-30  ;;  %v3414_v18 = vmax.f32 %v12315_v57, 1e-30 }
 0x75e   :  { %5389 = vperm.xlu1 %8555, %v9245_v63   ;;  %v9253_v46 = vpop.eup %9252  ;;  %9264 = vrcp.f32 %v2769_v17  ;;  %v2770_v63 = vmax.f32 %v15573_v40, 1e-30  ;;  %v3416_v17 = vmax.f32 %v12312_v59, 1e-30 }
 0x75f   :  { %9266 = vrcp.f32 %v2127_v45  ;;  %v3415_v45 = vmax.f32 %v12319_v50, 1e-30 }
 0x760   :  { %5394 = vperm.xlu0 %8554, %v9251_v19   ;;  %v9255_v33 = vpop.eup %9254  ;;  %9268 = vrcp.f32 %v2771_v10  ;;  %v3417_v10 = vmax.f32 %v12317_v1, 1e-30  ;;  %v15595_v1 = vld [vmem:[#allocation109_spill] sm:$0xff] }
 0x761   :  { %v9257_v41 = vpop.eup %9256  ;;  %9270 = vrcp.f32 %v2770_v63  ;;  %v2131_v59 = vmax.f32 %v15595_v1, 1e-30  ;;  %v15602_v1 = vld [vmem:[#allocation14_spill] sm:$0xff] }
 0x762   :  { %1529 = vperm.xlu1 %8555, %v9249_v51   ;;  %9272 = vrcp.f32 %v2772_v9  ;;  %v4061_v9 = vmax.f32 %v12368_v38, 1e-30  ;;  %v2776_v57 = vmax.f32 %v15602_v1, 1e-30 }
 0x763   :  { %9274 = vrcp.f32 %v3414_v18  ;;  %v4060_v18 = vmax.f32 %v12379_v52, 1e-30 }
 0x764   :  { %1534 = vperm.xlu0 %8554, %v9255_v33   ;;  %v9259_v49 = vpop.eup %9258  ;;  %9276 = vrcp.f32 %v3416_v17  ;;  %v4062_v17 = vmax.f32 %v12373_v47, 1e-30  ;;  %v15587_v47 = vld [vmem:[#allocation107_spill] sm:$0xff] }
 0x765   :  { %v9261_v51 = vpop.eup %9260  ;;  %9278 = vrcp.f32 %v3415_v45  ;;  %v4704_v45 = vmax.f32 %v12535_v62, 1e-30  ;;  %v2128_v38 = vmax.f32 %v15587_v47, 1e-30 }
 0x766   :  { %1539 = vperm.xlu1 %8555, %v9253_v46   ;;  %v9263_v19 = vpop.eup %9262  ;;  %9280 = vrcp.f32 %v3417_v10  ;;  %v4706_v10 = vmax.f32 %v12531_v7, 1e-30  ;;  %v5352_v7 = vmax.f32 %v12555_v28, 1e-30  ;;  %v15586_v28 = vld [vmem:[#allocation129_spill] sm:$0xff] }
 0x767   :  { %v1486_v62 = vmax.f32 %v15586_v28, 1e-30  ;;  %v15594_v28 = vld [vmem:[#allocation13_spill] sm:$0xff] }
 0x768   :  { %1544 = vperm.xlu0 %8554, %v9257_v41   ;;  %v9265_v33 = vpop.eup %9264 }
 0x769   :  { %v9267_v46 = vpop.eup %9266 }
 0x76a   :  { %2174 = vperm.xlu1 %8555, %v9259_v49   ;;  %v4059_v49 = vmax.f32 %v12370_v16, 1e-30  ;;  %v9269_v63 = vpop.eup %9268  ;;  %v2773_v16 = vmax.f32 %v15594_v28, 1e-30  ;;  %v15600_v28 = vld [vmem:[#allocation19_spill] sm:$0xff] }
 0x76b   :  { %v9271_v41 = vpop.eup %9270 }
 0x76c   :  { %2179 = vperm.xlu0 %8554, %v9263_v19   ;;  %9282 = vrcp.f32 %v4059_v49  ;;  %v4705_v49 = vmax.f32 %v12544_v26, 1e-30 }
 0x76d   :  { %9284 = vrcp.f32 %v4061_v9  ;;  %v4707_v9 = vmax.f32 %v12540_v12, 1e-30 }
 0x76e   :  { %2184 = vperm.xlu1 %8555, %v9261_v51   ;;  %v9273_v51 = vpop.eup %9272  ;;  %9286 = vrcp.f32 %v4060_v18  ;;  %v5349_v18 = vmax.f32 %v12552_v53, 1e-30  ;;  %v15579_v53 = vld [vmem:[#allocation127_spill] sm:$0xff] }
 0x76f   :  { %v9275_v19 = vpop.eup %9274  ;;  %9288 = vrcp.f32 %v4062_v17  ;;  %v1483_v12 = vmax.f32 %v15579_v53, 1e-30 }
 0x770   :  { %2189 = vperm.xlu0 %8554, %v9267_v46   ;;  %9290 = vrcp.f32 %v4704_v45  ;;  %v5351_v45 = vmax.f32 %v12550_v8, 1e-30 }
 0x771   :  { %9292 = vrcp.f32 %v4706_v10 }
 0x772   :  { %2819 = vperm.xlu1 %8555, %v9265_v33   ;;  %v9277_v33 = vpop.eup %9276  ;;  %9294 = vrcp.f32 %v4705_v49  ;;  %v5350_v49 = vmax.f32 %v12558_v3, 1e-30 }
 0x773   :  { %v9279_v46 = vpop.eup %9278  ;;  %9296 = vrcp.f32 %v4707_v9 }
 0x774   :  { %2824 = vperm.xlu0 %8554, %v9271_v41   ;;  %9298 = vrcp.f32 %v5349_v18  ;;  %v15583_v18 = vld [vmem:[#allocation126_spill] sm:$0xff] }
 0x775   :  { %9300 = vrcp.f32 %v5351_v45  ;;  %v1485_v3 = vmax.f32 %v15583_v18, 1e-30  ;;  %v15585_v45 = vld [vmem:[#allocation130_spill] sm:$0xff] }
 0x776   :  { %2829 = vperm.xlu1 %8555, %v9269_v63   ;;  %v9281_v63 = vpop.eup %9280  ;;  %9302 = vrcp.f32 %v5350_v49 }
 0x777   :  { %v9283_v41 = vpop.eup %9282  ;;  %9304 = vrcp.f32 %v1483_v12 }
 0x778   :  { %2834 = vperm.xlu0 %8554, %v9273_v51   ;;  %9306 = vrcp.f32 %v5352_v7  ;;  %v15591_v7 = vld [vmem:[#allocation108_spill] sm:$0xff] }
 0x779   :  { %9308 = vrcp.f32 %v1485_v3 }
 0x77a   :  { %3464 = vperm.xlu1 %8555, %v9275_v19   ;;  %v9285_v19 = vpop.eup %9284 }
 0x77c   :  { %3469 = vperm.xlu0 %8554, %v9279_v46   ;;  %v9287_v46 = vpop.eup %9286 }
 0x77e   :  { %3474 = vperm.xlu1 %8555, %v9277_v33  }
 0x780   :  { %3479 = vperm.xlu0 %8554, %v9281_v63   ;;  %v9289_v63 = vpop.eup %9288 }
 0x782   :  { %4109 = vperm.xlu1 %8555, %v9283_v41   ;;  %v9291_v41 = vpop.eup %9290 }
 0x783   :  { %v9293_v8 = vpop.eup %9292 }
 0x784   :  { %v12600_v51 = vpop.f32.mrb[72].mxu0  ;;  %4114 = vperm.xlu0 %8554, %v9287_v46  }
 0x785   :  { %15575 = vst [vmem:[#allocation90_spill] sm:$0xff] %v12600_v51  ;;  %v12602_v17 = vpop.f32.mrb[73].mxu0 }
 0x786   :  { %15576 = vst [vmem:[#allocation77_spill] sm:$0xff] %v12602_v17  ;;  %v12604_v33 = vpop.f32.mrb[74].mxu0  ;;  %4119 = vperm.xlu1 %8555, %v9285_v19   ;;  %v9295_v19 = vpop.eup %9294 }
 0x787   :  { %15577 = vst [vmem:[#allocation95_spill] sm:$0xff] %v12604_v33  ;;  %v12607_v10 = vpop.f32.mrb[75].mxu0 }
 0x788   :  { %15578 = vst [vmem:[#allocation81_spill] sm:$0xff] %v12607_v10  ;;  %4124 = vperm.xlu0 %8554, %v9289_v63   ;;  %v1484_v63 = vmax.f32 %v15585_v45, 1e-30  ;;  %v2130_v45 = vmax.f32 %v15591_v7, 1e-30  ;;  %v15598_v7 = vld [vmem:[#allocation10_spill] sm:$0xff] }
 0x78a   :  { %4754 = vperm.xlu1 %8555, %v9291_v41   ;;  %v9297_v41 = vpop.eup %9296  ;;  %9310 = vrcp.f32 %v1484_v63 }
 0x78b   :  { %v9299_v49 = vpop.eup %9298  ;;  %9312 = vrcp.f32 %v1486_v62 }
 0x78c   :  { %v12612_v9 = vpop.f32.mrb[72].mxu1  ;;  %4759 = vperm.xlu0 %8554, %v9295_v19   ;;  %v9301_v12 = vpop.eup %9300  ;;  %9314 = vrcp.f32 %v2128_v38  ;;  %v2775_v38 = vmax.f32 %v15598_v7, 1e-30  ;;  %v3418_v7 = vmax.f32 %v12327_v60, 1e-30 }
 0x78d   :  { %15580 = vst [vmem:[#allocation4_spill] sm:$0xff] %v12612_v9  ;;  %v12614_v46 = vpop.f32.mrb[73].mxu1  ;;  %9316 = vrcp.f32 %v2130_v45  ;;  %v2774_v45 = vmax.f32 %v15600_v28, 1e-30 }
 0x78e   :  { %15581 = vst [vmem:[#allocation134_spill] sm:$0xff] %v12614_v46  ;;  %v12616_v26 = vpop.f32.mrb[74].mxu1  ;;  %4764 = vperm.xlu1 %8555, %v9293_v8   ;;  %v9303_v8 = vpop.eup %9302 }
 0x78f   :  { %15582 = vst [vmem:[#allocation135_spill] sm:$0xff] %v12616_v26  ;;  %v12619_v53 = vpop.f32.mrb[75].mxu1 }
 0x790   :  { %15584 = vst [vmem:[#allocation136_spill] sm:$0xff] %v12619_v53  ;;  %4769 = vperm.xlu0 %8554, %v9297_v41   ;;  %v15593_v41 = vld [vmem:[#allocation3_spill] sm:$0xff] }
 0x791   :  { %v2129_v63 = vmax.f32 %v15593_v41, 1e-30 }
 0x792   :  { %5399 = vperm.xlu1 %8555, %v9299_v49   ;;  %v9305_v49 = vpop.eup %9304 }
 0x793   :  { %v9307_v47 = vpop.eup %9306  ;;  %9318 = vrcp.f32 %v2129_v63 }
 0x794   :  { %v12624_v52 = vpop.f32.mrb[76].mxu0  ;;  %5404 = vperm.xlu0 %8554, %v9303_v8   ;;  %v9309_v62 = vpop.eup %9308  ;;  %9320 = vrcp.f32 %v2773_v16 }
 0x795   :  { %15588 = vst [vmem:[#allocation137_spill] sm:$0xff] %v12624_v52  ;;  %v12626_v19 = vpop.f32.mrb[77].mxu0  ;;  %v9311_v8 = vpop.eup %9310  ;;  %9322 = vrcp.f32 %v2131_v59  ;;  %v3419_v59 = vmax.f32 %v12331_v30, 1e-30 }
 0x796   :  { %15589 = vst [vmem:[#allocation138_spill] sm:$0xff] %v12626_v19  ;;  %v12628_v18 = vpop.f32.mrb[78].mxu0  ;;  %5409 = vperm.xlu1 %8555, %v9301_v12   ;;  %9324 = vrcp.f32 %v2775_v38  ;;  %v3421_v38 = vmax.f32 %v12329_v15, 1e-30 }
 0x797   :  { %15590 = vst [vmem:[#allocation139_spill] sm:$0xff] %v12628_v18  ;;  %v12631_v3 = vpop.f32.mrb[79].mxu0  ;;  %9326 = vrcp.f32 %v2774_v45  ;;  %v4063_v45 = vmax.f32 %v12387_v20, 1e-30 }
 0x798   :  { %15592 = vst [vmem:[#allocation140_spill] sm:$0xff] %v12631_v3  ;;  %5414 = vperm.xlu0 %8554, %v9307_v47   ;;  %9328 = vrcp.f32 %v2776_v57  ;;  %v4065_v57 = vmax.f32 %v12385_v56, 1e-30 }
 0x799   :  { %9330 = vrcp.f32 %v3418_v7  ;;  %v4064_v7 = vmax.f32 %v12395_v61, 1e-30 }
 0x79a   :  { %1549 = vperm.xlu1 %8555, %v9305_v49   ;;  %v9313_v49 = vpop.eup %9312 }
 0x79b   :  { %v9315_v63 = vpop.eup %9314 }
 0x79c   :  { %v12636_v50 = vpop.f32.mrb[76].mxu1  ;;  %1554 = vperm.xlu0 %8554, %v9311_v8   ;;  %v9317_v16 = vpop.eup %9316 }
 0x79d   :  { %15596 = vst [vmem:[#allocation141_spill] sm:$0xff] %v12636_v50  ;;  %v12638_v12 = vpop.f32.mrb[77].mxu1  ;;  %v9319_v8 = vpop.eup %9318 }
 0x79e   :  { %15597 = vst [vmem:[#allocation142_spill] sm:$0xff] %v12638_v12  ;;  %1559 = vperm.xlu1 %8555, %v9309_v62   ;;  %v12641_v41 = vpop.f32.mrb[78].mxu1  ;;  %v3420_v62 = vmax.f32 %v12324_v24, 1e-30  ;;  %v9321_v28 = vpop.eup %9320 }
 0x79f   :  { %15599 = vst [vmem:[#allocation143_spill] sm:$0xff] %v12641_v41  ;;  %v12644_v47 = vpop.f32.mrb[79].mxu1  ;;  %v9323_v42 = vpop.eup %9322 }
 0x7a0   :  { %15601 = vst [vmem:[#allocation144_spill] sm:$0xff] %v12644_v47  ;;  %1564 = vperm.xlu0 %8554, %v9313_v49   ;;  %9332 = vrcp.f32 %v3420_v62  ;;  %v9325_v49 = vpop.eup %9324  ;;  %v4066_v62 = vmax.f32 %v12389_v21, 1e-30 }
 0x7a1   :  { %9334 = vrcp.f32 %v3419_v59 }
 0x7a2   :  { %2194 = vperm.xlu1 %8555, %v9315_v63   ;;  %v9327_v63 = vpop.eup %9326  ;;  %9336 = vrcp.f32 %v3421_v38  ;;  %v4710_v38 = vmax.f32 %v12600_v51, 1e-30 }
 0x7a3   :  { %9338 = vrcp.f32 %v4063_v45  ;;  %v4709_v45 = vmax.f32 %v12607_v10, 1e-30 }
 0x7a4   :  { %2199 = vperm.xlu0 %8554, %v9319_v8   ;;  %9340 = vrcp.f32 %v4065_v57  ;;  %v4711_v57 = vmax.f32 %v12604_v33, 1e-30 }
 0x7a5   :  { %9342 = vrcp.f32 %v4064_v7  ;;  %v5353_v7 = vmax.f32 %v12614_v46, 1e-30 }
 0x7a6   :  { %2204 = vperm.xlu1 %8555, %v9317_v16   ;;  %v9329_v16 = vpop.eup %9328  ;;  %9344 = vrcp.f32 %v4066_v62  ;;  %v5355_v62 = vmax.f32 %v12612_v9, 1e-30  ;;  %v15605_v9 = vld [vmem:[#allocation30_spill] sm:$0xff] }
 0x7a7   :  { %v9331_v8 = vpop.eup %9330 }
 0x7a8   :  { %2209 = vperm.xlu0 %8554, %v9323_v42  }
 0x7aa   :  { %2839 = vperm.xlu1 %8555, %v9321_v28   ;;  %v4708_v28 = vmax.f32 %v12602_v17, 1e-30  ;;  %v9333_v42 = vpop.eup %9332 }
 0x7ab   :  { %v9335_v59 = vpop.eup %9334 }
 0x7ac   :  { %2844 = vperm.xlu0 %8554, %v9327_v63   ;;  %9346 = vrcp.f32 %v4708_v28  ;;  %v5354_v28 = vmax.f32 %v12619_v53, 1e-30  ;;  %v15607_v53 = vld [vmem:[#allocation23_spill] sm:$0xff] }
 0x7ad   :  { %9348 = vrcp.f32 %v4710_v38  ;;  %v15603_v38 = vld [vmem:[#allocation132_spill] sm:$0xff]  ;;  %v2779_v33 = vmax.f32 %v15607_v53, 1e-30 }
 0x7ae   :  { %2849 = vperm.xlu1 %8555, %v9325_v49   ;;  %v9337_v49 = vpop.eup %9336  ;;  %9350 = vrcp.f32 %v4709_v45  ;;  %v1487_v51 = vmax.f32 %v15603_v38, 1e-30  ;;  %v5356_v45 = vmax.f32 %v12616_v26, 1e-30 }
 0x7af   :  { %v9339_v63 = vpop.eup %9338  ;;  %9352 = vrcp.f32 %v4711_v57 }
 0x7b0   :  { %2854 = vperm.xlu0 %8554, %v9329_v16   ;;  %v9341_v16 = vpop.eup %9340  ;;  %9354 = vrcp.f32 %v5353_v7  ;;  %v15606_v7 = vld [vmem:[#allocation133_spill] sm:$0xff] }
 0x7b1   :  { %9356 = vrcp.f32 %v5355_v62 }
 0x7b2   :  { %3484 = vperm.xlu1 %8555, %v9331_v8   ;;  %v9343_v8 = vpop.eup %9342  ;;  %9358 = vrcp.f32 %v5354_v28  ;;  %v15609_v28 = vld [vmem:[#allocation25_spill] sm:$0xff] }
 0x7b3   :  { %9360 = vrcp.f32 %v1487_v51  ;;  %v2780_v26 = vmax.f32 %v15609_v28, 1e-30  ;;  %v2132_v51 = vmax.f32 %v11873_v54, 1e-30 }
 0x7b4   :  { %3489 = vperm.xlu0 %8554, %v9335_v59   ;;  %9362 = vrcp.f32 %v5356_v45  ;;  %v2134_v45 = vmax.f32 %v11869_v14, 1e-30  ;;  %v15635_v14 = vld [vmem:[#allocation16_spill] sm:$0xff] }
 0x7b6   :  { %3494 = vperm.xlu1 %8555, %v9333_v42   ;;  %v9345_v42 = vpop.eup %9344 }
 0x7b7   :  { %v9347_v59 = vpop.eup %9346 }
 0x7b8   :  { %3499 = vperm.xlu0 %8554, %v9337_v49   ;;  %v9349_v49 = vpop.eup %9348 }
 0x7b9   :  { %v9351_v46 = vpop.eup %9350 }
 0x7ba   :  { %4129 = vperm.xlu1 %8555, %v9339_v63   ;;  %v15604_v63 = vld [vmem:[#allocation131_spill] sm:$0xff]  ;;  %v9353_v62 = vpop.eup %9352 }
 0x7bb   :  { %v1489_v57 = vmax.f32 %v15604_v63, 1e-30  ;;  %v9355_v38 = vpop.eup %9354  ;;  %v15610_v63 = vld [vmem:[#allocation12_spill] sm:$0xff] }
 0x7bc   :  { %4134 = vperm.xlu0 %8554, %v9343_v8   ;;  %v1490_v8 = vmax.f32 %v15605_v9, 1e-30  ;;  %v2778_v10 = vmax.f32 %v15610_v63, 1e-30 }
 0x7bd   :  { %9364 = vrcp.f32 %v1489_v57  ;;  %v15611_v57 = vld [vmem:[#allocation21_spill] sm:$0xff] }
 0x7be   :  { %4139 = vperm.xlu1 %8555, %v9341_v16   ;;  %v1488_v16 = vmax.f32 %v15606_v7, 1e-30  ;;  %9366 = vrcp.f32 %v1490_v8  ;;  %v2135_v53 = vmax.f32 %v15611_v57, 1e-30  ;;  %v15612_v8 = vld [vmem:[#allocation24_spill] sm:$0xff] }
 0x7c0   :  { %4144 = vperm.xlu0 %8554, %v9345_v42   ;;  %v15608_v42 = vld [vmem:[#allocation2_spill] sm:$0xff]  ;;  %9368 = vrcp.f32 %v1488_v16 }
 0x7c1   :  { %9370 = vrcp.f32 %v2779_v33 }
 0x7c2   :  { %4774 = vperm.xlu1 %8555, %v9347_v59   ;;  %v2777_v59 = vmax.f32 %v15608_v42, 1e-30  ;;  %v2133_v42 = vmax.f32 %v15612_v8, 1e-30 }
 0x7c4   :  { %4779 = vperm.xlu0 %8554, %v9351_v46   ;;  %v9357_v46 = vpop.eup %9356  ;;  %9372 = vrcp.f32 %v2777_v59 }
 0x7c5   :  { %9374 = vrcp.f32 %v2780_v26 }
 0x7c6   :  { %4784 = vperm.xlu1 %8555, %v9349_v49   ;;  %v9359_v49 = vpop.eup %9358  ;;  %9376 = vrcp.f32 %v2778_v10  ;;  %v3422_v10 = vmax.f32 %v12339_v6, 1e-30 }
 0x7c7   :  { %9378 = vrcp.f32 %v2132_v51  ;;  %v9361_v33 = vpop.eup %9360 }
 0x7c8   :  { %4789 = vperm.xlu0 %8554, %v9353_v62   ;;  %9380 = vrcp.f32 %v2134_v45  ;;  %v3424_v62 = vmax.f32 %v12336_v36, 1e-30  ;;  %v9363_v59 = vpop.eup %9362 }
 0x7c9   :  { %9382 = vrcp.f32 %v2135_v53  ;;  %v9365_v28 = vpop.eup %9364 }
 0x7ca   :  { %5419 = vperm.xlu1 %8555, %v9355_v38   ;;  %9384 = vrcp.f32 %v2133_v42  ;;  %v9367_v51 = vpop.eup %9366  ;;  %v3423_v42 = vmax.f32 %v12343_v39, 1e-30 }
 0x7cb   :  { %v9369_v53 = vpop.eup %9368  ;;  %9386 = vrcp.f32 %v3424_v62 }
 0x7cc   :  { %5424 = vperm.xlu0 %8554, %v9359_v49   ;;  %v12689_v63 = vpop.eup %9370 }
 0x7ce   :  { %5429 = vperm.xlu1 %8555, %v9357_v46  }
 0x7cf   :  { %v4735_v16 = vpop.permute.xlu1 %4734 }
 0x7d0   :  { %v12676_v38 = vmul.f32 %v4735_v16, %v12515_v48  ;;  %5434 = vperm.xlu0 %8554, %v9363_v59   ;;  %v3425_v48 = vmax.f32 %v12341_v55, 1e-30  ;;  %v9373_v59 = vpop.eup %9372 }
 0x7d2   :  { %v4844_v26 = vmin.f32 %v12676_v38, 0.0  ;;  %1569 = vperm.xlu1 %8555, %v9361_v33   ;;  %v4740_v46 = vpop.permute.xlu0 %4739  ;;  %vm4828_vm5 = vcmp.gt.f32.partialorder %v12676_v38, 0.0 }
 0x7d3   :  { %v4745_v49 = vpop.permute.xlu1 %4744  ;;  %v12683_v45 = vmul.f32 %v4740_v46, %v12525_v2  ;;  %v12693_v46 = vpop.eup %9374 }
 0x7d4   :  { %v4860_v16 = vmul.f32 1.442695, %v4844_v26  ;;  %v12686_v36 = vmul.f32 %v12512_v13, %v4745_v49  ;;  %1574 = vperm.xlu0 %8554, %v9369_v53   ;;  %v4069_v13 = vmax.f32 %v12401_v27, 1e-30  ;;  %v12699_v55 = vpop.eup %9376  ;;  %v4714_v27 = vmax.f32 %v12624_v52, 1e-30 }
 0x7d5   :  { %v4845_v33 = vmin.f32 %v12683_v45, 0.0  ;;  %v9379_v53 = vpop.eup %9378  ;;  %vm4829_vm7 = vcmp.gt.f32.partialorder %v12683_v45, 0.0 }
 0x7d6   :  { %9388 = vpow2.f32 %v4860_v16  ;;  %v4846_v26 = vmin.f32 %v12686_v36, 0.0  ;;  %1579 = vperm.xlu1 %8555, %v9365_v28   ;;  %v4750_v2 = vpop.permute.xlu0 %4749  ;;  %v4067_v16 = vmax.f32 %v12405_v43, 1e-30  ;;  %v9381_v6 = vpop.eup %9380  ;;  %vm4830_vm6 = vcmp.gt.f32.partialorder %v12686_v36, 0.0 }
 0x7d7   :  { %9390 = vrcp.f32 %v3422_v10  ;;  %v4862_v62 = vmul.f32 1.442695, %v4845_v33  ;;  %v12697_v49 = vmul.f32 %v12523_v22, %v4750_v2  ;;  %v9383_v22 = vpop.eup %9382 }
 0x7d8   :  { %9392 = vrcp.f32 %v3425_v48  ;;  %v4864_v10 = vmul.f32 1.442695, %v4846_v26  ;;  %v4070_v48 = vmax.f32 %v12407_v44, 1e-30  ;;  %1584 = vperm.xlu0 %8554, %v9367_v51   ;;  %v9385_v26 = vpop.eup %9384 }
 0x7d9   :  { %9394 = vrcp.f32 %v3423_v42  ;;  %v4847_v28 = vmin.f32 %v12697_v49, 0.0  ;;  %v5380_v39 = vpop.permute.xlu1 %5379  ;;  %v4068_v42 = vmax.f32 %v12413_v4, 1e-30  ;;  %vm4831_vm3 = vcmp.gt.f32.partialorder %v12697_v49, 0.0 }
 0x7da   :  { %9396 = vpow2.f32 %v4862_v62  ;;  %v12705_v33 = vmul.f32 %v5380_v39, %v12537_v37  ;;  %2214 = vperm.xlu1 %8555, %v9379_v53  }
 0x7db   :  { %9398 = vpow2.f32 %v4864_v10  ;;  %v4866_v2 = vmul.f32 1.442695, %v4847_v28  ;;  %v5385_v43 = vpop.permute.xlu0 %5384  ;;  %v12710_v10 = vpop.eup %9386 }
 0x7dc   :  { %9400 = vrcp.f32 %v4069_v13  ;;  %v5489_v62 = vmin.f32 %v12705_v33, 0.0  ;;  %v12713_v37 = vmul.f32 %v5385_v43, %v12546_v35  ;;  %2219 = vperm.xlu0 %8554, %v9385_v26  }
 0x7dd   :  { %9402 = vrcp.f32 %v4067_v16  ;;  %v5390_v44 = vpop.permute.xlu1 %5389  ;;  %v4712_v16 = vmax.f32 %v12626_v19, 1e-30 }
 0x7de   :  { %9404 = vpow2.f32 %v4866_v2  ;;  %v5505_v39 = vmul.f32 1.442695, %v5489_v62  ;;  %v12716_v51 = vmul.f32 %v12533_v0, %v5390_v44  ;;  %2224 = vperm.xlu1 %8555, %v9381_v6   ;;  %v5490_v28 = vmin.f32 %v12713_v37, 0.0 }
 0x7df   :  { %9406 = vrcp.f32 %v4070_v48  ;;  %v5395_v35 = vpop.permute.xlu0 %5394  ;;  %v4715_v6 = vmax.f32 %v12628_v18, 1e-30 }
 0x7e0   :  { %v9389_v13 = vpop.eup %9388  ;;  %9408 = vrcp.f32 %v4068_v42  ;;  %v5491_v43 = vmin.f32 %v12716_v51, 0.0  ;;  %v5507_v0 = vmul.f32 1.442695, %v5490_v28  ;;  %v12729_v42 = vmul.f32 %v12542_v31, %v5395_v35  ;;  %2229 = vperm.xlu0 %8554, %v9383_v22  }
 0x7e1   :  { %v12719_v53 = vpop.eup %9390  ;;  %9410 = vpow2.f32 %v5505_v39  ;;  %v7696_v48 = vadd.f32 -1.0, %v9389_v13  ;;  %v1530_v26 = vpop.permute.xlu1 %1529 }
 0x7e2   :  { %v12722_v2 = vpop.eup %9392  ;;  %9412 = vrcp.f32 %v4714_v27  ;;  %v12732_v62 = vmul.f32 %v1530_v26, %v15557_v32  ;;  %2859 = vperm.xlu1 %8555, %v9373_v59   ;;  %v4713_v27 = vmax.f32 %v12631_v3, 1e-30  ;;  %v5509_v13 = vmul.f32 1.442695, %v5491_v43 }
 0x7e3   :  { %v12725_v44 = vpop.eup %9394  ;;  %9414 = vrcp.f32 %v4712_v16  ;;  %v5492_v31 = vmin.f32 %v12729_v42, 0.0  ;;  %v12741_v32 = vsel %vm4828_vm5, %v12676_v38, %v7696_v48  ;;  %v1535_v16 = vpop.permute.xlu0 %1534  ;;  %v5359_v48 = vmax.f32 %v12636_v50, 1e-30 }
 0x7e4   :  { %v9397_v39 = vpop.eup %9396  ;;  %9416 = vpow2.f32 %v5507_v0  ;;  %v1623_v22 = vmin.f32 %v12732_v62, 0.0  ;;  %v12750_v0 = vmul.f32 %v1535_v16, %v15563_v58  ;;  %2864 = vperm.xlu0 %8554, %v12699_v55   ;;  %vm5473_vm5 = vcmp.gt.f32.partialorder %v12705_v33, 0.0 }
 0x7e5   :  { %v9399_v52 = vpop.eup %9398  ;;  %v7697_v18 = vadd.f32 -1.0, %v9397_v39  ;;  %9418 = vpow2.f32 %v5509_v13  ;;  %v1540_v35 = vpop.permute.xlu1 %1539  ;;  %v5511_v39 = vmul.f32 1.442695, %v5492_v31 }
 0x7e6   :  { %v12738_v28 = vpop.eup %9400  ;;  %v7698_v59 = vadd.f32 -1.0, %v9399_v52  ;;  %v12754_v38 = vmul.f32 %v15560_v5, %v1540_v35  ;;  %2869 = vperm.xlu1 %8555, %v12689_v63   ;;  %9420 = vrcp.f32 %v4715_v6  ;;  %v1624_v55 = vmin.f32 %v12750_v0, 0.0 }
 0x7e7   :  { %v12744_v26 = vpop.eup %9402  ;;  %v12747_v43 = vsel %vm4829_vm7, %v12683_v45, %v7697_v18  ;;  %v1643_v18 = vmul.f32 1.442695, %v1623_v22  ;;  %9422 = vpow2.f32 %v5511_v39  ;;  %v1545_v31 = vpop.permute.xlu0 %1544  ;;  %vm5474_vm7 = vcmp.gt.f32.partialorder %v12713_v37, 0.0 }
 0x7e8   :  { %v9405_v52 = vpop.eup %9404  ;;  %v12767_v63 = vsel %vm4830_vm6, %v12686_v36, %v7698_v59  ;;  %v1625_v6 = vmin.f32 %v12754_v38, 0.0  ;;  %v12775_v39 = vmul.f32 %v15564_v25, %v1545_v31  ;;  %2874 = vperm.xlu0 %8554, %v12693_v46   ;;  %v5357_v46 = vmax.f32 %v12638_v12, 1e-30  ;;  %v15627_v12 = vld [vmem:[#allocation8_spill] sm:$0xff] }
 0x7e9   :  { %v12760_v45 = vpop.eup %9406  ;;  %v7699_v58 = vadd.f32 -1.0, %v9405_v52  ;;  %9424 = vpow2.f32 %v1643_v18  ;;  %v2175_v22 = vpop.permute.xlu1 %2174  ;;  %v1645_v52 = vmul.f32 1.442695, %v1624_v55  ;;  %vm5475_vm6 = vcmp.gt.f32.partialorder %v12716_v51, 0.0 }
 0x7ea   :  { %v12764_v5 = vpop.eup %9408  ;;  %v12779_v36 = vmul.f32 %v2175_v22, %v15567_v23  ;;  %3504 = vperm.xlu1 %8555, %v12719_v53   ;;  %9426 = vrcp.f32 %v4713_v27  ;;  %v1647_v13 = vmul.f32 1.442695, %v1625_v6  ;;  %v15613_v6 = vld [vmem:[#allocation71_spill] sm:$0xff] }
 0x7eb   :  { %v9411_v16 = vpop.eup %9410  ;;  %v12772_v35 = vsel %vm4831_vm3, %v12697_v49, %v7699_v58  ;;  %9428 = vpow2.f32 %v1645_v52  ;;  %v1626_v58 = vmin.f32 %v12775_v39, 0.0  ;;  %v2180_v55 = vpop.permute.xlu0 %2179  ;;  %vm5476_vm3 = vcmp.gt.f32.partialorder %v12729_v42, 0.0 }
 0x7ec   :  { %v12782_v59 = vpop.eup %9412  ;;  %v7736_v49 = vadd.f32 -1.0, %v9411_v16  ;;  %9430 = vpow2.f32 %v1647_v13  ;;  %v2268_v23 = vmin.f32 %v12779_v36, 0.0  ;;  %v12792_v22 = vmul.f32 %v2180_v55, %v15569_v34  ;;  %3509 = vperm.xlu0 %8554, %v12725_v44  }
 0x7ed   :  { %v12787_v25 = vpop.eup %9414  ;;  %v2185_v53 = vpop.permute.xlu1 %2184  ;;  %9432 = vrcp.f32 %v5359_v48  ;;  %v1649_v27 = vmul.f32 1.442695, %v1626_v58  ;;  %v5360_v13 = vmax.f32 %v12641_v41, 1e-30 }
 0x7ee   :  { %v9417_v31 = vpop.eup %9416  ;;  %v12796_v16 = vmul.f32 %v15613_v6, %v2185_v53  ;;  %3514 = vperm.xlu1 %8555, %v12710_v10   ;;  %v2288_v50 = vmul.f32 1.442695, %v2268_v23  ;;  %v12802_v48 = vsel %vm5473_vm5, %v12705_v33, %v7736_v49  ;;  %v2269_v34 = vmin.f32 %v12792_v22, 0.0  ;;  %v15614_v6 = vld [vmem:[#allocation128_spill] sm:$0xff] }
 0x7ef   :  { %v9419_v52 = vpop.eup %9418  ;;  %v7737_v18 = vadd.f32 -1.0, %v9417_v31  ;;  %9434 = vpow2.f32 %v1649_v27  ;;  %v2190_v53 = vpop.permute.xlu0 %2189  ;;  %vm1607_vm5 = vcmp.gt.f32.partialorder %v12732_v62, 0.0 }
 0x7f0   :  { %v12806_v44 = vpop.eup %9420  ;;  %v7738_v10 = vadd.f32 -1.0, %v9419_v52  ;;  %9436 = vpow2.f32 %v2288_v50  ;;  %v2270_v55 = vmin.f32 %v12796_v16, 0.0  ;;  %v2290_v49 = vmul.f32 1.442695, %v2269_v34  ;;  %3519 = vperm.xlu0 %8554, %v12722_v2  }
 0x7f1   :  { %v12809_v58 = vsel %vm5474_vm7, %v12713_v37, %v7737_v18  ;;  %v2820_v31 = vpop.permute.xlu1 %2819  ;;  %v9423_v23 = vpop.eup %9422  ;;  %9438 = vrcp.f32 %v5357_v46  ;;  %v12815_v27 = vmul.f32 %v15571_v11, %v2190_v53  ;;  %vm1608_vm7 = vcmp.gt.f32.partialorder %v12750_v0, 0.0 }
 0x7f2   :  { %4149 = vperm.xlu1 %8555, %v12744_v26   ;;  %v7739_v50 = vadd.f32 -1.0, %v9423_v23  ;;  %v2292_v18 = vmul.f32 1.442695, %v2270_v55  ;;  %v12821_v52 = vmul.f32 %v2820_v31, %v15614_v6  ;;  %9440 = vpow2.f32 %v2290_v49 }
 0x7f3   :  { %v9425_v37 = vpop.eup %9424  ;;  %v2271_v34 = vmin.f32 %v12815_v27, 0.0  ;;  %v12826_v53 = vsel %vm5475_vm6, %v12716_v51, %v7738_v10  ;;  %v2825_v55 = vpop.permute.xlu0 %2824  ;;  %v5358_v6 = vmax.f32 %v12644_v47, 1e-30  ;;  %vm1609_vm6 = vcmp.gt.f32.partialorder %v12754_v38, 0.0 }
 0x7f4   :  { %v7500_v46 = vadd.f32 -1.0, %v9425_v37  ;;  %v9427_v11 = vpop.eup %9426  ;;  %v12829_v2 = vsel %vm5476_vm3, %v12729_v42, %v7739_v50  ;;  %9442 = vpow2.f32 %v2292_v18  ;;  %v2913_v26 = vmin.f32 %v12821_v52, 0.0  ;;  %4154 = vperm.xlu0 %8554, %v12764_v5  }
 0x7f5   :  { %v2830_v23 = vpop.permute.xlu1 %2829  ;;  %v9429_v31 = vpop.eup %9428  ;;  %v2294_v37 = vmul.f32 1.442695, %v2271_v34  ;;  %v12836_v33 = vmul.f32 %v2825_v55, %v15573_v40  ;;  %vm1610_vm3 = vcmp.gt.f32.partialorder %v12775_v39, 0.0 }
 0x7f6   :  { %4159 = vperm.xlu1 %8555, %v12738_v28   ;;  %v9431_v51 = vpop.eup %9430  ;;  %v7501_v42 = vadd.f32 -1.0, %v9429_v31  ;;  %v2933_v10 = vmul.f32 1.442695, %v2913_v26  ;;  %v12842_v50 = vmul.f32 %v15572_v29, %v2830_v23  ;;  %v12847_v49 = vsel %vm1607_vm5, %v12732_v62, %v7500_v46  ;;  %v15615_v23 = vld [vmem:[#allocation124_spill] sm:$0xff] }
 0x7f7   :  { %v12844_v18 = vpop.eup %9432  ;;  %9444 = vpow2.f32 %v2294_v37  ;;  %v2914_v40 = vmin.f32 %v12836_v33, 0.0  ;;  %v7502_v5 = vadd.f32 -1.0, %v9431_v51  ;;  %v2835_v26 = vpop.permute.xlu0 %2834  ;;  %vm2252_vm5 = vcmp.gt.f32.partialorder %v12779_v36, 0.0 }
 0x7f8   :  { %v12852_v28 = vsel %vm1608_vm7, %v12750_v0, %v7501_v42  ;;  %9446 = vpow2.f32 %v2933_v10  ;;  %v2915_v34 = vmin.f32 %v12842_v50, 0.0  ;;  %v12858_v31 = vmul.f32 %v15615_v23, %v2835_v26  ;;  %4164 = vperm.xlu0 %8554, %v12760_v45   ;;  %v15616_v42 = vld [vmem:[#allocation6_spill] sm:$0xff] }
 0x7f9   :  { %v3465_v29 = vpop.permute.xlu1 %3464  ;;  %v9435_v55 = vpop.eup %9434  ;;  %9448 = vrcp.f32 %v5358_v6  ;;  %v2935_v46 = vmul.f32 1.442695, %v2914_v40  ;;  %v12869_v26 = vsel %vm1609_vm6, %v12754_v38, %v7502_v5  ;;  %vm2253_vm7 = vcmp.gt.f32.partialorder %v12792_v22, 0.0 }
 0x7fa   :  { %4794 = vperm.xlu1 %8555, %v12787_v25   ;;  %v9437_v0 = vpop.eup %9436  ;;  %v7503_v37 = vadd.f32 -1.0, %v9435_v55  ;;  %v2937_v51 = vmul.f32 1.442695, %v2915_v34  ;;  %v12864_v10 = vmul.f32 %v3465_v29, %v15616_v42  ;;  %v2916_v40 = vmin.f32 %v12858_v31, 0.0 }
 0x7fb   :  { %v9439_v6 = vpop.eup %9438  ;;  %v7540_v62 = vadd.f32 -1.0, %v9437_v0  ;;  %9450 = vpow2.f32 %v2935_v46  ;;  %v3470_v34 = vpop.permute.xlu0 %3469  ;;  %v15617_v0 = vld [vmem:[#allocation29_spill] sm:$0xff]  ;;  %vm2254_vm6 = vcmp.gt.f32.partialorder %v12796_v16, 0.0 }
 0x7fc   :  { %v12872_v45 = vsel %vm1610_vm3, %v12775_v39, %v7503_v37  ;;  %9452 = vpow2.f32 %v2937_v51  ;;  %v3558_v25 = vmin.f32 %v12864_v10, 0.0  ;;  %v9441_v29 = vpop.eup %9440  ;;  %v2939_v23 = vmul.f32 1.442695, %v2916_v40  ;;  %4799 = vperm.xlu0 %8554, %v9427_v11   ;;  %v15618_v37 = vld [vmem:[#allocation32_spill] sm:$0xff] }
 0x7fd   :  { %v3475_v55 = vpop.permute.xlu1 %3474  ;;  %9454 = vrcp.f32 %v5360_v13  ;;  %v12880_v42 = vmul.f32 %v3470_v34, %v15617_v0  ;;  %v7541_v39 = vadd.f32 -1.0, %v9441_v29  ;;  %v12888_v13 = vsel %vm2252_vm5, %v12779_v36, %v7540_v62  ;;  %v15619_v62 = vld [vmem:[#allocation35_spill] sm:$0xff] }
 0x7fe   :  { %4804 = vperm.xlu1 %8555, %v12782_v59   ;;  %v9443_v38 = vpop.eup %9442  ;;  %v3578_v5 = vmul.f32 1.442695, %v3558_v25  ;;  %v12885_v51 = vmul.f32 %v15618_v37, %v3475_v55  ;;  %9456 = vpow2.f32 %v2939_v23  ;;  %vm2255_vm3 = vcmp.gt.f32.partialorder %v12815_v27, 0.0 }
 0x7ff   :  { %v3559_v40 = vmin.f32 %v12880_v42, 0.0  ;;  %v12893_v11 = vsel %vm2253_vm7, %v12792_v22, %v7541_v39  ;;  %v7542_v59 = vadd.f32 -1.0, %v9443_v38  ;;  %v3480_v29 = vpop.permute.xlu0 %3479  ;;  %v15620_v39 = vld [vmem:[#allocation22_spill] sm:$0xff]  ;;  %vm2897_vm5 = vcmp.gt.f32.partialorder %v12821_v52, 0.0 }
 0x800   :  { %9458 = vpow2.f32 %v3578_v5  ;;  %v3560_v34 = vmin.f32 %v12885_v51, 0.0  ;;  %v12899_v37 = vmul.f32 %v15619_v62, %v3480_v29  ;;  %4809 = vperm.xlu0 %8554, %v12806_v44   ;;  %vm2898_vm7 = vcmp.gt.f32.partialorder %v12836_v33, 0.0 }
 0x801   :  { %v4110_v25 = vpop.permute.xlu1 %4109  ;;  %v9445_v0 = vpop.eup %9444  ;;  %v3580_v36 = vmul.f32 1.442695, %v3559_v40  ;;  %v12909_v29 = vsel %vm2254_vm6, %v12796_v16, %v7542_v59  ;;  %vm2899_vm6 = vcmp.gt.f32.partialorder %v12842_v50, 0.0 }
 0x802   :  { %5439 = vperm.xlu1 %8555, %v9439_v6   ;;  %v9447_v23 = vpop.eup %9446  ;;  %v7543_v22 = vadd.f32 -1.0, %v9445_v0  ;;  %v3582_v38 = vmul.f32 1.442695, %v3560_v34  ;;  %v12904_v5 = vmul.f32 %v4110_v25, %v15620_v39  ;;  %v3561_v40 = vmin.f32 %v12899_v37, 0.0 }
 0x803   :  { %v9449_v46 = vpop.eup %9448  ;;  %v7580_v41 = vadd.f32 -1.0, %v9447_v23  ;;  %9460 = vpow2.f32 %v3580_v36  ;;  %v4115_v34 = vpop.permute.xlu0 %4114  ;;  %v15621_v23 = vld [vmem:[#allocation51_spill] sm:$0xff] }
 0x804   :  { %v12912_v44 = vsel %vm2255_vm3, %v12815_v27, %v7543_v22  ;;  %9462 = vpow2.f32 %v3582_v38  ;;  %v4203_v6 = vmin.f32 %v12904_v5, 0.0  ;;  %v3584_v36 = vmul.f32 1.442695, %v3561_v40  ;;  %5444 = vperm.xlu0 %8554, %v9449_v46   ;;  %v15622_v22 = vld [vmem:[#allocation36_spill] sm:$0xff] }
 0x805   :  { %v4120_v0 = vpop.permute.xlu1 %4119  ;;  %v9451_v25 = vpop.eup %9450  ;;  %v12919_v39 = vmul.f32 %v4115_v34, %v15621_v23  ;;  %v12927_v62 = vsel %vm2897_vm5, %v12821_v52, %v7580_v41  ;;  %vm2900_vm3 = vcmp.gt.f32.partialorder %v12858_v31, 0.0  ;;  %v15623_v52 = vld [vmem:[#allocation39_spill] sm:$0xff]  ;;  %v8858_v23 = vld [vmem:[%s14458_s4] sm:$0xff]   ;;  %vm3542_vm5 = vcmp.gt.f32.partialorder %v12864_v10, 0.0 }
 0x806   :  { %5449 = vperm.xlu1 %8555, %v12844_v18   ;;  %v9453_v16 = vpop.eup %9452  ;;  %v7581_v27 = vadd.f32 -1.0, %v9451_v25  ;;  %v4223_v59 = vmul.f32 1.442695, %v4203_v6  ;;  %v12924_v38 = vmul.f32 %v15622_v22, %v4120_v0  ;;  %9464 = vpow2.f32 %v3584_v36  ;;  %8280 = vmatprep.subr.bf16.mxu0 %v8858_v23 }
 0x807   :  { %v9455_v55 = vpop.eup %9454  ;;  %v4204_v40 = vmin.f32 %v12919_v39, 0.0  ;;  %v7582_v18 = vadd.f32 -1.0, %v9453_v16  ;;  %v4125_v6 = vpop.permute.xlu0 %4124  ;;  %8281 = vmatpush3.bf16.msra.mxu0 %v8858_v23 }
 0x808   :  { %v12932_v46 = vsel %vm2898_vm7, %v12836_v33, %v7581_v27  ;;  %9466 = vpow2.f32 %v4223_v59  ;;  %v4205_v34 = vmin.f32 %v12924_v38, 0.0  ;;  %v9457_v0 = vpop.eup %9456  ;;  %v12939_v36 = vmul.f32 %v15623_v52, %v4125_v6  ;;  %5454 = vperm.xlu0 %8554, %v9455_v55   ;;  %v15624_v33 = vld [vmem:[#allocation66_spill] sm:$0xff]  ;;  %v15625_v27 = vld [vmem:[#allocation65_spill] sm:$0xff] }
 0x809   :  { %v4755_v25 = vpop.permute.xlu1 %4754  ;;  %v4225_v41 = vmul.f32 1.442695, %v4204_v40  ;;  %v15626_v16 = vpack.i.bf16 %v15624_v33, %v15625_v27  ;;  %v7583_v22 = vadd.f32 -1.0, %v9457_v0  ;;  %v12956_v6 = vsel %vm2899_vm6, %v12842_v50, %v7582_v18  ;;  %v15628_v27 = vld [vmem:[#allocation75_spill] sm:$0xff]  ;;  %v15630_v18 = vld [vmem:[#allocation61_spill] sm:$0xff] }
 0x80a   :  { %v9459_v59 = vpop.eup %9458  ;;  %v4227_v47 = vmul.f32 1.442695, %v4205_v34  ;;  %v12946_v3 = vmul.f32 %v4755_v25, %v15627_v12  ;;  %v4206_v55 = vmin.f32 %v12939_v36, 0.0  ;;  %v15629_v50 = vld [vmem:[#allocation55_spill] sm:$0xff]  ;;  %vm3543_vm7 = vcmp.gt.f32.partialorder %v12880_v42, 0.0 }
 0x80b   :  { %8557 = vrot.lane.b32.xlu1 %v15626_v16, %s9811_s17  ;;  %v7620_v40 = vadd.f32 -1.0, %v9459_v59  ;;  %9468 = vpow2.f32 %v4225_v41  ;;  %v12961_v12 = vsel %vm2900_vm3, %v12858_v31, %v7583_v22  ;;  %v4760_v25 = vpop.permute.xlu0 %4759  ;;  %v15631_v59 = vpack.i.bf16 %v15629_v50, %v15630_v18  ;;  %v15633_v31 = vld [vmem:[#allocation20_spill] sm:$0xff] }
 0x80c   :  { %9470 = vpow2.f32 %v4227_v47  ;;  %v4848_v34 = vmin.f32 %v12946_v3, 0.0  ;;  %v4229_v33 = vmul.f32 1.442695, %v4206_v55  ;;  %v12967_v16 = vmul.f32 %v4760_v25, %v15628_v27  ;;  %v15632_v47 = vld [vmem:[#allocation68_spill] sm:$0xff]  ;;  %v8859_v55 = vld [vmem:[%s14458_s4 + $0x8] sm:$0xff]  }
 0x80d   :  { %v4765_v0 = vpop.permute.xlu1 %4764  ;;  %v9461_v52 = vpop.eup %9460  ;;  %8562 = vrot.lane.b32.xlu0 %v15631_v59, %s9811_s17  ;;  %v15634_v22 = vpack.i.bf16 %v15632_v47, %v15633_v31  ;;  %v12986_v25 = vsel %vm3542_vm5, %v12864_v10, %v7620_v40  ;;  %8282 = vmatprep.subr.bf16.mxu0 %v8859_v55  ;;  %v15636_v18 = vld [vmem:[#allocation28_spill] sm:$0xff]  ;;  %v15638_v47 = vld [vmem:[#allocation87_spill] sm:$0xff]  ;;  %vm3544_vm6 = vcmp.gt.f32.partialorder %v12885_v51, 0.0  ;;  %v15643_v10 = vld [vmem:[#allocation57_spill] sm:$0xff]  ;;  %vm3545_vm3 = vcmp.gt.f32.partialorder %v12899_v37, 0.0 }
 0x80e   :  { %v9463_v19 = vpop.eup %9462  ;;  %v7621_v4 = vadd.f32 -1.0, %v9461_v52  ;;  %v4868_v57 = vmul.f32 1.442695, %v4848_v34  ;;  %v12978_v8 = vmul.f32 %v15635_v14, %v4765_v0  ;;  %9472 = vpow2.f32 %v4229_v33  ;;  %v15637_v33 = vld [vmem:[#allocation5_spill] sm:$0xff]  ;;  %8283 = vmatpush3.bf16.msra.mxu0 %v8859_v55 }
 0x80f   :  { %8567 = vrot.lane.b32.xlu1 %v15634_v22, %s9810_s3  ;;  %v4849_v27 = vmin.f32 %v12967_v16, 0.0  ;;  %v7622_v14 = vadd.f32 -1.0, %v9463_v19  ;;  %v4770_v0 = vpop.permute.xlu0 %4769  ;;  %v15640_v19 = vld [vmem:[#allocation17_spill] sm:$0xff]  ;;  %vm4187_vm5 = vcmp.gt.f32.partialorder %v12904_v5, 0.0 }
 0x810   :  { %v12991_v34 = vsel %vm3543_vm7, %v12880_v42, %v7621_v4  ;;  %9474 = vpow2.f32 %v4868_v57  ;;  %v4850_v23 = vmin.f32 %v12978_v8, 0.0  ;;  %v9465_v50 = vpop.eup %9464  ;;  %v12997_v59 = vmul.f32 %v15636_v18, %v4770_v0  ;;  %v15641_v57 = vld [vmem:[#allocation82_spill] sm:$0xff]  ;;  %v8860_v0 = vld [vmem:[%s14458_s4 + $0x10] sm:$0xff]  }
 0x811   :  { %v5400_v52 = vpop.permute.xlu1 %5399  ;;  %v4870_v40 = vmul.f32 1.442695, %v4849_v27  ;;  %v15639_v4 = vpack.i.bf16 %v15637_v33, %v15638_v47  ;;  %v15642_v42 = vpack.i.bf16 %v15640_v19, %v15641_v57  ;;  %v7623_v22 = vadd.f32 -1.0, %v9465_v50  ;;  %8284 = vmatprep.subr.bf16.mxu0 %v8860_v0 }
 0x812   :  { %v9467_v31 = vpop.eup %9466  ;;  %v4872_v41 = vmul.f32 1.442695, %v4850_v23  ;;  %v13009_v27 = vmul.f32 %v5400_v52, %v15643_v10  ;;  %v4851_v33 = vmin.f32 %v12997_v59, 0.0  ;;  %v13017_v47 = vsel %vm3544_vm6, %v12885_v51, %v7622_v14  ;;  %v15645_v51 = vld [vmem:[#allocation7_spill] sm:$0xff]  ;;  %v15646_v14 = vld [vmem:[#allocation97_spill] sm:$0xff]  ;;  %8285 = vmatpush3.bf16.msra.mxu0 %v8860_v0 }
 0x813   :  { %8572 = vrot.lane.b32.xlu0 %v15639_v4, %s9810_s3  ;;  %8577 = vrot.lane.b32.xlu1 %v15642_v42, %s9809_s14  ;;  %v7660_v18 = vadd.f32 -1.0, %v9467_v31  ;;  %9476 = vpow2.f32 %v4870_v40  ;;  %v13020_v50 = vsel %vm3545_vm3, %v12899_v37, %v7623_v22  ;;  %v5405_v55 = vpop.permute.xlu0 %5404  ;;  %v15644_v40 = vld [vmem:[#allocation96_spill] sm:$0xff]  ;;  %v15647_v42 = vpack.i.bf16 %v15645_v51, %v15646_v14  ;;  %v15648_v37 = vld [vmem:[#allocation46_spill] sm:$0xff]  ;;  %v15651_v4 = vld [vmem:[#allocation33_spill] sm:$0xff] }
 0x814   :  { %9478 = vpow2.f32 %v4872_v41  ;;  %v5493_v23 = vmin.f32 %v13009_v27, 0.0  ;;  %v4874_v19 = vmul.f32 1.442695, %v4851_v33  ;;  %v13026_v57 = vmul.f32 %v5405_v55, %v15644_v40  ;;  %v15649_v41 = vld [vmem:[#allocation125_spill] sm:$0xff] }
 0x815   :  { %v5410_v52 = vpop.permute.xlu1 %5409  ;;  %v9469_v10 = vpop.eup %9468  ;;  %v15650_v31 = vpack.i.bf16 %v15648_v37, %v15649_v41  ;;  %v8861_v55 = vld [vmem:[%s14458_s4 + $0x18] sm:$0xff]   ;;  %v13044_v40 = vsel %vm4187_vm5, %v12904_v5, %v7660_v18  ;;  %vm4188_vm7 = vcmp.gt.f32.partialorder %v12919_v39, 0.0  ;;  %v15654_v41 = vld [vmem:[#allocation27_spill] sm:$0xff]  ;;  %vm4189_vm6 = vcmp.gt.f32.partialorder %v12924_v38, 0.0 }
 0x816   :  { %v9471_v22 = vpop.eup %9470  ;;  %v7661_v54 = vadd.f32 -1.0, %v9469_v10  ;;  %v5513_v9 = vmul.f32 1.442695, %v5493_v23  ;;  %v13038_v33 = vmul.f32 %v15651_v4, %v5410_v52  ;;  %9480 = vpow2.f32 %v4874_v19  ;;  %8286 = vmatprep.subr.bf16.mxu0 %v8861_v55  ;;  %v15653_v19 = vld [vmem:[#allocation37_spill] sm:$0xff]  ;;  %v15659_v5 = vld [vmem:[#allocation127_spill] sm:$0xff] }
 0x817   :  { %8582 = vrot.lane.b32.xlu0 %v15647_v42, %s9809_s14  ;;  %8587 = vrot.lane.b32.xlu1 %v15650_v31, %s9808_s13  ;;  %v5494_v51 = vmin.f32 %v13026_v57, 0.0  ;;  %v7662_v23 = vadd.f32 -1.0, %v9471_v22  ;;  %v5415_v0 = vpop.permute.xlu0 %5414  ;;  %v15652_v42 = vld [vmem:[#allocation45_spill] sm:$0xff]  ;;  %vm4190_vm3 = vcmp.gt.f32.partialorder %v12939_v36, 0.0  ;;  %vm4832_vm5 = vcmp.gt.f32.partialorder %v12946_v3, 0.0 }
 0x818   :  { %v13049_v14 = vsel %vm4188_vm7, %v12919_v39, %v7661_v54  ;;  %9482 = vpow2.f32 %v5513_v9  ;;  %v5495_v52 = vmin.f32 %v13038_v33, 0.0  ;;  %v9473_v4 = vpop.eup %9472  ;;  %v13055_v37 = vmul.f32 %v15652_v42, %v5415_v0  ;;  %v15656_v9 = vld [vmem:[#allocation118_spill] sm:$0xff]  ;;  %v15657_v39 = vld [vmem:[#allocation119_spill] sm:$0xff]  ;;  %8287 = vmatpush3.bf16.msra.mxu0 %v8861_v55 }
 0x819   :  { %v1550_v10 = vpop.permute.xlu1 %1549  ;;  %v5515_v18 = vmul.f32 1.442695, %v5494_v51  ;;  %v15655_v54 = vpack.i.bf16 %v15653_v19, %v15654_v41  ;;  %v15658_v31 = vpack.i.bf16 %v15656_v9, %v15657_v39  ;;  %v7663_v7 = vadd.f32 -1.0, %v9473_v4  ;;  %v8862_v0 = vld [vmem:[%s14458_s4 + $0x20] sm:$0xff]  }
 0x81a   :  { %v9475_v22 = vpop.eup %9474  ;;  %v5517_v17 = vmul.f32 1.442695, %v5495_v52  ;;  %v13067_v51 = vmul.f32 %v1550_v10, %v15659_v5  ;;  %v5496_v19 = vmin.f32 %v13055_v37, 0.0  ;;  %v13075_v41 = vsel %vm4189_vm6, %v12924_v38, %v7662_v23  ;;  %8288 = vmatprep.subr.bf16.mxu0 %v8862_v0  ;;  %v15661_v38 = vld [vmem:[#allocation121_spill] sm:$0xff]  ;;  %v15662_v23 = vld [vmem:[#allocation122_spill] sm:$0xff] }
 0x81b   :  { %8592 = vrot.lane.b32.xlu0 %v15655_v54, %s9808_s13  ;;  %8597 = vrot.lane.b32.xlu1 %v15658_v31, %s9805_s11  ;;  %v7700_v42 = vadd.f32 -1.0, %v9475_v22  ;;  %9484 = vpow2.f32 %v5515_v18  ;;  %v13078_v4 = vsel %vm4190_vm3, %v12939_v36, %v7663_v7  ;;  %v1555_v55 = vpop.permute.xlu0 %1554  ;;  %v15660_v18 = vld [vmem:[#allocation130_spill] sm:$0xff]  ;;  %v15663_v31 = vpack.i.bf16 %v15661_v38, %v15662_v23  ;;  %v15666_v38 = vld [vmem:[#allocation129_spill] sm:$0xff] }
 0x81c   :  { %9486 = vpow2.f32 %v5517_v17  ;;  %v1627_v52 = vmin.f32 %v13067_v51, 0.0  ;;  %v5519_v9 = vmul.f32 1.442695, %v5496_v19  ;;  %v13084_v39 = vmul.f32 %v1555_v55, %v15660_v18  ;;  %v15665_v54 = vld [vmem:[#allocation126_spill] sm:$0xff]  ;;  %8289 = vmatpush3.bf16.msra.mxu0 %v8862_v0  ;;  %v8863_v55 = vld [vmem:[%s14458_s4 + $0x28] sm:$0xff]  }
 0x81d   :  { %v1560_v10 = vpop.permute.xlu1 %1559  ;;  %v9477_v5 = vpop.eup %9476  ;;  %v15664_v17 = vpack.i.bf16 %v12747_v43, %v12741_v32  ;;  %v13102_v18 = vsel %vm4832_vm5, %v12946_v3, %v7700_v42  ;;  %vm4833_vm7 = vcmp.gt.f32.partialorder %v12967_v16, 0.0  ;;  %8290 = vmatprep.subr.bf16.mxu0 %v8863_v55  ;;  %vm4834_vm6 = vcmp.gt.f32.partialorder %v12978_v8, 0.0 }
 0x81e   :  { %v9479_v7 = vpop.eup %9478  ;;  %v7701_v36 = vadd.f32 -1.0, %v9477_v5  ;;  %v1651_v22 = vmul.f32 1.442695, %v1627_v52  ;;  %v13096_v19 = vmul.f32 %v15665_v54, %v1560_v10  ;;  %9488 = vpow2.f32 %v5519_v9 }
 0x81f   :  { %8602 = vrot.lane.b32.xlu0 %v15663_v31, %s9805_s11  ;;  %8607 = vrot.lane.b32.xlu1 %v15664_v17, %s9804_s10  ;;  %v1628_v32 = vmin.f32 %v13084_v39, 0.0  ;;  %v7702_v52 = vadd.f32 -1.0, %v9479_v7  ;;  %v1565_v0 = vpop.permute.xlu0 %1564  ;;  %v15668_v9 = vpack.i.bf16 %v12809_v58, %v12802_v48  ;;  %vm4835_vm3 = vcmp.gt.f32.partialorder %v12997_v59, 0.0 }
 0x820   :  { %v13107_v43 = vsel %vm4833_vm7, %v12967_v16, %v7701_v36  ;;  %9490 = vpow2.f32 %v1651_v22  ;;  %v1629_v10 = vmin.f32 %v13096_v19, 0.0  ;;  %v9481_v54 = vpop.eup %9480  ;;  %v13113_v23 = vmul.f32 %v15666_v38, %v1565_v0  ;;  %v15669_v36 = vld [vmem:[#allocation107_spill] sm:$0xff]  ;;  %8291 = vmatpush3.bf16.msra.mxu0 %v8863_v55 }
 0x821   :  { %v2195_v5 = vpop.permute.xlu1 %2194  ;;  %v8676_v3 = vpack.i.bf16 %v13107_v43, %v13102_v18  ;;  %v1653_v42 = vmul.f32 1.442695, %v1628_v32  ;;  %v15667_v16 = vpack.i.bf16 %v12772_v35, %v12767_v63  ;;  %v7703_v17 = vadd.f32 -1.0, %v9481_v54  ;;  %v8864_v32 = vld [vmem:[%s14458_s4 + $0x30] sm:$0xff]   ;;  %v15670_v54 = vld [vmem:[#allocation85_spill] sm:$0xff]  ;;  %v15671_v38 = vld [vmem:[#allocation15_spill] sm:$0xff] }
 0x822   :  { %v9483_v31 = vpop.eup %9482  ;;  %v1655_v7 = vmul.f32 1.442695, %v1629_v10  ;;  %v13125_v22 = vmul.f32 %v2195_v5, %v15669_v36  ;;  %v1630_v35 = vmin.f32 %v13113_v23, 0.0  ;;  %v13133_v48 = vsel %vm4834_vm6, %v12978_v8, %v7702_v52  ;;  %8292 = vmatprep.subr.bf16.mxu0 %v8864_v32  ;;  %v15672_v8 = vld [vmem:[#allocation3_spill] sm:$0xff] }
 0x823   :  { %8612 = vrot.lane.b32.xlu0 %v15667_v16, %s9804_s10  ;;  %8617 = vrot.lane.b32.xlu1 %v15668_v9, %s9803_s0  ;;  %v7740_v63 = vadd.f32 -1.0, %v9483_v31  ;;  %9492 = vpow2.f32 %v1653_v42  ;;  %v13136_v58 = vsel %vm4835_vm3, %v12997_v59, %v7703_v17  ;;  %v2200_v55 = vpop.permute.xlu0 %2199  ;;  %v13141_v16 = vmul.f32 %v15671_v38, %v15670_v54  ;;  %v15675_v54 = vld [vmem:[#allocation108_spill] sm:$0xff] }
 0x824   :  { %9494 = vpow2.f32 %v1655_v7  ;;  %v2272_v10 = vmin.f32 %v13125_v22, 0.0  ;;  %v8681_v42 = vpack.i.bf16 %v13136_v58, %v13133_v48  ;;  %v1657_v9 = vmul.f32 1.442695, %v1630_v35  ;;  %8293 = vmatpush3.bf16.msra.mxu0 %v8864_v32 }
 0x825   :  { %v2205_v0 = vpop.permute.xlu1 %2204  ;;  %v9485_v5 = vpop.eup %9484  ;;  %v13146_v52 = vmul.f32 %v2200_v55, %v15672_v8  ;;  %v15673_v59 = vpack.i.bf16 %v12829_v2, %v12826_v53  ;;  %v15674_v31 = vpack.i.bf16 %v12852_v28, %v12847_v49  ;;  %vm5477_vm5 = vcmp.gt.f32.partialorder %v13009_v27, 0.0  ;;  %v8865_v55 = vld [vmem:[%s14458_s4 + $0x38] sm:$0xff]   ;;  %s9813_s4 = smov 120  }
 0x826   :  { %v9487_v17 = vpop.eup %9486  ;;  %v7741_v7 = vadd.f32 -1.0, %v9485_v5  ;;  %v2296_v36 = vmul.f32 1.442695, %v2272_v10  ;;  %v13158_v35 = vmul.f32 %v15675_v54, %v2205_v0  ;;  %v13164_v53 = vsel %vm5477_vm5, %v13009_v27, %v7740_v63  ;;  %8294 = vmatprep.subr.bf16.mxu0 %v8865_v55 }
 0x827   :  { %8622 = vrot.lane.b32.xlu0 %v15673_v59, %s9803_s0  ;;  %8627 = vrot.lane.b32.xlu1 %v15674_v31, %s9811_s17  ;;  %vm5478_vm7 = vcmp.gt.f32.partialorder %v13026_v57, 0.0  ;;  %9496 = vpow2.f32 %v1657_v9  ;;  %v2273_v2 = vmin.f32 %v13146_v52, 0.0  ;;  %v7742_v28 = vadd.f32 -1.0, %v9487_v17  ;;  %v2210_v32 = vpop.permute.xlu0 %2209  ;;  %v15676_v9 = vld [vmem:[#allocation109_spill] sm:$0xff] }
 0x828   :  { %v13169_v49 = vsel %vm5478_vm7, %v13026_v57, %v7741_v7  ;;  %9498 = vpow2.f32 %v2296_v36  ;;  %v2274_v10 = vmin.f32 %v13158_v35, 0.0  ;;  %v9489_v5 = vpop.eup %9488  ;;  %v967_v38 = vmin.f32 %v13141_v16, 0.0  ;;  %v15679_v36 = vld [vmem:[#allocation13_spill] sm:$0xff]  ;;  %8295 = vmatpush3.bf16.msra.mxu0 %v8865_v55 }
 0x829   :  { %v2840_v0 = vpop.permute.xlu1 %2839  ;;  %v8686_v27 = vpack.i.bf16 %v13169_v49, %v13164_v53  ;;  %v2298_v63 = vmul.f32 1.442695, %v2273_v2  ;;  %v13176_v8 = vmul.f32 %v15676_v9, %v2210_v32  ;;  %v15677_v57 = vpack.i.bf16 %v12872_v45, %v12869_v26 }
 0x82a   :  { %v15678_v59 = vpack.i.bf16 %v12893_v11, %v12888_v13  ;;  %v9491_v31 = vpop.eup %9490  ;;  %vm5479_vm6 = vcmp.gt.f32.partialorder %v13038_v33, 0.0  ;;  %v7743_v17 = vadd.f32 -1.0, %v9489_v5  ;;  %v2300_v7 = vmul.f32 1.442695, %v2274_v10 }
 0x82b   :  { %8632 = vrot.lane.b32.xlu0 %v15677_v57, %s9811_s17  ;;  %v13188_v54 = vmul.f32 %v2840_v0, %v15679_v36  ;;  %vm5480_vm3 = vcmp.gt.f32.partialorder %v13055_v37, 0.0  ;;  %v7504_v2 = vadd.f32 -1.0, %v9491_v31  ;;  %9500 = vpow2.f32 %v2298_v63  ;;  %v2845_v10 = vpop.permute.xlu0 %2844  ;;  %v15680_v63 = vld [vmem:[#allocation19_spill] sm:$0xff]  ;;  %v15683_v31 = vld [vmem:[#allocation10_spill] sm:$0xff] }
 0x82c   :  { %8637 = vrot.lane.b32.xlu1 %v15678_v59, %s9810_s3  ;;  %v2275_v26 = vmin.f32 %v13176_v8, 0.0  ;;  %v13193_v45 = vsel %vm5479_vm6, %v13038_v33, %v7742_v28  ;;  %v13196_v13 = vsel %vm5480_vm3, %v13055_v37, %v7743_v17  ;;  %9502 = vpow2.f32 %v2300_v7 }
 0x82d   :  { %v2917_v11 = vmin.f32 %v13188_v54, 0.0  ;;  %v2850_v32 = vpop.permute.xlu1 %2849  ;;  %v9493_v0 = vpop.eup %9492  ;;  %v984_v5 = vmul.f32 1.442695, %v967_v38  ;;  %v8691_v55 = vpack.i.bf16 %v13196_v13, %v13193_v45  ;;  %v13202_v57 = vmul.f32 %v2845_v10, %v15680_v63 }
 0x82e   :  { %v2302_v9 = vmul.f32 1.442695, %v2275_v26  ;;  %v15681_v33 = vpack.i.bf16 %v12912_v44, %v12909_v29  ;;  %v15682_v37 = vpack.i.bf16 %v12932_v46, %v12927_v62  ;;  %v9495_v28 = vpop.eup %9494  ;;  %vm1611_vm5 = vcmp.gt.f32.partialorder %v13067_v51, 0.0 }
 0x82f   :  { %v7505_v38 = vadd.f32 -1.0, %v9493_v0  ;;  %v2941_v59 = vmul.f32 1.442695, %v2917_v11  ;;  %v13214_v17 = vmul.f32 %v15683_v31, %v2850_v32  ;;  %v13217_v7 = vsel %vm1611_vm5, %v13067_v51, %v7504_v2  ;;  %v2855_v36 = vpop.permute.xlu0 %2854 }
 0x830   :  { %8642 = vrot.lane.b32.xlu0 %v15681_v33, %s9810_s3  ;;  %8647 = vrot.lane.b32.xlu1 %v15682_v37, %s9809_s14  ;;  %vm1612_vm7 = vcmp.gt.f32.partialorder %v13084_v39, 0.0  ;;  %9504 = vpow2.f32 %v2302_v9  ;;  %v2918_v29 = vmin.f32 %v13202_v57, 0.0  ;;  %v7506_v62 = vadd.f32 -1.0, %v9495_v28 }
 0x831   :  { %v13222_v44 = vsel %vm1612_vm7, %v13084_v39, %v7505_v38  ;;  %9506 = vpow2.f32 %v2941_v59  ;;  %v2919_v46 = vmin.f32 %v13214_v17, 0.0  ;;  %v3485_v26 = vpop.permute.xlu1 %3484  ;;  %v9497_v11 = vpop.eup %9496  ;;  %v13228_v10 = vmul.f32 %v15602_v1, %v2855_v36  ;;  %v15687_v38 = vld [vmem:[#allocation93_spill] sm:$0xff] }
 0x832   :  { %9508 = vpow2.f32 %v984_v5  ;;  %v8696_v51 = vpack.i.bf16 %v13222_v44, %v13217_v7  ;;  %v2943_v2 = vmul.f32 1.442695, %v2918_v29  ;;  %v15684_v39 = vpack.i.bf16 %v12961_v12, %v12956_v6  ;;  %v9499_v0 = vpop.eup %9498 }
 0x833   :  { %v15685_v32 = vpack.i.bf16 %v12991_v34, %v12986_v25  ;;  %vm1613_vm6 = vcmp.gt.f32.partialorder %v13096_v19, 0.0  ;;  %v7507_v5 = vadd.f32 -1.0, %v9497_v11  ;;  %v2945_v9 = vmul.f32 1.442695, %v2919_v46  ;;  %v3490_v33 = vpop.permute.xlu0 %3489 }
 0x834   :  { %8652 = vrot.lane.b32.xlu0 %v15684_v39, %s9809_s14  ;;  %v13240_v63 = vmul.f32 %v3485_v26, %v12327_v60  ;;  %vm1614_vm3 = vcmp.gt.f32.partialorder %v13113_v23, 0.0  ;;  %v7544_v1 = vadd.f32 -1.0, %v9499_v0  ;;  %9510 = vpow2.f32 %v2943_v2  ;;  %v15686_v60 = vld [vmem:[#allocation18_spill] sm:$0xff]  ;;  %v15691_v0 = vld [vmem:[#allocation123_spill] sm:$0xff] }
 0x835   :  { %8657 = vrot.lane.b32.xlu1 %v15685_v32, %s9808_s13  ;;  %v2920_v6 = vmin.f32 %v13228_v10, 0.0  ;;  %v13245_v12 = vsel %vm1613_vm6, %v13096_v19, %v7506_v62  ;;  %v13248_v25 = vsel %vm1614_vm3, %v13113_v23, %v7507_v5  ;;  %9512 = vpow2.f32 %v2945_v9  ;;  %v3495_v37 = vpop.permute.xlu1 %3494  ;;  %v9501_v28 = vpop.eup %9500 }
 0x836   :  { %v3562_v34 = vmin.f32 %v13240_v63, 0.0  ;;  %v13253_v59 = vmul.f32 %v15687_v38, %v15686_v60  ;;  %v8701_v31 = vpack.i.bf16 %v13248_v25, %v13245_v12  ;;  %v13258_v19 = vmul.f32 %v3490_v33, %v12331_v30  ;;  %v9503_v46 = vpop.eup %9502 }
 0x837   :  { %v2947_v29 = vmul.f32 1.442695, %v2920_v6  ;;  %v15688_v23 = vpack.i.bf16 %v13020_v50, %v13017_v47  ;;  %v15689_v62 = vpack.i.bf16 %v13049_v14, %v13044_v40  ;;  %vm2256_vm5 = vcmp.gt.f32.partialorder %v13125_v22, 0.0  ;;  %v3500_v2 = vpop.permute.xlu0 %3499 }
 0x838   :  { %v7545_v36 = vadd.f32 -1.0, %v9501_v28  ;;  %v3586_v26 = vmul.f32 1.442695, %v3562_v34  ;;  %v13270_v11 = vmul.f32 %v12324_v24, %v3495_v37  ;;  %v13273_v30 = vsel %vm2256_vm5, %v13125_v22, %v7544_v1  ;;  %v15690_v24 = vld [vmem:[#allocation9_spill] sm:$0xff] }
 0x839   :  { %8662 = vrot.lane.b32.xlu0 %v15688_v23, %s9808_s13  ;;  %8667 = vrot.lane.b32.xlu1 %v15689_v62, %s9805_s11  ;;  %vm2257_vm7 = vcmp.gt.f32.partialorder %v13146_v52, 0.0  ;;  %9514 = vpow2.f32 %v2947_v29  ;;  %v3563_v47 = vmin.f32 %v13258_v19, 0.0  ;;  %v7546_v40 = vadd.f32 -1.0, %v9503_v46  ;;  %v4130_v39 = vpop.permute.xlu1 %4129 }
 0x83a   :  { %v13278_v50 = vsel %vm2257_vm7, %v13146_v52, %v7545_v36  ;;  %9516 = vpow2.f32 %v3586_v26  ;;  %v3564_v14 = vmin.f32 %v13270_v11, 0.0  ;;  %v9505_v32 = vpop.eup %9504  ;;  %v13283_v5 = vmul.f32 %v15691_v0, %v15690_v24 }
 0x83b   :  { %v8706_v22 = vpack.i.bf16 %v13278_v50, %v13273_v30  ;;  %v3588_v9 = vmul.f32 1.442695, %v3563_v47  ;;  %v13288_v1 = vmul.f32 %v12329_v15, %v3500_v2  ;;  %v15692_v52 = vpack.i.bf16 %v13078_v4, %v13075_v41  ;;  %v9507_v6 = vpop.eup %9506 }
 0x83c   :  { %vm2258_vm6 = vcmp.gt.f32.partialorder %v13158_v35, 0.0  ;;  %v7547_v34 = vadd.f32 -1.0, %v9505_v32  ;;  %v3590_v33 = vmul.f32 1.442695, %v3564_v14  ;;  %v13300_v37 = vmul.f32 %v4130_v39, %v12387_v20  ;;  %v9509_v15 = vpop.eup %9508  ;;  %v15693_v39 = vld [vmem:[#allocation77_spill] sm:$0xff] }
 0x83d   :  { %8672 = vrot.lane.b32.xlu0 %v15692_v52, %s9805_s11  ;;  %8677 = vrot.lane.b32.xlu1 %v8676_v3, %s9804_s10  ;;  %vm2259_vm3 = vcmp.gt.f32.partialorder %v13176_v8, 0.0  ;;  %v7584_v28 = vadd.f32 -1.0, %v9507_v6  ;;  %9518 = vpow2.f32 %v3588_v9  ;;  %v3565_v41 = vmin.f32 %v13288_v1, 0.0  ;;  %v4135_v3 = vpop.permute.xlu0 %4134  ;;  %v4140_v60 = vpop.permute.xlu1 %4139  ;;  %v15694_v6 = vld [vmem:[#allocation81_spill] sm:$0xff] }
 0x83e   :  { %v13305_v4 = vsel %vm2258_vm6, %v13158_v35, %v7546_v40  ;;  %v13308_v18 = vsel %vm2259_vm3, %v13176_v8, %v7547_v34  ;;  %9520 = vpow2.f32 %v3590_v33  ;;  %v4207_v43 = vmin.f32 %v13300_v37, 0.0  ;;  %v9511_v20 = vpop.eup %9510 }
 0x83f   :  { %v966_v38 = vmin.f32 %v13283_v5, 0.0  ;;  %v8711_v29 = vpack.i.bf16 %v13308_v18, %v13305_v4  ;;  %v3592_v23 = vmul.f32 1.442695, %v3565_v41  ;;  %v13315_v62 = vmul.f32 %v4135_v3, %v12395_v61  ;;  %v9513_v35 = vpop.eup %9512  ;;  %v15696_v3 = vld [vmem:[#allocation49_spill] sm:$0xff] }
 0x840   :  { %vm2901_vm5 = vcmp.gt.f32.partialorder %v13188_v54, 0.0  ;;  %v7585_v8 = vadd.f32 -1.0, %v9511_v20  ;;  %v4231_v46 = vmul.f32 1.442695, %v4207_v43  ;;  %v13327_v36 = vmul.f32 %v12385_v56, %v4140_v60  ;;  %v15697_v60 = vld [vmem:[#allocation72_spill] sm:$0xff] }
 0x841   :  { %8682 = vrot.lane.b32.xlu0 %v8681_v42, %s9804_s10  ;;  %8687 = vrot.lane.b32.xlu1 %v8686_v27, %s9803_s0  ;;  %v2981_v61 = vsel %vm2901_vm5, %v13188_v54, %v7584_v28  ;;  %vm2902_vm7 = vcmp.gt.f32.partialorder %v13202_v57, 0.0  ;;  %9522 = vpow2.f32 %v3592_v23  ;;  %v4208_v48 = vmin.f32 %v13315_v62, 0.0  ;;  %v4145_v49 = vpop.permute.xlu0 %4144  ;;  %v4775_v27 = vpop.permute.xlu1 %4774  ;;  %v15698_v23 = vld [vmem:[#allocation95_spill] sm:$0xff] }
 0x842   :  { %v2982_v58 = vsel %vm2902_vm7, %v13202_v57, %v7585_v8  ;;  %v7586_v42 = vadd.f32 -1.0, %v9513_v35  ;;  %9524 = vpow2.f32 %v4231_v46  ;;  %v4209_v53 = vmin.f32 %v13327_v36, 0.0 }
 0x843   :  { %v9515_v26 = vpop.eup %9514  ;;  %v13334_v47 = vadd.f32 -1.0, %v9509_v15  ;;  %v8716_v56 = vpack.i.bf16 %v2982_v58, %v2981_v61  ;;  %v4233_v40 = vmul.f32 1.442695, %v4208_v48  ;;  %v13337_v54 = vmul.f32 %v12389_v21, %v4145_v49  ;;  %v15695_v15 = vld [vmem:[#allocation90_spill] sm:$0xff] }
 0x844   :  { %v9517_v57 = vpop.eup %9516  ;;  %vm2903_vm6 = vcmp.gt.f32.partialorder %v13214_v17, 0.0  ;;  %v7587_v14 = vadd.f32 -1.0, %v9515_v26  ;;  %v4235_v2 = vmul.f32 1.442695, %v4209_v53  ;;  %v13349_v32 = vmul.f32 %v4775_v27, %v15693_v39  ;;  %v15699_v61 = vld [vmem:[#allocation134_spill] sm:$0xff]  ;;  %v15701_v39 = vld [vmem:[#allocation4_spill] sm:$0xff] }
 0x845   :  { %8692 = vrot.lane.b32.xlu0 %v8691_v55, %s9803_s0  ;;  %8697 = vrot.lane.b32.xlu1 %v8696_v51, %s9811_s17  ;;  %vm2904_vm3 = vcmp.gt.f32.partialorder %v13228_v10, 0.0  ;;  %v7624_v21 = vadd.f32 -1.0, %v9517_v57  ;;  %9526 = vpow2.f32 %v4233_v40  ;;  %v4210_v45 = vmin.f32 %v13337_v54, 0.0  ;;  %v4780_v44 = vpop.permute.xlu0 %4779  ;;  %v4785_v51 = vpop.permute.xlu1 %4784  ;;  %v15700_v57 = vld [vmem:[#allocation136_spill] sm:$0xff] }
 0x846   :  { %vm951_vm5 = vcmp.gt.f32.partialorder %v13141_v16, 0.0  ;;  %v2983_v13 = vsel %vm2903_vm6, %v13214_v17, %v7586_v42  ;;  %v2984_v55 = vsel %vm2904_vm3, %v13228_v10, %v7587_v14  ;;  %9528 = vpow2.f32 %v4235_v2 }
 0x847   :  { %v4852_v7 = vmin.f32 %v13349_v32, 0.0  ;;  %v9519_v24 = vpop.eup %9518  ;;  %v13357_v0 = vmul.f32 1.442695, %v966_v38  ;;  %v8721_v9 = vpack.i.bf16 %v2984_v55, %v2983_v13  ;;  %v4237_v52 = vmul.f32 1.442695, %v4210_v45 }
 0x848   :  { %v13360_v34 = vmul.f32 %v4780_v44, %v15694_v6  ;;  %v9521_v17 = vpop.eup %9520  ;;  %vm3546_vm7 = vcmp.gt.f32.partialorder %v13240_v63, 0.0  ;;  %v7625_v10 = vadd.f32 -1.0, %v9519_v24  ;;  %v13372_v28 = vmul.f32 %v15695_v15, %v4785_v51 }
 0x849   :  { %8702 = vrot.lane.b32.xlu0 %v8701_v31, %s9811_s17  ;;  %8707 = vrot.lane.b32.xlu1 %v8706_v22, %s9810_s3  ;;  %v4876_v33 = vmul.f32 1.442695, %v4852_v7  ;;  %v3626_v41 = vsel %vm3546_vm7, %v13240_v63, %v7624_v21  ;;  %vm3547_vm6 = vcmp.gt.f32.partialorder %v13258_v19, 0.0  ;;  %9530 = vpow2.f32 %v4237_v52  ;;  %v4790_v50 = vpop.permute.xlu0 %4789  ;;  %v5420_v22 = vpop.permute.xlu1 %5419  ;;  %v15702_v52 = vld [vmem:[#allocation135_spill] sm:$0xff] }
 0x84a   :  { %v4853_v12 = vmin.f32 %v13360_v34, 0.0  ;;  %v3627_v25 = vsel %vm3547_vm6, %v13258_v19, %v7625_v10  ;;  %v7626_v31 = vadd.f32 -1.0, %v9521_v17  ;;  %v4854_v30 = vmin.f32 %v13372_v28, 0.0  ;;  %v15703_v10 = vld [vmem:[#allocation132_spill] sm:$0xff] }
 0x84b   :  { %9532 = vpow2.f32 %v4876_v33  ;;  %v9523_v43 = vpop.eup %9522  ;;  %v13381_v20 = vmul.f32 %v15697_v60, %v15696_v3  ;;  %v8726_v38 = vpack.i.bf16 %v3627_v25, %v3626_v41  ;;  %v13384_v35 = vmul.f32 %v15698_v23, %v4790_v50  ;;  %v15704_v60 = vld [vmem:[#allocation133_spill] sm:$0xff] }
 0x84c   :  { %v4878_v63 = vmul.f32 1.442695, %v4853_v12  ;;  %v9525_v19 = vpop.eup %9524  ;;  %vm3548_vm3 = vcmp.gt.f32.partialorder %v13270_v11, 0.0  ;;  %v7627_v8 = vadd.f32 -1.0, %v9523_v43  ;;  %v4880_v46 = vmul.f32 1.442695, %v4854_v30 }
 0x84d   :  { %8712 = vrot.lane.b32.xlu0 %v8711_v29, %s9810_s3  ;;  %8717 = vrot.lane.b32.xlu1 %v8716_v56, %s9809_s14  ;;  %v13393_v48 = vmul.f32 %v5420_v22, %v15699_v61  ;;  %vm3549_vm7 = vcmp.gt.f32.partialorder %v13288_v1, 0.0  ;;  %v7664_v58 = vadd.f32 -1.0, %v9525_v19  ;;  %v4855_v42 = vmin.f32 %v13384_v35, 0.0  ;;  %v5425_v29 = vpop.permute.xlu0 %5424  ;;  %v5430_v49 = vpop.permute.xlu1 %5429  ;;  %v15705_v19 = vld [vmem:[#allocation131_spill] sm:$0xff] }
 0x84e   :  { %9534 = vpow2.f32 %v4878_v63  ;;  %v3628_v53 = vsel %vm3548_vm3, %v13270_v11, %v7626_v31  ;;  %v3629_v4 = vsel %vm3549_vm7, %v13288_v1, %v7627_v8  ;;  %v13404_v26 = vsel %vm951_vm5, %v13141_v16, %v13334_v47 }
 0x84f   :  { %9536 = vpow2.f32 %v4880_v46  ;;  %v5497_v18 = vmin.f32 %v13393_v48, 0.0  ;;  %v9527_v27 = vpop.eup %9526  ;;  %v8731_v56 = vpack.i.bf16 %v3629_v4, %v3628_v53  ;;  %v4882_v40 = vmul.f32 1.442695, %v4855_v42 }
 0x850   :  { %v13407_v14 = vmul.f32 %v5425_v29, %v15700_v57  ;;  %v9529_v11 = vpop.eup %9528  ;;  %vm4191_vm6 = vcmp.gt.f32.partialorder %v13300_v37, 0.0  ;;  %v7665_v1 = vadd.f32 -1.0, %v9527_v27  ;;  %v13413_v21 = vmul.f32 %v15701_v39, %v5430_v49 }
 0x851   :  { %8722 = vrot.lane.b32.xlu0 %v8721_v9, %s9809_s14  ;;  %8727 = vrot.lane.b32.xlu1 %v8726_v38, %s9808_s13  ;;  %v5521_v2 = vmul.f32 1.442695, %v5497_v18  ;;  %v4271_v16 = vsel %vm4191_vm6, %v13300_v37, %v7664_v58  ;;  %vm4192_vm5 = vcmp.gt.f32.partialorder %v13315_v62, 0.0  ;;  %9538 = vpow2.f32 %v4882_v40  ;;  %v5435_v7 = vpop.permute.xlu0 %5434  ;;  %v1570_v44 = vpop.permute.xlu1 %1569 }
 0x852   :  { %v5498_v47 = vmin.f32 %v13407_v14, 0.0  ;;  %v4272_v45 = vsel %vm4192_vm5, %v13315_v62, %v7665_v1  ;;  %v7666_v13 = vadd.f32 -1.0, %v9529_v11  ;;  %v5499_v55 = vmin.f32 %v13413_v21, 0.0  ;;  %v15707_v1 = vld [vmem:[#allocation111_spill] sm:$0xff] }
 0x853   :  { %9540 = vpow2.f32 %v5521_v2  ;;  %v9531_v51 = vpop.eup %9530  ;;  %v8736_v24 = vpack.i.bf16 %v4272_v45, %v4271_v16  ;;  %v13422_v37 = vmul.f32 %v15702_v52, %v5435_v7  ;;  %vm4193_vm3 = vcmp.gt.f32.partialorder %v13327_v36, 0.0 }
 0x854   :  { %9542 = vpow2.f32 %v13357_v0  ;;  %v5523_v9 = vmul.f32 1.442695, %v5498_v47  ;;  %v7667_v62 = vadd.f32 -1.0, %v9531_v51  ;;  %v5525_v17 = vmul.f32 1.442695, %v5499_v55  ;;  %v15708_v51 = vld [vmem:[#allocation63_spill] sm:$0xff] }
 0x855   :  { %8732 = vrot.lane.b32.xlu0 %v8731_v56, %s9808_s13  ;;  %v9533_v6 = vpop.eup %9532  ;;  %v13427_v33 = vmul.f32 %v1570_v44, %v15703_v10  ;;  %vm4194_vm7 = vcmp.gt.f32.partialorder %v13337_v54, 0.0  ;;  %v5500_v0 = vmin.f32 %v13422_v37, 0.0  ;;  %8737 = vrot.lane.b32.xlu1 %v8736_v24, %s9805_s11  ;;  %v4273_v41 = vsel %vm4193_vm3, %v13327_v36, %v7666_v13  ;;  %v1575_v31 = vpop.permute.xlu0 %1574  ;;  %v15709_v24 = vld [vmem:[#allocation80_spill] sm:$0xff] }
 0x856   :  { %v7704_v15 = vadd.f32 -1.0, %v9533_v6  ;;  %9544 = vpow2.f32 %v5523_v9  ;;  %v4274_v12 = vsel %vm4194_vm7, %v13337_v54, %v7667_v62  ;;  %v1580_v30 = vpop.permute.xlu1 %1579  ;;  %v968_v22 = vmin.f32 %v13381_v20, 0.0  ;;  %v15710_v62 = vld [vmem:[#allocation24_spill] sm:$0xff] }
 0x857   :  { %9546 = vpow2.f32 %v5525_v17  ;;  %v1631_v25 = vmin.f32 %v13427_v33, 0.0  ;;  %v8741_v43 = vpack.i.bf16 %v4274_v12, %v4273_v41  ;;  %v5527_v3 = vmul.f32 1.442695, %v5500_v0 }
 0x858   :  { %v9535_v50 = vpop.eup %9534  ;;  %v13437_v38 = vmul.f32 %v1575_v31, %v15704_v60  ;;  %vm4836_vm6 = vcmp.gt.f32.partialorder %v13349_v32, 0.0  ;;  %v13441_v54 = vmul.f32 %v15705_v19, %v1580_v30  ;;  %vm4837_vm5 = vcmp.gt.f32.partialorder %v13360_v34, 0.0 }
 0x859   :  { %v9537_v63 = vpop.eup %9536  ;;  %v7705_v23 = vadd.f32 -1.0, %v9535_v50  ;;  %v1659_v36 = vmul.f32 1.442695, %v1631_v25  ;;  %v4916_v8 = vsel %vm4836_vm6, %v13349_v32, %v7704_v15  ;;  %9548 = vpow2.f32 %v5527_v3  ;;  %8742 = vrot.lane.b32.xlu0 %v8741_v43, %s9805_s11  ;;  %v1585_v53 = vpop.permute.xlu0 %1584  ;;  %v15706_v32 = vld [vmem:[#allocation30_spill] sm:$0xff] }
 0x85a   :  { %v1632_v46 = vmin.f32 %v13437_v38, 0.0  ;;  %v7706_v58 = vadd.f32 -1.0, %v9537_v63  ;;  %v1633_v42 = vmin.f32 %v13441_v54, 0.0  ;;  %v2215_v4 = vpop.permute.xlu1 %2214  ;;  %v986_v29 = vmul.f32 1.442695, %v968_v22  ;;  %v15711_v15 = vld [vmem:[#allocation110_spill] sm:$0xff] }
 0x85b   :  { %v4917_v61 = vsel %vm4837_vm5, %v13360_v34, %v7705_v23  ;;  %9550 = vpow2.f32 %v1659_v36  ;;  %v9539_v18 = vpop.eup %9538  ;;  %v13450_v56 = vmul.f32 %v15706_v32, %v1585_v53  ;;  %vm4838_vm3 = vcmp.gt.f32.partialorder %v13372_v28, 0.0 }
 0x85c   :  { %v8746_v49 = vpack.i.bf16 %v4917_v61, %v4916_v8  ;;  %v1661_v27 = vmul.f32 1.442695, %v1632_v46  ;;  %v7707_v57 = vadd.f32 -1.0, %v9539_v18  ;;  %v1663_v11 = vmul.f32 1.442695, %v1633_v42  ;;  %v15713_v8 = vld [vmem:[#allocation2_spill] sm:$0xff] }
 0x85d   :  { %v9541_v40 = vpop.eup %9540  ;;  %v13454_v34 = vmul.f32 %v2215_v4, %v15707_v1  ;;  %vm4839_vm7 = vcmp.gt.f32.partialorder %v13384_v35, 0.0  ;;  %v1634_v16 = vmin.f32 %v13450_v56, 0.0  ;;  %v4918_v47 = vsel %vm4838_vm3, %v13372_v28, %v7706_v58  ;;  %v2220_v55 = vpop.permute.xlu0 %2219 }
 0x85e   :  { %v13456_v2 = vpop.eup %9542  ;;  %v7744_v39 = vadd.f32 -1.0, %v9541_v40  ;;  %9552 = vpow2.f32 %v1661_v27  ;;  %8747 = vrot.lane.b32.xlu1 %v8746_v49, %s9804_s10  ;;  %v4919_v45 = vsel %vm4839_vm7, %v13384_v35, %v7707_v57  ;;  %v2225_v7 = vpop.permute.xlu1 %2224  ;;  %v13466_v9 = vmul.f32 %v15709_v24, %v15708_v51  ;;  %v15714_v40 = vld [vmem:[#allocation12_spill] sm:$0xff] }
 0x85f   :  { %9554 = vpow2.f32 %v1663_v11  ;;  %v2276_v13 = vmin.f32 %v13454_v34, 0.0  ;;  %v8751_v52 = vpack.i.bf16 %v4919_v45, %v4918_v47  ;;  %v1665_v6 = vmul.f32 1.442695, %v1634_v16 }
 0x860   :  { %v9545_v44 = vpop.eup %9544  ;;  %v13469_v17 = vmul.f32 %v2220_v55, %v15710_v62  ;;  %vm5481_vm6 = vcmp.gt.f32.partialorder %v13393_v48, 0.0  ;;  %v13473_v0 = vmul.f32 %v15711_v15, %v2225_v7  ;;  %vm5482_vm5 = vcmp.gt.f32.partialorder %v13407_v14, 0.0  ;;  %v15717_v15 = vld [vmem:[#allocation42_spill] sm:$0xff] }
 0x861   :  { %v9547_v10 = vpop.eup %9546  ;;  %v7745_v28 = vadd.f32 -1.0, %v9545_v44  ;;  %v2304_v35 = vmul.f32 1.442695, %v2276_v13  ;;  %v5561_v41 = vsel %vm5481_vm6, %v13393_v48, %v7744_v39  ;;  %9556 = vpow2.f32 %v1665_v6  ;;  %8752 = vrot.lane.b32.xlu0 %v8751_v52, %s9804_s10  ;;  %v2230_v50 = vpop.permute.xlu0 %2229  ;;  %v15712_v48 = vld [vmem:[#allocation21_spill] sm:$0xff]  ;;  %v15715_v39 = vld [vmem:[#allocation23_spill] sm:$0xff] }
 0x862   :  { %v2277_v12 = vmin.f32 %v13469_v17, 0.0  ;;  %v7746_v31 = vadd.f32 -1.0, %v9547_v10  ;;  %v2278_v30 = vmin.f32 %v13473_v0, 0.0  ;;  %v2860_v22 = vpop.permute.xlu1 %2859  ;;  %v13482_v63 = vmul.f32 %v15712_v48, %v2230_v50  ;;  %v15719_v48 = vld [vmem:[#allocation64_spill] sm:$0xff] }
 0x863   :  { %v5562_v25 = vsel %vm5482_vm5, %v13407_v14, %v7745_v28  ;;  %9558 = vpow2.f32 %v2304_v35  ;;  %v9549_v43 = vpop.eup %9548  ;;  %vm5483_vm3 = vcmp.gt.f32.partialorder %v13413_v21, 0.0  ;;  %v13486_v14 = vmul.f32 %v2860_v22, %v15713_v8  ;;  %v15720_v8 = vld [vmem:[#allocation103_spill] sm:$0xff] }
 0x864   :  { %9560 = vpow2.f32 %v986_v29  ;;  %v8756_v3 = vpack.i.bf16 %v5562_v25, %v5561_v41  ;;  %v2306_v60 = vmul.f32 1.442695, %v2277_v12  ;;  %v7747_v36 = vadd.f32 -1.0, %v9549_v43 }
 0x865   :  { %v9551_v23 = vpop.eup %9550  ;;  %v2308_v19 = vmul.f32 1.442695, %v2278_v30  ;;  %vm5484_vm7 = vcmp.gt.f32.partialorder %v13422_v37, 0.0  ;;  %v2279_v61 = vmin.f32 %v13482_v63, 0.0  ;;  %v5563_v58 = vsel %vm5483_vm3, %v13413_v21, %v7746_v31  ;;  %v2865_v4 = vpop.permute.xlu0 %2864 }
 0x866   :  { %v7508_v46 = vadd.f32 -1.0, %v9551_v23  ;;  %9562 = vpow2.f32 %v2306_v60  ;;  %8757 = vrot.lane.b32.xlu1 %v8756_v3, %s9803_s0  ;;  %v5564_v42 = vsel %vm5484_vm7, %v13422_v37, %v7747_v36  ;;  %v2921_v53 = vmin.f32 %v13486_v14, 0.0  ;;  %v2870_v18 = vpop.permute.xlu1 %2869  ;;  %v15718_v60 = vld [vmem:[#allocation76_spill] sm:$0xff] }
 0x867   :  { %9564 = vpow2.f32 %v2308_v19  ;;  %v969_v49 = vmin.f32 %v13466_v9, 0.0  ;;  %v8761_v27 = vpack.i.bf16 %v5564_v42, %v5563_v58  ;;  %v2310_v32 = vmul.f32 1.442695, %v2279_v61  ;;  %v15721_v58 = vld [vmem:[#allocation88_spill] sm:$0xff] }
 0x868   :  { %v9553_v29 = vpop.eup %9552  ;;  %v13496_v57 = vmul.f32 %v2865_v4, %v15714_v40  ;;  %vm1615_vm6 = vcmp.gt.f32.partialorder %v13427_v33, 0.0  ;;  %v2949_v21 = vmul.f32 1.442695, %v2921_v53  ;;  %v13500_v37 = vmul.f32 %v15715_v39, %v2870_v18 }
 0x869   :  { %v9555_v11 = vpop.eup %9554  ;;  %v7509_v1 = vadd.f32 -1.0, %v9553_v29  ;;  %v1695_v16 = vsel %vm1615_vm6, %v13427_v33, %v7508_v46  ;;  %vm1616_vm5 = vcmp.gt.f32.partialorder %v13437_v38, 0.0  ;;  %9566 = vpow2.f32 %v2310_v32  ;;  %8762 = vrot.lane.b32.xlu0 %v8761_v27, %s9803_s0  ;;  %v2875_v7 = vpop.permute.xlu0 %2874  ;;  %v15716_v33 = vld [vmem:[#allocation25_spill] sm:$0xff] }
 0x86a   :  { %v2922_v47 = vmin.f32 %v13496_v57, 0.0  ;;  %v7510_v13 = vadd.f32 -1.0, %v9555_v11  ;;  %9568 = vpow2.f32 %v2949_v21  ;;  %v2923_v55 = vmin.f32 %v13500_v37, 0.0  ;;  %v3505_v44 = vpop.permute.xlu1 %3504 }
 0x86b   :  { %v1696_v45 = vsel %vm1616_vm5, %v13437_v38, %v7509_v1  ;;  %v9557_v51 = vpop.eup %9556  ;;  %v988_v24 = vmul.f32 1.442695, %v969_v49  ;;  %v13509_v62 = vmul.f32 %v15716_v33, %v2875_v7  ;;  %vm1617_vm3 = vcmp.gt.f32.partialorder %v13441_v54, 0.0 }
 0x86c   :  { %v8766_v52 = vpack.i.bf16 %v1696_v45, %v1695_v16  ;;  %v2951_v6 = vmul.f32 1.442695, %v2922_v47  ;;  %v7511_v28 = vadd.f32 -1.0, %v9557_v51  ;;  %v2953_v35 = vmul.f32 1.442695, %v2923_v55  ;;  %v15723_v45 = vld [vmem:[#allocation69_spill] sm:$0xff] }
 0x86d   :  { %v9559_v10 = vpop.eup %9558  ;;  %v13513_v38 = vmul.f32 %v3505_v44, %v15717_v15  ;;  %vm1618_vm7 = vcmp.gt.f32.partialorder %v13450_v56, 0.0  ;;  %v2924_v25 = vmin.f32 %v13509_v62, 0.0  ;;  %v1697_v31 = vsel %vm1617_vm3, %v13441_v54, %v7510_v13  ;;  %v3510_v22 = vpop.permute.xlu0 %3509 }
 0x86e   :  { %v13515_v41 = vpop.eup %9560  ;;  %v7548_v12 = vadd.f32 -1.0, %v9559_v10  ;;  %9570 = vpow2.f32 %v2951_v6  ;;  %8767 = vrot.lane.b32.xlu1 %v8766_v52, %s9811_s17  ;;  %v1698_v30 = vsel %vm1618_vm7, %v13450_v56, %v7511_v28  ;;  %v3515_v43 = vpop.permute.xlu1 %3514  ;;  %v13525_v23 = vmul.f32 %v15719_v48, %v15718_v60 }
 0x86f   :  { %9572 = vpow2.f32 %v2953_v35  ;;  %v3566_v50 = vmin.f32 %v13513_v38, 0.0  ;;  %v8771_v36 = vpack.i.bf16 %v1698_v30, %v1697_v31  ;;  %v2955_v19 = vmul.f32 1.442695, %v2924_v25  ;;  %v15724_v35 = vld [vmem:[#allocation44_spill] sm:$0xff]  ;;  %v15725_v31 = vld [vmem:[#allocation58_spill] sm:$0xff] }
 0x870   :  { %v9563_v3 = vpop.eup %9562  ;;  %v13528_v46 = vmul.f32 %v3510_v22, %v15720_v8  ;;  %vm2260_vm6 = vcmp.gt.f32.partialorder %v13454_v34, 0.0  ;;  %v13532_v42 = vmul.f32 %v15721_v58, %v3515_v43  ;;  %vm2261_vm5 = vcmp.gt.f32.partialorder %v13469_v17, 0.0 }
 0x871   :  { %v9565_v61 = vpop.eup %9564  ;;  %v7549_v54 = vadd.f32 -1.0, %v9563_v3  ;;  %v3594_v56 = vmul.f32 1.442695, %v3566_v50  ;;  %v2340_v53 = vsel %vm2260_vm6, %v13454_v34, %v7548_v12  ;;  %9574 = vpow2.f32 %v2955_v19  ;;  %8772 = vrot.lane.b32.xlu0 %v8771_v36, %s9811_s17  ;;  %v3520_v27 = vpop.permute.xlu0 %3519  ;;  %v15722_v34 = vld [vmem:[#allocation26_spill] sm:$0xff] }
 0x872   :  { %v3567_v4 = vmin.f32 %v13528_v46, 0.0  ;;  %v7550_v29 = vadd.f32 -1.0, %v9565_v61  ;;  %v3568_v49 = vmin.f32 %v13532_v42, 0.0  ;;  %v4150_v32 = vpop.permute.xlu1 %4149  ;;  %v13541_v21 = vmul.f32 %v15722_v34, %v3520_v27  ;;  %v15726_v61 = vld [vmem:[#allocation41_spill] sm:$0xff] }
 0x873   :  { %v2341_v18 = vsel %vm2261_vm5, %v13469_v17, %v7549_v54  ;;  %9576 = vpow2.f32 %v3594_v56  ;;  %v9567_v40 = vpop.eup %9566  ;;  %vm2262_vm3 = vcmp.gt.f32.partialorder %v13473_v0, 0.0  ;;  %v13545_v17 = vmul.f32 %v4150_v32, %v15723_v45 }
 0x874   :  { %9578 = vpow2.f32 %v988_v24  ;;  %v8776_v11 = vpack.i.bf16 %v2341_v18, %v2340_v53  ;;  %v3596_v1 = vmul.f32 1.442695, %v3567_v4  ;;  %v9569_v39 = vpop.eup %9568  ;;  %v7551_v16 = vadd.f32 -1.0, %v9567_v40  ;;  %v15727_v53 = vld [vmem:[#allocation138_spill] sm:$0xff] }
 0x875   :  { %v3598_v47 = vmul.f32 1.442695, %v3568_v49  ;;  %vm2263_vm7 = vcmp.gt.f32.partialorder %v13482_v63, 0.0  ;;  %v7588_v13 = vadd.f32 -1.0, %v9569_v39  ;;  %v3569_v55 = vmin.f32 %v13541_v21, 0.0  ;;  %v4155_v24 = vpop.permute.xlu0 %4154 }
 0x876   :  { %9580 = vpow2.f32 %v3596_v1  ;;  %8777 = vrot.lane.b32.xlu1 %v8776_v11, %s9810_s3  ;;  %v2342_v7 = vsel %vm2262_vm3, %v13473_v0, %v7550_v29  ;;  %v2343_v44 = vsel %vm2263_vm7, %v13482_v63, %v7551_v16  ;;  %v4211_v51 = vmin.f32 %v13545_v17, 0.0  ;;  %v4160_v52 = vpop.permute.xlu1 %4159 }
 0x877   :  { %9582 = vpow2.f32 %v3598_v47  ;;  %v970_v33 = vmin.f32 %v13525_v23, 0.0  ;;  %v8781_v10 = vpack.i.bf16 %v2343_v44, %v2342_v7  ;;  %v3600_v28 = vmul.f32 1.442695, %v3569_v55  ;;  %v15728_v47 = vld [vmem:[#allocation140_spill] sm:$0xff]  ;;  %v15729_v7 = vld [vmem:[#allocation137_spill] sm:$0xff] }
 0x878   :  { %v9571_v6 = vpop.eup %9570  ;;  %v13555_v15 = vmul.f32 %v4155_v24, %v15724_v35  ;;  %vm2905_vm6 = vcmp.gt.f32.partialorder %v13486_v14, 0.0  ;;  %v4239_v0 = vmul.f32 1.442695, %v4211_v51  ;;  %v13559_v63 = vmul.f32 %v15725_v31, %v4160_v52  ;;  %v15730_v35 = vld [vmem:[#allocation74_spill] sm:$0xff]  ;;  %v15732_v31 = vld [vmem:[#allocation139_spill] sm:$0xff] }
 0x879   :  { %v9573_v12 = vpop.eup %9572  ;;  %v7589_v25 = vadd.f32 -1.0, %v9571_v6  ;;  %v2985_v30 = vsel %vm2905_vm6, %v13486_v14, %v7588_v13  ;;  %vm2906_vm5 = vcmp.gt.f32.partialorder %v13496_v57, 0.0  ;;  %9584 = vpow2.f32 %v3600_v28  ;;  %8782 = vrot.lane.b32.xlu0 %v8781_v10, %s9810_s3  ;;  %v4165_v60 = vpop.permute.xlu0 %4164 }
 0x87a   :  { %v4212_v50 = vmin.f32 %v13555_v15, 0.0  ;;  %v7590_v43 = vadd.f32 -1.0, %v9573_v12  ;;  %9586 = vpow2.f32 %v4239_v0  ;;  %v4213_v3 = vmin.f32 %v13559_v63, 0.0  ;;  %v4795_v48 = vpop.permute.xlu1 %4794  ;;  %v15731_v12 = vld [vmem:[#allocation56_spill] sm:$0xff] }
 0x87b   :  { %v2986_v22 = vsel %vm2906_vm5, %v13496_v57, %v7589_v25  ;;  %v9575_v36 = vpop.eup %9574  ;;  %v13568_v19 = vadd.f32 -1.0, %v13456_v2  ;;  %v13571_v54 = vmul.f32 %v15726_v61, %v4165_v60  ;;  %vm2907_vm3 = vcmp.gt.f32.partialorder %v13500_v37, 0.0 }
 0x87c   :  { %v8786_v14 = vpack.i.bf16 %v2986_v22, %v2985_v30  ;;  %v4241_v8 = vmul.f32 1.442695, %v4212_v50  ;;  %v7591_v58 = vadd.f32 -1.0, %v9575_v36  ;;  %v4243_v57 = vmul.f32 1.442695, %v4213_v3 }
 0x87d   :  { %v9577_v56 = vpop.eup %9576  ;;  %v13575_v4 = vmul.f32 %v4795_v48, %v15727_v53  ;;  %vm2908_vm7 = vcmp.gt.f32.partialorder %v13509_v62, 0.0  ;;  %v4214_v2 = vmin.f32 %v13571_v54, 0.0  ;;  %v2987_v49 = vsel %vm2907_vm3, %v13500_v37, %v7590_v43  ;;  %v4800_v40 = vpop.permute.xlu0 %4799  ;;  %v15733_v43 = vld [vmem:[#allocation142_spill] sm:$0xff]  ;;  %v15735_v53 = vld [vmem:[#allocation99_spill] sm:$0xff] }
 0x87e   :  { %v13577_v18 = vpop.eup %9578  ;;  %v7628_v29 = vadd.f32 -1.0, %v9577_v56  ;;  %9588 = vpow2.f32 %v4241_v8  ;;  %8787 = vrot.lane.b32.xlu1 %v8786_v14, %s9809_s14  ;;  %v2988_v27 = vsel %vm2908_vm7, %v13509_v62, %v7591_v58  ;;  %v4805_v11 = vpop.permute.xlu1 %4804  ;;  %v13585_v34 = vmul.f32 1.442695, %v970_v33 }
 0x87f   :  { %9590 = vpow2.f32 %v4243_v57  ;;  %v4856_v32 = vmin.f32 %v13575_v4, 0.0  ;;  %v8791_v39 = vpack.i.bf16 %v2988_v27, %v2987_v49  ;;  %v4245_v16 = vmul.f32 1.442695, %v4214_v2  ;;  %v15734_v57 = vld [vmem:[#allocation83_spill] sm:$0xff]  ;;  %v15736_v27 = vld [vmem:[#allocation144_spill] sm:$0xff] }
 0x880   :  { %v9581_v1 = vpop.eup %9580  ;;  %v13588_v45 = vmul.f32 %v4800_v40, %v15728_v47  ;;  %vm3550_vm6 = vcmp.gt.f32.partialorder %v13513_v38, 0.0  ;;  %v13592_v62 = vmul.f32 %v15729_v7, %v4805_v11  ;;  %vm3551_vm5 = vcmp.gt.f32.partialorder %v13528_v46, 0.0  ;;  %v15737_v11 = vld [vmem:[#allocation141_spill] sm:$0xff] }
 0x881   :  { %v9583_v13 = vpop.eup %9582  ;;  %v7629_v55 = vadd.f32 -1.0, %v9581_v1  ;;  %v4884_v37 = vmul.f32 1.442695, %v4856_v32  ;;  %v3630_v44 = vsel %vm3550_vm6, %v13513_v38, %v7628_v29  ;;  %9592 = vpow2.f32 %v4245_v16  ;;  %8792 = vrot.lane.b32.xlu0 %v8791_v39, %s9809_s14  ;;  %v4810_v33 = vpop.permute.xlu0 %4809 }
 0x882   :  { %v4857_v51 = vmin.f32 %v13588_v45, 0.0  ;;  %v7630_v52 = vadd.f32 -1.0, %v9583_v13  ;;  %v4858_v6 = vmin.f32 %v13592_v62, 0.0  ;;  %v5440_v10 = vpop.permute.xlu1 %5439  ;;  %v13602_v25 = vmul.f32 %v15731_v12, %v15730_v35 }
 0x883   :  { %v3631_v24 = vsel %vm3551_vm5, %v13528_v46, %v7629_v55  ;;  %9594 = vpow2.f32 %v4884_v37  ;;  %v9585_v28 = vpop.eup %9584  ;;  %v13605_v30 = vmul.f32 %v15732_v31, %v4810_v33  ;;  %vm3552_vm3 = vcmp.gt.f32.partialorder %v13532_v42, 0.0 }
 0x884   :  { %v8796_v38 = vpack.i.bf16 %v3631_v24, %v3630_v44  ;;  %v4886_v0 = vmul.f32 1.442695, %v4857_v51  ;;  %v9587_v50 = vpop.eup %9586  ;;  %v7631_v46 = vadd.f32 -1.0, %v9585_v28  ;;  %v4888_v22 = vmul.f32 1.442695, %v4858_v6  ;;  %v15739_v28 = vld [vmem:[#allocation62_spill] sm:$0xff] }
 0x885   :  { %v13609_v3 = vmul.f32 %v5440_v10, %v15733_v43  ;;  %vm3553_vm7 = vcmp.gt.f32.partialorder %v13541_v21, 0.0  ;;  %v7668_v60 = vadd.f32 -1.0, %v9587_v50  ;;  %v4859_v48 = vmin.f32 %v13605_v30, 0.0  ;;  %v5445_v61 = vpop.permute.xlu0 %5444 }
 0x886   :  { %9596 = vpow2.f32 %v4886_v0  ;;  %8797 = vrot.lane.b32.xlu1 %v8796_v38, %s9808_s13  ;;  %v3632_v36 = vsel %vm3552_vm3, %v13532_v42, %v7630_v52  ;;  %v3633_v14 = vsel %vm3553_vm7, %v13541_v21, %v7631_v46  ;;  %v5450_v56 = vpop.permute.xlu1 %5449  ;;  %v13619_v29 = vmul.f32 %v15735_v53, %v15734_v57  ;;  %v15738_v52 = vld [vmem:[#allocation143_spill] sm:$0xff] }
 0x887   :  { %9598 = vpow2.f32 %v4888_v22  ;;  %v5501_v8 = vmin.f32 %v13609_v3, 0.0  ;;  %v8801_v2 = vpack.i.bf16 %v3633_v14, %v3632_v36  ;;  %v4890_v49 = vmul.f32 1.442695, %v4859_v48 }
 0x888   :  { %v9589_v58 = vpop.eup %9588  ;;  %v13622_v32 = vmul.f32 %v5445_v61, %v15736_v27  ;;  %vm4195_vm6 = vcmp.gt.f32.partialorder %v13545_v17, 0.0  ;;  %v13626_v1 = vmul.f32 %v15737_v11, %v5450_v56  ;;  %vm4196_vm5 = vcmp.gt.f32.partialorder %v13555_v15, 0.0 }
 0x889   :  { %v9591_v40 = vpop.eup %9590  ;;  %v7669_v42 = vadd.f32 -1.0, %v9589_v58  ;;  %v5529_v21 = vmul.f32 1.442695, %v5501_v8  ;;  %v4275_v39 = vsel %vm4195_vm6, %v13545_v17, %v7668_v60  ;;  %9600 = vpow2.f32 %v4890_v49  ;;  %8802 = vrot.lane.b32.xlu0 %v8801_v2, %s9808_s13  ;;  %v5455_v37 = vpop.permute.xlu0 %5454 }
 0x88a   :  { %v5502_v16 = vmin.f32 %v13622_v32, 0.0  ;;  %vm950_vm3 = vcmp.gt.f32.partialorder %v13283_v5, 0.0  ;;  %v7670_v13 = vadd.f32 -1.0, %v9591_v40  ;;  %v5503_v55 = vmin.f32 %v13626_v1, 0.0  ;;  %v13636_v7 = vpop.permute.xlu1 %8557 }
 0x88b   :  { %v4276_v47 = vsel %vm4196_vm5, %v13555_v15, %v7669_v42  ;;  %9602 = vpow2.f32 %v5529_v21  ;;  %v9593_v17 = vpop.eup %9592  ;;  %v971_v44 = vmin.f32 %v13602_v25, 0.0  ;;  %v13640_v6 = vmul.f32 %v15738_v52, %v5455_v37  ;;  %v15740_v15 = vld [vmem:[#allocation102_spill] sm:$0xff] }
 0x88c   :  { %v8806_v51 = vpack.i.bf16 %v4276_v47, %v4275_v39  ;;  %v5531_v24 = vmul.f32 1.442695, %v5502_v16  ;;  %v972_v10 = vmin.f32 %v13619_v29, 0.0  ;;  %v13645_v35 = vmul.f32 %v15740_v15, %v15739_v28 }
 0x88d   :  { %v9595_v33 = vpop.eup %9594  ;;  %v7671_v12 = vadd.f32 -1.0, %v9593_v17  ;;  %v5533_v38 = vmul.f32 1.442695, %v5503_v55  ;;  %vm4197_vm6 = vcmp.gt.f32.partialorder %v13559_v63, 0.0  ;;  %vm4198_vm5 = vcmp.gt.f32.partialorder %v13571_v54, 0.0  ;;  %v13653_v22 = vpop.permute.xlu0 %8562 }
 0x88e   :  { %9604 = vpow2.f32 %v5531_v24  ;;  %v5504_v0 = vmin.f32 %v13640_v6, 0.0  ;;  %8807 = vrot.lane.b32.xlu1 %v8806_v51, %s9805_s11  ;;  %v4277_v31 = vsel %vm4197_vm6, %v13559_v63, %v7670_v13  ;;  %v7708_v46 = vadd.f32 -1.0, %v9595_v33  ;;  %v13655_v43 = vpop.permute.xlu1 %8567 }
 0x88f   :  { %v4278_v50 = vsel %vm4198_vm5, %v13571_v54, %v7671_v12  ;;  %9606 = vpow2.f32 %v5533_v38  ;;  %v7458_v48 = vadd.f32 -1.0, %v13515_v41  ;;  %v992_v36 = vmul.f32 1.442695, %v971_v44 }
 0x890   :  { %v9597_v60 = vpop.eup %9596  ;;  %v8811_v14 = vpack.i.bf16 %v4278_v50, %v4277_v31  ;;  %v5535_v8 = vmul.f32 1.442695, %v5504_v0  ;;  %v7459_v56 = vadd.f32 -1.0, %v13577_v18  ;;  %v994_v58 = vmul.f32 1.442695, %v972_v10 }
 0x891   :  { %v9599_v61 = vpop.eup %9598  ;;  %v973_v63 = vmin.f32 %v13645_v35, 0.0  ;;  %v7709_v57 = vadd.f32 -1.0, %v9597_v60  ;;  %vm4840_vm5 = vcmp.gt.f32.partialorder %v13575_v4, 0.0  ;;  %vm4841_vm7 = vcmp.gt.f32.partialorder %v13588_v45, 0.0  ;;  %v13667_v53 = vpop.permute.xlu0 %8572 }
 0x892   :  { %9608 = vpow2.f32 %v5535_v8  ;;  %8812 = vrot.lane.b32.xlu0 %v8811_v14, %s9805_s11  ;;  %v4920_v41 = vsel %vm4840_vm5, %v13575_v4, %v7708_v46  ;;  %v7710_v18 = vadd.f32 -1.0, %v9599_v61  ;;  %v13669_v2 = vpop.permute.xlu1 %8577  ;;  %v1030_v27 = vsel %vm950_vm3, %v13283_v5, %v13568_v19 }
 0x893   :  { %9610 = vpow2.f32 %v13585_v34  ;;  %v4921_v54 = vsel %vm4841_vm7, %v13588_v45, %v7709_v57  ;;  %v9601_v49 = vpop.eup %9600  ;;  %vm15741_vm6 = vcmp.gt.f32.partialorder %v13381_v20, 0.0  ;;  %vm15742_vm7 = vcmp.gt.f32.partialorder %v13466_v9, 0.0 }
 0x894   :  { %v1032_v40 = vsel %vm15741_vm6, %v13381_v20, %v7458_v48  ;;  %9612 = vpow2.f32 %v992_v36  ;;  %v8816_v34 = vpack.i.bf16 %v4921_v54, %v4920_v41  ;;  %v1033_v45 = vsel %vm15742_vm7, %v13466_v9, %v7459_v56  ;;  %vm15744_vm7 = vmmov %vm15743_vm0 }
 0x895   :  { %v9603_v4 = vpop.eup %9602  ;;  %9614 = vpow2.f32 %v994_v58  ;;  %v13681_v42 = vmul.f32 1.442695, %v973_v63  ;;  %v7711_v21 = vadd.f32 -1.0, %v9601_v49  ;;  %vm4842_vm5 = vcmp.gt.f32.partialorder %v13592_v62, 0.0  ;;  %v13690_v39 = vpop.permute.xlu0 %8582 }
 0x896   :  { %vm4843_vm12 = vcmp.gt.f32.partialorder %v13605_v30, 0.0  ;;  %v8560_v5 = vunpack.i.h.bf16 %v13636_v7  ;;  %8817 = vrot.lane.b32.xlu1 %v8816_v34, %s9804_s10  ;;  %v4922_v20 = vsel %vm4842_vm5, %v13592_v62, %v7710_v18  ;;  %v7748_v11 = vadd.f32 -1.0, %v9603_v4  ;;  %v8588_v16 = vpop.permute.xlu1 %8587 }
 0x897   :  { %v4923_v19 = vsel %vm4843_vm12, %v13605_v30, %v7711_v21  ;;  %v8559_v9 = vunpack.i.l.bf16 %v13636_v7  ;;  %vm5485_vm6 = vcmp.gt.f32.partialorder %v13609_v3, 0.0  ;;  %vm5486_vm3 = vcmp.gt.f32.partialorder %v13622_v32, 0.0 }
 0x898   :  { %v9605_v47 = vpop.eup %9604  ;;  %v8821_v13 = vpack.i.bf16 %v4923_v19, %v4922_v20  ;;  %vm5487_vm5 = vcmp.gt.f32.partialorder %v13626_v1, 0.0  ;;  %v8565_v62 = vunpack.i.h.bf16 %v13653_v22  ;;  %v6018_v30 = vsel %vm15743_vm0, %v13404_v26, %v8560_v5 }
 0x899   :  { %v9607_v55 = vpop.eup %9606  ;;  %v7749_v37 = vadd.f32 -1.0, %v9605_v47  ;;  %v8564_v7 = vunpack.i.l.bf16 %v13653_v22  ;;  %v8569_v17 = vunpack.i.l.bf16 %v13655_v43  ;;  %v5565_v44 = vsel %vm5485_vm6, %v13609_v3, %v7748_v11  ;;  %v8593_v33 = vpop.permute.xlu0 %8592 }
 0x89a   :  { %8822 = vrot.lane.b32.xlu0 %v8821_v13, %s9804_s10  ;;  %v7750_v24 = vadd.f32 -1.0, %v9607_v55  ;;  %v6017_v52 = vsel %vm15744_vm7, %v1030_v27, %v8559_v9  ;;  %v8598_v10 = vpop.permute.xlu1 %8597  ;;  %v8570_v26 = vunpack.i.h.bf16 %v13655_v43  ;;  %v8575_v12 = vunpack.i.h.bf16 %v13667_v53 }
 0x89b   :  { %v5566_v51 = vsel %vm5486_vm3, %v13622_v32, %v7749_v37  ;;  %v8574_v38 = vunpack.i.l.bf16 %v13667_v53  ;;  %v6020_v3 = vsel %vm15743_vm0, %v1033_v45, %v8565_v62  ;;  %v8580_v32 = vunpack.i.h.bf16 %v13669_v2  ;;  %vm15745_vm3 = vmmov %vm15743_vm0 }
 0x89c   :  { %v9609_v28 = vpop.eup %9608  ;;  %v8826_v15 = vpack.i.bf16 %v5566_v51, %v5565_v44  ;;  %v8579_v50 = vunpack.i.l.bf16 %v13669_v2  ;;  %v6019_v22 = vsel %vm15745_vm3, %v1032_v40, %v8564_v7  ;;  %vm15746_vm6 = vcmask 261120  }
 0x89d   :  { %v13708_v0 = vpop.eup %9610  ;;  %v7751_v31 = vadd.f32 -1.0, %v9609_v28  ;;  %v6034_v60 = vsel %vm15746_vm6, %v6017_v52, %v8569_v17  ;;  %v8590_v43 = vunpack.i.h.bf16 %v8588_v16  ;;  %v8589_v48 = vunpack.i.l.bf16 %v8588_v16  ;;  %v8603_v58 = vpop.permute.xlu0 %8602  ;;  %vm15748_vm0 = vmmov %vm15746_vm6 }
 0x89e   :  { %v13713_v46 = vpop.eup %9612  ;;  %8827 = vrot.lane.b32.xlu1 %v8826_v15, %s9803_s0  ;;  %v5567_v14 = vsel %vm5487_vm5, %v13626_v1, %v7750_v24  ;;  %vm15747_vm7 = vcmp.gt.f32.partialorder %v13640_v6, 0.0  ;;  %v8600_v61 = vunpack.i.h.bf16 %v8598_v10  ;;  %v8599_v56 = vunpack.i.l.bf16 %v8598_v10  ;;  %v8608_v63 = vpop.permute.xlu1 %8607  ;;  %vm15749_vm3 = vmmov %vm15748_vm0 }
 0x89f   :  { %v13718_v36 = vpop.eup %9614  ;;  %v5568_v8 = vsel %vm15747_vm7, %v13640_v6, %v7751_v31  ;;  %v6035_v41 = vsel %vm15748_vm0, %v6018_v30, %v8570_v26  ;;  %v6037_v54 = vsel %vm15749_vm3, %v6020_v3, %v8575_v12  ;;  %vm15750_vm6 = vmmov %vm15748_vm0  ;;  %vm15751_vm12 = vcmask 392192   ;;  %v15769_v31 = vld [vmem:[#allocation112_spill] sm:$0xff] }
 0x8a0   :  { %v8831_v57 = vpack.i.bf16 %v5568_v8, %v5567_v14  ;;  %v6036_v18 = vsel %vm15750_vm6, %v6019_v22, %v8574_v38  ;;  %v6051_v53 = vsel %vm15751_vm12, %v6034_v60, %v8579_v50  ;;  %vm15752_vm15 = vmmov %vm15751_vm12  ;;  %v8610_v1 = vunpack.i.h.bf16 %v8608_v63  ;;  %v15773_v22 = vld [vmem:[#allocation114_spill] sm:$0xff]  ;;  %v15774_v60 = vld [vmem:[#allocation11_spill] sm:$0xff] }
 0x8a1   :  { %v6052_v2 = vsel %vm15752_vm15, %v6035_v41, %v8580_v32  ;;  %v8609_v49 = vunpack.i.l.bf16 %v8608_v63  ;;  %v8585_v27 = vunpack.i.h.bf16 %v13690_v39  ;;  %v8584_v6 = vunpack.i.l.bf16 %v13690_v39  ;;  %v8613_v20 = vpop.permute.xlu0 %8612 }
 0x8a2   :  { %vm15753_vm5 = vcmask 523264   ;;  %8832 = vrot.lane.b32.xlu0 %v8831_v57, %s9803_s0  ;;  %v8595_v4 = vunpack.i.h.bf16 %v8593_v33  ;;  %v8594_v45 = vunpack.i.l.bf16 %v8593_v33  ;;  %vm15755_vm0 = vcmask 654336   ;;  %v8618_v19 = vpop.permute.xlu1 %8617 }
 0x8a3   :  { %v6067_v40 = vsel %vm15753_vm5, %v6051_v53, %v8589_v48  ;;  %vm15754_vm7 = vmmov %vm15753_vm5  ;;  %v8605_v11 = vunpack.i.h.bf16 %v8603_v58  ;;  %v8604_v9 = vunpack.i.l.bf16 %v8603_v58  ;;  %v8620_v16 = vunpack.i.h.bf16 %v8618_v19  ;;  %v15775_v53 = vld [vmem:[#allocation60_spill] sm:$0xff] }
 0x8a4   :  { %v6068_v34 = vsel %vm15754_vm7, %v6052_v2, %v8590_v43  ;;  %v6084_v21 = vsel %vm15755_vm0, %v6067_v40, %v8599_v56  ;;  %vm15756_vm3 = vmmov %vm15755_vm0  ;;  %v8619_v47 = vunpack.i.l.bf16 %v8618_v19  ;;  %v8615_v13 = vunpack.i.h.bf16 %v8613_v20  ;;  %v15776_v2 = vld [vmem:[#allocation113_spill] sm:$0xff] }
 0x8a5   :  { %v6085_v5 = vsel %vm15756_vm3, %v6068_v34, %v8600_v61  ;;  %v8614_v39 = vunpack.i.l.bf16 %v8613_v20  ;;  %vm15757_vm15 = vcmask 785408   ;;  %vm15759_vm6 = vcmask 392192   ;;  %v8623_v24 = vpop.permute.xlu0 %8622 }
 0x8a6   :  { %v6101_v55 = vsel %vm15757_vm15, %v6084_v21, %v8609_v49  ;;  %vm15758_vm12 = vmmov %vm15757_vm15  ;;  %v6054_v62 = vsel %vm15759_vm6, %v6037_v54, %v8585_v27  ;;  %vm15761_vm7 = vcmask 916480   ;;  %9616 = vpow2.f32 %v13681_v42  ;;  %v8628_v52 = vpop.permute.xlu1 %8627  ;;  %v15770_v42 = vld [vmem:[#allocation53_spill] sm:$0xff] }
 0x8a7   :  { %v6102_v37 = vsel %vm15758_vm12, %v6085_v5, %v8610_v1  ;;  %vm15760_vm5 = vmmov %vm15759_vm6  ;;  %v6118_v7 = vsel %vm15761_vm7, %v6101_v55, %v8619_v47  ;;  %vm15763_vm3 = vcmask 523264   ;;  %vm15765_vm15 = vcmask 654336  }
 0x8a8   :  { %v6053_v30 = vsel %vm15760_vm5, %v6036_v18, %v8584_v6  ;;  %vm15762_vm0 = vmmov %vm15761_vm7  ;;  %v6070_v44 = vsel %vm15763_vm3, %v6054_v62, %v8595_v4  ;;  %v8625_v15 = vunpack.i.h.bf16 %v8623_v24  ;;  %v8624_v26 = vunpack.i.l.bf16 %v8623_v24 }
 0x8a9   :  { %v6119_v17 = vsel %vm15762_vm0, %v6102_v37, %v8620_v16  ;;  %vm15764_vm2 = vmmov %vm15763_vm3  ;;  %v6087_v10 = vsel %vm15765_vm15, %v6070_v44, %v8605_v11  ;;  %vm15767_vm6 = vcmask 785408   ;;  %v13753_v3 = vmul.f32 %v15770_v42, %v15769_v31  ;;  %v8633_v14 = vpop.permute.xlu0 %8632 }
 0x8aa   :  { %v6069_v51 = vsel %vm15764_vm2, %v6053_v30, %v8594_v45  ;;  %v6134_v33 = vpack.c.bf16 %v6119_v17, %v6118_v7  ;;  %vm15766_vm12 = vmmov %vm15765_vm15  ;;  %v6104_v12 = vsel %vm15767_vm6, %v6087_v10, %v8615_v13  ;;  %v13759_v43 = vmul.f32 %v15774_v60, %v15773_v22  ;;  %v8638_v8 = vpop.permute.xlu1 %8637 }
 0x8ab   :  { %v6086_v28 = vsel %vm15766_vm12, %v6069_v51, %v8604_v9  ;;  %vm15768_vm5 = vmmov %vm15767_vm6  ;;  %v976_v61 = vmin.f32 %v13253_v59, 0.0  ;;  %v974_v56 = vmin.f32 %v13753_v3, 0.0  ;;  %v7460_v18 = vadd.f32 -1.0, %v13708_v0 }
 0x8ac   :  { %v6103_v38 = vsel %vm15768_vm5, %v6086_v28, %v8614_v39  ;;  %8296 = vmatprep.mubr.bf16.mxu0 %v6134_v33  ;;  %vm15771_vm7 = vmmov %vm15762_vm0  ;;  %v975_v58 = vmin.f32 %v13759_v43, 0.0  ;;  %v13767_v1 = vmul.f32 %v15776_v2, %v15775_v53  ;;  %v7461_v49 = vadd.f32 -1.0, %v13713_v46 }
 0x8ad   :  { %v6121_v32 = vsel %vm15771_vm7, %v6104_v12, %v8625_v15  ;;  %vm15772_vm2 = vmmov %vm15762_vm0  ;;  %v8643_v63 = vpop.permute.xlu0 %8642  ;;  %v1002_v41 = vmul.f32 1.442695, %v976_v61  ;;  %v998_v27 = vmul.f32 1.442695, %v974_v56  ;;  %v7462_v6 = vadd.f32 -1.0, %v13718_v36 }
 0x8ae   :  { %v6120_v50 = vsel %vm15772_vm2, %v6103_v38, %v8624_v26  ;;  %v8648_v57 = vpop.permute.xlu1 %8647  ;;  %v1000_v40 = vmul.f32 1.442695, %v975_v58  ;;  %vm954_vm0 = vcmp.gt.f32.partialorder %v13525_v23, 0.0  ;;  %vm955_vm3 = vcmp.gt.f32.partialorder %v13602_v25, 0.0 }
 0x8af   :  { %v6135_v48 = vpack.c.bf16 %v6121_v32, %v6120_v50  ;;  %9618 = vpow2.f32 %v1002_v41  ;;  %vm956_vm15 = vcmp.gt.f32.partialorder %v13619_v29, 0.0  ;;  %v1034_v0 = vsel %vm954_vm0, %v13525_v23, %v7460_v18 }
 0x8b0   :  { %v9617_v54 = vpop.eup %9616  ;;  %vm957_vm12 = vcmp.gt.f32.partialorder %v13645_v35, 0.0  ;;  %v977_v46 = vmin.f32 %v13767_v1, 0.0  ;;  %v1035_v36 = vsel %vm955_vm3, %v13602_v25, %v7461_v49  ;;  %9620 = vpow2.f32 %v998_v27 }
 0x8b1   :  { %8297 = vmatmul.mubr.bf16.vlgmr.msra.gmra.mrb[80].mxu0 %v6135_v48  ;;  %v13771_v34 = vpop.permute.xlu0 %8652  ;;  %v7463_v45 = vadd.f32 -1.0, %v9617_v54  ;;  %v8630_v21 = vunpack.i.h.bf16 %v8628_v52  ;;  %v8629_v5 = vunpack.i.l.bf16 %v8628_v52  ;;  %v1036_v20 = vsel %vm956_vm15, %v13619_v29, %v7462_v6 }
 0x8b2   :  { %v8658_v4 = vpop.permute.xlu1 %8657  ;;  %9622 = vpow2.f32 %v1000_v40  ;;  %v8635_v19 = vunpack.i.h.bf16 %v8633_v14  ;;  %v8634_v11 = vunpack.i.l.bf16 %v8633_v14  ;;  %v8640_v47 = vunpack.i.h.bf16 %v8638_v8 }
 0x8b3   :  { %v8639_v13 = vunpack.i.l.bf16 %v8638_v8  ;;  %v8645_v23 = vunpack.i.h.bf16 %v8643_v63  ;;  %v8644_v39 = vunpack.i.l.bf16 %v8643_v63  ;;  %v1037_v55 = vsel %vm957_vm12, %v13645_v35, %v7463_v45 }
 0x8b4   :  { %v1004_v37 = vmul.f32 1.442695, %v977_v46  ;;  %v8650_v25 = vunpack.i.h.bf16 %v8648_v57  ;;  %v8649_v62 = vunpack.i.l.bf16 %v8648_v57  ;;  %vm15777_vm6 = vcmask 130048  }
 0x8b5   :  { %v8663_v9 = vpop.permute.xlu0 %8662  ;;  %v6022_v30 = vsel %vm15777_vm6, %v1035_v36, %v8630_v21  ;;  %vm15778_vm5 = vmmov %vm15777_vm6  ;;  %v8660_v7 = vunpack.i.h.bf16 %v8658_v4  ;;  %v8659_v17 = vunpack.i.l.bf16 %v8658_v4  ;;  %vm15781_vm0 = vcmask 261120  }
 0x8b6   :  { %v8668_v16 = vpop.permute.xlu1 %8667  ;;  %v6021_v29 = vsel %vm15778_vm5, %v1034_v0, %v8629_v5  ;;  %vm15779_vm7 = vmmov %vm15778_vm5  ;;  %vm15785_vm6 = vcmask 392192   ;;  %v8655_v50 = vunpack.i.h.bf16 %v13771_v34  ;;  %v8654_v22 = vunpack.i.l.bf16 %v13771_v34 }
 0x8b7   :  { %v6024_v44 = vsel %vm15779_vm7, %v1037_v55, %v8635_v19  ;;  %vm15780_vm2 = vmmov %vm15778_vm5  ;;  %v8670_v24 = vunpack.i.h.bf16 %v8668_v16  ;;  %v8669_v52 = vunpack.i.l.bf16 %v8668_v16  ;;  %v6038_v28 = vsel %vm15781_vm0, %v6021_v29, %v8639_v13 }
 0x8b8   :  { %v6023_v51 = vsel %vm15780_vm2, %v1036_v20, %v8634_v11  ;;  %vm15782_vm3 = vmmov %vm15781_vm0  ;;  %v6055_v12 = vsel %vm15785_vm6, %v6038_v28, %v8649_v62  ;;  %vm15787_vm7 = vcmask 523264   ;;  %v8665_v14 = vunpack.i.h.bf16 %v8663_v9 }
 0x8b9   :  { %v8673_v33 = vpop.permute.xlu0 %8672  ;;  %v6039_v35 = vsel %vm15782_vm3, %v6022_v30, %v8640_v47  ;;  %vm15783_vm15 = vmmov %vm15781_vm0  ;;  %v9619_v32 = vpop.eup %9618  ;;  %v6071_v60 = vsel %vm15787_vm7, %v6055_v12, %v8659_v17  ;;  %v8664_v8 = vunpack.i.l.bf16 %v8663_v9  ;;  %9624 = vpow2.f32 %v1004_v37 }
 0x8ba   :  { %v8678_v10 = vpop.permute.xlu1 %8677  ;;  %v6041_v15 = vsel %vm15783_vm15, %v6024_v44, %v8645_v23  ;;  %vm15784_vm12 = vmmov %vm15781_vm0  ;;  %vm15789_vm0 = vcmask 654336   ;;  %v9621_v57 = vpop.eup %9620  ;;  %v8675_v41 = vunpack.i.h.bf16 %v8673_v33  ;;  %v8674_v54 = vunpack.i.l.bf16 %v8673_v33 }
 0x8bb   :  { %v6040_v26 = vsel %vm15784_vm12, %v6023_v51, %v8644_v39  ;;  %vm15786_vm5 = vmmov %vm15785_vm6  ;;  %v8680_v31 = vunpack.i.h.bf16 %v8678_v10  ;;  %v8679_v42 = vunpack.i.l.bf16 %v8678_v10  ;;  %v6088_v61 = vsel %vm15789_vm0, %v6071_v60, %v8669_v52 }
 0x8bc   :  { %v6056_v38 = vsel %vm15786_vm5, %v6039_v35, %v8650_v25  ;;  %vm15788_vm2 = vmmov %vm15787_vm7  ;;  %v9623_v2 = vpop.eup %9622  ;;  %vm15791_vm15 = vcmask 785408   ;;  %v6057_v4 = vsel %vm15786_vm5, %v6040_v26, %v8654_v22  ;;  %vm15794_vm7 = vcmask 916480  }
 0x8bd   :  { %v6072_v48 = vsel %vm15788_vm2, %v6056_v38, %v8660_v7  ;;  %vm15790_vm3 = vmmov %vm15789_vm0  ;;  %v8683_v58 = vpop.permute.xlu0 %8682  ;;  %v6105_v6 = vsel %vm15791_vm15, %v6088_v61, %v8679_v42  ;;  %vm15796_vm0 = vcmask 523264   ;;  %v7466_v7 = vadd.f32 -1.0, %v9619_v32 }
 0x8be   :  { %v6089_v56 = vsel %vm15790_vm3, %v6072_v48, %v8670_v24  ;;  %v8688_v63 = vpop.permute.xlu1 %8687  ;;  %v8685_v49 = vunpack.i.h.bf16 %v8683_v58  ;;  %v8684_v27 = vunpack.i.l.bf16 %v8683_v58  ;;  %vm15792_vm12 = vmmov %vm15791_vm15  ;;  %v7464_v17 = vadd.f32 -1.0, %v9621_v57 }
 0x8bf   :  { %v8690_v18 = vunpack.i.h.bf16 %v8688_v63  ;;  %v8689_v53 = vunpack.i.l.bf16 %v8688_v63  ;;  %v6106_v40 = vsel %vm15792_vm12, %v6089_v56, %v8680_v31  ;;  %vm15793_vm6 = vmmov %vm15786_vm5  ;;  %v7465_v52 = vadd.f32 -1.0, %v9623_v2 }
 0x8c0   :  { %v6058_v34 = vsel %vm15793_vm6, %v6041_v15, %v8655_v50  ;;  %vm15795_vm2 = vmmov %vm15794_vm7 }
 0x8c1   :  { %v6122_v0 = vsel %vm15794_vm7, %v6105_v6, %v8689_v53  ;;  %v6123_v45 = vsel %vm15795_vm2, %v6106_v40, %v8690_v18  ;;  %v6074_v46 = vsel %vm15796_vm0, %v6058_v34, %v8665_v14  ;;  %vm15797_vm3 = vmmov %vm15796_vm0  ;;  %v8693_v21 = vpop.permute.xlu0 %8692  ;;  %vm959_vm0 = vcmp.gt.f32.partialorder %v13759_v43, 0.0 }
 0x8c2   :  { %v6073_v36 = vsel %vm15797_vm3, %v6057_v4, %v8664_v8  ;;  %v8698_v5 = vpop.permute.xlu1 %8697  ;;  %v6136_v20 = vpack.c.bf16 %v6123_v45, %v6122_v0  ;;  %v6091_v19 = vsel %vm15798_vm1, %v6074_v46, %v8675_v41  ;;  %vm15799_vm15 = vmmov %vm15798_vm1  ;;  %v8695_v9 = vunpack.i.h.bf16 %v8693_v21 }
 0x8c3   :  { %v6090_v11 = vsel %vm15799_vm15, %v6073_v36, %v8674_v54  ;;  %v8694_v16 = vunpack.i.l.bf16 %v8693_v21  ;;  %vm15800_vm6 = vmmov %vm15792_vm12  ;;  %v9625_v29 = vpop.eup %9624  ;;  %vm960_vm1 = vcmp.gt.f32.partialorder %v13253_v59, 0.0  ;;  %v8700_v10 = vunpack.i.h.bf16 %v8698_v5 }
 0x8c4   :  { %8300 = vmatprep.mubr.bf16.mxu0 %v6136_v20  ;;  %v6107_v47 = vsel %vm15792_vm12, %v6090_v11, %v8684_v27  ;;  %v6108_v13 = vsel %vm15800_vm6, %v6091_v19, %v8685_v49  ;;  %vm15801_vm5 = vmmov %vm15795_vm2  ;;  %v1040_v24 = vsel %vm960_vm1, %v13253_v59, %v7466_v7  ;;  %v7467_v33 = vadd.f32 -1.0, %v9625_v29 }
 0x8c5   :  { %v6124_v23 = vsel %vm15801_vm5, %v6107_v47, %v8694_v16  ;;  %vm15802_vm7 = vmmov %vm15795_vm2  ;;  %v8703_v55 = vpop.permute.xlu0 %8702  ;;  %vm958_vm2 = vcmp.gt.f32.partialorder %v13753_v3, 0.0  ;;  %v8699_v28 = vunpack.i.l.bf16 %v8698_v5  ;;  %vm961_vm3 = vcmp.gt.f32.partialorder %v13767_v1, 0.0 }
 0x8c6   :  { %v6125_v39 = vsel %vm15802_vm7, %v6108_v13, %v8695_v9  ;;  %v8708_v37 = vpop.permute.xlu1 %8707  ;;  %v1038_v35 = vsel %vm958_vm2, %v13753_v3, %v7464_v17  ;;  %v8705_v15 = vunpack.i.h.bf16 %v8703_v55  ;;  %v8704_v26 = vunpack.i.l.bf16 %v8703_v55 }
 0x8c7   :  { %v6137_v25 = vpack.c.bf16 %v6125_v39, %v6124_v23  ;;  %v8710_v31 = vunpack.i.h.bf16 %v8708_v37  ;;  %v8709_v42 = vunpack.i.l.bf16 %v8708_v37  ;;  %v1039_v50 = vsel %vm959_vm0, %v13759_v43, %v7465_v52 }
 0x8c8   :  { %v1041_v22 = vsel %vm961_vm3, %v13767_v1, %v7467_v33  ;;  %vm15803_vm15 = vcmask 130048   ;;  %vm15807_vm7 = vcmask 261120   ;;  %vm15811_vm3 = vcmask 392192  }
 0x8c9   :  { %8301 = vmatmul.mubr.bf16.gmra.mrb[84].mxu0 %v6137_v25  ;;  %v8713_v62 = vpop.permute.xlu0 %8712  ;;  %v6026_v14 = vsel %vm15803_vm15, %v1039_v50, %v8700_v10  ;;  %vm15804_vm12 = vmmov %vm15803_vm15  ;;  %v15833_v50 = vld [vmem:[#allocation120_spill] sm:$0xff] }
 0x8ca   :  { %v8718_v30 = vpop.permute.xlu1 %8717  ;;  %v8715_v32 = vunpack.i.h.bf16 %v8713_v62  ;;  %v8714_v59 = vunpack.i.l.bf16 %v8713_v62  ;;  %v6025_v3 = vsel %vm15804_vm12, %v1038_v35, %v8699_v28  ;;  %vm15805_vm6 = vmmov %vm15804_vm12  ;;  %vm15813_vm12 = vcmask 523264  }
 0x8cb   :  { %v8720_v60 = vunpack.i.h.bf16 %v8718_v30  ;;  %v8719_v48 = vunpack.i.l.bf16 %v8718_v30  ;;  %v6028_v56 = vsel %vm15805_vm6, %v1041_v22, %v8705_v15  ;;  %vm15806_vm5 = vmmov %vm15805_vm6  ;;  %v6042_v43 = vsel %vm15807_vm7, %v6025_v3, %v8709_v42  ;;  %v15831_v42 = vld [vmem:[#allocation100_spill] sm:$0xff] }
 0x8cc   :  { %v6027_v58 = vsel %vm15806_vm5, %v1040_v24, %v8704_v26  ;;  %vm15808_vm1 = vmmov %vm15807_vm7  ;;  %vm15815_vm5 = vcmask 654336   ;;  %v15828_v26 = vld [vmem:[#allocation115_spill] sm:$0xff] }
 0x8cd   :  { %v13814_v44 = vpop.permute.xlu0 %8722  ;;  %v6043_v1 = vsel %vm15808_vm1, %v6026_v14, %v8710_v31  ;;  %vm15809_vm2 = vmmov %vm15808_vm1  ;;  %v6059_v2 = vsel %vm15811_vm3, %v6042_v43, %v8719_v48  ;;  %v15830_v31 = vld [vmem:[#allocation86_spill] sm:$0xff]  ;;  %v15835_v14 = vld [vmem:[#allocation116_spill] sm:$0xff] }
 0x8ce   :  { %v8728_v51 = vpop.permute.xlu1 %8727  ;;  %v6045_v18 = vsel %vm15809_vm2, %v6028_v56, %v8715_v32  ;;  %vm15810_vm0 = vmmov %vm15808_vm1  ;;  %v8725_v40 = vunpack.i.h.bf16 %v13814_v44  ;;  %v8724_v34 = vunpack.i.l.bf16 %v13814_v44  ;;  %vm15817_vm1 = vcmask 785408   ;;  %v15834_v48 = vld [vmem:[#allocation50_spill] sm:$0xff] }
 0x8cf   :  { %v8730_v8 = vunpack.i.h.bf16 %v8728_v51  ;;  %v8729_v61 = vunpack.i.l.bf16 %v8728_v51  ;;  %v6044_v53 = vsel %vm15810_vm0, %v6027_v58, %v8714_v59  ;;  %vm15812_vm15 = vmmov %vm15811_vm3  ;;  %v948_v32 = vmul.f32 %v15831_v42, %v15830_v31  ;;  %v15832_v59 = vld [vmem:[#allocation117_spill] sm:$0xff] }
 0x8d0   :  { %v6060_v49 = vsel %vm15812_vm15, %v6043_v1, %v8720_v60  ;;  %vm15814_vm6 = vmmov %vm15813_vm12  ;;  %vm15821_vm15 = vcmask 916480   ;;  %v947_v22 = vmul.f32 %v15833_v50, %v15832_v59  ;;  %v949_v3 = vmul.f32 %v15835_v14, %v15834_v48 }
 0x8d1   :  { %v8733_v12 = vpop.permute.xlu0 %8732  ;;  %v6075_v4 = vsel %vm15813_vm12, %v6059_v2, %v8729_v61  ;;  %v6076_v0 = vsel %vm15814_vm6, %v6060_v49, %v8730_v8  ;;  %vm15816_vm7 = vmmov %vm15815_vm5  ;;  %v980_v8 = vmin.f32 %v948_v32, 0.0 }
 0x8d2   :  { %v8738_v38 = vpop.permute.xlu1 %8737  ;;  %v8735_v45 = vunpack.i.h.bf16 %v8733_v12  ;;  %v8734_v46 = vunpack.i.l.bf16 %v8733_v12  ;;  %vm15818_vm2 = vmmov %vm15817_vm1  ;;  %v15829_v12 = vld [vmem:[#allocation67_spill] sm:$0xff]  ;;  %v979_v61 = vmin.f32 %v947_v22, 0.0  ;;  %v981_v58 = vmin.f32 %v949_v3, 0.0 }
 0x8d3   :  { %v8740_v63 = vunpack.i.h.bf16 %v8738_v38  ;;  %v8739_v57 = vunpack.i.l.bf16 %v8738_v38  ;;  %vm15819_vm0 = vmmov %vm15811_vm3  ;;  %v946_v38 = vmul.f32 %v15829_v12, %v15828_v26 }
 0x8d4   :  { %v6062_v55 = vsel %vm15819_vm0, %v6045_v18, %v8725_v40  ;;  %vm15820_vm3 = vmmov %vm15819_vm0 }
 0x8d5   :  { %v8743_v41 = vpop.permute.xlu0 %8742  ;;  %v6092_v36 = vsel %vm15815_vm5, %v6075_v4, %v8739_v57  ;;  %v6093_v21 = vsel %vm15816_vm7, %v6076_v0, %v8740_v63  ;;  %v6061_v37 = vsel %vm15820_vm3, %v6044_v53, %v8724_v34  ;;  %vm15822_vm12 = vmmov %vm15821_vm15  ;;  %v6078_v30 = vsel %vm15814_vm6, %v6062_v55, %v8735_v45 }
 0x8d6   :  { %v8748_v54 = vpop.permute.xlu1 %8747  ;;  %v8745_v19 = vunpack.i.h.bf16 %v8743_v41  ;;  %v8744_v11 = vunpack.i.l.bf16 %v8743_v41  ;;  %vm15823_vm5 = vmmov %vm15814_vm6  ;;  %v978_v60 = vmin.f32 %v946_v38, 0.0  ;;  %v1010_v63 = vmul.f32 1.442695, %v980_v8 }
 0x8d7   :  { %v8750_v27 = vunpack.i.h.bf16 %v8748_v54  ;;  %v8749_v6 = vunpack.i.l.bf16 %v8748_v54  ;;  %v6077_v29 = vsel %vm15823_vm5, %v6061_v37, %v8734_v46  ;;  %vm15824_vm10 = vmmov %vm15816_vm7  ;;  %v1008_v57 = vmul.f32 1.442695, %v979_v61 }
 0x8d8   :  { %v6095_v44 = vsel %vm15816_vm7, %v6078_v30, %v8745_v19  ;;  %v6094_v51 = vsel %vm15824_vm10, %v6077_v29, %v8744_v11  ;;  %vm15826_vm0 = vmmov %vm15822_vm12  ;;  %v1006_v56 = vmul.f32 1.442695, %v978_v60  ;;  %v1012_v41 = vmul.f32 1.442695, %v981_v58 }
 0x8d9   :  { %v8753_v5 = vpop.permute.xlu0 %8752  ;;  %v6109_v23 = vsel %vm15817_vm1, %v6092_v36, %v8749_v6  ;;  %v6110_v39 = vsel %vm15818_vm2, %v6093_v21, %v8750_v27  ;;  %vm15825_vm2 = vmmov %vm15817_vm1  ;;  %vm962_vm10 = vcmp.gt.f32.partialorder %v946_v38, 0.0  ;;  %vm965_vm6 = vcmp.gt.f32.partialorder %v949_v3, 0.0 }
 0x8da   :  { %v8758_v20 = vpop.permute.xlu1 %8757  ;;  %v8755_v47 = vunpack.i.h.bf16 %v8753_v5  ;;  %v8754_v13 = vunpack.i.l.bf16 %v8753_v5  ;;  %vm15827_vm3 = vmmov %vm15826_vm0  ;;  %9626 = vpow2.f32 %v1006_v56  ;;  %vm15836_vm5 = vcmask 130048  }
 0x8db   :  { %v8760_v9 = vunpack.i.h.bf16 %v8758_v20  ;;  %v8759_v16 = vunpack.i.l.bf16 %v8758_v20  ;;  %9628 = vpow2.f32 %v1010_v63  ;;  %vm15837_vm7 = vmmov %vm15836_vm5 }
 0x8dc   :  { %v6112_v33 = vsel %vm15817_vm1, %v6095_v44, %v8755_v47  ;;  %v6111_v10 = vsel %vm15825_vm2, %v6094_v51, %v8754_v13  ;;  %9630 = vpow2.f32 %v1008_v57  ;;  %vm15838_vm1 = vmmov %vm15836_vm5 }
 0x8dd   :  { %v6126_v25 = vsel %vm15821_vm15, %v6109_v23, %v8759_v16  ;;  %v6127_v62 = vsel %vm15822_vm12, %v6110_v39, %v8760_v9  ;;  %v8763_v7 = vpop.permute.xlu0 %8762  ;;  %9632 = vpow2.f32 %v1012_v41  ;;  %vm964_vm15 = vcmp.gt.f32.partialorder %v948_v32, 0.0  ;;  %vm15839_vm2 = vmmov %vm15838_vm1 }
 0x8de   :  { %v6138_v17 = vpack.c.bf16 %v6127_v62, %v6126_v25  ;;  %v8765_v24 = vunpack.i.h.bf16 %v8763_v7  ;;  %v8764_v52 = vunpack.i.l.bf16 %v8763_v7  ;;  %vm963_vm12 = vcmp.gt.f32.partialorder %v947_v22, 0.0 }
 0x8e0   :  { %8304 = vmatprep.mubr.bf16.mxu0 %v6138_v17  ;;  %v6128_v28 = vsel %vm15826_vm0, %v6111_v10, %v8764_v52  ;;  %v6129_v35 = vsel %vm15827_vm3, %v6112_v33, %v8765_v24  ;;  %v8768_v54 = vpop.permute.xlu1 %8767  ;;  %vm15840_vm0 = vcmask 261120  }
 0x8e1   :  { %v6139_v15 = vpack.c.bf16 %v6129_v35, %v6128_v28  ;;  %v8770_v5 = vunpack.i.h.bf16 %v8768_v54  ;;  %v8769_v20 = vunpack.i.l.bf16 %v8768_v54  ;;  %vm15841_vm3 = vmmov %vm15840_vm0 }
 0x8e3   :  { %8305 = vmatmul.mubr.bf16.gmra.mrb[88].mxu0 %v6139_v15  ;;  %v8773_v43 = vpop.permute.xlu0 %8772 }
 0x8e4   :  { %v9627_v18 = vpop.eup %9626  ;;  %v8775_v9 = vunpack.i.h.bf16 %v8773_v43  ;;  %v8774_v16 = vunpack.i.l.bf16 %v8773_v43 }
 0x8e5   :  { %v9629_v49 = vpop.eup %9628  ;;  %v7468_v40 = vadd.f32 -1.0, %v9627_v18 }
 0x8e6   :  { %v9631_v27 = vpop.eup %9630  ;;  %v7470_v34 = vadd.f32 -1.0, %v9629_v49 }
 0x8e7   :  { %v9633_v6 = vpop.eup %9632  ;;  %v7469_v45 = vadd.f32 -1.0, %v9631_v27  ;;  %v1042_v36 = vsel %vm962_vm10, %v946_v38, %v7468_v40  ;;  %vm15842_vm10 = vmmov %vm15840_vm0 }
 0x8e8   :  { %v8778_v1 = vpop.permute.xlu1 %8777  ;;  %v7471_v46 = vadd.f32 -1.0, %v9633_v6  ;;  %v1044_v21 = vsel %vm964_vm15, %v948_v32, %v7470_v34  ;;  %v6029_v29 = vsel %vm15837_vm7, %v1042_v36, %v8769_v20  ;;  %vm15843_vm15 = vmmov %vm15840_vm0 }
 0x8e9   :  { %v8780_v47 = vunpack.i.h.bf16 %v8778_v1  ;;  %v8779_v13 = vunpack.i.l.bf16 %v8778_v1  ;;  %v1043_v55 = vsel %vm963_vm12, %v947_v22, %v7469_v45  ;;  %v6031_v52 = vsel %vm15839_vm2, %v1044_v21, %v8774_v16 }
 0x8ea   :  { %v1045_v37 = vsel %vm965_vm6, %v949_v3, %v7471_v46  ;;  %v6030_v30 = vsel %vm15836_vm5, %v1043_v55, %v8770_v5  ;;  %vm15844_vm12 = vcmask 392192   ;;  %vm15846_vm5 = vcmask 523264  }
 0x8eb   :  { %v8783_v53 = vpop.permute.xlu0 %8782  ;;  %v6032_v24 = vsel %vm15838_vm1, %v1045_v37, %v8775_v9  ;;  %v6046_v28 = vsel %vm15840_vm0, %v6029_v29, %v8779_v13  ;;  %v6047_v35 = vsel %vm15841_vm3, %v6030_v30, %v8780_v47  ;;  %vm15845_vm6 = vmmov %vm15844_vm12  ;;  %vm15848_vm1 = vcmask 654336  }
 0x8ec   :  { %v8785_v23 = vunpack.i.h.bf16 %v8783_v53  ;;  %v8784_v39 = vunpack.i.l.bf16 %v8783_v53  ;;  %vm15847_vm7 = vmmov %vm15846_vm5  ;;  %vm15850_vm0 = vcmask 785408  }
 0x8ed   :  { %vm15849_vm2 = vmmov %vm15848_vm1 }
 0x8ee   :  { %v6049_v15 = vsel %vm15842_vm10, %v6032_v24, %v8785_v23  ;;  %v6048_v26 = vsel %vm15843_vm15, %v6031_v52, %v8784_v39  ;;  %vm15851_vm3 = vmmov %vm15850_vm0 }
 0x8ef   :  { %vm15852_vm10 = vmmov %vm15845_vm6 }
 0x8f0   :  { %v8788_v2 = vpop.permute.xlu1 %8787  ;;  %vm15853_vm15 = vmmov %vm15845_vm6 }
 0x8f1   :  { %v8790_v25 = vunpack.i.h.bf16 %v8788_v2  ;;  %v8789_v62 = vunpack.i.l.bf16 %v8788_v2 }
 0x8f3   :  { %v13862_v4 = vpop.permute.xlu0 %8792  ;;  %v6063_v12 = vsel %vm15844_vm12, %v6046_v28, %v8789_v62  ;;  %v6064_v38 = vsel %vm15845_vm6, %v6047_v35, %v8790_v25  ;;  %vm15854_vm12 = vcmask 916480  }
 0x8f4   :  { %v8795_v32 = vunpack.i.h.bf16 %v13862_v4  ;;  %v8794_v59 = vunpack.i.l.bf16 %v13862_v4  ;;  %vm15855_vm6 = vmmov %vm15854_vm12 }
 0x8f6   :  { %v6066_v18 = vsel %vm15852_vm10, %v6049_v15, %v8795_v32  ;;  %v6065_v53 = vsel %vm15853_vm15, %v6048_v26, %v8794_v59  ;;  %vm15859_vm10 = vmmov %vm15855_vm6 }
 0x8f7   :  { %vm15860_vm15 = vmmov %vm15855_vm6 }
 0x8f8   :  { %v8798_v0 = vpop.permute.xlu1 %8797 }
 0x8f9   :  { %v8800_v7 = vunpack.i.h.bf16 %v8798_v0  ;;  %v8799_v17 = vunpack.i.l.bf16 %v8798_v0 }
 0x8fb   :  { %v8803_v19 = vpop.permute.xlu0 %8802  ;;  %v6079_v50 = vsel %vm15846_vm5, %v6063_v12, %v8799_v17  ;;  %v6080_v22 = vsel %vm15847_vm7, %v6064_v38, %v8800_v7  ;;  %vm15856_vm7 = vmmov %vm15846_vm5 }
 0x8fc   :  { %v8805_v48 = vunpack.i.h.bf16 %v8803_v19  ;;  %v8804_v14 = vunpack.i.l.bf16 %v8803_v19 }
 0x8fe   :  { %v6082_v27 = vsel %vm15846_vm5, %v6066_v18, %v8805_v48  ;;  %v6081_v6 = vsel %vm15856_vm7, %v6065_v53, %v8804_v14  ;;  %vm6408_vm5 = vcmask 15360  }
 0x8ff   :  { %vm13924_vm7 = vmpackc.low %vm6408_vm5, %vm6408_vm5 }
 0x900   :  { %v8808_v11 = vpop.permute.xlu1 %8807 }
 0x901   :  { %v8810_v33 = vunpack.i.h.bf16 %v8808_v11  ;;  %v8809_v10 = vunpack.i.l.bf16 %v8808_v11 }
 0x903   :  { %v6096_v3 = vsel %vm15848_vm1, %v6079_v50, %v8809_v10  ;;  %v6097_v8 = vsel %vm15849_vm2, %v6080_v22, %v8810_v33  ;;  %vm15857_vm2 = vmmov %vm15848_vm1 }
 0x904   :  { %v8813_v44 = vpop.permute.xlu0 %8812 }
 0x905   :  { %v8815_v56 = vunpack.i.h.bf16 %v8813_v44  ;;  %v8814_v58 = vunpack.i.l.bf16 %v8813_v44 }
 0x907   :  { %v6099_v4 = vsel %vm15848_vm1, %v6082_v27, %v8815_v56  ;;  %v6098_v0 = vsel %vm15857_vm2, %v6081_v6, %v8814_v58 }
 0x908   :  { %v8818_v51 = vpop.permute.xlu1 %8817 }
 0x909   :  { %v8820_v31 = vunpack.i.h.bf16 %v8818_v51  ;;  %v8819_v42 = vunpack.i.l.bf16 %v8818_v51 }
 0x90b   :  { %v6113_v41 = vsel %vm15850_vm0, %v6096_v3, %v8819_v42  ;;  %v6114_v54 = vsel %vm15851_vm3, %v6097_v8, %v8820_v31  ;;  %vm15858_vm3 = vmmov %vm15850_vm0 }
 0x90c   :  { %v8823_v60 = vpop.permute.xlu0 %8822 }
 0x90d   :  { %v8825_v43 = vunpack.i.h.bf16 %v8823_v60  ;;  %v8824_v1 = vunpack.i.l.bf16 %v8823_v60 }
 0x90f   :  { %v6116_v36 = vsel %vm15850_vm0, %v6099_v4, %v8825_v43  ;;  %v6115_v21 = vsel %vm15858_vm3, %v6098_v0, %v8824_v1 }
 0x910   :  { %v8828_v61 = vpop.permute.xlu1 %8827 }
 0x911   :  { %v8830_v63 = vunpack.i.h.bf16 %v8828_v61  ;;  %v8829_v57 = vunpack.i.l.bf16 %v8828_v61 }
 0x913   :  { %v6130_v2 = vsel %vm15854_vm12, %v6113_v41, %v8829_v57  ;;  %v6131_v49 = vsel %vm15855_vm6, %v6114_v54, %v8830_v63  ;;  %vm6850_vm12 = vcmask 64512   ;;  %vm6375_vm6 = vcmask 7168  }
 0x914   :  { %v8833_v40 = vpop.permute.xlu0 %8832  ;;  %v6140_v34 = vpack.c.bf16 %v6131_v49, %v6130_v2 }
 0x915   :  { %v8835_v45 = vunpack.i.h.bf16 %v8833_v40  ;;  %v8834_v46 = vunpack.i.l.bf16 %v8833_v40 }
 0x916   :  { %8308 = vmatprep.mubr.bf16.mxu0 %v6140_v34 }
 0x917   :  { %v6132_v5 = vsel %vm15859_vm10, %v6115_v21, %v8834_v46  ;;  %v6133_v20 = vsel %vm15860_vm15, %v6116_v36, %v8835_v45 }
 0x918   :  { %v6141_v19 = vpack.c.bf16 %v6133_v20, %v6132_v5 }
 0x91a   :  { %8309 = vmatmul.mubr.bf16.gmra.mrb[92].mxu0 %v6141_v19 }
 0x984   :  { %v8298_v11 = vpop.f32.mrb[80].mxu0 }
 0x985   :  { %v6240_v9 = vpop.f32.mrb[81].mxu0 }
 0x986   :  { %6327 = vrot.lane.b32.xlu1 %v6240_v9, %s9813_s4  ;;  %v8299_v16 = vpop.f32.mrb[82].mxu0 }
 0x987   :  { %v6304_v47 = vpack.c.bf16 %v8299_v16, %v8298_v11  ;;  %v6243_v13 = vpop.f32.mrb[83].mxu0 }
 0x988   :  { %v6303_v23 = vpack.c.bf16 %v6243_v13, %v6240_v9  ;;  %6329 = vrot.lane.b32.xlu0 %v6243_v13, %s9813_s4 }
 0x989   :  { %v6855_v55 = vsel %vm6850_vm12, %v6304_v47, 1065369472 }
 0x98a   :  { %6331 = vrot.lane.b32.xlu1 %v8298_v11, %s9813_s4  ;;  %v6852_v39 = vsel %vm6850_vm12, %v6303_v23, 1065369472 }
 0x98b   :  { %8368 = vmatprep.subr.bf16.mxu0 %v6852_v39 }
 0x98c   :  { %6333 = vrot.lane.b32.xlu0 %v8299_v16, %s9813_s4  ;;  %8369 = vmatpush3.bf16.msra.mxu0 %v6852_v39 }
 0x98d   :  { %8370 = vmatprep.subr.bf16.mxu0 %v6855_v55 }
 0x990   :  { %8371 = vmatpush3.bf16.msra.mxu0 %v6855_v55 }
 0x99c   :  { %v8302_v37 = vpop.f32.mrb[84].mxu0 }
 0x99d   :  { %v6256_v25 = vpop.f32.mrb[85].mxu0 }
 0x99e   :  { %6335 = vrot.lane.b32.xlu1 %v6256_v25, %s9813_s4  ;;  %v8303_v62 = vpop.f32.mrb[86].mxu0 }
 0x99f   :  { %v6306_v30 = vpack.c.bf16 %v8303_v62, %v8302_v37  ;;  %v6259_v29 = vpop.f32.mrb[87].mxu0 }
 0x9a0   :  { %v6305_v7 = vpack.c.bf16 %v6259_v29, %v6256_v25  ;;  %6337 = vrot.lane.b32.xlu0 %v6259_v29, %s9813_s4 }
 0x9a1   :  { %v6861_v44 = vsel %vm6850_vm12, %v6306_v30, 1065369472 }
 0x9a2   :  { %6339 = vrot.lane.b32.xlu1 %v8302_v37, %s9813_s4  ;;  %v6858_v17 = vsel %vm6850_vm12, %v6305_v7, 1065369472 }
 0x9a3   :  { %8372 = vmatprep.subr.bf16.mxu0 %v6858_v17 }
 0x9a4   :  { %6341 = vrot.lane.b32.xlu0 %v8303_v62, %s9813_s4  ;;  %8373 = vmatpush3.bf16.msra.mxu0 %v6858_v17 }
 0x9a5   :  { %8374 = vmatprep.subr.bf16.mxu0 %v6861_v44 }
 0x9a8   :  { %8375 = vmatpush3.bf16.msra.mxu0 %v6861_v44 }
 0x9b6   :  { %v8306_v51 = vpop.f32.mrb[88].mxu0 }
 0x9b7   :  { %v6272_v24 = vpop.f32.mrb[89].mxu0 }
 0x9b8   :  { %6343 = vrot.lane.b32.xlu1 %v6272_v24, %s9813_s4  ;;  %v8307_v52 = vpop.f32.mrb[90].mxu0 }
 0x9b9   :  { %v6308_v33 = vpack.c.bf16 %v8307_v52, %v8306_v51  ;;  %v6275_v10 = vpop.f32.mrb[91].mxu0 }
 0x9ba   :  { %v6307_v28 = vpack.c.bf16 %v6275_v10, %v6272_v24  ;;  %6345 = vrot.lane.b32.xlu0 %v6275_v10, %s9813_s4 }
 0x9bb   :  { %v6867_v15 = vsel %vm6850_vm12, %v6308_v33, 1065369472 }
 0x9bc   :  { %6347 = vrot.lane.b32.xlu1 %v8306_v51, %s9813_s4  ;;  %v6864_v35 = vsel %vm6850_vm12, %v6307_v28, 1065369472 }
 0x9bd   :  { %8376 = vmatprep.subr.bf16.mxu0 %v6864_v35 }
 0x9be   :  { %6349 = vrot.lane.b32.xlu0 %v8307_v52, %s9813_s4  ;;  %8377 = vmatpush3.bf16.msra.mxu0 %v6864_v35 }
 0x9bf   :  { %8378 = vmatprep.subr.bf16.mxu0 %v6867_v15 }
 0x9c2   :  { %8379 = vmatpush3.bf16.msra.mxu0 %v6867_v15 }
 0x9ed   :  { %v8310_v26 = vpop.f32.mrb[92].mxu0 }
 0x9ee   :  { %v6288_v12 = vpop.f32.mrb[93].mxu0 }
 0x9ef   :  { %6351 = vrot.lane.b32.xlu1 %v6288_v12, %s9813_s4  ;;  %v8311_v38 = vpop.f32.mrb[94].mxu0 }
 0x9f0   :  { %v6310_v31 = vpack.c.bf16 %v8311_v38, %v8310_v26  ;;  %v6291_v42 = vpop.f32.mrb[95].mxu0 }
 0x9f1   :  { %v6309_v32 = vpack.c.bf16 %v6291_v42, %v6288_v12  ;;  %6353 = vrot.lane.b32.xlu0 %v6291_v42, %s9813_s4 }
 0x9f2   :  { %v6873_v60 = vsel %vm6850_vm12, %v6310_v31, 1065369472 }
 0x9f3   :  { %6355 = vrot.lane.b32.xlu1 %v8310_v26, %s9813_s4  ;;  %v6870_v59 = vsel %vm6850_vm12, %v6309_v32, 1065369472 }
 0x9f4   :  { %8380 = vmatprep.subr.bf16.mxu0 %v6870_v59 }
 0x9f5   :  { %6357 = vrot.lane.b32.xlu0 %v8311_v38, %s9813_s4  ;;  %8381 = vmatpush3.bf16.msra.mxu0 %v6870_v59 }
 0x9f6   :  { %8382 = vmatprep.subr.bf16.mxu0 %v6873_v60 }
 0x9f8   :  { %v6328_v50 = vpop.permute.xlu1 %6327 }
 0x9f9   :  { %v6376_v22 = vsel %vm6375_vm6, %v6328_v50, 1.0  ;;  %v6392_v14 = vsel %vm6375_vm6, 1.0, %v6328_v50  ;;  %8383 = vmatpush3.bf16.msra.mxu0 %v6873_v60 }
 0x9fa   :  { %8344 = vmatprep.mubr.msk.f32.mxu1 %vm6408_vm5, %v6376_v22  ;;  %v6330_v48 = vpop.permute.xlu0 %6329 }
 0x9fb   :  { %v6393_v3 = vsel %vm6375_vm6, 1.0, %v6330_v48  ;;  %v6377_v62 = vsel %vm6375_vm6, %v6330_v48, 1.0 }
 0x9fc   :  { %v8400_v61 = vpack.c.bf16 %v6393_v3, %v6392_v14  ;;  %v6332_v56 = vpop.permute.xlu1 %6331 }
 0x9fd   :  { %v6394_v63 = vsel %vm6375_vm6, 1.0, %v6332_v56  ;;  %v6378_v30 = vsel %vm6375_vm6, %v6332_v56, 1.0 }
 0x9fe   :  { %8402 = vmatprep.subr.msk.bf16.mxu1 %vm13924_vm7, %v8400_v61  ;;  %v6334_v58 = vpop.permute.xlu0 %6333 }
 0x9ff   :  { %v6395_v57 = vsel %vm6375_vm6, 1.0, %v6334_v58  ;;  %8405 = vmatpush3.bf16.xpose.msk.msra.mxu1 %vm13924_vm7, %v8400_v61  ;;  %v6379_v29 = vsel %vm6375_vm6, %v6334_v58, 1.0 }
 0xa00   :  { %v8406_v41 = vpack.c.bf16 %v6395_v57, %v6394_v63  ;;  %v15864_v63 = vld [vmem:[#allocation38_spill] sm:$0xff] }
 0xa01   :  { %vm15865_vm10 = vnez %v15864_v63 }
 0xa02   :  { %8408 = vmatprep.subr.msk.bf16.mxu1 %vm13924_vm7, %v8406_v41 }
 0xa07   :  { %8411 = vmatpush3.bf16.xpose.msk.msra.mxu1 %vm13924_vm7, %v8406_v41 }
 0xa10   :  { %v6336_v54 = vpop.permute.xlu1 %6335 }
 0xa11   :  { %v6396_v1 = vsel %vm6375_vm6, 1.0, %v6336_v54  ;;  %v6380_v7 = vsel %vm6375_vm6, %v6336_v54, 1.0 }
 0xa12   :  { %v6338_v43 = vpop.permute.xlu0 %6337 }
 0xa13   :  { %v6397_v18 = vsel %vm6375_vm6, 1.0, %v6338_v43  ;;  %v6381_v17 = vsel %vm6375_vm6, %v6338_v43, 1.0  ;;  %v15866_v43 = vld [vmem:[#allocation48_spill] sm:$0xff] }
 0xa14   :  { %v8412_v53 = vpack.c.bf16 %v6397_v18, %v6396_v1  ;;  %v6340_v2 = vpop.permute.xlu1 %6339 }
 0xa15   :  { %v6398_v27 = vsel %vm6375_vm6, 1.0, %v6340_v2  ;;  %v6382_v44 = vsel %vm6375_vm6, %v6340_v2, 1.0 }
 0xa16   :  { %8414 = vmatprep.subr.msk.bf16.mxu1 %vm13924_vm7, %v8412_v53  ;;  %v6342_v49 = vpop.permute.xlu0 %6341 }
 0xa17   :  { %v6399_v6 = vsel %vm6375_vm6, 1.0, %v6342_v49  ;;  %8417 = vmatpush3.bf16.xpose.msk.msra.mxu1 %vm13924_vm7, %v8412_v53  ;;  %v6383_v51 = vsel %vm6375_vm6, %v6342_v49, 1.0 }
 0xa18   :  { %v8418_v40 = vpack.c.bf16 %v6399_v6, %v6398_v27 }
 0xa1a   :  { %8420 = vmatprep.subr.msk.bf16.mxu1 %vm13924_vm7, %v8418_v40 }
 0xa1f   :  { %8423 = vmatpush3.bf16.xpose.msk.msra.mxu1 %vm13924_vm7, %v8418_v40  ;;  %v15868_v40 = vld [vmem:[#allocation43_spill] sm:$0xff] }
 0xa2a   :  { %v6344_v34 = vpop.permute.xlu1 %6343 }
 0xa2b   :  { %v6400_v0 = vsel %vm6375_vm6, 1.0, %v6344_v34  ;;  %v6384_v24 = vsel %vm6375_vm6, %v6344_v34, 1.0 }
 0xa2c   :  { %v6346_v4 = vpop.permute.xlu0 %6345 }
 0xa2d   :  { %v6401_v45 = vsel %vm6375_vm6, 1.0, %v6346_v4  ;;  %v6385_v52 = vsel %vm6375_vm6, %v6346_v4, 1.0 }
 0xa2e   :  { %v8424_v46 = vpack.c.bf16 %v6401_v45, %v6400_v0  ;;  %v6348_v36 = vpop.permute.xlu1 %6347  ;;  %v15870_v45 = vld [vmem:[#allocation59_spill] sm:$0xff] }
 0xa2f   :  { %v6402_v5 = vsel %vm6375_vm6, 1.0, %v6348_v36  ;;  %v6386_v33 = vsel %vm6375_vm6, %v6348_v36, 1.0 }
 0xa30   :  { %8426 = vmatprep.subr.msk.bf16.mxu1 %vm13924_vm7, %v8424_v46  ;;  %v6350_v21 = vpop.permute.xlu0 %6349 }
 0xa31   :  { %v6403_v20 = vsel %vm6375_vm6, 1.0, %v6350_v21  ;;  %8429 = vmatpush3.bf16.xpose.msk.msra.mxu1 %vm13924_vm7, %v8424_v46  ;;  %v6387_v10 = vsel %vm6375_vm6, %v6350_v21, 1.0 }
 0xa32   :  { %v8430_v19 = vpack.c.bf16 %v6403_v20, %v6402_v5 }
 0xa34   :  { %8432 = vmatprep.subr.msk.bf16.mxu1 %vm13924_vm7, %v8430_v19 }
 0xa39   :  { %8435 = vmatpush3.bf16.xpose.msk.msra.mxu1 %vm13924_vm7, %v8430_v19 }
 0xa61   :  { %v6352_v11 = vpop.permute.xlu1 %6351 }
 0xa62   :  { %v6404_v16 = vsel %vm6375_vm6, 1.0, %v6352_v11  ;;  %v6388_v28 = vsel %vm6375_vm6, %v6352_v11, 1.0 }
 0xa63   :  { %v6354_v9 = vpop.permute.xlu0 %6353 }
 0xa64   :  { %v6405_v47 = vsel %vm6375_vm6, 1.0, %v6354_v9  ;;  %v6389_v35 = vsel %vm6375_vm6, %v6354_v9, 1.0  ;;  %v15872_v9 = vld [vmem:[#allocation54_spill] sm:$0xff] }
 0xa65   :  { %v8436_v13 = vpack.c.bf16 %v6405_v47, %v6404_v16  ;;  %v6356_v23 = vpop.permute.xlu1 %6355 }
 0xa66   :  { %v6406_v55 = vsel %vm6375_vm6, 1.0, %v6356_v23  ;;  %v6390_v15 = vsel %vm6375_vm6, %v6356_v23, 1.0  ;;  %v15874_v23 = vld [vmem:[#allocation70_spill] sm:$0xff] }
 0xa67   :  { %8438 = vmatprep.subr.msk.bf16.mxu1 %vm13924_vm7, %v8436_v13  ;;  %v6358_v39 = vpop.permute.xlu0 %6357 }
 0xa68   :  { %v6407_v37 = vsel %vm6375_vm6, 1.0, %v6358_v39  ;;  %8441 = vmatpush3.bf16.xpose.msk.msra.mxu1 %vm13924_vm7, %v8436_v13  ;;  %v6391_v26 = vsel %vm6375_vm6, %v6358_v39, 1.0 }
 0xa69   :  { %v8442_v25 = vpack.c.bf16 %v6407_v37, %v6406_v55 }
 0xa6b   :  { %8444 = vmatprep.subr.msk.bf16.mxu1 %vm13924_vm7, %v8442_v25 }
 0xa70   :  { %8447 = vmatpush3.bf16.xpose.msk.msra.mxu1 %vm13924_vm7, %v8442_v25  ;;  %vm15871_vm7 = vnez %v15870_v45 }
 0xa77   :  { %8345 = vmatmul.mubr.msk.f32.vlgmr.msra.gmra.mrb[80].mxu1 %vm6408_vm5, %v6377_v62 }
 0xa78   :  { %8347 = vmatprep.mubr.msk.f32.mxu1 %vm6408_vm5, %v6378_v30 }
 0xa7b   :  { %8348 = vmatmul.mubr.msk.f32.gmra.mrb[82].mxu1 %vm6408_vm5, %v6379_v29 }
 0xa7c   :  { %8350 = vmatprep.mubr.msk.f32.mxu1 %vm6408_vm5, %v6380_v7  ;;  %v15876_v7 = vld [vmem:[#allocation78_spill] sm:$0xff] }
 0xa7f   :  { %8351 = vmatmul.mubr.msk.f32.gmra.mrb[84].mxu1 %vm6408_vm5, %v6381_v17 }
 0xa80   :  { %8353 = vmatprep.mubr.msk.f32.mxu1 %vm6408_vm5, %v6382_v44 }
 0xa83   :  { %8354 = vmatmul.mubr.msk.f32.gmra.mrb[86].mxu1 %vm6408_vm5, %v6383_v51 }
 0xa84   :  { %8356 = vmatprep.mubr.msk.f32.mxu1 %vm6408_vm5, %v6384_v24 }
 0xa87   :  { %8357 = vmatmul.mubr.msk.f32.gmra.mrb[88].mxu1 %vm6408_vm5, %v6385_v52 }
 0xa88   :  { %8359 = vmatprep.mubr.msk.f32.mxu1 %vm6408_vm5, %v6386_v33 }
 0xa8b   :  { %8360 = vmatmul.mubr.msk.f32.gmra.mrb[90].mxu1 %vm6408_vm5, %v6387_v10 }
 0xa8c   :  { %8362 = vmatprep.mubr.msk.f32.mxu1 %vm6408_vm5, %v6388_v28 }
 0xa8f   :  { %8363 = vmatmul.mubr.msk.f32.gmra.mrb[92].mxu1 %vm6408_vm5, %v6389_v35 }
 0xa90   :  { %8365 = vmatprep.mubr.msk.f32.mxu1 %vm6408_vm5, %v6390_v15 }
 0xa93   :  { %8366 = vmatmul.mubr.msk.f32.gmra.mrb[94].mxu1 %vm6408_vm5, %v6391_v26  ;;  %vm15869_vm5 = vnez %v15868_v40  ;;  %v15886_v40 = vld [vmem:[#allocation91_spill] sm:$0xff] }
 0xb4a   :  { %v8346_v12 = vpop.f32.mrb[80].mxu1 }
 0xb4b   :  { %vm6651_vm1 = vcmp.gt.f32.partialorder %v8346_v12, 0.0  ;;  %v6667_v38 = vsub.f32 0.0, %v8346_v12  ;;  %v6683_v31 = vmul.f32 -0.2, %v8346_v12  ;;  %v6571_v42 = vpop.f32.mrb[81].mxu1  ;;  %v15879_v12 = vld [vmem:[#allocation84_spill] sm:$0xff] }
 0xb4c   :  { %vm6650_vm2 = vcmp.gt.f32.partialorder %v6571_v42, 0.0  ;;  %v6666_v32 = vsub.f32 0.0, %v6571_v42  ;;  %v6682_v59 = vmul.f32 -0.2, %v6571_v42 }
 0xb4d   :  { %v14004_v50 = vsel %vm6651_vm1, %v6667_v38, %v6683_v31 }
 0xb4e   :  { %v8349_v22 = vpop.f32.mrb[82].mxu1  ;;  %v6715_v48 = vsel %vm15385_vm14, %v14004_v50, -1e+30  ;;  %v14009_v14 = vsel %vm6650_vm2, %v6666_v32, %v6682_v59  ;;  %vm15867_vm14 = vnez %v15866_v43  ;;  %v15881_v32 = vld [vmem:[#allocation94_spill] sm:$0xff] }
 0xb4f   :  { %vm6653_vm0 = vcmp.gt.f32.partialorder %v8349_v22, 0.0  ;;  %v6669_v3 = vsub.f32 0.0, %v8349_v22  ;;  %v6685_v8 = vmul.f32 -0.2, %v8349_v22  ;;  %6732 = vmax.xlane.f32.xlu0 %v6715_v48  ;;  %v6581_v61 = vpop.f32.mrb[83].mxu1 }
 0xb50   :  { %vm6652_vm3 = vcmp.gt.f32.partialorder %v6581_v61, 0.0  ;;  %v6668_v56 = vsub.f32 0.0, %v6581_v61  ;;  %v6684_v58 = vmul.f32 -0.2, %v6581_v61  ;;  %v6714_v57 = vsel %vm15865_vm10, %v14009_v14, -1e+30 }
 0xb51   :  { %6730 = vmax.xlane.f32.xlu1 %v6714_v57  ;;  %v14014_v41 = vsel %vm6653_vm0, %v6669_v3, %v6685_v8  ;;  %vm15873_vm0 = vnez %v15872_v9 }
 0xb52   :  { %v8352_v54 = vpop.f32.mrb[84].mxu1  ;;  %v6717_v1 = vsel %vm15867_vm14, %v14014_v41, -1e+30  ;;  %v14019_v18 = vsel %vm6652_vm3, %v6668_v56, %v6684_v58  ;;  %vm15875_vm3 = vnez %v15874_v23  ;;  %v15883_v56 = vld [vmem:[#allocation89_spill] sm:$0xff] }
 0xb53   :  { %vm6655_vm15 = vcmp.gt.f32.partialorder %v8352_v54, 0.0  ;;  %v6671_v53 = vsub.f32 0.0, %v8352_v54  ;;  %v6687_v2 = vmul.f32 -0.2, %v8352_v54  ;;  %v6591_v49 = vpop.f32.mrb[85].mxu1 }
 0xb54   :  { %vm6654_vm6 = vcmp.gt.f32.partialorder %v6591_v49, 0.0  ;;  %v6670_v27 = vsub.f32 0.0, %v6591_v49  ;;  %v6686_v6 = vmul.f32 -0.2, %v6591_v49  ;;  %v6716_v34 = vsel %vm15869_vm5, %v14019_v18, -1e+30 }
 0xb55   :  { %6736 = vmax.xlane.f32.xlu1 %v6717_v1  ;;  %6734 = vmax.xlane.f32.xlu0 %v6716_v34  ;;  %v14024_v4 = vsel %vm6655_vm15, %v6671_v53, %v6687_v2  ;;  %vm15877_vm15 = vnez %v15876_v7 }
 0xb56   :  { %v8355_v0 = vpop.f32.mrb[86].mxu1  ;;  %v6719_v46 = vsel %vm15871_vm7, %v14024_v4, -1e+30  ;;  %v14029_v36 = vsel %vm6654_vm6, %v6670_v27, %v6686_v6  ;;  %vm15880_vm7 = vnez %v15879_v12 }
 0xb57   :  { %vm6657_vm1 = vcmp.gt.f32.partialorder %v8355_v0, 0.0  ;;  %v6673_v21 = vsub.f32 0.0, %v8355_v0  ;;  %v6689_v5 = vmul.f32 -0.2, %v8355_v0  ;;  %v6601_v20 = vpop.f32.mrb[87].mxu1 }
 0xb58   :  { %vm6656_vm2 = vcmp.gt.f32.partialorder %v6601_v20, 0.0  ;;  %v6672_v19 = vsub.f32 0.0, %v6601_v20  ;;  %v6688_v11 = vmul.f32 -0.2, %v6601_v20  ;;  %v6718_v16 = vsel %vm15873_vm0, %v14029_v36, -1e+30 }
 0xb59   :  { %6740 = vmax.xlane.f32.xlu1 %v6719_v46  ;;  %6738 = vmax.xlane.f32.xlu0 %v6718_v16  ;;  %v14034_v47 = vsel %vm6657_vm1, %v6673_v21, %v6689_v5  ;;  %vm15884_vm0 = vnez %v15883_v56  ;;  %v15889_v5 = vld [vmem:[#allocation92_spill] sm:$0xff] }
 0xb5a   :  { %v8358_v13 = vpop.f32.mrb[88].mxu1  ;;  %v6721_v39 = vsel %vm15875_vm3, %v14034_v47, -1e+30  ;;  %v14039_v55 = vsel %vm6656_vm2, %v6672_v19, %v6688_v11 }
 0xb5b   :  { %vm6659_vm10 = vcmp.gt.f32.partialorder %v8358_v13, 0.0  ;;  %v6675_v37 = vsub.f32 0.0, %v8358_v13  ;;  %v6691_v25 = vmul.f32 -0.2, %v8358_v13  ;;  %v6611_v62 = vpop.f32.mrb[89].mxu1 }
 0xb5c   :  { %vm6658_vm14 = vcmp.gt.f32.partialorder %v6611_v62, 0.0  ;;  %v6674_v30 = vsub.f32 0.0, %v6611_v62  ;;  %v6690_v29 = vmul.f32 -0.2, %v6611_v62  ;;  %v6720_v17 = vsel %vm15877_vm15, %v14039_v55, -1e+30 }
 0xb5d   :  { %6744 = vmax.xlane.f32.xlu1 %v6721_v39  ;;  %6742 = vmax.xlane.f32.xlu0 %v6720_v17  ;;  %v14044_v44 = vsel %vm6659_vm10, %v6675_v37, %v6691_v25 }
 0xb5e   :  { %v8361_v51 = vpop.f32.mrb[90].mxu1  ;;  %v6723_v52 = vsel %vm15433_vm9, %v14044_v44, -1e+30  ;;  %v14049_v33 = vsel %vm6658_vm14, %v6674_v30, %v6690_v29  ;;  %vm15882_vm9 = vnez %v15881_v32  ;;  %vm15887_vm14 = vnez %v15886_v40 }
 0xb5f   :  { %vm6661_vm6 = vcmp.gt.f32.partialorder %v8361_v51, 0.0  ;;  %v6677_v10 = vsub.f32 0.0, %v8361_v51  ;;  %v6693_v28 = vmul.f32 -0.2, %v8361_v51  ;;  %v6621_v35 = vpop.f32.mrb[91].mxu1 }
 0xb60   :  { %vm6660_vm5 = vcmp.gt.f32.partialorder %v6621_v35, 0.0  ;;  %v6676_v15 = vsub.f32 0.0, %v6621_v35  ;;  %v6692_v26 = vmul.f32 -0.2, %v6621_v35  ;;  %v6722_v38 = vsel %vm15880_vm7, %v14049_v33, -1e+30 }
 0xb61   :  { %6748 = vmax.xlane.f32.xlu1 %v6723_v52  ;;  %6746 = vmax.xlane.f32.xlu0 %v6722_v38  ;;  %v14054_v31 = vsel %vm6661_vm6, %v6677_v10, %v6693_v28 }
 0xb62   :  { %v8364_v42 = vpop.f32.mrb[92].mxu1  ;;  %v6725_v59 = vsel %vm15882_vm9, %v14054_v31, -1e+30  ;;  %v14059_v22 = vsel %vm6660_vm5, %v6676_v15, %v6692_v26 }
 0xb63   :  { %vm6663_vm1 = vcmp.gt.f32.partialorder %v8364_v42, 0.0  ;;  %v6679_v60 = vsub.f32 0.0, %v8364_v42  ;;  %v6695_v48 = vmul.f32 -0.2, %v8364_v42  ;;  %v6631_v3 = vpop.f32.mrb[93].mxu1 }
 0xb64   :  { %vm6662_vm2 = vcmp.gt.f32.partialorder %v6631_v3, 0.0  ;;  %v6678_v8 = vsub.f32 0.0, %v6631_v3  ;;  %v6694_v61 = vmul.f32 -0.2, %v6631_v3  ;;  %v6724_v58 = vsel %vm15884_vm0, %v14059_v22, -1e+30 }
 0xb65   :  { %6752 = vmax.xlane.f32.xlu1 %v6725_v59  ;;  %6750 = vmax.xlane.f32.xlu0 %v6724_v58  ;;  %v14064_v63 = vsel %vm6663_vm1, %v6679_v60, %v6695_v48 }
 0xb66   :  { %v8367_v57 = vpop.f32.mrb[94].mxu1  ;;  %v6727_v43 = vsel %vm15463_vm11, %v14064_v63, -1e+30  ;;  %v14069_v1 = vsel %vm6662_vm2, %v6678_v8, %v6694_v61  ;;  %vm15890_vm11 = vnez %v15889_v5 }
 0xb67   :  { %vm6665_vm3 = vcmp.gt.f32.partialorder %v8367_v57, 0.0  ;;  %v6681_v53 = vsub.f32 0.0, %v8367_v57  ;;  %v6697_v2 = vmul.f32 -0.2, %v8367_v57  ;;  %v6641_v49 = vpop.f32.mrb[95].mxu1 }
 0xb68   :  { %vm6664_vm10 = vcmp.gt.f32.partialorder %v6641_v49, 0.0  ;;  %v6680_v27 = vsub.f32 0.0, %v6641_v49  ;;  %v6696_v6 = vmul.f32 -0.2, %v6641_v49  ;;  %v6726_v34 = vsel %vm15887_vm14, %v14069_v1, -1e+30 }
 0xb69   :  { %6756 = vmax.xlane.f32.xlu1 %v6727_v43  ;;  %6754 = vmax.xlane.f32.xlu0 %v6726_v34  ;;  %v14074_v0 = vsel %vm6665_vm3, %v6681_v53, %v6697_v2 }
 0xb6a   :  { %v6729_v46 = vsel %vm15467_vm13, %v14074_v0, -1e+30  ;;  %v14079_v21 = vsel %vm6664_vm10, %v6680_v27, %v6696_v6 }
 0xb6b   :  { %v6728_v20 = vsel %vm15890_vm11, %v14079_v21, -1e+30 }
 0xb6d   :  { %6760 = vmax.xlane.f32.xlu1 %v6729_v46  ;;  %6758 = vmax.xlane.f32.xlu0 %v6728_v20 }
 0xbdc   :  { %v6733_v19 = vpop.xlane.xlu0 %6732 }
 0xbdd   :  { %v6763_v11 = vsub.f32 %v14004_v50, %v6733_v19 }
 0xbde   :  { %v6731_v9 = vpop.xlane.xlu1 %6730 }
 0xbdf   :  { %v6779_v16 = vmin.f32 %v6763_v11, 0.0  ;;  %v6762_v13 = vsub.f32 %v14009_v14, %v6731_v9 }
 0xbe1   :  { %v6796_v23 = vmul.f32 1.442695, %v6779_v16  ;;  %v6778_v39 = vmin.f32 %v6762_v13, 0.0 }
 0xbe2   :  { %v6737_v37 = vpop.xlane.xlu1 %6736  ;;  %v6735_v25 = vpop.xlane.xlu0 %6734 }
 0xbe3   :  { %9634 = vpow2.f32 %v6796_v23  ;;  %v6794_v62 = vmul.f32 1.442695, %v6778_v39  ;;  %v6765_v30 = vsub.f32 %v14014_v41, %v6737_v37  ;;  %v6764_v29 = vsub.f32 %v14019_v18, %v6735_v25 }
 0xbe5   :  { %9636 = vpow2.f32 %v6794_v62  ;;  %v6781_v7 = vmin.f32 %v6765_v30, 0.0  ;;  %v6780_v17 = vmin.f32 %v6764_v29, 0.0  ;;  %v15893_v29 = vld [vmem:[#allocation34_spill] sm:$0xff] }
 0xbe6   :  { %v6741_v51 = vpop.xlane.xlu1 %6740  ;;  %v6739_v24 = vpop.xlane.xlu0 %6738  ;;  %vm15894_vm13 = vnez %v15893_v29 }
 0xbe7   :  { %v6800_v50 = vmul.f32 1.442695, %v6781_v7  ;;  %v6798_v52 = vmul.f32 1.442695, %v6780_v17  ;;  %v6767_v10 = vsub.f32 %v14024_v4, %v6741_v51  ;;  %v6766_v14 = vsub.f32 %v14029_v36, %v6739_v24 }
 0xbe9   :  { %9638 = vpow2.f32 %v6800_v50  ;;  %v6783_v28 = vmin.f32 %v6767_v10, 0.0  ;;  %v6782_v35 = vmin.f32 %v6766_v14, 0.0  ;;  %v15895_v10 = vld [vmem:[#allocation31_spill] sm:$0xff] }
 0xbea   :  { %9640 = vpow2.f32 %v6798_v52  ;;  %v6745_v15 = vpop.xlane.xlu1 %6744  ;;  %v6743_v26 = vpop.xlane.xlu0 %6742 }
 0xbeb   :  { %v6804_v41 = vmul.f32 1.442695, %v6783_v28  ;;  %v6802_v12 = vmul.f32 1.442695, %v6782_v35  ;;  %v6769_v18 = vsub.f32 %v14034_v47, %v6745_v15  ;;  %v6768_v38 = vsub.f32 %v14039_v55, %v6743_v26  ;;  %v15897_v28 = vld [vmem:[#allocation52_spill] sm:$0xff] }
 0xbed   :  { %v9635_v42 = vpop.eup %9634  ;;  %9642 = vpow2.f32 %v6804_v41  ;;  %v6785_v32 = vmin.f32 %v6769_v18, 0.0  ;;  %v6784_v59 = vmin.f32 %v6768_v38, 0.0  ;;  %v15899_v41 = vld [vmem:[#allocation106_spill] sm:$0xff] }
 0xbee   :  { %9644 = vpow2.f32 %v6802_v12  ;;  %v6749_v4 = vpop.xlane.xlu1 %6748  ;;  %v6747_v60 = vpop.xlane.xlu0 %6746  ;;  %vm15900_vm15 = vnez %v15899_v41 }
 0xbef   :  { %v9637_v36 = vpop.eup %9636  ;;  %v6808_v48 = vmul.f32 1.442695, %v6785_v32  ;;  %v6806_v3 = vmul.f32 1.442695, %v6784_v59  ;;  %v6771_v8 = vsub.f32 %v14044_v44, %v6749_v4  ;;  %v6770_v61 = vsub.f32 %v14049_v33, %v6747_v60  ;;  %v15903_v4 = vld [vmem:[#allocation47_spill] sm:$0xff] }
 0xbf0   :  { %v7793_v56 = vpack.c.bf16 %v9635_v42, %v9637_v36  ;;  %v15901_v42 = vld [vmem:[#allocation73_spill] sm:$0xff]  ;;  %vm15904_vm5 = vnez %v15903_v4  ;;  %v9814_v60 = vmov 8  }
 0xbf1   :  { %9646 = vpow2.f32 %v6808_v48  ;;  %v6787_v58 = vmin.f32 %v6771_v8, 0.0  ;;  %v6786_v47 = vmin.f32 %v6770_v61, 0.0  ;;  %vm15902_vm6 = vnez %v15901_v42  ;;  %8836 = vset.pattern.permute.xlu1 %v9814_v60  ;;  %8837 = vset.pattern.permute.xlu0 %v9814_v60 }
 0xbf2   :  { %9648 = vpow2.f32 %v6806_v3  ;;  %8384 = vmatprep.mubr.msk.bf16.mxu0 %vm15457_vm4, %v7793_v56  ;;  %v6753_v57 = vpop.xlane.xlu1 %6752  ;;  %v6751_v54 = vpop.xlane.xlu0 %6750  ;;  %vm15898_vm4 = vnez %v15897_v28 }
 0xbf3   :  { %v9639_v43 = vpop.eup %9638  ;;  %v6812_v53 = vmul.f32 1.442695, %v6787_v58  ;;  %v6810_v2 = vmul.f32 1.442695, %v6786_v47  ;;  %v6773_v49 = vsub.f32 %v14054_v31, %v6753_v57  ;;  %v6772_v27 = vsub.f32 %v14059_v22, %v6751_v54 }
 0xbf4   :  { %v9641_v44 = vpop.eup %9640 }
 0xbf5   :  { %v7796_v6 = vpack.c.bf16 %v9639_v43, %v9641_v44  ;;  %9650 = vpow2.f32 %v6812_v53  ;;  %v6789_v33 = vmin.f32 %v6773_v49, 0.0  ;;  %v6788_v40 = vmin.f32 %v6772_v27, 0.0 }
 0xbf6   :  { %9652 = vpow2.f32 %v6810_v2  ;;  %v6757_v34 = vpop.xlane.xlu1 %6756  ;;  %v6755_v45 = vpop.xlane.xlu0 %6754 }
 0xbf7   :  { %v9643_v46 = vpop.eup %9642  ;;  %v6816_v5 = vmul.f32 1.442695, %v6789_v33  ;;  %v6814_v20 = vmul.f32 1.442695, %v6788_v40  ;;  %v6775_v19 = vsub.f32 %v14064_v63, %v6757_v34  ;;  %v6774_v11 = vsub.f32 %v14069_v1, %v6755_v45  ;;  %8385 = vmatmul.mubr.msk.bf16.vlgmr.msra.gmra.mrb[96].mxu0 %vm15090_vm8, %v7796_v6 }
 0xbf8   :  { %v9645_v31 = vpop.eup %9644  ;;  %vm15896_vm8 = vnez %v15895_v10 }
 0xbf9   :  { %9654 = vpow2.f32 %v6816_v5  ;;  %v6791_v22 = vmin.f32 %v6775_v19, 0.0  ;;  %v6790_v16 = vmin.f32 %v6774_v11, 0.0  ;;  %v7799_v13 = vpack.c.bf16 %v9643_v46, %v9645_v31 }
 0xbfa   :  { %9656 = vpow2.f32 %v6814_v20  ;;  %v6761_v23 = vpop.xlane.xlu1 %6760  ;;  %v6759_v39 = vpop.xlane.xlu0 %6758 }
 0xbfb   :  { %v9647_v37 = vpop.eup %9646  ;;  %v6820_v25 = vmul.f32 1.442695, %v6791_v22  ;;  %v6818_v62 = vmul.f32 1.442695, %v6790_v16  ;;  %v6777_v30 = vsub.f32 %v14074_v0, %v6761_v23  ;;  %v6776_v63 = vsub.f32 %v14079_v21, %v6759_v39  ;;  %8388 = vmatprep.mubr.msk.bf16.mxu0 %vm15894_vm13, %v7799_v13 }
 0xbfc   :  { %v9649_v1 = vpop.eup %9648 }
 0xbfd   :  { %9658 = vpow2.f32 %v6820_v25  ;;  %v6793_v7 = vmin.f32 %v6777_v30, 0.0  ;;  %v6792_v17 = vmin.f32 %v6776_v63, 0.0  ;;  %v7802_v51 = vpack.c.bf16 %v9647_v37, %v9649_v1 }
 0xbfe   :  { %9660 = vpow2.f32 %v6818_v62 }
 0xbff   :  { %v9651_v24 = vpop.eup %9650  ;;  %v6824_v50 = vmul.f32 1.442695, %v6793_v7  ;;  %v6822_v52 = vmul.f32 1.442695, %v6792_v17  ;;  %8389 = vmatmul.mubr.msk.bf16.gmra.mrb[100].mxu0 %vm15896_vm8, %v7802_v51 }
 0xc00   :  { %v9653_v14 = vpop.eup %9652 }
 0xc01   :  { %9662 = vpow2.f32 %v6824_v50  ;;  %v7805_v0 = vpack.c.bf16 %v9651_v24, %v9653_v14 }
 0xc02   :  { %9664 = vpow2.f32 %v6822_v52 }
 0xc03   :  { %v9655_v21 = vpop.eup %9654  ;;  %8392 = vmatprep.mubr.msk.bf16.mxu0 %vm15898_vm4, %v7805_v0 }
 0xc04   :  { %v9657_v35 = vpop.eup %9656 }
 0xc05   :  { %v7808_v15 = vpack.c.bf16 %v9655_v21, %v9657_v35 }
 0xc07   :  { %v9659_v26 = vpop.eup %9658  ;;  %8393 = vmatmul.mubr.msk.bf16.gmra.mrb[104].mxu0 %vm15900_vm15, %v7808_v15 }
 0xc08   :  { %v9661_v12 = vpop.eup %9660 }
 0xc09   :  { %v7811_v18 = vpack.c.bf16 %v9659_v26, %v9661_v12 }
 0xc0b   :  { %v9663_v38 = vpop.eup %9662  ;;  %8396 = vmatprep.mubr.msk.bf16.mxu0 %vm15902_vm6, %v7811_v18 }
 0xc0c   :  { %v9665_v32 = vpop.eup %9664 }
 0xc0d   :  { %v7814_v59 = vpack.c.bf16 %v9663_v38, %v9665_v32 }
 0xc0f   :  { %8397 = vmatmul.mubr.msk.bf16.gmra.mrb[108].mxu0 %vm15904_vm5, %v7814_v59 }
 0xcca   :  { %v14116_v36 = vpop.f32.mrb[96].mxu0 }
 0xccb   :  { %v6974_v48 = vmax.f32 %v14116_v36, 1e-30  ;;  %v14119_v3 = vpop.f32.mrb[97].mxu0 }
 0xccc   :  { %v6972_v8 = vmax.f32 %v14119_v3, 1e-30  ;;  %v14122_v61 = vpop.f32.mrb[98].mxu0 }
 0xccd   :  { %9666 = vrcp.f32 %v6974_v48  ;;  %v6975_v56 = vmax.f32 %v14122_v61, 1e-30  ;;  %v14125_v58 = vpop.f32.mrb[99].mxu0 }
 0xcce   :  { %9668 = vrcp.f32 %v6972_v8  ;;  %v6973_v47 = vmax.f32 %v14125_v58, 1e-30 }
 0xccf   :  { %9670 = vrcp.f32 %v6975_v56 }
 0xcd0   :  { %9672 = vrcp.f32 %v6973_v47 }
 0xcd2   :  { %v14128_v55 = vpop.f32.mrb[100].mxu0 }
 0xcd3   :  { %v14130_v57 = vpop.f32.mrb[101].mxu0  ;;  %v6978_v43 = vmax.f32 %v14128_v55, 1e-30 }
 0xcd4   :  { %v14132_v54 = vpop.f32.mrb[102].mxu0  ;;  %v6976_v27 = vmax.f32 %v14130_v57, 1e-30 }
 0xcd5   :  { %v14135_v53 = vpop.f32.mrb[103].mxu0  ;;  %9674 = vrcp.f32 %v6978_v43  ;;  %v6979_v34 = vmax.f32 %v14132_v54, 1e-30 }
 0xcd6   :  { %9676 = vrcp.f32 %v6976_v27  ;;  %v6977_v19 = vmax.f32 %v14135_v53, 1e-30 }
 0xcd7   :  { %v9667_v2 = vpop.eup %9666 }
 0xcd8   :  { %v9669_v49 = vpop.eup %9668  ;;  %7016 = vperm.xlu1 %8836, %v9667_v2  }
 0xcd9   :  { %7006 = vperm.xlu0 %8837, %v9669_v49   ;;  %v9671_v6 = vpop.eup %9670 }
 0xcda   :  { %v14138_v44 = vpop.f32.mrb[104].mxu0  ;;  %v9673_v20 = vpop.eup %9672 }
 0xcdb   :  { %v6982_v33 = vmax.f32 %v14138_v44, 1e-30  ;;  %v14141_v40 = vpop.f32.mrb[105].mxu0 }
 0xcdc   :  { %7021 = vperm.xlu1 %8836, %v9671_v6   ;;  %v14144_v45 = vpop.f32.mrb[106].mxu0  ;;  %v6980_v46 = vmax.f32 %v14141_v40, 1e-30 }
 0xcdd   :  { %9678 = vrcp.f32 %v6982_v33  ;;  %v14147_v5 = vpop.f32.mrb[107].mxu0  ;;  %v6983_v13 = vmax.f32 %v14144_v45, 1e-30 }
 0xcde   :  { %9680 = vrcp.f32 %v6979_v34  ;;  %v6981_v62 = vmax.f32 %v14147_v5, 1e-30 }
 0xcdf   :  { %9682 = vrcp.f32 %v6980_v46  ;;  %v9675_v9 = vpop.eup %9674 }
 0xce0   :  { %7011 = vperm.xlu1 %8836, %v9673_v20   ;;  %9684 = vrcp.f32 %v6977_v19  ;;  %v9677_v39 = vpop.eup %9676 }
 0xce2   :  { %v14150_v11 = vpop.f32.mrb[108].mxu0 }
 0xce3   :  { %v14152_v31 = vpop.f32.mrb[109].mxu0  ;;  %v6986_v37 = vmax.f32 %v14150_v11, 1e-30 }
 0xce4   :  { %v6984_v22 = vmax.f32 %v14152_v31, 1e-30  ;;  %7036 = vperm.xlu1 %8836, %v9675_v9   ;;  %v14155_v16 = vpop.f32.mrb[110].mxu0 }
 0xce5   :  { %v14158_v23 = vpop.f32.mrb[111].mxu0  ;;  %v6987_v17 = vmax.f32 %v14155_v16, 1e-30 }
 0xce6   :  { %9686 = vrcp.f32 %v6984_v22  ;;  %v6985_v29 = vmax.f32 %v14158_v23, 1e-30 }
 0xce7   :  { %v9679_v25 = vpop.eup %9678  ;;  %9688 = vrcp.f32 %v6983_v13 }
 0xce8   :  { %7026 = vperm.xlu1 %8836, %v9677_v39   ;;  %7056 = vperm.xlu0 %8837, %v9679_v25   ;;  %v9681_v30 = vpop.eup %9680  ;;  %9690 = vrcp.f32 %v6986_v37 }
 0xce9   :  { %v9683_v63 = vpop.eup %9682  ;;  %9692 = vrcp.f32 %v6981_v62 }
 0xcea   :  { %v9685_v1 = vpop.eup %9684  ;;  %9694 = vrcp.f32 %v6985_v29 }
 0xceb   :  { %9696 = vrcp.f32 %v6987_v17 }
 0xcec   :  { %7041 = vperm.xlu1 %8836, %v9681_v30   ;;  %7046 = vperm.xlu0 %8837, %v9683_v63  }
 0xcf0   :  { %v9687_v7 = vpop.eup %9686  ;;  %7031 = vperm.xlu1 %8836, %v9685_v1  }
 0xcf1   :  { %7066 = vperm.xlu0 %8837, %v9687_v7   ;;  %v9689_v51 = vpop.eup %9688 }
 0xcf2   :  { %v9691_v24 = vpop.eup %9690 }
 0xcf3   :  { %v9693_v50 = vpop.eup %9692 }
 0xcf4   :  { %7061 = vperm.xlu1 %8836, %v9689_v51   ;;  %v9695_v52 = vpop.eup %9694 }
 0xcf5   :  { %7076 = vperm.xlu0 %8837, %v9691_v24   ;;  %v9697_v10 = vpop.eup %9696 }
 0xcf8   :  { %7051 = vperm.xlu1 %8836, %v9693_v50  }
 0xcfc   :  { %7071 = vperm.xlu1 %8836, %v9695_v52  }
 0xd00   :  { %7081 = vperm.xlu1 %8836, %v9697_v10  }
 0xd57   :  { %v7017_v14 = vpop.permute.xlu1 %7016 }
 0xd58   :  { %v7086_v0 = vmul.f32 %v14116_v36, %v7017_v14  ;;  %v7007_v21 = vpop.permute.xlu0 %7006 }
 0xd59   :  { %v7084_v28 = vmul.f32 %v7007_v21, %v14119_v3 }
 0xd5a   :  { %v7118_v35 = vmin.f32 %v7086_v0, 0.0  ;;  %vm7102_vm7 = vcmp.gt.f32.partialorder %v7086_v0, 0.0 }
 0xd5b   :  { %v7116_v15 = vmin.f32 %v7084_v28, 0.0  ;;  %v7022_v26 = vpop.permute.xlu1 %7021  ;;  %vm7100_vm9 = vcmp.gt.f32.partialorder %v7084_v28, 0.0 }
 0xd5c   :  { %v7136_v41 = vmul.f32 1.442695, %v7118_v35  ;;  %v7087_v12 = vmul.f32 %v14122_v61, %v7022_v26 }
 0xd5d   :  { %v7132_v18 = vmul.f32 1.442695, %v7116_v15 }
 0xd5e   :  { %9698 = vpow2.f32 %v7136_v41  ;;  %v7119_v38 = vmin.f32 %v7087_v12, 0.0  ;;  %vm7103_vm1 = vcmp.gt.f32.partialorder %v7087_v12, 0.0 }
 0xd5f   :  { %9700 = vpow2.f32 %v7132_v18  ;;  %v7012_v42 = vpop.permute.xlu1 %7011 }
 0xd60   :  { %v7138_v32 = vmul.f32 1.442695, %v7119_v38  ;;  %v7085_v59 = vmul.f32 %v7012_v42, %v14125_v58 }
 0xd62   :  { %9702 = vpow2.f32 %v7138_v32  ;;  %v7117_v4 = vmin.f32 %v7085_v59, 0.0  ;;  %vm7101_vm2 = vcmp.gt.f32.partialorder %v7085_v59, 0.0 }
 0xd63   :  { %v7037_v60 = vpop.permute.xlu1 %7036 }
 0xd64   :  { %v7134_v36 = vmul.f32 1.442695, %v7117_v4  ;;  %v14169_v48 = vmul.f32 %v14128_v55, %v7037_v60 }
 0xd66   :  { %9704 = vpow2.f32 %v7134_v36  ;;  %v7122_v3 = vmin.f32 %v14169_v48, 0.0  ;;  %vm7106_vm0 = vcmp.gt.f32.partialorder %v14169_v48, 0.0 }
 0xd67   :  { %v7027_v8 = vpop.permute.xlu1 %7026  ;;  %v7057_v61 = vpop.permute.xlu0 %7056 }
 0xd68   :  { %v9699_v56 = vpop.eup %9698  ;;  %v7144_v47 = vmul.f32 1.442695, %v7122_v3  ;;  %v14173_v43 = vmul.f32 %v7027_v8, %v14130_v57  ;;  %v14176_v2 = vmul.f32 %v14138_v44, %v7057_v61 }
 0xd69   :  { %v9701_v58 = vpop.eup %9700  ;;  %v7818_v49 = vadd.f32 -1.0, %v9699_v56 }
 0xd6a   :  { %9706 = vpow2.f32 %v7144_v47  ;;  %v7120_v55 = vmin.f32 %v14173_v43, 0.0  ;;  %v7126_v27 = vmin.f32 %v14176_v2, 0.0  ;;  %v7816_v6 = vadd.f32 -1.0, %v9701_v58 }
 0xd6b   :  { %v7042_v33 = vpop.permute.xlu1 %7041  ;;  %v7047_v34 = vpop.permute.xlu0 %7046  ;;  %v14180_v46 = vsel %vm7102_vm7, %v7086_v0, %v7818_v49  ;;  %vm7104_vm3 = vcmp.gt.f32.partialorder %v14173_v43, 0.0  ;;  %vm7110_vm10 = vcmp.gt.f32.partialorder %v14176_v2, 0.0 }
 0xd6c   :  { %v9703_v20 = vpop.eup %9702  ;;  %v7140_v57 = vmul.f32 1.442695, %v7120_v55  ;;  %v7152_v19 = vmul.f32 1.442695, %v7126_v27  ;;  %v14183_v44 = vmul.f32 %v14132_v54, %v7042_v33  ;;  %v14186_v9 = vmul.f32 %v7047_v34, %v14141_v40 }
 0xd6d   :  { %v7202_v22 = vsel %vm6850_vm12, %v14180_v46, -inf  ;;  %v14190_v13 = vsel %vm7100_vm9, %v7084_v28, %v7816_v6  ;;  %v7819_v25 = vadd.f32 -1.0, %v9703_v20 }
 0xd6e   :  { %9708 = vpow2.f32 %v7140_v57  ;;  %v7123_v39 = vmin.f32 %v14183_v44, 0.0  ;;  %v7124_v37 = vmin.f32 %v14186_v9, 0.0  ;;  %7203 = vmax.xlane.f32.xlu0 %v7202_v22  ;;  %v7196_v7 = vsel %vm6850_vm12, %v14190_v13, -inf }
 0xd6f   :  { %9710 = vpow2.f32 %v7152_v19  ;;  %v7032_v62 = vpop.permute.xlu1 %7031  ;;  %v14203_v24 = vsel %vm7103_vm1, %v7087_v12, %v7819_v25  ;;  %vm7107_vm14 = vcmp.gt.f32.partialorder %v14183_v44, 0.0  ;;  %vm7108_vm11 = vcmp.gt.f32.partialorder %v14186_v9, 0.0 }
 0xd70   :  { %v9705_v30 = vpop.eup %9704  ;;  %v7146_v54 = vmul.f32 1.442695, %v7123_v39  ;;  %v7148_v63 = vmul.f32 1.442695, %v7124_v37  ;;  %v14195_v40 = vmul.f32 %v7032_v62, %v14135_v53  ;;  %v7067_v29 = vpop.permute.xlu0 %7066  ;;  %v7205_v15 = vsel %vm6850_vm12, %v14203_v24, -inf }
 0xd71   :  { %v14198_v1 = vmul.f32 %v7067_v29, %v14152_v31  ;;  %v7817_v17 = vadd.f32 -1.0, %v9705_v30 }
 0xd72   :  { %9712 = vpow2.f32 %v7146_v54  ;;  %v7121_v51 = vmin.f32 %v14195_v40, 0.0  ;;  %7197 = vmax.xlane.f32.xlu0 %v7196_v7  ;;  %vm7105_vm13 = vcmp.gt.f32.partialorder %v14195_v40, 0.0 }
 0xd73   :  { %9714 = vpow2.f32 %v7148_v63  ;;  %v7128_v53 = vmin.f32 %v14198_v1, 0.0  ;;  %v7062_v50 = vpop.permute.xlu1 %7061  ;;  %v14206_v52 = vsel %vm7101_vm2, %v7085_v59, %v7817_v17  ;;  %vm7112_vm8 = vcmp.gt.f32.partialorder %v14198_v1, 0.0 }
 0xd74   :  { %v9707_v31 = vpop.eup %9706  ;;  %v7142_v10 = vmul.f32 1.442695, %v7121_v51  ;;  %v14209_v14 = vmul.f32 %v14144_v45, %v7062_v50  ;;  %v7077_v0 = vpop.permute.xlu0 %7076  ;;  %v7199_v21 = vsel %vm6850_vm12, %v14206_v52, -inf }
 0xd75   :  { %v7156_v28 = vmul.f32 1.442695, %v7128_v53  ;;  %v14214_v35 = vmul.f32 %v14150_v11, %v7077_v0  ;;  %7200 = vmax.xlane.f32.xlu1 %v7199_v21  ;;  %v7822_v26 = vadd.f32 -1.0, %v9707_v31 }
 0xd76   :  { %9716 = vpow2.f32 %v7142_v10  ;;  %v7127_v41 = vmin.f32 %v14209_v14, 0.0  ;;  %7206 = vmax.xlane.f32.xlu0 %v7205_v15  ;;  %vm7111_vm4 = vcmp.gt.f32.partialorder %v14209_v14, 0.0 }
 0xd77   :  { %9718 = vpow2.f32 %v7156_v28  ;;  %v7130_v45 = vmin.f32 %v14214_v35, 0.0  ;;  %v7052_v12 = vpop.permute.xlu1 %7051  ;;  %v14222_v18 = vsel %vm7106_vm0, %v14169_v48, %v7822_v26  ;;  %vm7114_vm15 = vcmp.gt.f32.partialorder %v14214_v35, 0.0 }
 0xd78   :  { %v9709_v11 = vpop.eup %9708  ;;  %v7154_v38 = vmul.f32 1.442695, %v7127_v41  ;;  %v14225_v42 = vmul.f32 %v7052_v12, %v14147_v5  ;;  %v7214_v32 = vsel %vm6850_vm12, %v14222_v18, -inf }
 0xd79   :  { %v9711_v59 = vpop.eup %9710  ;;  %v7160_v4 = vmul.f32 1.442695, %v7130_v45  ;;  %7215 = vmax.xlane.f32.xlu1 %v7214_v32  ;;  %v7820_v60 = vadd.f32 -1.0, %v9709_v11 }
 0xd7a   :  { %9720 = vpow2.f32 %v7154_v38  ;;  %v7125_v36 = vmin.f32 %v14225_v42, 0.0  ;;  %v7826_v3 = vadd.f32 -1.0, %v9711_v59  ;;  %vm7109_vm6 = vcmp.gt.f32.partialorder %v14225_v42, 0.0 }
 0xd7b   :  { %9722 = vpow2.f32 %v7160_v4  ;;  %v7072_v48 = vpop.permute.xlu1 %7071  ;;  %v14232_v8 = vsel %vm7104_vm3, %v14173_v43, %v7820_v60 }
 0xd7c   :  { %v9713_v5 = vpop.eup %9712  ;;  %v7150_v61 = vmul.f32 1.442695, %v7125_v36  ;;  %v7097_v56 = vmul.f32 %v7072_v48, %v14158_v23  ;;  %v7208_v47 = vsel %vm6850_vm12, %v14232_v8, -inf  ;;  %v14239_v55 = vsel %vm7110_vm10, %v14176_v2, %v7826_v3 }
 0xd7d   :  { %v9715_v58 = vpop.eup %9714  ;;  %7209 = vmax.xlane.f32.xlu1 %v7208_v47  ;;  %v7823_v49 = vadd.f32 -1.0, %v9713_v5  ;;  %v7226_v2 = vsel %vm6850_vm12, %v14239_v55, -inf }
 0xd7e   :  { %9724 = vpow2.f32 %v7150_v61  ;;  %v7129_v27 = vmin.f32 %v7097_v56, 0.0  ;;  %v7824_v43 = vadd.f32 -1.0, %v9715_v58  ;;  %vm7113_vm5 = vcmp.gt.f32.partialorder %v7097_v56, 0.0 }
 0xd7f   :  { %v7082_v6 = vpop.permute.xlu1 %7081  ;;  %v14243_v33 = vsel %vm7107_vm14, %v14183_v44, %v7823_v49 }
 0xd80   :  { %v9717_v23 = vpop.eup %9716  ;;  %v7158_v34 = vmul.f32 1.442695, %v7129_v27  ;;  %v7099_v20 = vmul.f32 %v14155_v16, %v7082_v6  ;;  %v7217_v57 = vsel %vm6850_vm12, %v14243_v33, -inf  ;;  %v14252_v39 = vsel %vm7108_vm11, %v14186_v9, %v7824_v43 }
 0xd81   :  { %v9719_v19 = vpop.eup %9718  ;;  %7218 = vmax.xlane.f32.xlu0 %v7217_v57  ;;  %7227 = vmax.xlane.f32.xlu1 %v7226_v2  ;;  %v7821_v22 = vadd.f32 -1.0, %v9717_v23  ;;  %v7220_v54 = vsel %vm6850_vm12, %v14252_v39, -inf }
 0xd82   :  { %9726 = vpow2.f32 %v7158_v34  ;;  %v7131_v44 = vmin.f32 %v7099_v20, 0.0  ;;  %v7828_v37 = vadd.f32 -1.0, %v9719_v19  ;;  %vm7115_vm7 = vcmp.gt.f32.partialorder %v7099_v20, 0.0 }
 0xd83   :  { %v14256_v16 = vsel %vm7105_vm13, %v14195_v40, %v7821_v22 }
 0xd84   :  { %v9721_v25 = vpop.eup %9720  ;;  %v7162_v62 = vmul.f32 1.442695, %v7131_v44  ;;  %v7211_v30 = vsel %vm6850_vm12, %v14256_v16, -inf  ;;  %v14264_v29 = vsel %vm7112_vm8, %v14198_v1, %v7828_v37 }
 0xd85   :  { %v9723_v9 = vpop.eup %9722  ;;  %7212 = vmax.xlane.f32.xlu0 %v7211_v30  ;;  %7221 = vmax.xlane.f32.xlu1 %v7220_v54  ;;  %v7827_v63 = vadd.f32 -1.0, %v9721_v25  ;;  %v7232_v53 = vsel %vm6850_vm12, %v14264_v29, -inf }
 0xd86   :  { %9728 = vpow2.f32 %v7162_v62  ;;  %v7830_v40 = vadd.f32 -1.0, %v9723_v9 }
 0xd87   :  { %v14268_v7 = vsel %vm7111_vm4, %v14209_v14, %v7827_v63 }
 0xd88   :  { %v9725_v17 = vpop.eup %9724  ;;  %v7229_v51 = vsel %vm6850_vm12, %v14268_v7, -inf  ;;  %v14276_v50 = vsel %vm7114_vm15, %v14214_v35, %v7830_v40 }
 0xd89   :  { %7230 = vmax.xlane.f32.xlu0 %v7229_v51  ;;  %7233 = vmax.xlane.f32.xlu1 %v7232_v53  ;;  %v7825_v1 = vadd.f32 -1.0, %v9725_v17  ;;  %v7238_v0 = vsel %vm6850_vm12, %v14276_v50, -inf }
 0xd8b   :  { %v14280_v31 = vsel %vm7109_vm6, %v14225_v42, %v7825_v1 }
 0xd8c   :  { %v9727_v10 = vpop.eup %9726  ;;  %v7223_v14 = vsel %vm6850_vm12, %v14280_v31, -inf }
 0xd8d   :  { %7224 = vmax.xlane.f32.xlu0 %v7223_v14  ;;  %7239 = vmax.xlane.f32.xlu1 %v7238_v0  ;;  %v7829_v21 = vadd.f32 -1.0, %v9727_v10 }
 0xd8f   :  { %v14286_v28 = vsel %vm7113_vm5, %v7097_v56, %v7829_v21 }
 0xd90   :  { %v9729_v35 = vpop.eup %9728  ;;  %v7235_v15 = vsel %vm6850_vm12, %v14286_v28, -inf }
 0xd91   :  { %7236 = vmax.xlane.f32.xlu0 %v7235_v15  ;;  %v7831_v26 = vadd.f32 -1.0, %v9729_v35 }
 0xd93   :  { %v14290_v41 = vsel %vm7115_vm7, %v7099_v20, %v7831_v26 }
 0xd94   :  { %v7241_v45 = vsel %vm6850_vm12, %v14290_v41, -inf }
 0xd95   :  { %7242 = vmax.xlane.f32.xlu0 %v7241_v45 }
 0xdfb   :  { %v7204_v12 = vpop.xlane.xlu0 %7203 }
 0xdfc   :  { %v14295_v11 = vsub.f32 %v14180_v46, %v7204_v12 }
 0xdfe   :  { %v7264_v38 = vmul.f32 1.442695, %v14295_v11 }
 0xdff   :  { %v7198_v42 = vpop.xlane.xlu0 %7197 }
 0xe00   :  { %9730 = vpow2.f32 %v7264_v38  ;;  %v14299_v32 = vsub.f32 %v14190_v13, %v7198_v42 }
 0xe02   :  { %v7260_v59 = vmul.f32 1.442695, %v14299_v32  ;;  %v7201_v4 = vpop.xlane.xlu1 %7200 }
 0xe03   :  { %v7207_v60 = vpop.xlane.xlu0 %7206  ;;  %v14303_v36 = vsub.f32 %v14206_v52, %v7201_v4 }
 0xe04   :  { %9732 = vpow2.f32 %v7260_v59  ;;  %v14306_v3 = vsub.f32 %v14203_v24, %v7207_v60 }
 0xe05   :  { %v7262_v48 = vmul.f32 1.442695, %v14303_v36 }
 0xe06   :  { %v7266_v46 = vmul.f32 1.442695, %v14306_v3  ;;  %v7216_v5 = vpop.xlane.xlu1 %7215 }
 0xe07   :  { %v14311_v61 = vsub.f32 %v14222_v18, %v7216_v5 }
 0xe08   :  { %9734 = vpow2.f32 %v7266_v46 }
 0xe09   :  { %v7272_v13 = vmul.f32 1.442695, %v14311_v61  ;;  %9736 = vpow2.f32 %v7262_v48 }
 0xe0a   :  { %v9731_v56 = vpop.eup %9730  ;;  %v7210_v47 = vpop.xlane.xlu1 %7209 }
 0xe0b   :  { %9738 = vpow2.f32 %v7272_v13  ;;  %v14315_v52 = vsub.f32 %v14232_v8, %v7210_v47  ;;  %v7298_v24 = vsel %vm6850_vm12, %v9731_v56, 0.0 }
 0xe0c   :  { %7299 = vadd.xlane.f32.xlu1 %v7298_v24 }
 0xe0d   :  { %v7268_v58 = vmul.f32 1.442695, %v14315_v52 }
 0xe0e   :  { %v9733_v49 = vpop.eup %9732  ;;  %v7219_v27 = vpop.xlane.xlu0 %7218 }
 0xe0f   :  { %v7228_v43 = vpop.xlane.xlu1 %7227  ;;  %9740 = vpow2.f32 %v7268_v58  ;;  %v14320_v18 = vsub.f32 %v14243_v33, %v7219_v27  ;;  %v7292_v23 = vsel %vm6850_vm12, %v9733_v49, 0.0 }
 0xe10   :  { %v14323_v6 = vsub.f32 %v14239_v55, %v7228_v43  ;;  %7293 = vadd.xlane.f32.xlu1 %v7292_v23 }
 0xe11   :  { %v7274_v8 = vmul.f32 1.442695, %v14320_v18 }
 0xe12   :  { %v7280_v34 = vmul.f32 1.442695, %v14323_v6  ;;  %v9735_v20 = vpop.eup %9734  ;;  %v7213_v57 = vpop.xlane.xlu0 %7212 }
 0xe13   :  { %v7222_v2 = vpop.xlane.xlu1 %7221  ;;  %9742 = vpow2.f32 %v7274_v8  ;;  %v14329_v19 = vsub.f32 %v14256_v16, %v7213_v57  ;;  %v7301_v55 = vsel %vm6850_vm12, %v9735_v20, 0.0  ;;  %v9737_v22 = vpop.eup %9736 }
 0xe14   :  { %v14332_v33 = vsub.f32 %v14252_v39, %v7222_v2  ;;  %9744 = vpow2.f32 %v7280_v34  ;;  %7302 = vadd.xlane.f32.xlu0 %v7301_v55  ;;  %v7295_v9 = vsel %vm6850_vm12, %v9737_v22, 0.0 }
 0xe15   :  { %v9739_v44 = vpop.eup %9738  ;;  %v7270_v37 = vmul.f32 1.442695, %v14329_v19 }
 0xe16   :  { %v7276_v25 = vmul.f32 1.442695, %v14332_v33  ;;  %v7231_v62 = vpop.xlane.xlu0 %7230  ;;  %v7310_v54 = vsel %vm6850_vm12, %v9739_v44, 0.0 }
 0xe17   :  { %v7234_v30 = vpop.xlane.xlu1 %7233  ;;  %9746 = vpow2.f32 %v7270_v37  ;;  %v14339_v16 = vsub.f32 %v14268_v7, %v7231_v62  ;;  %7311 = vadd.xlane.f32.xlu1 %v7310_v54 }
 0xe18   :  { %v14342_v39 = vsub.f32 %v14264_v29, %v7234_v30  ;;  %9748 = vpow2.f32 %v7276_v25  ;;  %7296 = vadd.xlane.f32.xlu0 %v7295_v9 }
 0xe19   :  { %v9741_v63 = vpop.eup %9740  ;;  %v7282_v40 = vmul.f32 1.442695, %v14339_v16 }
 0xe1a   :  { %v7284_v17 = vmul.f32 1.442695, %v14342_v39  ;;  %v7225_v51 = vpop.xlane.xlu0 %7224  ;;  %v7304_v1 = vsel %vm6850_vm12, %v9741_v63, 0.0 }
 0xe1b   :  { %v7240_v53 = vpop.xlane.xlu1 %7239  ;;  %9750 = vpow2.f32 %v7282_v40  ;;  %v14349_v7 = vsub.f32 %v14280_v31, %v7225_v51  ;;  %7305 = vadd.xlane.f32.xlu1 %v7304_v1 }
 0xe1c   :  { %v14352_v29 = vsub.f32 %v14276_v50, %v7240_v53  ;;  %9752 = vpow2.f32 %v7284_v17 }
 0xe1d   :  { %v9743_v10 = vpop.eup %9742  ;;  %v7278_v14 = vmul.f32 1.442695, %v14349_v7 }
 0xe1e   :  { %v7288_v0 = vmul.f32 1.442695, %v14352_v29  ;;  %v9745_v21 = vpop.eup %9744  ;;  %v7237_v35 = vpop.xlane.xlu0 %7236  ;;  %v7313_v15 = vsel %vm6850_vm12, %v9743_v10, 0.0 }
 0xe1f   :  { %9754 = vpow2.f32 %v7278_v14  ;;  %v14358_v26 = vsub.f32 %v14286_v28, %v7237_v35  ;;  %7314 = vadd.xlane.f32.xlu0 %v7313_v15  ;;  %v7322_v31 = vsel %vm6850_vm12, %v9745_v21, 0.0 }
 0xe20   :  { %9756 = vpow2.f32 %v7288_v0  ;;  %7323 = vadd.xlane.f32.xlu1 %v7322_v31 }
 0xe21   :  { %v9747_v50 = vpop.eup %9746  ;;  %v7286_v45 = vmul.f32 1.442695, %v14358_v26 }
 0xe22   :  { %v9749_v12 = vpop.eup %9748  ;;  %v7243_v38 = vpop.xlane.xlu0 %7242  ;;  %v7307_v42 = vsel %vm6850_vm12, %v9747_v50, 0.0 }
 0xe23   :  { %9758 = vpow2.f32 %v7286_v45  ;;  %v14364_v59 = vsub.f32 %v14290_v41, %v7243_v38  ;;  %7308 = vadd.xlane.f32.xlu0 %v7307_v42  ;;  %v7316_v28 = vsel %vm6850_vm12, %v9749_v12, 0.0 }
 0xe24   :  { %7317 = vadd.xlane.f32.xlu1 %v7316_v28 }
 0xe25   :  { %v9751_v4 = vpop.eup %9750  ;;  %v7290_v60 = vmul.f32 1.442695, %v14364_v59 }
 0xe26   :  { %v9753_v46 = vpop.eup %9752  ;;  %v7325_v48 = vsel %vm6850_vm12, %v9751_v4, 0.0 }
 0xe27   :  { %9760 = vpow2.f32 %v7290_v60  ;;  %7326 = vadd.xlane.f32.xlu0 %v7325_v48  ;;  %v7328_v5 = vsel %vm6850_vm12, %v9753_v46, 0.0 }
 0xe28   :  { %7329 = vadd.xlane.f32.xlu1 %v7328_v5 }
 0xe29   :  { %v9755_v13 = vpop.eup %9754 }
 0xe2a   :  { %v9757_v56 = vpop.eup %9756  ;;  %v7319_v41 = vsel %vm6850_vm12, %v9755_v13, 0.0 }
 0xe2b   :  { %7320 = vadd.xlane.f32.xlu0 %v7319_v41  ;;  %v7334_v47 = vsel %vm6850_vm12, %v9757_v56, 0.0 }
 0xe2c   :  { %7335 = vadd.xlane.f32.xlu1 %v7334_v47 }
 0xe2d   :  { %v9759_v24 = vpop.eup %9758 }
 0xe2e   :  { %v7331_v58 = vsel %vm6850_vm12, %v9759_v24, 0.0 }
 0xe2f   :  { %7332 = vadd.xlane.f32.xlu0 %v7331_v58 }
 0xe31   :  { %v9761_v49 = vpop.eup %9760 }
 0xe32   :  { %v7337_v27 = vsel %vm6850_vm12, %v9761_v49, 0.0 }
 0xe33   :  { %7338 = vadd.xlane.f32.xlu0 %v7337_v27 }
 0xe99   :  { %v7300_v43 = vpop.xlane.xlu1 %7299 }
 0xe9a   :  { %9762 = vlog2.f32 %v7300_v43 }
 0xe9d   :  { %v7294_v23 = vpop.xlane.xlu1 %7293 }
 0xe9e   :  { %9764 = vlog2.f32 %v7294_v23 }
 0xea1   :  { %v7303_v8 = vpop.xlane.xlu0 %7302 }
 0xea2   :  { %9766 = vlog2.f32 %v7303_v8 }
 0xea4   :  { %v9763_v34 = vpop.eup %9762  ;;  %v7312_v20 = vpop.xlane.xlu1 %7311 }
 0xea5   :  { %v7345_v57 = vmul.f32 0.6931472, %v9763_v34  ;;  %v7297_v2 = vpop.xlane.xlu0 %7296  ;;  %9768 = vlog2.f32 %v7312_v20 }
 0xea6   :  { %9770 = vlog2.f32 %v7297_v2 }
 0xea7   :  { %v7374_v55 = vsub.f32 %v14295_v11, %v7345_v57 }
 0xea8   :  { %v9765_v22 = vpop.eup %9764  ;;  %v7306_v44 = vpop.xlane.xlu1 %7305 }
 0xea9   :  { %7390 = vst.msk [vmem:[%s14459_s5 + $0x10] sm:$0xff] %vm6850_vm12, %v7374_v55  ;;  %v7341_v37 = vmul.f32 0.6931472, %v9765_v22  ;;  %9772 = vlog2.f32 %v7306_v44 }
 0xeab   :  { %v7372_v25 = vsub.f32 %v14299_v32, %v7341_v37 }
 0xeac   :  { %v9767_v62 = vpop.eup %9766  ;;  %v7315_v30 = vpop.xlane.xlu0 %7314 }
 0xead   :  { %7388 = vst.msk [vmem:[%s14459_s5] sm:$0xff] %vm6850_vm12, %v7372_v25  ;;  %v7347_v54 = vmul.f32 0.6931472, %v9767_v62  ;;  %9774 = vlog2.f32 %v7315_v30  ;;  %v7324_v11 = vpop.xlane.xlu1 %7323 }
 0xeae   :  { %9776 = vlog2.f32 %v7324_v11 }
 0xeaf   :  { %v9769_v9 = vpop.eup %9768  ;;  %v7375_v63 = vsub.f32 %v14306_v3, %v7347_v54 }
 0xeb0   :  { %v9771_v40 = vpop.eup %9770  ;;  %v7353_v17 = vmul.f32 0.6931472, %v9769_v9  ;;  %v7309_v51 = vpop.xlane.xlu0 %7308 }
 0xeb1   :  { %7391 = vst.msk [vmem:[%s14459_s5 + $0x18] sm:$0xff] %vm6850_vm12, %v7375_v63  ;;  %v7343_v32 = vmul.f32 0.6931472, %v9771_v40  ;;  %9778 = vlog2.f32 %v7309_v51  ;;  %v7318_v53 = vpop.xlane.xlu1 %7317 }
 0xeb2   :  { %v7378_v1 = vsub.f32 %v14311_v61, %v7353_v17  ;;  %9780 = vlog2.f32 %v7318_v53 }
 0xeb3   :  { %v9773_v10 = vpop.eup %9772  ;;  %v7373_v14 = vsub.f32 %v14303_v36, %v7343_v32 }
 0xeb4   :  { %7394 = vst.msk [vmem:[%s14459_s5 + $0x30] sm:$0xff] %vm6850_vm12, %v7378_v1  ;;  %v7349_v3 = vmul.f32 0.6931472, %v9773_v10  ;;  %v7327_v0 = vpop.xlane.xlu0 %7326 }
 0xeb5   :  { %7389 = vst.msk [vmem:[%s14459_s5 + $0x8] sm:$0xff] %vm6850_vm12, %v7373_v14  ;;  %9782 = vlog2.f32 %v7327_v0  ;;  %v7330_v21 = vpop.xlane.xlu1 %7329 }
 0xeb6   :  { %v7376_v61 = vsub.f32 %v14315_v52, %v7349_v3  ;;  %9784 = vlog2.f32 %v7330_v21 }
 0xeb7   :  { %v9775_v35 = vpop.eup %9774 }
 0xeb8   :  { %v9777_v15 = vpop.eup %9776  ;;  %7392 = vst.msk [vmem:[%s14459_s5 + $0x20] sm:$0xff] %vm6850_vm12, %v7376_v61  ;;  %v7355_v36 = vmul.f32 0.6931472, %v9775_v35  ;;  %v7321_v31 = vpop.xlane.xlu0 %7320 }
 0xeb9   :  { %v7361_v50 = vmul.f32 0.6931472, %v9777_v15  ;;  %9786 = vlog2.f32 %v7321_v31  ;;  %v7336_v45 = vpop.xlane.xlu1 %7335 }
 0xeba   :  { %v7379_v12 = vsub.f32 %v14320_v18, %v7355_v36  ;;  %9788 = vlog2.f32 %v7336_v45 }
 0xebb   :  { %v9779_v38 = vpop.eup %9778  ;;  %v7382_v42 = vsub.f32 %v14323_v6, %v7361_v50 }
 0xebc   :  { %v9781_v52 = vpop.eup %9780  ;;  %7395 = vst.msk [vmem:[%s14459_s5 + $0x38] sm:$0xff] %vm6850_vm12, %v7379_v12  ;;  %v7351_v28 = vmul.f32 0.6931472, %v9779_v38  ;;  %v7333_v4 = vpop.xlane.xlu0 %7332 }
 0xebd   :  { %7398 = vst.msk [vmem:[%s14459_s5 + $0x50] sm:$0xff] %vm6850_vm12, %v7382_v42  ;;  %v7357_v60 = vmul.f32 0.6931472, %v9781_v52  ;;  %9790 = vlog2.f32 %v7333_v4 }
 0xebe   :  { %v7377_v18 = vsub.f32 %v14329_v19, %v7351_v28 }
 0xebf   :  { %v9783_v46 = vpop.eup %9782  ;;  %v7380_v6 = vsub.f32 %v14332_v33, %v7357_v60 }
 0xec0   :  { %v9785_v48 = vpop.eup %9784  ;;  %7393 = vst.msk [vmem:[%s14459_s5 + $0x28] sm:$0xff] %vm6850_vm12, %v7377_v18  ;;  %v7363_v5 = vmul.f32 0.6931472, %v9783_v46  ;;  %v7339_v13 = vpop.xlane.xlu0 %7338 }
 0xec1   :  { %7396 = vst.msk [vmem:[%s14459_s5 + $0x40] sm:$0xff] %vm6850_vm12, %v7380_v6  ;;  %v7365_v56 = vmul.f32 0.6931472, %v9785_v48  ;;  %9792 = vlog2.f32 %v7339_v13 }
 0xec2   :  { %v7383_v19 = vsub.f32 %v14339_v16, %v7363_v5 }
 0xec3   :  { %v9787_v41 = vpop.eup %9786  ;;  %v7384_v33 = vsub.f32 %v14342_v39, %v7365_v56 }
 0xec4   :  { %v9789_v47 = vpop.eup %9788  ;;  %7399 = vst.msk [vmem:[%s14459_s5 + $0x58] sm:$0xff] %vm6850_vm12, %v7383_v19  ;;  %v7359_v24 = vmul.f32 0.6931472, %v9787_v41 }
 0xec5   :  { %7400 = vst.msk [vmem:[%s14459_s5 + $0x60] sm:$0xff] %vm6850_vm12, %v7384_v33  ;;  %v7369_v58 = vmul.f32 0.6931472, %v9789_v47 }
 0xec6   :  { %v7381_v49 = vsub.f32 %v14349_v7, %v7359_v24 }
 0xec7   :  { %v9791_v27 = vpop.eup %9790  ;;  %v7386_v16 = vsub.f32 %v14352_v29, %v7369_v58 }
 0xec8   :  { %7397 = vst.msk [vmem:[%s14459_s5 + $0x48] sm:$0xff] %vm6850_vm12, %v7381_v49  ;;  %v7367_v39 = vmul.f32 0.6931472, %v9791_v27 }
 0xec9   :  { %7402 = vst.msk [vmem:[%s14459_s5 + $0x70] sm:$0xff] %vm6850_vm12, %v7386_v16 }
 0xeca   :  { %v7385_v43 = vsub.f32 %v14358_v26, %v7367_v39 }
 0xecb   :  { %v9793_v23 = vpop.eup %9792 }
 0xecc   :  { %7401 = vst.msk [vmem:[%s14459_s5 + $0x68] sm:$0xff] %vm6850_vm12, %v7385_v43  ;;  %v7371_v7 = vmul.f32 0.6931472, %v9793_v23 }
 0xece   :  { %v7387_v29 = vsub.f32 %v14364_v59, %v7371_v7 }
 0xed0   :  { %7403 = vst.msk [vmem:[%s14459_s5 + $0x78] sm:$0xff] %vm6850_vm12, %v7387_v29 }

</bundles_post_ra>
